<compile_context>
chip_gen: v5e
topology: v5e:2x2
jax: 0.10.0
libtpu: 0.0.40
codegen_flags: <defaults>
</compile_context>

<pallas_src>
import functools

import numpy as np
import jax
import jax.numpy as jnp
from jax.experimental import pallas as pl
from jax.experimental.pallas import tpu as pltpu

# ------------------------------ static geometry ------------------------------ #
IMG = 28                 # input spatial size (implied by fc1's 7*7*C2 in_features)
KS = 3                   # conv kernel size ('same' padding, stride 1)
C1, C2 = 7, 49           # conv channel counts
NCLASS = 10

PAD1 = IMG + 2           # 30  : conv1 padded side
NFLAT1 = PAD1 * PAD1     # 900 : conv1 output in padded-flat coords
MARGIN1 = PAD1 + 1       # 31  : margin so all 9 conv1 shifts are in-bounds lane slices
XLEN = 1024              # margined flat input row (31 + 900 + 31 -> rounded up)

POOL1 = IMG // 2         # 14  : pool1 output side
PAD2 = POOL1 + 2         # 16  : conv2 padded side
NFLAT2 = PAD2 * PAD2     # 256 : conv2 output in padded-flat coords
MARGIN2 = PAD2 + 1       # 17  : margin for the 9 conv2 shifts
P2LEN = MARGIN2 + NFLAT2 + MARGIN2   # 290 : pool1 result scattered into conv2's layout

POOL2 = POOL1 // 2       # 7
SPATIAL2 = POOL2 * POOL2 # 49  : fc1 spatial extent per channel


@functools.lru_cache(maxsize=None)
def _pool_selectors():
    """0/1 selection matrices implementing 2x2 max-pool as max of 4 matmuls.

    s1: conv1 padded-flat coords (30*30) -> conv2 margined padded-flat coords (290)
        (simultaneously re-scatters the pooled values into conv2's zero-padded layout).
    s2: conv2 padded-flat coords (16*16) -> flat valid 7*7 spatial (NCHW order).
    Entries are exactly 0/1, so the matmul is an exact selection in f32.
    """
    s1 = np.zeros((4, NFLAT1, P2LEN), np.float32)
    s2 = np.zeros((4, NFLAT2, SPATIAL2), np.float32)
    for a, (ay, ax) in enumerate(((0, 0), (0, 1), (1, 0), (1, 1))):
        for hh in range(POOL1):
            for ww in range(POOL1):
                src = (2 * hh + 1 + ay) * PAD1 + (2 * ww + 1 + ax)
                dst = MARGIN2 + (hh + 1) * PAD2 + (ww + 1)
                s1[a, src, dst] = 1.0
        for hh in range(POOL2):
            for ww in range(POOL2):
                src = (2 * hh + 1 + ay) * PAD2 + (2 * ww + 1 + ax)
                s2[a, src, hh * POOL2 + ww] = 1.0
    return jnp.asarray(s1), jnp.asarray(s2)


# --------------------------------- kernel ------------------------------------ #

def _convnet_kernel(xm_ref, w1_ref, b1_ref, w2_ref, b2_ref, s1_ref, s2_ref,
                    fc1w_ref, fc1b_ref, fc2w_ref, fc2b_ref, o_ref):
    f32 = jnp.float32
    xin = xm_ref[0]                                               # [1, XLEN]

    # ---- conv1 + bias + ReLU ----------------------------------------------- #
    # In-kernel im2col: 9 lane-shifted slices of the margined flat image. Cin=1,
    # so the contraction is a broadcast multiply-accumulate (VPU).
    out1 = b1_ref[...]                                            # [C1, 1]
    for dy in range(KS):
        for dx in range(KS):
            k = dy * KS + dx
            off = dy * PAD1 + dx
            out1 = out1 + w1_ref[:, k:k + 1] * xin[:, off:off + NFLAT1]
    out1 = jnp.maximum(out1, 0.0)                                 # [C1, 900]

    # ---- 2x2 max-pool #1 (fused scatter into conv2's zero-padded layout) ---- #
    p2 = jnp.dot(out1, s1_ref[0], preferred_element_type=f32)
    for a in range(1, 4):
        p2 = jnp.maximum(p2, jnp.dot(out1, s1_ref[a], preferred_element_type=f32))
    # p2: [C1, 290]; margins / border positions are exactly zero == conv2's padding.

    # ---- conv2 + bias + ReLU: 9 shifted [C2,C1]@[C1,256] MXU matmuls --------- #
    acc = None
    for dy in range(KS):
        for dx in range(KS):
            k = dy * KS + dx
            off = dy * PAD2 + dx
            t = jnp.dot(w2_ref[k], p2[:, off:off + NFLAT2],
                        preferred_element_type=f32)
            acc = t if acc is None else acc + t
    out2 = jnp.maximum(acc + b2_ref[...], 0.0)                    # [C2, 256]

    # ---- 2x2 max-pool #2 -> [C2, 49] (channels x 7*7 spatial, NCHW order) ---- #
    p3 = jnp.dot(out2, s2_ref[0], preferred_element_type=f32)
    for a in range(1, 4):
        p3 = jnp.maximum(p3, jnp.dot(out2, s2_ref[a], preferred_element_type=f32))

    # ---- fc1 + ReLU: contract channels (unrolled) and spatial (MXU) --------- #
    h = fc1b_ref[...]                                             # [1, 10]
    for c in range(C2):
        h = h + jnp.dot(p3[c:c + 1, :], fc1w_ref[c], preferred_element_type=f32)
    h = jnp.maximum(h, 0.0)

    # ---- fc2 + log_softmax -------------------------------------------------- #
    z = jnp.dot(h, fc2w_ref[...], preferred_element_type=f32) + fc2b_ref[...]
    m = jnp.max(z, axis=-1, keepdims=True)
    lse = jnp.log(jnp.sum(jnp.exp(z - m), axis=-1, keepdims=True)) + m
    o_ref[0] = z - lse


# --------------------------------- wrapper ------------------------------------ #

@jax.jit
def convnet_forward(x, params):
    B, cin, hh, ww = x.shape
    assert (cin, hh, ww) == (1, IMG, IMG), "ConvNet expects 1x28x28 inputs"
    s1, s2 = _pool_selectors()

    # Zero-margined flat row per image: padded 30x30 image placed at offset MARGIN1.
    xpad = jnp.pad(x[:, 0].astype(jnp.float32), ((0, 0), (1, 1), (1, 1)))  # [B,30,30]
    xm = jnp.zeros((B, 1, XLEN), jnp.float32)
    xm = xm.at[:, 0, MARGIN1:MARGIN1 + NFLAT1].set(xpad.reshape(B, NFLAT1))

    # Weight re-layouts (done once, outside the kernel).
    w1 = params["conv1_w"].reshape(C1, KS * KS)                               # [7, 9]
    b1 = params["conv1_b"].reshape(C1, 1)
    w2 = jnp.transpose(params["conv2_w"], (2, 3, 0, 1)).reshape(KS * KS, C2, C1)
    b2 = params["conv2_b"].reshape(C2, 1)
    fc1w = jnp.transpose(params["fc1_w"].reshape(NCLASS, C2, SPATIAL2), (1, 2, 0))
    fc1b = params["fc1_b"].reshape(1, NCLASS)
    fc2w = params["fc2_w"].T
    fc2b = params["fc2_b"].reshape(1, NCLASS)

    def resident(a):
        # full-array block + constant index_map -> loaded once, stays in VMEM.
        return pl.BlockSpec(a.shape, lambda *args, nd=a.ndim: (0,) * nd)

    out = pl.pallas_call(
        _convnet_kernel,
        out_shape=jax.ShapeDtypeStruct((B, 1, NCLASS), jnp.float32),
        grid_spec=pltpu.PrefetchScalarGridSpec(
            num_scalar_prefetch=0,
            grid=(B,),
            in_specs=[
                pl.BlockSpec((1, 1, XLEN), lambda b: (b, 0, 0)),
                resident(w1), resident(b1), resident(w2), resident(b2),
                resident(s1), resident(s2),
                resident(fc1w), resident(fc1b), resident(fc2w), resident(fc2b),
            ],
            out_specs=pl.BlockSpec((1, 1, NCLASS), lambda b: (b, 0, 0)),
        ),
        compiler_params=pltpu.CompilerParams(
            dimension_semantics=("parallel",),
            vmem_limit_bytes=32 * 1024 * 1024,
        ),
    )(xm, w1, b1, w2, b2, s1, s2, fc1w, fc1b, fc2w, fc2b)
    return out.reshape(B, NCLASS)


# ----------------------------- pure-JAX reference ------------------------------ #

def convnet_reference(x, params):
    dn = ('NCHW', 'OIHW', 'NCHW')
    y = jax.lax.conv_general_dilated(x, params["conv1_w"], (1, 1),
                                     [(1, 1), (1, 1)], dimension_numbers=dn)
    y = jax.nn.relu(y + params["conv1_b"].reshape(1, -1, 1, 1))
    y = jax.lax.reduce_window(y, -jnp.inf, jax.lax.max,
                              (1, 1, 2, 2), (1, 1, 2, 2), 'VALID')
    y = jax.lax.conv_general_dilated(y, params["conv2_w"], (1, 1),
                                     [(1, 1), (1, 1)], dimension_numbers=dn)
    y = jax.nn.relu(y + params["conv2_b"].reshape(1, -1, 1, 1))
    y = jax.lax.reduce_window(y, -jnp.inf, jax.lax.max,
                              (1, 1, 2, 2), (1, 1, 2, 2), 'VALID')
    y = y.reshape(y.shape[0], -1)
    h = jax.nn.relu(y @ params["fc1_w"].T + params["fc1_b"])
    z = h @ params["fc2_w"].T + params["fc2_b"]
    return jax.nn.log_softmax(z, axis=1)


# ------------------------------- params / main --------------------------------- #

def init_params(key, c1=C1, c2=C2, k=KS):
    ks = jax.random.split(key, 8)

    def rnd(kk, shape, scale):
        return (scale * jax.random.normal(kk, shape)).astype(jnp.float32)

    # fc1.weight/bias are frozen in the torch module (requires_grad=False);
    # that's a training-time detail and does not affect the forward pass.
    return {
        "conv1_w": rnd(ks[0], (c1, 1, k, k), 0.3),
        "conv1_b": rnd(ks[1], (c1,), 0.1),
        "conv2_w": rnd(ks[2], (c2, c1, k, k), 0.1),
        "conv2_b": rnd(ks[3], (c2,), 0.1),
        "fc1_w":   rnd(ks[4], (NCLASS, POOL2 * POOL2 * c2), 0.02),
        "fc1_b":   rnd(ks[5], (NCLASS,), 0.1),
        "fc2_w":   rnd(ks[6], (NCLASS, NCLASS), 0.2),
        "fc2_b":   rnd(ks[7], (NCLASS,), 0.1),
    }


if __name__ == "__main__":
    key = jax.random.PRNGKey(0)
    k_x, k_p = jax.random.split(key)
    # MNIST-sized input implied by fc1's 7*7*C2 in_features: 28x28, 1 channel.
    x = jax.random.normal(k_x, (2, 1, 28, 28), dtype=jnp.float32)
    params = init_params(k_p)

    out = jax.block_until_ready(convnet_forward(x, params))
    ref = convnet_reference(x, params)

    assert out.shape == (2, NCLASS), out.shape
    max_err = float(jnp.max(jnp.abs(out - ref)))
    assert jnp.allclose(out, ref, atol=1e-3, rtol=1e-3), max_err
    print("KERNEL_OK")
</pallas_src>

<mosaic_0001>
module attributes {stable_mosaic.version = 11 : i64} {
  func.func @_convnet_kernel(%arg0: i32, %arg1: memref<1x1x1024xf32, #tpu.memory_space<vmem>>, %arg2: memref<7x9xf32, #tpu.memory_space<vmem>>, %arg3: memref<7x1xf32, #tpu.memory_space<vmem>>, %arg4: memref<9x49x7xf32, #tpu.memory_space<vmem>>, %arg5: memref<49x1xf32, #tpu.memory_space<vmem>>, %arg6: memref<4x900x290xf32, #tpu.memory_space<vmem>>, %arg7: memref<4x256x49xf32, #tpu.memory_space<vmem>>, %arg8: memref<49x49x10xf32, #tpu.memory_space<vmem>>, %arg9: memref<1x10xf32, #tpu.memory_space<vmem>>, %arg10: memref<10x10xf32, #tpu.memory_space<vmem>>, %arg11: memref<1x10xf32, #tpu.memory_space<vmem>>, %arg12: memref<1x1x10xf32, #tpu.memory_space<vmem>>) attributes {dimension_semantics = [#tpu.dimension_semantics<parallel>], iteration_bounds = array<i64: 2>, scalar_prefetch = 0 : i64, scratch_operands = 0 : i64, tpu.core_type = #tpu.core_type<tc>, window_params = [{transform_indices = @transform_0, window_bounds = array<i64: 1, 1, 1024>}, {pipeline_mode = #tpu.pipeline_mode<synchronous>, transform_indices = @transform_1, window_bounds = array<i64: 7, 9>}, {pipeline_mode = #tpu.pipeline_mode<synchronous>, transform_indices = @transform_2, window_bounds = array<i64: 7, 1>}, {pipeline_mode = #tpu.pipeline_mode<synchronous>, transform_indices = @transform_3, window_bounds = array<i64: 9, 49, 7>}, {pipeline_mode = #tpu.pipeline_mode<synchronous>, transform_indices = @transform_4, window_bounds = array<i64: 49, 1>}, {pipeline_mode = #tpu.pipeline_mode<synchronous>, transform_indices = @transform_5, window_bounds = array<i64: 4, 900, 290>}, {pipeline_mode = #tpu.pipeline_mode<synchronous>, transform_indices = @transform_6, window_bounds = array<i64: 4, 256, 49>}, {pipeline_mode = #tpu.pipeline_mode<synchronous>, transform_indices = @transform_7, window_bounds = array<i64: 49, 49, 10>}, {pipeline_mode = #tpu.pipeline_mode<synchronous>, transform_indices = @transform_8, window_bounds = array<i64: 1, 10>}, {pipeline_mode = #tpu.pipeline_mode<synchronous>, transform_indices = @transform_9, window_bounds = array<i64: 10, 10>}, {pipeline_mode = #tpu.pipeline_mode<synchronous>, transform_indices = @transform_10, window_bounds = array<i64: 1, 10>}, {transform_indices = @transform_11, window_bounds = array<i64: 1, 1, 10>}]} {
    %c0 = arith.constant 0 : index
    %c0_0 = arith.constant 0 : index
    %c0_1 = arith.constant 0 : index
    %0 = vector.load %arg1[%c0, %c0_0, %c0_1] : memref<1x1x1024xf32, #tpu.memory_space<vmem>>, vector<1x1x1024xf32>
    %1 = vector.shape_cast %0 : vector<1x1x1024xf32> to vector<1x1024xf32>
    %c0_2 = arith.constant 0 : index
    %c0_3 = arith.constant 0 : index
    %2 = vector.load %arg3[%c0_2, %c0_3] : memref<7x1xf32, #tpu.memory_space<vmem>>, vector<7x1xf32>
    %c0_4 = arith.constant 0 : index
    %c0_5 = arith.constant 0 : index
    %3 = vector.load %arg2[%c0_4, %c0_5] : memref<7x9xf32, #tpu.memory_space<vmem>>, vector<7x1xf32>
    %4 = vector.extract_strided_slice %1 {offsets = [0, 0], sizes = [1, 900], strides = [1, 1]} : vector<1x1024xf32> to vector<1x900xf32>
    %5 = vector.broadcast %3 : vector<7x1xf32> to vector<7x900xf32>
    %6 = vector.broadcast %4 : vector<1x900xf32> to vector<7x900xf32>
    %7 = arith.mulf %5, %6 : vector<7x900xf32>
    %8 = vector.broadcast %2 : vector<7x1xf32> to vector<7x900xf32>
    %9 = arith.addf %8, %7 : vector<7x900xf32>
    %c0_6 = arith.constant 0 : index
    %c1 = arith.constant 1 : index
    %10 = vector.load %arg2[%c0_6, %c1] : memref<7x9xf32, #tpu.memory_space<vmem>>, vector<7x1xf32>
    %11 = vector.extract_strided_slice %1 {offsets = [0, 1], sizes = [1, 900], strides = [1, 1]} : vector<1x1024xf32> to vector<1x900xf32>
    %12 = vector.broadcast %10 : vector<7x1xf32> to vector<7x900xf32>
    %13 = vector.broadcast %11 : vector<1x900xf32> to vector<7x900xf32>
    %14 = arith.mulf %12, %13 : vector<7x900xf32>
    %15 = arith.addf %9, %14 : vector<7x900xf32>
    %c0_7 = arith.constant 0 : index
    %c2 = arith.constant 2 : index
    %16 = vector.load %arg2[%c0_7, %c2] : memref<7x9xf32, #tpu.memory_space<vmem>>, vector<7x1xf32>
    %17 = vector.extract_strided_slice %1 {offsets = [0, 2], sizes = [1, 900], strides = [1, 1]} : vector<1x1024xf32> to vector<1x900xf32>
    %18 = vector.broadcast %16 : vector<7x1xf32> to vector<7x900xf32>
    %19 = vector.broadcast %17 : vector<1x900xf32> to vector<7x900xf32>
    %20 = arith.mulf %18, %19 : vector<7x900xf32>
    %21 = arith.addf %15, %20 : vector<7x900xf32>
    %c0_8 = arith.constant 0 : index
    %c3 = arith.constant 3 : index
    %22 = vector.load %arg2[%c0_8, %c3] : memref<7x9xf32, #tpu.memory_space<vmem>>, vector<7x1xf32>
    %23 = vector.extract_strided_slice %1 {offsets = [0, 30], sizes = [1, 900], strides = [1, 1]} : vector<1x1024xf32> to vector<1x900xf32>
    %24 = vector.broadcast %22 : vector<7x1xf32> to vector<7x900xf32>
    %25 = vector.broadcast %23 : vector<1x900xf32> to vector<7x900xf32>
    %26 = arith.mulf %24, %25 : vector<7x900xf32>
    %27 = arith.addf %21, %26 : vector<7x900xf32>
    %c0_9 = arith.constant 0 : index
    %c4 = arith.constant 4 : index
    %28 = vector.load %arg2[%c0_9, %c4] : memref<7x9xf32, #tpu.memory_space<vmem>>, vector<7x1xf32>
    %29 = vector.extract_strided_slice %1 {offsets = [0, 31], sizes = [1, 900], strides = [1, 1]} : vector<1x1024xf32> to vector<1x900xf32>
    %30 = vector.broadcast %28 : vector<7x1xf32> to vector<7x900xf32>
    %31 = vector.broadcast %29 : vector<1x900xf32> to vector<7x900xf32>
    %32 = arith.mulf %30, %31 : vector<7x900xf32>
    %33 = arith.addf %27, %32 : vector<7x900xf32>
    %c0_10 = arith.constant 0 : index
    %c5 = arith.constant 5 : index
    %34 = vector.load %arg2[%c0_10, %c5] : memref<7x9xf32, #tpu.memory_space<vmem>>, vector<7x1xf32>
    %35 = vector.extract_strided_slice %1 {offsets = [0, 32], sizes = [1, 900], strides = [1, 1]} : vector<1x1024xf32> to vector<1x900xf32>
    %36 = vector.broadcast %34 : vector<7x1xf32> to vector<7x900xf32>
    %37 = vector.broadcast %35 : vector<1x900xf32> to vector<7x900xf32>
    %38 = arith.mulf %36, %37 : vector<7x900xf32>
    %39 = arith.addf %33, %38 : vector<7x900xf32>
    %c0_11 = arith.constant 0 : index
    %c6 = arith.constant 6 : index
    %40 = vector.load %arg2[%c0_11, %c6] : memref<7x9xf32, #tpu.memory_space<vmem>>, vector<7x1xf32>
    %41 = vector.extract_strided_slice %1 {offsets = [0, 60], sizes = [1, 900], strides = [1, 1]} : vector<1x1024xf32> to vector<1x900xf32>
    %42 = vector.broadcast %40 : vector<7x1xf32> to vector<7x900xf32>
    %43 = vector.broadcast %41 : vector<1x900xf32> to vector<7x900xf32>
    %44 = arith.mulf %42, %43 : vector<7x900xf32>
    %45 = arith.addf %39, %44 : vector<7x900xf32>
    %c0_12 = arith.constant 0 : index
    %c7 = arith.constant 7 : index
    %46 = vector.load %arg2[%c0_12, %c7] : memref<7x9xf32, #tpu.memory_space<vmem>>, vector<7x1xf32>
    %47 = vector.extract_strided_slice %1 {offsets = [0, 61], sizes = [1, 900], strides = [1, 1]} : vector<1x1024xf32> to vector<1x900xf32>
    %48 = vector.broadcast %46 : vector<7x1xf32> to vector<7x900xf32>
    %49 = vector.broadcast %47 : vector<1x900xf32> to vector<7x900xf32>
    %50 = arith.mulf %48, %49 : vector<7x900xf32>
    %51 = arith.addf %45, %50 : vector<7x900xf32>
    %c0_13 = arith.constant 0 : index
    %c8 = arith.constant 8 : index
    %52 = vector.load %arg2[%c0_13, %c8] : memref<7x9xf32, #tpu.memory_space<vmem>>, vector<7x1xf32>
    %53 = vector.extract_strided_slice %1 {offsets = [0, 62], sizes = [1, 900], strides = [1, 1]} : vector<1x1024xf32> to vector<1x900xf32>
    %54 = vector.broadcast %52 : vector<7x1xf32> to vector<7x900xf32>
    %55 = vector.broadcast %53 : vector<1x900xf32> to vector<7x900xf32>
    %56 = arith.mulf %54, %55 : vector<7x900xf32>
    %57 = arith.addf %51, %56 : vector<7x900xf32>
    %cst = arith.constant 0.000000e+00 : f32
    %58 = vector.broadcast %cst : f32 to vector<7x900xf32>
    %59 = arith.maximumf %57, %58 : vector<7x900xf32>
    %c0_14 = arith.constant 0 : index
    %c0_15 = arith.constant 0 : index
    %c0_16 = arith.constant 0 : index
    %60 = vector.load %arg6[%c0_14, %c0_15, %c0_16] : memref<4x900x290xf32, #tpu.memory_space<vmem>>, vector<1x900x290xf32>
    %61 = vector.shape_cast %60 : vector<1x900x290xf32> to vector<900x290xf32>
    %cst_17 = arith.constant dense<0.000000e+00> : vector<7x290xf32>
    %62 = tpu.matmul %59, %61, %cst_17 {dimension_numbers = #tpu.dot_dimension_numbers<[1], [0], [0], [1], [0, 0, 1, 1], [], []>} : vector<7x900xf32>, vector<900x290xf32>, vector<7x290xf32> -> vector<7x290xf32>
    %c1_18 = arith.constant 1 : index
    %c0_19 = arith.constant 0 : index
    %c0_20 = arith.constant 0 : index
    %63 = vector.load %arg6[%c1_18, %c0_19, %c0_20] : memref<4x900x290xf32, #tpu.memory_space<vmem>>, vector<1x900x290xf32>
    %64 = vector.shape_cast %63 : vector<1x900x290xf32> to vector<900x290xf32>
    %cst_21 = arith.constant dense<0.000000e+00> : vector<7x290xf32>
    %65 = tpu.matmul %59, %64, %cst_21 {dimension_numbers = #tpu.dot_dimension_numbers<[1], [0], [0], [1], [0, 0, 1, 1], [], []>} : vector<7x900xf32>, vector<900x290xf32>, vector<7x290xf32> -> vector<7x290xf32>
    %66 = arith.maximumf %62, %65 : vector<7x290xf32>
    %c2_22 = arith.constant 2 : index
    %c0_23 = arith.constant 0 : index
    %c0_24 = arith.constant 0 : index
    %67 = vector.load %arg6[%c2_22, %c0_23, %c0_24] : memref<4x900x290xf32, #tpu.memory_space<vmem>>, vector<1x900x290xf32>
    %68 = vector.shape_cast %67 : vector<1x900x290xf32> to vector<900x290xf32>
    %cst_25 = arith.constant dense<0.000000e+00> : vector<7x290xf32>
    %69 = tpu.matmul %59, %68, %cst_25 {dimension_numbers = #tpu.dot_dimension_numbers<[1], [0], [0], [1], [0, 0, 1, 1], [], []>} : vector<7x900xf32>, vector<900x290xf32>, vector<7x290xf32> -> vector<7x290xf32>
    %70 = arith.maximumf %66, %69 : vector<7x290xf32>
    %c3_26 = arith.constant 3 : index
    %c0_27 = arith.constant 0 : index
    %c0_28 = arith.constant 0 : index
    %71 = vector.load %arg6[%c3_26, %c0_27, %c0_28] : memref<4x900x290xf32, #tpu.memory_space<vmem>>, vector<1x900x290xf32>
    %72 = vector.shape_cast %71 : vector<1x900x290xf32> to vector<900x290xf32>
    %cst_29 = arith.constant dense<0.000000e+00> : vector<7x290xf32>
    %73 = tpu.matmul %59, %72, %cst_29 {dimension_numbers = #tpu.dot_dimension_numbers<[1], [0], [0], [1], [0, 0, 1, 1], [], []>} : vector<7x900xf32>, vector<900x290xf32>, vector<7x290xf32> -> vector<7x290xf32>
    %74 = arith.maximumf %70, %73 : vector<7x290xf32>
    %c0_30 = arith.constant 0 : index
    %c0_31 = arith.constant 0 : index
    %c0_32 = arith.constant 0 : index
    %75 = vector.load %arg4[%c0_30, %c0_31, %c0_32] : memref<9x49x7xf32, #tpu.memory_space<vmem>>, vector<1x49x7xf32>
    %76 = vector.shape_cast %75 : vector<1x49x7xf32> to vector<49x7xf32>
    %77 = vector.extract_strided_slice %74 {offsets = [0, 0], sizes = [7, 256], strides = [1, 1]} : vector<7x290xf32> to vector<7x256xf32>
    %cst_33 = arith.constant dense<0.000000e+00> : vector<49x256xf32>
    %78 = tpu.matmul %76, %77, %cst_33 {dimension_numbers = #tpu.dot_dimension_numbers<[1], [0], [0], [1], [0, 0, 1, 1], [], []>} : vector<49x7xf32>, vector<7x256xf32>, vector<49x256xf32> -> vector<49x256xf32>
    %c1_34 = arith.constant 1 : index
    %c0_35 = arith.constant 0 : index
    %c0_36 = arith.constant 0 : index
    %79 = vector.load %arg4[%c1_34, %c0_35, %c0_36] : memref<9x49x7xf32, #tpu.memory_space<vmem>>, vector<1x49x7xf32>
    %80 = vector.shape_cast %79 : vector<1x49x7xf32> to vector<49x7xf32>
    %81 = vector.extract_strided_slice %74 {offsets = [0, 1], sizes = [7, 256], strides = [1, 1]} : vector<7x290xf32> to vector<7x256xf32>
    %cst_37 = arith.constant dense<0.000000e+00> : vector<49x256xf32>
    %82 = tpu.matmul %80, %81, %cst_37 {dimension_numbers = #tpu.dot_dimension_numbers<[1], [0], [0], [1], [0, 0, 1, 1], [], []>} : vector<49x7xf32>, vector<7x256xf32>, vector<49x256xf32> -> vector<49x256xf32>
    %83 = arith.addf %78, %82 : vector<49x256xf32>
    %c2_38 = arith.constant 2 : index
    %c0_39 = arith.constant 0 : index
    %c0_40 = arith.constant 0 : index
    %84 = vector.load %arg4[%c2_38, %c0_39, %c0_40] : memref<9x49x7xf32, #tpu.memory_space<vmem>>, vector<1x49x7xf32>
    %85 = vector.shape_cast %84 : vector<1x49x7xf32> to vector<49x7xf32>
    %86 = vector.extract_strided_slice %74 {offsets = [0, 2], sizes = [7, 256], strides = [1, 1]} : vector<7x290xf32> to vector<7x256xf32>
    %cst_41 = arith.constant dense<0.000000e+00> : vector<49x256xf32>
    %87 = tpu.matmul %85, %86, %cst_41 {dimension_numbers = #tpu.dot_dimension_numbers<[1], [0], [0], [1], [0, 0, 1, 1], [], []>} : vector<49x7xf32>, vector<7x256xf32>, vector<49x256xf32> -> vector<49x256xf32>
    %88 = arith.addf %83, %87 : vector<49x256xf32>
    %c3_42 = arith.constant 3 : index
    %c0_43 = arith.constant 0 : index
    %c0_44 = arith.constant 0 : index
    %89 = vector.load %arg4[%c3_42, %c0_43, %c0_44] : memref<9x49x7xf32, #tpu.memory_space<vmem>>, vector<1x49x7xf32>
    %90 = vector.shape_cast %89 : vector<1x49x7xf32> to vector<49x7xf32>
    %91 = vector.extract_strided_slice %74 {offsets = [0, 16], sizes = [7, 256], strides = [1, 1]} : vector<7x290xf32> to vector<7x256xf32>
    %cst_45 = arith.constant dense<0.000000e+00> : vector<49x256xf32>
    %92 = tpu.matmul %90, %91, %cst_45 {dimension_numbers = #tpu.dot_dimension_numbers<[1], [0], [0], [1], [0, 0, 1, 1], [], []>} : vector<49x7xf32>, vector<7x256xf32>, vector<49x256xf32> -> vector<49x256xf32>
    %93 = arith.addf %88, %92 : vector<49x256xf32>
    %c4_46 = arith.constant 4 : index
    %c0_47 = arith.constant 0 : index
    %c0_48 = arith.constant 0 : index
    %94 = vector.load %arg4[%c4_46, %c0_47, %c0_48] : memref<9x49x7xf32, #tpu.memory_space<vmem>>, vector<1x49x7xf32>
    %95 = vector.shape_cast %94 : vector<1x49x7xf32> to vector<49x7xf32>
    %96 = vector.extract_strided_slice %74 {offsets = [0, 17], sizes = [7, 256], strides = [1, 1]} : vector<7x290xf32> to vector<7x256xf32>
    %cst_49 = arith.constant dense<0.000000e+00> : vector<49x256xf32>
    %97 = tpu.matmul %95, %96, %cst_49 {dimension_numbers = #tpu.dot_dimension_numbers<[1], [0], [0], [1], [0, 0, 1, 1], [], []>} : vector<49x7xf32>, vector<7x256xf32>, vector<49x256xf32> -> vector<49x256xf32>
    %98 = arith.addf %93, %97 : vector<49x256xf32>
    %c5_50 = arith.constant 5 : index
    %c0_51 = arith.constant 0 : index
    %c0_52 = arith.constant 0 : index
    %99 = vector.load %arg4[%c5_50, %c0_51, %c0_52] : memref<9x49x7xf32, #tpu.memory_space<vmem>>, vector<1x49x7xf32>
    %100 = vector.shape_cast %99 : vector<1x49x7xf32> to vector<49x7xf32>
    %101 = vector.extract_strided_slice %74 {offsets = [0, 18], sizes = [7, 256], strides = [1, 1]} : vector<7x290xf32> to vector<7x256xf32>
    %cst_53 = arith.constant dense<0.000000e+00> : vector<49x256xf32>
    %102 = tpu.matmul %100, %101, %cst_53 {dimension_numbers = #tpu.dot_dimension_numbers<[1], [0], [0], [1], [0, 0, 1, 1], [], []>} : vector<49x7xf32>, vector<7x256xf32>, vector<49x256xf32> -> vector<49x256xf32>
    %103 = arith.addf %98, %102 : vector<49x256xf32>
    %c6_54 = arith.constant 6 : index
    %c0_55 = arith.constant 0 : index
    %c0_56 = arith.constant 0 : index
    %104 = vector.load %arg4[%c6_54, %c0_55, %c0_56] : memref<9x49x7xf32, #tpu.memory_space<vmem>>, vector<1x49x7xf32>
    %105 = vector.shape_cast %104 : vector<1x49x7xf32> to vector<49x7xf32>
    %106 = vector.extract_strided_slice %74 {offsets = [0, 32], sizes = [7, 256], strides = [1, 1]} : vector<7x290xf32> to vector<7x256xf32>
    %cst_57 = arith.constant dense<0.000000e+00> : vector<49x256xf32>
    %107 = tpu.matmul %105, %106, %cst_57 {dimension_numbers = #tpu.dot_dimension_numbers<[1], [0], [0], [1], [0, 0, 1, 1], [], []>} : vector<49x7xf32>, vector<7x256xf32>, vector<49x256xf32> -> vector<49x256xf32>
    %108 = arith.addf %103, %107 : vector<49x256xf32>
    %c7_58 = arith.constant 7 : index
    %c0_59 = arith.constant 0 : index
    %c0_60 = arith.constant 0 : index
    %109 = vector.load %arg4[%c7_58, %c0_59, %c0_60] : memref<9x49x7xf32, #tpu.memory_space<vmem>>, vector<1x49x7xf32>
    %110 = vector.shape_cast %109 : vector<1x49x7xf32> to vector<49x7xf32>
    %111 = vector.extract_strided_slice %74 {offsets = [0, 33], sizes = [7, 256], strides = [1, 1]} : vector<7x290xf32> to vector<7x256xf32>
    %cst_61 = arith.constant dense<0.000000e+00> : vector<49x256xf32>
    %112 = tpu.matmul %110, %111, %cst_61 {dimension_numbers = #tpu.dot_dimension_numbers<[1], [0], [0], [1], [0, 0, 1, 1], [], []>} : vector<49x7xf32>, vector<7x256xf32>, vector<49x256xf32> -> vector<49x256xf32>
    %113 = arith.addf %108, %112 : vector<49x256xf32>
    %c8_62 = arith.constant 8 : index
    %c0_63 = arith.constant 0 : index
    %c0_64 = arith.constant 0 : index
    %114 = vector.load %arg4[%c8_62, %c0_63, %c0_64] : memref<9x49x7xf32, #tpu.memory_space<vmem>>, vector<1x49x7xf32>
    %115 = vector.shape_cast %114 : vector<1x49x7xf32> to vector<49x7xf32>
    %116 = vector.extract_strided_slice %74 {offsets = [0, 34], sizes = [7, 256], strides = [1, 1]} : vector<7x290xf32> to vector<7x256xf32>
    %cst_65 = arith.constant dense<0.000000e+00> : vector<49x256xf32>
    %117 = tpu.matmul %115, %116, %cst_65 {dimension_numbers = #tpu.dot_dimension_numbers<[1], [0], [0], [1], [0, 0, 1, 1], [], []>} : vector<49x7xf32>, vector<7x256xf32>, vector<49x256xf32> -> vector<49x256xf32>
    %118 = arith.addf %113, %117 : vector<49x256xf32>
    %c0_66 = arith.constant 0 : index
    %c0_67 = arith.constant 0 : index
    %119 = vector.load %arg5[%c0_66, %c0_67] : memref<49x1xf32, #tpu.memory_space<vmem>>, vector<49x1xf32>
    %120 = vector.broadcast %119 : vector<49x1xf32> to vector<49x256xf32>
    %121 = arith.addf %118, %120 : vector<49x256xf32>
    %cst_68 = arith.constant 0.000000e+00 : f32
    %122 = vector.broadcast %cst_68 : f32 to vector<49x256xf32>
    %123 = arith.maximumf %121, %122 : vector<49x256xf32>
    %c0_69 = arith.constant 0 : index
    %c0_70 = arith.constant 0 : index
    %c0_71 = arith.constant 0 : index
    %124 = vector.load %arg7[%c0_69, %c0_70, %c0_71] : memref<4x256x49xf32, #tpu.memory_space<vmem>>, vector<1x256x49xf32>
    %125 = vector.shape_cast %124 : vector<1x256x49xf32> to vector<256x49xf32>
    %cst_72 = arith.constant dense<0.000000e+00> : vector<49x49xf32>
    %126 = tpu.matmul %123, %125, %cst_72 {dimension_numbers = #tpu.dot_dimension_numbers<[1], [0], [0], [1], [0, 0, 1, 1], [], []>} : vector<49x256xf32>, vector<256x49xf32>, vector<49x49xf32> -> vector<49x49xf32>
    %c1_73 = arith.constant 1 : index
    %c0_74 = arith.constant 0 : index
    %c0_75 = arith.constant 0 : index
    %127 = vector.load %arg7[%c1_73, %c0_74, %c0_75] : memref<4x256x49xf32, #tpu.memory_space<vmem>>, vector<1x256x49xf32>
    %128 = vector.shape_cast %127 : vector<1x256x49xf32> to vector<256x49xf32>
    %cst_76 = arith.constant dense<0.000000e+00> : vector<49x49xf32>
    %129 = tpu.matmul %123, %128, %cst_76 {dimension_numbers = #tpu.dot_dimension_numbers<[1], [0], [0], [1], [0, 0, 1, 1], [], []>} : vector<49x256xf32>, vector<256x49xf32>, vector<49x49xf32> -> vector<49x49xf32>
    %130 = arith.maximumf %126, %129 : vector<49x49xf32>
    %c2_77 = arith.constant 2 : index
    %c0_78 = arith.constant 0 : index
    %c0_79 = arith.constant 0 : index
    %131 = vector.load %arg7[%c2_77, %c0_78, %c0_79] : memref<4x256x49xf32, #tpu.memory_space<vmem>>, vector<1x256x49xf32>
    %132 = vector.shape_cast %131 : vector<1x256x49xf32> to vector<256x49xf32>
    %cst_80 = arith.constant dense<0.000000e+00> : vector<49x49xf32>
    %133 = tpu.matmul %123, %132, %cst_80 {dimension_numbers = #tpu.dot_dimension_numbers<[1], [0], [0], [1], [0, 0, 1, 1], [], []>} : vector<49x256xf32>, vector<256x49xf32>, vector<49x49xf32> -> vector<49x49xf32>
    %134 = arith.maximumf %130, %133 : vector<49x49xf32>
    %c3_81 = arith.constant 3 : index
    %c0_82 = arith.constant 0 : index
    %c0_83 = arith.constant 0 : index
    %135 = vector.load %arg7[%c3_81, %c0_82, %c0_83] : memref<4x256x49xf32, #tpu.memory_space<vmem>>, vector<1x256x49xf32>
    %136 = vector.shape_cast %135 : vector<1x256x49xf32> to vector<256x49xf32>
    %cst_84 = arith.constant dense<0.000000e+00> : vector<49x49xf32>
    %137 = tpu.matmul %123, %136, %cst_84 {dimension_numbers = #tpu.dot_dimension_numbers<[1], [0], [0], [1], [0, 0, 1, 1], [], []>} : vector<49x256xf32>, vector<256x49xf32>, vector<49x49xf32> -> vector<49x49xf32>
    %138 = arith.maximumf %134, %137 : vector<49x49xf32>
    %c0_85 = arith.constant 0 : index
    %c0_86 = arith.constant 0 : index
    %139 = vector.load %arg9[%c0_85, %c0_86] : memref<1x10xf32, #tpu.memory_space<vmem>>, vector<1x10xf32>
    %140 = vector.extract_strided_slice %138 {offsets = [0, 0], sizes = [1, 49], strides = [1, 1]} : vector<49x49xf32> to vector<1x49xf32>
    %c0_87 = arith.constant 0 : index
    %c0_88 = arith.constant 0 : index
    %c0_89 = arith.constant 0 : index
    %141 = vector.load %arg8[%c0_87, %c0_88, %c0_89] : memref<49x49x10xf32, #tpu.memory_space<vmem>>, vector<1x49x10xf32>
    %142 = vector.shape_cast %141 : vector<1x49x10xf32> to vector<49x10xf32>
    %cst_90 = arith.constant dense<0.000000e+00> : vector<1x10xf32>
    %143 = tpu.matmul %140, %142, %cst_90 {dimension_numbers = #tpu.dot_dimension_numbers<[1], [0], [0], [1], [0, 0, 1, 1], [], []>} : vector<1x49xf32>, vector<49x10xf32>, vector<1x10xf32> -> vector<1x10xf32>
    %144 = arith.addf %139, %143 : vector<1x10xf32>
    %145 = vector.extract_strided_slice %138 {offsets = [1, 0], sizes = [1, 49], strides = [1, 1]} : vector<49x49xf32> to vector<1x49xf32>
    %c1_91 = arith.constant 1 : index
    %c0_92 = arith.constant 0 : index
    %c0_93 = arith.constant 0 : index
    %146 = vector.load %arg8[%c1_91, %c0_92, %c0_93] : memref<49x49x10xf32, #tpu.memory_space<vmem>>, vector<1x49x10xf32>
    %147 = vector.shape_cast %146 : vector<1x49x10xf32> to vector<49x10xf32>
    %cst_94 = arith.constant dense<0.000000e+00> : vector<1x10xf32>
    %148 = tpu.matmul %145, %147, %cst_94 {dimension_numbers = #tpu.dot_dimension_numbers<[1], [0], [0], [1], [0, 0, 1, 1], [], []>} : vector<1x49xf32>, vector<49x10xf32>, vector<1x10xf32> -> vector<1x10xf32>
    %149 = arith.addf %144, %148 : vector<1x10xf32>
    %150 = vector.extract_strided_slice %138 {offsets = [2, 0], sizes = [1, 49], strides = [1, 1]} : vector<49x49xf32> to vector<1x49xf32>
    %c2_95 = arith.constant 2 : index
    %c0_96 = arith.constant 0 : index
    %c0_97 = arith.constant 0 : index
    %151 = vector.load %arg8[%c2_95, %c0_96, %c0_97] : memref<49x49x10xf32, #tpu.memory_space<vmem>>, vector<1x49x10xf32>
    %152 = vector.shape_cast %151 : vector<1x49x10xf32> to vector<49x10xf32>
    %cst_98 = arith.constant dense<0.000000e+00> : vector<1x10xf32>
    %153 = tpu.matmul %150, %152, %cst_98 {dimension_numbers = #tpu.dot_dimension_numbers<[1], [0], [0], [1], [0, 0, 1, 1], [], []>} : vector<1x49xf32>, vector<49x10xf32>, vector<1x10xf32> -> vector<1x10xf32>
    %154 = arith.addf %149, %153 : vector<1x10xf32>
    %155 = vector.extract_strided_slice %138 {offsets = [3, 0], sizes = [1, 49], strides = [1, 1]} : vector<49x49xf32> to vector<1x49xf32>
    %c3_99 = arith.constant 3 : index
    %c0_100 = arith.constant 0 : index
    %c0_101 = arith.constant 0 : index
    %156 = vector.load %arg8[%c3_99, %c0_100, %c0_101] : memref<49x49x10xf32, #tpu.memory_space<vmem>>, vector<1x49x10xf32>
    %157 = vector.shape_cast %156 : vector<1x49x10xf32> to vector<49x10xf32>
    %cst_102 = arith.constant dense<0.000000e+00> : vector<1x10xf32>
    %158 = tpu.matmul %155, %157, %cst_102 {dimension_numbers = #tpu.dot_dimension_numbers<[1], [0], [0], [1], [0, 0, 1, 1], [], []>} : vector<1x49xf32>, vector<49x10xf32>, vector<1x10xf32> -> vector<1x10xf32>
    %159 = arith.addf %154, %158 : vector<1x10xf32>
    %160 = vector.extract_strided_slice %138 {offsets = [4, 0], sizes = [1, 49], strides = [1, 1]} : vector<49x49xf32> to vector<1x49xf32>
    %c4_103 = arith.constant 4 : index
    %c0_104 = arith.constant 0 : index
    %c0_105 = arith.constant 0 : index
    %161 = vector.load %arg8[%c4_103, %c0_104, %c0_105] : memref<49x49x10xf32, #tpu.memory_space<vmem>>, vector<1x49x10xf32>
    %162 = vector.shape_cast %161 : vector<1x49x10xf32> to vector<49x10xf32>
    %cst_106 = arith.constant dense<0.000000e+00> : vector<1x10xf32>
    %163 = tpu.matmul %160, %162, %cst_106 {dimension_numbers = #tpu.dot_dimension_numbers<[1], [0], [0], [1], [0, 0, 1, 1], [], []>} : vector<1x49xf32>, vector<49x10xf32>, vector<1x10xf32> -> vector<1x10xf32>
    %164 = arith.addf %159, %163 : vector<1x10xf32>
    %165 = vector.extract_strided_slice %138 {offsets = [5, 0], sizes = [1, 49], strides = [1, 1]} : vector<49x49xf32> to vector<1x49xf32>
    %c5_107 = arith.constant 5 : index
    %c0_108 = arith.constant 0 : index
    %c0_109 = arith.constant 0 : index
    %166 = vector.load %arg8[%c5_107, %c0_108, %c0_109] : memref<49x49x10xf32, #tpu.memory_space<vmem>>, vector<1x49x10xf32>
    %167 = vector.shape_cast %166 : vector<1x49x10xf32> to vector<49x10xf32>
    %cst_110 = arith.constant dense<0.000000e+00> : vector<1x10xf32>
    %168 = tpu.matmul %165, %167, %cst_110 {dimension_numbers = #tpu.dot_dimension_numbers<[1], [0], [0], [1], [0, 0, 1, 1], [], []>} : vector<1x49xf32>, vector<49x10xf32>, vector<1x10xf32> -> vector<1x10xf32>
    %169 = arith.addf %164, %168 : vector<1x10xf32>
    %170 = vector.extract_strided_slice %138 {offsets = [6, 0], sizes = [1, 49], strides = [1, 1]} : vector<49x49xf32> to vector<1x49xf32>
    %c6_111 = arith.constant 6 : index
    %c0_112 = arith.constant 0 : index
    %c0_113 = arith.constant 0 : index
    %171 = vector.load %arg8[%c6_111, %c0_112, %c0_113] : memref<49x49x10xf32, #tpu.memory_space<vmem>>, vector<1x49x10xf32>
    %172 = vector.shape_cast %171 : vector<1x49x10xf32> to vector<49x10xf32>
    %cst_114 = arith.constant dense<0.000000e+00> : vector<1x10xf32>
    %173 = tpu.matmul %170, %172, %cst_114 {dimension_numbers = #tpu.dot_dimension_numbers<[1], [0], [0], [1], [0, 0, 1, 1], [], []>} : vector<1x49xf32>, vector<49x10xf32>, vector<1x10xf32> -> vector<1x10xf32>
    %174 = arith.addf %169, %173 : vector<1x10xf32>
    %175 = vector.extract_strided_slice %138 {offsets = [7, 0], sizes = [1, 49], strides = [1, 1]} : vector<49x49xf32> to vector<1x49xf32>
    %c7_115 = arith.constant 7 : index
    %c0_116 = arith.constant 0 : index
    %c0_117 = arith.constant 0 : index
    %176 = vector.load %arg8[%c7_115, %c0_116, %c0_117] : memref<49x49x10xf32, #tpu.memory_space<vmem>>, vector<1x49x10xf32>
    %177 = vector.shape_cast %176 : vector<1x49x10xf32> to vector<49x10xf32>
    %cst_118 = arith.constant dense<0.000000e+00> : vector<1x10xf32>
    %178 = tpu.matmul %175, %177, %cst_118 {dimension_numbers = #tpu.dot_dimension_numbers<[1], [0], [0], [1], [0, 0, 1, 1], [], []>} : vector<1x49xf32>, vector<49x10xf32>, vector<1x10xf32> -> vector<1x10xf32>
    %179 = arith.addf %174, %178 : vector<1x10xf32>
    %180 = vector.extract_strided_slice %138 {offsets = [8, 0], sizes = [1, 49], strides = [1, 1]} : vector<49x49xf32> to vector<1x49xf32>
    %c8_119 = arith.constant 8 : index
    %c0_120 = arith.constant 0 : index
    %c0_121 = arith.constant 0 : index
    %181 = vector.load %arg8[%c8_119, %c0_120, %c0_121] : memref<49x49x10xf32, #tpu.memory_space<vmem>>, vector<1x49x10xf32>
    %182 = vector.shape_cast %181 : vector<1x49x10xf32> to vector<49x10xf32>
    %cst_122 = arith.constant dense<0.000000e+00> : vector<1x10xf32>
    %183 = tpu.matmul %180, %182, %cst_122 {dimension_numbers = #tpu.dot_dimension_numbers<[1], [0], [0], [1], [0, 0, 1, 1], [], []>} : vector<1x49xf32>, vector<49x10xf32>, vector<1x10xf32> -> vector<1x10xf32>
    %184 = arith.addf %179, %183 : vector<1x10xf32>
    %185 = vector.extract_strided_slice %138 {offsets = [9, 0], sizes = [1, 49], strides = [1, 1]} : vector<49x49xf32> to vector<1x49xf32>
    %c9 = arith.constant 9 : index
    %c0_123 = arith.constant 0 : index
    %c0_124 = arith.constant 0 : index
    %186 = vector.load %arg8[%c9, %c0_123, %c0_124] : memref<49x49x10xf32, #tpu.memory_space<vmem>>, vector<1x49x10xf32>
    %187 = vector.shape_cast %186 : vector<1x49x10xf32> to vector<49x10xf32>
    %cst_125 = arith.constant dense<0.000000e+00> : vector<1x10xf32>
    %188 = tpu.matmul %185, %187, %cst_125 {dimension_numbers = #tpu.dot_dimension_numbers<[1], [0], [0], [1], [0, 0, 1, 1], [], []>} : vector<1x49xf32>, vector<49x10xf32>, vector<1x10xf32> -> vector<1x10xf32>
    %189 = arith.addf %184, %188 : vector<1x10xf32>
    %190 = vector.extract_strided_slice %138 {offsets = [10, 0], sizes = [1, 49], strides = [1, 1]} : vector<49x49xf32> to vector<1x49xf32>
    %c10 = arith.constant 10 : index
    %c0_126 = arith.constant 0 : index
    %c0_127 = arith.constant 0 : index
    %191 = vector.load %arg8[%c10, %c0_126, %c0_127] : memref<49x49x10xf32, #tpu.memory_space<vmem>>, vector<1x49x10xf32>
    %192 = vector.shape_cast %191 : vector<1x49x10xf32> to vector<49x10xf32>
    %cst_128 = arith.constant dense<0.000000e+00> : vector<1x10xf32>
    %193 = tpu.matmul %190, %192, %cst_128 {dimension_numbers = #tpu.dot_dimension_numbers<[1], [0], [0], [1], [0, 0, 1, 1], [], []>} : vector<1x49xf32>, vector<49x10xf32>, vector<1x10xf32> -> vector<1x10xf32>
    %194 = arith.addf %189, %193 : vector<1x10xf32>
    %195 = vector.extract_strided_slice %138 {offsets = [11, 0], sizes = [1, 49], strides = [1, 1]} : vector<49x49xf32> to vector<1x49xf32>
    %c11 = arith.constant 11 : index
    %c0_129 = arith.constant 0 : index
    %c0_130 = arith.constant 0 : index
    %196 = vector.load %arg8[%c11, %c0_129, %c0_130] : memref<49x49x10xf32, #tpu.memory_space<vmem>>, vector<1x49x10xf32>
    %197 = vector.shape_cast %196 : vector<1x49x10xf32> to vector<49x10xf32>
    %cst_131 = arith.constant dense<0.000000e+00> : vector<1x10xf32>
    %198 = tpu.matmul %195, %197, %cst_131 {dimension_numbers = #tpu.dot_dimension_numbers<[1], [0], [0], [1], [0, 0, 1, 1], [], []>} : vector<1x49xf32>, vector<49x10xf32>, vector<1x10xf32> -> vector<1x10xf32>
    %199 = arith.addf %194, %198 : vector<1x10xf32>
    %200 = vector.extract_strided_slice %138 {offsets = [12, 0], sizes = [1, 49], strides = [1, 1]} : vector<49x49xf32> to vector<1x49xf32>
    %c12 = arith.constant 12 : index
    %c0_132 = arith.constant 0 : index
    %c0_133 = arith.constant 0 : index
    %201 = vector.load %arg8[%c12, %c0_132, %c0_133] : memref<49x49x10xf32, #tpu.memory_space<vmem>>, vector<1x49x10xf32>
    %202 = vector.shape_cast %201 : vector<1x49x10xf32> to vector<49x10xf32>
    %cst_134 = arith.constant dense<0.000000e+00> : vector<1x10xf32>
    %203 = tpu.matmul %200, %202, %cst_134 {dimension_numbers = #tpu.dot_dimension_numbers<[1], [0], [0], [1], [0, 0, 1, 1], [], []>} : vector<1x49xf32>, vector<49x10xf32>, vector<1x10xf32> -> vector<1x10xf32>
    %204 = arith.addf %199, %203 : vector<1x10xf32>
    %205 = vector.extract_strided_slice %138 {offsets = [13, 0], sizes = [1, 49], strides = [1, 1]} : vector<49x49xf32> to vector<1x49xf32>
    %c13 = arith.constant 13 : index
    %c0_135 = arith.constant 0 : index
    %c0_136 = arith.constant 0 : index
    %206 = vector.load %arg8[%c13, %c0_135, %c0_136] : memref<49x49x10xf32, #tpu.memory_space<vmem>>, vector<1x49x10xf32>
    %207 = vector.shape_cast %206 : vector<1x49x10xf32> to vector<49x10xf32>
    %cst_137 = arith.constant dense<0.000000e+00> : vector<1x10xf32>
    %208 = tpu.matmul %205, %207, %cst_137 {dimension_numbers = #tpu.dot_dimension_numbers<[1], [0], [0], [1], [0, 0, 1, 1], [], []>} : vector<1x49xf32>, vector<49x10xf32>, vector<1x10xf32> -> vector<1x10xf32>
    %209 = arith.addf %204, %208 : vector<1x10xf32>
    %210 = vector.extract_strided_slice %138 {offsets = [14, 0], sizes = [1, 49], strides = [1, 1]} : vector<49x49xf32> to vector<1x49xf32>
    %c14 = arith.constant 14 : index
    %c0_138 = arith.constant 0 : index
    %c0_139 = arith.constant 0 : index
    %211 = vector.load %arg8[%c14, %c0_138, %c0_139] : memref<49x49x10xf32, #tpu.memory_space<vmem>>, vector<1x49x10xf32>
    %212 = vector.shape_cast %211 : vector<1x49x10xf32> to vector<49x10xf32>
    %cst_140 = arith.constant dense<0.000000e+00> : vector<1x10xf32>
    %213 = tpu.matmul %210, %212, %cst_140 {dimension_numbers = #tpu.dot_dimension_numbers<[1], [0], [0], [1], [0, 0, 1, 1], [], []>} : vector<1x49xf32>, vector<49x10xf32>, vector<1x10xf32> -> vector<1x10xf32>
    %214 = arith.addf %209, %213 : vector<1x10xf32>
    %215 = vector.extract_strided_slice %138 {offsets = [15, 0], sizes = [1, 49], strides = [1, 1]} : vector<49x49xf32> to vector<1x49xf32>
    %c15 = arith.constant 15 : index
    %c0_141 = arith.constant 0 : index
    %c0_142 = arith.constant 0 : index
    %216 = vector.load %arg8[%c15, %c0_141, %c0_142] : memref<49x49x10xf32, #tpu.memory_space<vmem>>, vector<1x49x10xf32>
    %217 = vector.shape_cast %216 : vector<1x49x10xf32> to vector<49x10xf32>
    %cst_143 = arith.constant dense<0.000000e+00> : vector<1x10xf32>
    %218 = tpu.matmul %215, %217, %cst_143 {dimension_numbers = #tpu.dot_dimension_numbers<[1], [0], [0], [1], [0, 0, 1, 1], [], []>} : vector<1x49xf32>, vector<49x10xf32>, vector<1x10xf32> -> vector<1x10xf32>
    %219 = arith.addf %214, %218 : vector<1x10xf32>
    %220 = vector.extract_strided_slice %138 {offsets = [16, 0], sizes = [1, 49], strides = [1, 1]} : vector<49x49xf32> to vector<1x49xf32>
    %c16 = arith.constant 16 : index
    %c0_144 = arith.constant 0 : index
    %c0_145 = arith.constant 0 : index
    %221 = vector.load %arg8[%c16, %c0_144, %c0_145] : memref<49x49x10xf32, #tpu.memory_space<vmem>>, vector<1x49x10xf32>
    %222 = vector.shape_cast %221 : vector<1x49x10xf32> to vector<49x10xf32>
    %cst_146 = arith.constant dense<0.000000e+00> : vector<1x10xf32>
    %223 = tpu.matmul %220, %222, %cst_146 {dimension_numbers = #tpu.dot_dimension_numbers<[1], [0], [0], [1], [0, 0, 1, 1], [], []>} : vector<1x49xf32>, vector<49x10xf32>, vector<1x10xf32> -> vector<1x10xf32>
    %224 = arith.addf %219, %223 : vector<1x10xf32>
    %225 = vector.extract_strided_slice %138 {offsets = [17, 0], sizes = [1, 49], strides = [1, 1]} : vector<49x49xf32> to vector<1x49xf32>
    %c17 = arith.constant 17 : index
    %c0_147 = arith.constant 0 : index
    %c0_148 = arith.constant 0 : index
    %226 = vector.load %arg8[%c17, %c0_147, %c0_148] : memref<49x49x10xf32, #tpu.memory_space<vmem>>, vector<1x49x10xf32>
    %227 = vector.shape_cast %226 : vector<1x49x10xf32> to vector<49x10xf32>
    %cst_149 = arith.constant dense<0.000000e+00> : vector<1x10xf32>
    %228 = tpu.matmul %225, %227, %cst_149 {dimension_numbers = #tpu.dot_dimension_numbers<[1], [0], [0], [1], [0, 0, 1, 1], [], []>} : vector<1x49xf32>, vector<49x10xf32>, vector<1x10xf32> -> vector<1x10xf32>
    %229 = arith.addf %224, %228 : vector<1x10xf32>
    %230 = vector.extract_strided_slice %138 {offsets = [18, 0], sizes = [1, 49], strides = [1, 1]} : vector<49x49xf32> to vector<1x49xf32>
    %c18 = arith.constant 18 : index
    %c0_150 = arith.constant 0 : index
    %c0_151 = arith.constant 0 : index
    %231 = vector.load %arg8[%c18, %c0_150, %c0_151] : memref<49x49x10xf32, #tpu.memory_space<vmem>>, vector<1x49x10xf32>
    %232 = vector.shape_cast %231 : vector<1x49x10xf32> to vector<49x10xf32>
    %cst_152 = arith.constant dense<0.000000e+00> : vector<1x10xf32>
    %233 = tpu.matmul %230, %232, %cst_152 {dimension_numbers = #tpu.dot_dimension_numbers<[1], [0], [0], [1], [0, 0, 1, 1], [], []>} : vector<1x49xf32>, vector<49x10xf32>, vector<1x10xf32> -> vector<1x10xf32>
    %234 = arith.addf %229, %233 : vector<1x10xf32>
    %235 = vector.extract_strided_slice %138 {offsets = [19, 0], sizes = [1, 49], strides = [1, 1]} : vector<49x49xf32> to vector<1x49xf32>
    %c19 = arith.constant 19 : index
    %c0_153 = arith.constant 0 : index
    %c0_154 = arith.constant 0 : index
    %236 = vector.load %arg8[%c19, %c0_153, %c0_154] : memref<49x49x10xf32, #tpu.memory_space<vmem>>, vector<1x49x10xf32>
    %237 = vector.shape_cast %236 : vector<1x49x10xf32> to vector<49x10xf32>
    %cst_155 = arith.constant dense<0.000000e+00> : vector<1x10xf32>
    %238 = tpu.matmul %235, %237, %cst_155 {dimension_numbers = #tpu.dot_dimension_numbers<[1], [0], [0], [1], [0, 0, 1, 1], [], []>} : vector<1x49xf32>, vector<49x10xf32>, vector<1x10xf32> -> vector<1x10xf32>
    %239 = arith.addf %234, %238 : vector<1x10xf32>
    %240 = vector.extract_strided_slice %138 {offsets = [20, 0], sizes = [1, 49], strides = [1, 1]} : vector<49x49xf32> to vector<1x49xf32>
    %c20 = arith.constant 20 : index
    %c0_156 = arith.constant 0 : index
    %c0_157 = arith.constant 0 : index
    %241 = vector.load %arg8[%c20, %c0_156, %c0_157] : memref<49x49x10xf32, #tpu.memory_space<vmem>>, vector<1x49x10xf32>
    %242 = vector.shape_cast %241 : vector<1x49x10xf32> to vector<49x10xf32>
    %cst_158 = arith.constant dense<0.000000e+00> : vector<1x10xf32>
    %243 = tpu.matmul %240, %242, %cst_158 {dimension_numbers = #tpu.dot_dimension_numbers<[1], [0], [0], [1], [0, 0, 1, 1], [], []>} : vector<1x49xf32>, vector<49x10xf32>, vector<1x10xf32> -> vector<1x10xf32>
    %244 = arith.addf %239, %243 : vector<1x10xf32>
    %245 = vector.extract_strided_slice %138 {offsets = [21, 0], sizes = [1, 49], strides = [1, 1]} : vector<49x49xf32> to vector<1x49xf32>
    %c21 = arith.constant 21 : index
    %c0_159 = arith.constant 0 : index
    %c0_160 = arith.constant 0 : index
    %246 = vector.load %arg8[%c21, %c0_159, %c0_160] : memref<49x49x10xf32, #tpu.memory_space<vmem>>, vector<1x49x10xf32>
    %247 = vector.shape_cast %246 : vector<1x49x10xf32> to vector<49x10xf32>
    %cst_161 = arith.constant dense<0.000000e+00> : vector<1x10xf32>
    %248 = tpu.matmul %245, %247, %cst_161 {dimension_numbers = #tpu.dot_dimension_numbers<[1], [0], [0], [1], [0, 0, 1, 1], [], []>} : vector<1x49xf32>, vector<49x10xf32>, vector<1x10xf32> -> vector<1x10xf32>
    %249 = arith.addf %244, %248 : vector<1x10xf32>
    %250 = vector.extract_strided_slice %138 {offsets = [22, 0], sizes = [1, 49], strides = [1, 1]} : vector<49x49xf32> to vector<1x49xf32>
    %c22 = arith.constant 22 : index
    %c0_162 = arith.constant 0 : index
    %c0_163 = arith.constant 0 : index
    %251 = vector.load %arg8[%c22, %c0_162, %c0_163] : memref<49x49x10xf32, #tpu.memory_space<vmem>>, vector<1x49x10xf32>
    %252 = vector.shape_cast %251 : vector<1x49x10xf32> to vector<49x10xf32>
    %cst_164 = arith.constant dense<0.000000e+00> : vector<1x10xf32>
    %253 = tpu.matmul %250, %252, %cst_164 {dimension_numbers = #tpu.dot_dimension_numbers<[1], [0], [0], [1], [0, 0, 1, 1], [], []>} : vector<1x49xf32>, vector<49x10xf32>, vector<1x10xf32> -> vector<1x10xf32>
    %254 = arith.addf %249, %253 : vector<1x10xf32>
    %255 = vector.extract_strided_slice %138 {offsets = [23, 0], sizes = [1, 49], strides = [1, 1]} : vector<49x49xf32> to vector<1x49xf32>
    %c23 = arith.constant 23 : index
    %c0_165 = arith.constant 0 : index
    %c0_166 = arith.constant 0 : index
    %256 = vector.load %arg8[%c23, %c0_165, %c0_166] : memref<49x49x10xf32, #tpu.memory_space<vmem>>, vector<1x49x10xf32>
    %257 = vector.shape_cast %256 : vector<1x49x10xf32> to vector<49x10xf32>
    %cst_167 = arith.constant dense<0.000000e+00> : vector<1x10xf32>
    %258 = tpu.matmul %255, %257, %cst_167 {dimension_numbers = #tpu.dot_dimension_numbers<[1], [0], [0], [1], [0, 0, 1, 1], [], []>} : vector<1x49xf32>, vector<49x10xf32>, vector<1x10xf32> -> vector<1x10xf32>
    %259 = arith.addf %254, %258 : vector<1x10xf32>
    %260 = vector.extract_strided_slice %138 {offsets = [24, 0], sizes = [1, 49], strides = [1, 1]} : vector<49x49xf32> to vector<1x49xf32>
    %c24 = arith.constant 24 : index
    %c0_168 = arith.constant 0 : index
    %c0_169 = arith.constant 0 : index
    %261 = vector.load %arg8[%c24, %c0_168, %c0_169] : memref<49x49x10xf32, #tpu.memory_space<vmem>>, vector<1x49x10xf32>
    %262 = vector.shape_cast %261 : vector<1x49x10xf32> to vector<49x10xf32>
    %cst_170 = arith.constant dense<0.000000e+00> : vector<1x10xf32>
    %263 = tpu.matmul %260, %262, %cst_170 {dimension_numbers = #tpu.dot_dimension_numbers<[1], [0], [0], [1], [0, 0, 1, 1], [], []>} : vector<1x49xf32>, vector<49x10xf32>, vector<1x10xf32> -> vector<1x10xf32>
    %264 = arith.addf %259, %263 : vector<1x10xf32>
    %265 = vector.extract_strided_slice %138 {offsets = [25, 0], sizes = [1, 49], strides = [1, 1]} : vector<49x49xf32> to vector<1x49xf32>
    %c25 = arith.constant 25 : index
    %c0_171 = arith.constant 0 : index
    %c0_172 = arith.constant 0 : index
    %266 = vector.load %arg8[%c25, %c0_171, %c0_172] : memref<49x49x10xf32, #tpu.memory_space<vmem>>, vector<1x49x10xf32>
    %267 = vector.shape_cast %266 : vector<1x49x10xf32> to vector<49x10xf32>
    %cst_173 = arith.constant dense<0.000000e+00> : vector<1x10xf32>
    %268 = tpu.matmul %265, %267, %cst_173 {dimension_numbers = #tpu.dot_dimension_numbers<[1], [0], [0], [1], [0, 0, 1, 1], [], []>} : vector<1x49xf32>, vector<49x10xf32>, vector<1x10xf32> -> vector<1x10xf32>
    %269 = arith.addf %264, %268 : vector<1x10xf32>
    %270 = vector.extract_strided_slice %138 {offsets = [26, 0], sizes = [1, 49], strides = [1, 1]} : vector<49x49xf32> to vector<1x49xf32>
    %c26 = arith.constant 26 : index
    %c0_174 = arith.constant 0 : index
    %c0_175 = arith.constant 0 : index
    %271 = vector.load %arg8[%c26, %c0_174, %c0_175] : memref<49x49x10xf32, #tpu.memory_space<vmem>>, vector<1x49x10xf32>
    %272 = vector.shape_cast %271 : vector<1x49x10xf32> to vector<49x10xf32>
    %cst_176 = arith.constant dense<0.000000e+00> : vector<1x10xf32>
    %273 = tpu.matmul %270, %272, %cst_176 {dimension_numbers = #tpu.dot_dimension_numbers<[1], [0], [0], [1], [0, 0, 1, 1], [], []>} : vector<1x49xf32>, vector<49x10xf32>, vector<1x10xf32> -> vector<1x10xf32>
    %274 = arith.addf %269, %273 : vector<1x10xf32>
    %275 = vector.extract_strided_slice %138 {offsets = [27, 0], sizes = [1, 49], strides = [1, 1]} : vector<49x49xf32> to vector<1x49xf32>
    %c27 = arith.constant 27 : index
    %c0_177 = arith.constant 0 : index
    %c0_178 = arith.constant 0 : index
    %276 = vector.load %arg8[%c27, %c0_177, %c0_178] : memref<49x49x10xf32, #tpu.memory_space<vmem>>, vector<1x49x10xf32>
    %277 = vector.shape_cast %276 : vector<1x49x10xf32> to vector<49x10xf32>
    %cst_179 = arith.constant dense<0.000000e+00> : vector<1x10xf32>
    %278 = tpu.matmul %275, %277, %cst_179 {dimension_numbers = #tpu.dot_dimension_numbers<[1], [0], [0], [1], [0, 0, 1, 1], [], []>} : vector<1x49xf32>, vector<49x10xf32>, vector<1x10xf32> -> vector<1x10xf32>
    %279 = arith.addf %274, %278 : vector<1x10xf32>
    %280 = vector.extract_strided_slice %138 {offsets = [28, 0], sizes = [1, 49], strides = [1, 1]} : vector<49x49xf32> to vector<1x49xf32>
    %c28 = arith.constant 28 : index
    %c0_180 = arith.constant 0 : index
    %c0_181 = arith.constant 0 : index
    %281 = vector.load %arg8[%c28, %c0_180, %c0_181] : memref<49x49x10xf32, #tpu.memory_space<vmem>>, vector<1x49x10xf32>
    %282 = vector.shape_cast %281 : vector<1x49x10xf32> to vector<49x10xf32>
    %cst_182 = arith.constant dense<0.000000e+00> : vector<1x10xf32>
    %283 = tpu.matmul %280, %282, %cst_182 {dimension_numbers = #tpu.dot_dimension_numbers<[1], [0], [0], [1], [0, 0, 1, 1], [], []>} : vector<1x49xf32>, vector<49x10xf32>, vector<1x10xf32> -> vector<1x10xf32>
    %284 = arith.addf %279, %283 : vector<1x10xf32>
    %285 = vector.extract_strided_slice %138 {offsets = [29, 0], sizes = [1, 49], strides = [1, 1]} : vector<49x49xf32> to vector<1x49xf32>
    %c29 = arith.constant 29 : index
    %c0_183 = arith.constant 0 : index
    %c0_184 = arith.constant 0 : index
    %286 = vector.load %arg8[%c29, %c0_183, %c0_184] : memref<49x49x10xf32, #tpu.memory_space<vmem>>, vector<1x49x10xf32>
    %287 = vector.shape_cast %286 : vector<1x49x10xf32> to vector<49x10xf32>
    %cst_185 = arith.constant dense<0.000000e+00> : vector<1x10xf32>
    %288 = tpu.matmul %285, %287, %cst_185 {dimension_numbers = #tpu.dot_dimension_numbers<[1], [0], [0], [1], [0, 0, 1, 1], [], []>} : vector<1x49xf32>, vector<49x10xf32>, vector<1x10xf32> -> vector<1x10xf32>
    %289 = arith.addf %284, %288 : vector<1x10xf32>
    %290 = vector.extract_strided_slice %138 {offsets = [30, 0], sizes = [1, 49], strides = [1, 1]} : vector<49x49xf32> to vector<1x49xf32>
    %c30 = arith.constant 30 : index
    %c0_186 = arith.constant 0 : index
    %c0_187 = arith.constant 0 : index
    %291 = vector.load %arg8[%c30, %c0_186, %c0_187] : memref<49x49x10xf32, #tpu.memory_space<vmem>>, vector<1x49x10xf32>
    %292 = vector.shape_cast %291 : vector<1x49x10xf32> to vector<49x10xf32>
    %cst_188 = arith.constant dense<0.000000e+00> : vector<1x10xf32>
    %293 = tpu.matmul %290, %292, %cst_188 {dimension_numbers = #tpu.dot_dimension_numbers<[1], [0], [0], [1], [0, 0, 1, 1], [], []>} : vector<1x49xf32>, vector<49x10xf32>, vector<1x10xf32> -> vector<1x10xf32>
    %294 = arith.addf %289, %293 : vector<1x10xf32>
    %295 = vector.extract_strided_slice %138 {offsets = [31, 0], sizes = [1, 49], strides = [1, 1]} : vector<49x49xf32> to vector<1x49xf32>
    %c31 = arith.constant 31 : index
    %c0_189 = arith.constant 0 : index
    %c0_190 = arith.constant 0 : index
    %296 = vector.load %arg8[%c31, %c0_189, %c0_190] : memref<49x49x10xf32, #tpu.memory_space<vmem>>, vector<1x49x10xf32>
    %297 = vector.shape_cast %296 : vector<1x49x10xf32> to vector<49x10xf32>
    %cst_191 = arith.constant dense<0.000000e+00> : vector<1x10xf32>
    %298 = tpu.matmul %295, %297, %cst_191 {dimension_numbers = #tpu.dot_dimension_numbers<[1], [0], [0], [1], [0, 0, 1, 1], [], []>} : vector<1x49xf32>, vector<49x10xf32>, vector<1x10xf32> -> vector<1x10xf32>
    %299 = arith.addf %294, %298 : vector<1x10xf32>
    %300 = vector.extract_strided_slice %138 {offsets = [32, 0], sizes = [1, 49], strides = [1, 1]} : vector<49x49xf32> to vector<1x49xf32>
    %c32 = arith.constant 32 : index
    %c0_192 = arith.constant 0 : index
    %c0_193 = arith.constant 0 : index
    %301 = vector.load %arg8[%c32, %c0_192, %c0_193] : memref<49x49x10xf32, #tpu.memory_space<vmem>>, vector<1x49x10xf32>
    %302 = vector.shape_cast %301 : vector<1x49x10xf32> to vector<49x10xf32>
    %cst_194 = arith.constant dense<0.000000e+00> : vector<1x10xf32>
    %303 = tpu.matmul %300, %302, %cst_194 {dimension_numbers = #tpu.dot_dimension_numbers<[1], [0], [0], [1], [0, 0, 1, 1], [], []>} : vector<1x49xf32>, vector<49x10xf32>, vector<1x10xf32> -> vector<1x10xf32>
    %304 = arith.addf %299, %303 : vector<1x10xf32>
    %305 = vector.extract_strided_slice %138 {offsets = [33, 0], sizes = [1, 49], strides = [1, 1]} : vector<49x49xf32> to vector<1x49xf32>
    %c33 = arith.constant 33 : index
    %c0_195 = arith.constant 0 : index
    %c0_196 = arith.constant 0 : index
    %306 = vector.load %arg8[%c33, %c0_195, %c0_196] : memref<49x49x10xf32, #tpu.memory_space<vmem>>, vector<1x49x10xf32>
    %307 = vector.shape_cast %306 : vector<1x49x10xf32> to vector<49x10xf32>
    %cst_197 = arith.constant dense<0.000000e+00> : vector<1x10xf32>
    %308 = tpu.matmul %305, %307, %cst_197 {dimension_numbers = #tpu.dot_dimension_numbers<[1], [0], [0], [1], [0, 0, 1, 1], [], []>} : vector<1x49xf32>, vector<49x10xf32>, vector<1x10xf32> -> vector<1x10xf32>
    %309 = arith.addf %304, %308 : vector<1x10xf32>
    %310 = vector.extract_strided_slice %138 {offsets = [34, 0], sizes = [1, 49], strides = [1, 1]} : vector<49x49xf32> to vector<1x49xf32>
    %c34 = arith.constant 34 : index
    %c0_198 = arith.constant 0 : index
    %c0_199 = arith.constant 0 : index
    %311 = vector.load %arg8[%c34, %c0_198, %c0_199] : memref<49x49x10xf32, #tpu.memory_space<vmem>>, vector<1x49x10xf32>
    %312 = vector.shape_cast %311 : vector<1x49x10xf32> to vector<49x10xf32>
    %cst_200 = arith.constant dense<0.000000e+00> : vector<1x10xf32>
    %313 = tpu.matmul %310, %312, %cst_200 {dimension_numbers = #tpu.dot_dimension_numbers<[1], [0], [0], [1], [0, 0, 1, 1], [], []>} : vector<1x49xf32>, vector<49x10xf32>, vector<1x10xf32> -> vector<1x10xf32>
    %314 = arith.addf %309, %313 : vector<1x10xf32>
    %315 = vector.extract_strided_slice %138 {offsets = [35, 0], sizes = [1, 49], strides = [1, 1]} : vector<49x49xf32> to vector<1x49xf32>
    %c35 = arith.constant 35 : index
    %c0_201 = arith.constant 0 : index
    %c0_202 = arith.constant 0 : index
    %316 = vector.load %arg8[%c35, %c0_201, %c0_202] : memref<49x49x10xf32, #tpu.memory_space<vmem>>, vector<1x49x10xf32>
    %317 = vector.shape_cast %316 : vector<1x49x10xf32> to vector<49x10xf32>
    %cst_203 = arith.constant dense<0.000000e+00> : vector<1x10xf32>
    %318 = tpu.matmul %315, %317, %cst_203 {dimension_numbers = #tpu.dot_dimension_numbers<[1], [0], [0], [1], [0, 0, 1, 1], [], []>} : vector<1x49xf32>, vector<49x10xf32>, vector<1x10xf32> -> vector<1x10xf32>
    %319 = arith.addf %314, %318 : vector<1x10xf32>
    %320 = vector.extract_strided_slice %138 {offsets = [36, 0], sizes = [1, 49], strides = [1, 1]} : vector<49x49xf32> to vector<1x49xf32>
    %c36 = arith.constant 36 : index
    %c0_204 = arith.constant 0 : index
    %c0_205 = arith.constant 0 : index
    %321 = vector.load %arg8[%c36, %c0_204, %c0_205] : memref<49x49x10xf32, #tpu.memory_space<vmem>>, vector<1x49x10xf32>
    %322 = vector.shape_cast %321 : vector<1x49x10xf32> to vector<49x10xf32>
    %cst_206 = arith.constant dense<0.000000e+00> : vector<1x10xf32>
    %323 = tpu.matmul %320, %322, %cst_206 {dimension_numbers = #tpu.dot_dimension_numbers<[1], [0], [0], [1], [0, 0, 1, 1], [], []>} : vector<1x49xf32>, vector<49x10xf32>, vector<1x10xf32> -> vector<1x10xf32>
    %324 = arith.addf %319, %323 : vector<1x10xf32>
    %325 = vector.extract_strided_slice %138 {offsets = [37, 0], sizes = [1, 49], strides = [1, 1]} : vector<49x49xf32> to vector<1x49xf32>
    %c37 = arith.constant 37 : index
    %c0_207 = arith.constant 0 : index
    %c0_208 = arith.constant 0 : index
    %326 = vector.load %arg8[%c37, %c0_207, %c0_208] : memref<49x49x10xf32, #tpu.memory_space<vmem>>, vector<1x49x10xf32>
    %327 = vector.shape_cast %326 : vector<1x49x10xf32> to vector<49x10xf32>
    %cst_209 = arith.constant dense<0.000000e+00> : vector<1x10xf32>
    %328 = tpu.matmul %325, %327, %cst_209 {dimension_numbers = #tpu.dot_dimension_numbers<[1], [0], [0], [1], [0, 0, 1, 1], [], []>} : vector<1x49xf32>, vector<49x10xf32>, vector<1x10xf32> -> vector<1x10xf32>
    %329 = arith.addf %324, %328 : vector<1x10xf32>
    %330 = vector.extract_strided_slice %138 {offsets = [38, 0], sizes = [1, 49], strides = [1, 1]} : vector<49x49xf32> to vector<1x49xf32>
    %c38 = arith.constant 38 : index
    %c0_210 = arith.constant 0 : index
    %c0_211 = arith.constant 0 : index
    %331 = vector.load %arg8[%c38, %c0_210, %c0_211] : memref<49x49x10xf32, #tpu.memory_space<vmem>>, vector<1x49x10xf32>
    %332 = vector.shape_cast %331 : vector<1x49x10xf32> to vector<49x10xf32>
    %cst_212 = arith.constant dense<0.000000e+00> : vector<1x10xf32>
    %333 = tpu.matmul %330, %332, %cst_212 {dimension_numbers = #tpu.dot_dimension_numbers<[1], [0], [0], [1], [0, 0, 1, 1], [], []>} : vector<1x49xf32>, vector<49x10xf32>, vector<1x10xf32> -> vector<1x10xf32>
    %334 = arith.addf %329, %333 : vector<1x10xf32>
    %335 = vector.extract_strided_slice %138 {offsets = [39, 0], sizes = [1, 49], strides = [1, 1]} : vector<49x49xf32> to vector<1x49xf32>
    %c39 = arith.constant 39 : index
    %c0_213 = arith.constant 0 : index
    %c0_214 = arith.constant 0 : index
    %336 = vector.load %arg8[%c39, %c0_213, %c0_214] : memref<49x49x10xf32, #tpu.memory_space<vmem>>, vector<1x49x10xf32>
    %337 = vector.shape_cast %336 : vector<1x49x10xf32> to vector<49x10xf32>
    %cst_215 = arith.constant dense<0.000000e+00> : vector<1x10xf32>
    %338 = tpu.matmul %335, %337, %cst_215 {dimension_numbers = #tpu.dot_dimension_numbers<[1], [0], [0], [1], [0, 0, 1, 1], [], []>} : vector<1x49xf32>, vector<49x10xf32>, vector<1x10xf32> -> vector<1x10xf32>
    %339 = arith.addf %334, %338 : vector<1x10xf32>
    %340 = vector.extract_strided_slice %138 {offsets = [40, 0], sizes = [1, 49], strides = [1, 1]} : vector<49x49xf32> to vector<1x49xf32>
    %c40 = arith.constant 40 : index
    %c0_216 = arith.constant 0 : index
    %c0_217 = arith.constant 0 : index
    %341 = vector.load %arg8[%c40, %c0_216, %c0_217] : memref<49x49x10xf32, #tpu.memory_space<vmem>>, vector<1x49x10xf32>
    %342 = vector.shape_cast %341 : vector<1x49x10xf32> to vector<49x10xf32>
    %cst_218 = arith.constant dense<0.000000e+00> : vector<1x10xf32>
    %343 = tpu.matmul %340, %342, %cst_218 {dimension_numbers = #tpu.dot_dimension_numbers<[1], [0], [0], [1], [0, 0, 1, 1], [], []>} : vector<1x49xf32>, vector<49x10xf32>, vector<1x10xf32> -> vector<1x10xf32>
    %344 = arith.addf %339, %343 : vector<1x10xf32>
    %345 = vector.extract_strided_slice %138 {offsets = [41, 0], sizes = [1, 49], strides = [1, 1]} : vector<49x49xf32> to vector<1x49xf32>
    %c41 = arith.constant 41 : index
    %c0_219 = arith.constant 0 : index
    %c0_220 = arith.constant 0 : index
    %346 = vector.load %arg8[%c41, %c0_219, %c0_220] : memref<49x49x10xf32, #tpu.memory_space<vmem>>, vector<1x49x10xf32>
    %347 = vector.shape_cast %346 : vector<1x49x10xf32> to vector<49x10xf32>
    %cst_221 = arith.constant dense<0.000000e+00> : vector<1x10xf32>
    %348 = tpu.matmul %345, %347, %cst_221 {dimension_numbers = #tpu.dot_dimension_numbers<[1], [0], [0], [1], [0, 0, 1, 1], [], []>} : vector<1x49xf32>, vector<49x10xf32>, vector<1x10xf32> -> vector<1x10xf32>
    %349 = arith.addf %344, %348 : vector<1x10xf32>
    %350 = vector.extract_strided_slice %138 {offsets = [42, 0], sizes = [1, 49], strides = [1, 1]} : vector<49x49xf32> to vector<1x49xf32>
    %c42 = arith.constant 42 : index
    %c0_222 = arith.constant 0 : index
    %c0_223 = arith.constant 0 : index
    %351 = vector.load %arg8[%c42, %c0_222, %c0_223] : memref<49x49x10xf32, #tpu.memory_space<vmem>>, vector<1x49x10xf32>
    %352 = vector.shape_cast %351 : vector<1x49x10xf32> to vector<49x10xf32>
    %cst_224 = arith.constant dense<0.000000e+00> : vector<1x10xf32>
    %353 = tpu.matmul %350, %352, %cst_224 {dimension_numbers = #tpu.dot_dimension_numbers<[1], [0], [0], [1], [0, 0, 1, 1], [], []>} : vector<1x49xf32>, vector<49x10xf32>, vector<1x10xf32> -> vector<1x10xf32>
    %354 = arith.addf %349, %353 : vector<1x10xf32>
    %355 = vector.extract_strided_slice %138 {offsets = [43, 0], sizes = [1, 49], strides = [1, 1]} : vector<49x49xf32> to vector<1x49xf32>
    %c43 = arith.constant 43 : index
    %c0_225 = arith.constant 0 : index
    %c0_226 = arith.constant 0 : index
    %356 = vector.load %arg8[%c43, %c0_225, %c0_226] : memref<49x49x10xf32, #tpu.memory_space<vmem>>, vector<1x49x10xf32>
    %357 = vector.shape_cast %356 : vector<1x49x10xf32> to vector<49x10xf32>
    %cst_227 = arith.constant dense<0.000000e+00> : vector<1x10xf32>
    %358 = tpu.matmul %355, %357, %cst_227 {dimension_numbers = #tpu.dot_dimension_numbers<[1], [0], [0], [1], [0, 0, 1, 1], [], []>} : vector<1x49xf32>, vector<49x10xf32>, vector<1x10xf32> -> vector<1x10xf32>
    %359 = arith.addf %354, %358 : vector<1x10xf32>
    %360 = vector.extract_strided_slice %138 {offsets = [44, 0], sizes = [1, 49], strides = [1, 1]} : vector<49x49xf32> to vector<1x49xf32>
    %c44 = arith.constant 44 : index
    %c0_228 = arith.constant 0 : index
    %c0_229 = arith.constant 0 : index
    %361 = vector.load %arg8[%c44, %c0_228, %c0_229] : memref<49x49x10xf32, #tpu.memory_space<vmem>>, vector<1x49x10xf32>
    %362 = vector.shape_cast %361 : vector<1x49x10xf32> to vector<49x10xf32>
    %cst_230 = arith.constant dense<0.000000e+00> : vector<1x10xf32>
    %363 = tpu.matmul %360, %362, %cst_230 {dimension_numbers = #tpu.dot_dimension_numbers<[1], [0], [0], [1], [0, 0, 1, 1], [], []>} : vector<1x49xf32>, vector<49x10xf32>, vector<1x10xf32> -> vector<1x10xf32>
    %364 = arith.addf %359, %363 : vector<1x10xf32>
    %365 = vector.extract_strided_slice %138 {offsets = [45, 0], sizes = [1, 49], strides = [1, 1]} : vector<49x49xf32> to vector<1x49xf32>
    %c45 = arith.constant 45 : index
    %c0_231 = arith.constant 0 : index
    %c0_232 = arith.constant 0 : index
    %366 = vector.load %arg8[%c45, %c0_231, %c0_232] : memref<49x49x10xf32, #tpu.memory_space<vmem>>, vector<1x49x10xf32>
    %367 = vector.shape_cast %366 : vector<1x49x10xf32> to vector<49x10xf32>
    %cst_233 = arith.constant dense<0.000000e+00> : vector<1x10xf32>
    %368 = tpu.matmul %365, %367, %cst_233 {dimension_numbers = #tpu.dot_dimension_numbers<[1], [0], [0], [1], [0, 0, 1, 1], [], []>} : vector<1x49xf32>, vector<49x10xf32>, vector<1x10xf32> -> vector<1x10xf32>
    %369 = arith.addf %364, %368 : vector<1x10xf32>
    %370 = vector.extract_strided_slice %138 {offsets = [46, 0], sizes = [1, 49], strides = [1, 1]} : vector<49x49xf32> to vector<1x49xf32>
    %c46 = arith.constant 46 : index
    %c0_234 = arith.constant 0 : index
    %c0_235 = arith.constant 0 : index
    %371 = vector.load %arg8[%c46, %c0_234, %c0_235] : memref<49x49x10xf32, #tpu.memory_space<vmem>>, vector<1x49x10xf32>
    %372 = vector.shape_cast %371 : vector<1x49x10xf32> to vector<49x10xf32>
    %cst_236 = arith.constant dense<0.000000e+00> : vector<1x10xf32>
    %373 = tpu.matmul %370, %372, %cst_236 {dimension_numbers = #tpu.dot_dimension_numbers<[1], [0], [0], [1], [0, 0, 1, 1], [], []>} : vector<1x49xf32>, vector<49x10xf32>, vector<1x10xf32> -> vector<1x10xf32>
    %374 = arith.addf %369, %373 : vector<1x10xf32>
    %375 = vector.extract_strided_slice %138 {offsets = [47, 0], sizes = [1, 49], strides = [1, 1]} : vector<49x49xf32> to vector<1x49xf32>
    %c47 = arith.constant 47 : index
    %c0_237 = arith.constant 0 : index
    %c0_238 = arith.constant 0 : index
    %376 = vector.load %arg8[%c47, %c0_237, %c0_238] : memref<49x49x10xf32, #tpu.memory_space<vmem>>, vector<1x49x10xf32>
    %377 = vector.shape_cast %376 : vector<1x49x10xf32> to vector<49x10xf32>
    %cst_239 = arith.constant dense<0.000000e+00> : vector<1x10xf32>
    %378 = tpu.matmul %375, %377, %cst_239 {dimension_numbers = #tpu.dot_dimension_numbers<[1], [0], [0], [1], [0, 0, 1, 1], [], []>} : vector<1x49xf32>, vector<49x10xf32>, vector<1x10xf32> -> vector<1x10xf32>
    %379 = arith.addf %374, %378 : vector<1x10xf32>
    %380 = vector.extract_strided_slice %138 {offsets = [48, 0], sizes = [1, 49], strides = [1, 1]} : vector<49x49xf32> to vector<1x49xf32>
    %c48 = arith.constant 48 : index
    %c0_240 = arith.constant 0 : index
    %c0_241 = arith.constant 0 : index
    %381 = vector.load %arg8[%c48, %c0_240, %c0_241] : memref<49x49x10xf32, #tpu.memory_space<vmem>>, vector<1x49x10xf32>
    %382 = vector.shape_cast %381 : vector<1x49x10xf32> to vector<49x10xf32>
    %cst_242 = arith.constant dense<0.000000e+00> : vector<1x10xf32>
    %383 = tpu.matmul %380, %382, %cst_242 {dimension_numbers = #tpu.dot_dimension_numbers<[1], [0], [0], [1], [0, 0, 1, 1], [], []>} : vector<1x49xf32>, vector<49x10xf32>, vector<1x10xf32> -> vector<1x10xf32>
    %384 = arith.addf %379, %383 : vector<1x10xf32>
    %cst_243 = arith.constant 0.000000e+00 : f32
    %385 = vector.broadcast %cst_243 : f32 to vector<1x10xf32>
    %386 = arith.maximumf %384, %385 : vector<1x10xf32>
    %c0_244 = arith.constant 0 : index
    %c0_245 = arith.constant 0 : index
    %387 = vector.load %arg10[%c0_244, %c0_245] : memref<10x10xf32, #tpu.memory_space<vmem>>, vector<10x10xf32>
    %cst_246 = arith.constant dense<0.000000e+00> : vector<1x10xf32>
    %388 = tpu.matmul %386, %387, %cst_246 {dimension_numbers = #tpu.dot_dimension_numbers<[1], [0], [0], [1], [0, 0, 1, 1], [], []>} : vector<1x10xf32>, vector<10x10xf32>, vector<1x10xf32> -> vector<1x10xf32>
    %c0_247 = arith.constant 0 : index
    %c0_248 = arith.constant 0 : index
    %389 = vector.load %arg11[%c0_247, %c0_248] : memref<1x10xf32, #tpu.memory_space<vmem>>, vector<1x10xf32>
    %390 = arith.addf %388, %389 : vector<1x10xf32>
    %cst_249 = arith.constant dense<0xFF800000> : vector<1xf32>
    %391 = vector.multi_reduction <maximumf>, %390, %cst_249 [1] : vector<1x10xf32> to vector<1xf32>
    %392 = vector.shape_cast %391 : vector<1xf32> to vector<1x1xf32>
    %393 = vector.broadcast %392 : vector<1x1xf32> to vector<1x10xf32>
    %394 = arith.subf %390, %393 : vector<1x10xf32>
    %395 = math.exp %394 : vector<1x10xf32>
    %cst_250 = arith.constant dense<0.000000e+00> : vector<1xf32>
    %396 = vector.multi_reduction <add>, %395, %cst_250 [1] : vector<1x10xf32> to vector<1xf32>
    %397 = vector.shape_cast %396 : vector<1xf32> to vector<1x1xf32>
    %398 = math.log %397 : vector<1x1xf32>
    %399 = arith.addf %398, %392 : vector<1x1xf32>
    %400 = vector.broadcast %399 : vector<1x1xf32> to vector<1x10xf32>
    %401 = arith.subf %390, %400 : vector<1x10xf32>
    %c0_251 = arith.constant 0 : index
    %c0_252 = arith.constant 0 : index
    %c0_253 = arith.constant 0 : index
    %402 = vector.load %arg12[%c0_251, %c0_252, %c0_253] : memref<1x1x10xf32, #tpu.memory_space<vmem>>, vector<1x1x10xf32>
    %403 = vector.shape_cast %402 : vector<1x1x10xf32> to vector<1x10xf32>
    %404 = vector.shape_cast %401 : vector<1x10xf32> to vector<1x1x10xf32>
    tpu.vector_store %arg12[%c0_251, %c0_252, %c0_253], %404 {strides = array<i32>} : memref<1x1x10xf32, #tpu.memory_space<vmem>>, vector<1x1x10xf32>,
    return
  }
  func.func @transform_0(%arg0: i32) -> (i32, i32, i32) {
    %c0_i32 = arith.constant 0 : i32
    %c0_i32_0 = arith.constant 0 : i32
    %c0_i32_1 = arith.constant 0 : i32
    return %arg0, %c0_i32, %c0_i32_0 : i32, i32, i32
  }
  func.func @transform_1(%arg0: i32) -> (i32, i32) {
    %c0_i32 = arith.constant 0 : i32
    %c0_i32_0 = arith.constant 0 : i32
    %c0_i32_1 = arith.constant 0 : i32
    return %c0_i32, %c0_i32_0 : i32, i32
  }
  func.func @transform_2(%arg0: i32) -> (i32, i32) {
    %c0_i32 = arith.constant 0 : i32
    %c0_i32_0 = arith.constant 0 : i32
    %c0_i32_1 = arith.constant 0 : i32
    return %c0_i32, %c0_i32_0 : i32, i32
  }
  func.func @transform_3(%arg0: i32) -> (i32, i32, i32) {
    %c0_i32 = arith.constant 0 : i32
    %c0_i32_0 = arith.constant 0 : i32
    %c0_i32_1 = arith.constant 0 : i32
    %c0_i32_2 = arith.constant 0 : i32
    return %c0_i32, %c0_i32_0, %c0_i32_1 : i32, i32, i32
  }
  func.func @transform_4(%arg0: i32) -> (i32, i32) {
    %c0_i32 = arith.constant 0 : i32
    %c0_i32_0 = arith.constant 0 : i32
    %c0_i32_1 = arith.constant 0 : i32
    return %c0_i32, %c0_i32_0 : i32, i32
  }
  func.func @transform_5(%arg0: i32) -> (i32, i32, i32) {
    %c0_i32 = arith.constant 0 : i32
    %c0_i32_0 = arith.constant 0 : i32
    %c0_i32_1 = arith.constant 0 : i32
    %c0_i32_2 = arith.constant 0 : i32
    return %c0_i32, %c0_i32_0, %c0_i32_1 : i32, i32, i32
  }
  func.func @transform_6(%arg0: i32) -> (i32, i32, i32) {
    %c0_i32 = arith.constant 0 : i32
    %c0_i32_0 = arith.constant 0 : i32
    %c0_i32_1 = arith.constant 0 : i32
    %c0_i32_2 = arith.constant 0 : i32
    return %c0_i32, %c0_i32_0, %c0_i32_1 : i32, i32, i32
  }
  func.func @transform_7(%arg0: i32) -> (i32, i32, i32) {
    %c0_i32 = arith.constant 0 : i32
    %c0_i32_0 = arith.constant 0 : i32
    %c0_i32_1 = arith.constant 0 : i32
    %c0_i32_2 = arith.constant 0 : i32
    return %c0_i32, %c0_i32_0, %c0_i32_1 : i32, i32, i32
  }
  func.func @transform_8(%arg0: i32) -> (i32, i32) {
    %c0_i32 = arith.constant 0 : i32
    %c0_i32_0 = arith.constant 0 : i32
    %c0_i32_1 = arith.constant 0 : i32
    return %c0_i32, %c0_i32_0 : i32, i32
  }
  func.func @transform_9(%arg0: i32) -> (i32, i32) {
    %c0_i32 = arith.constant 0 : i32
    %c0_i32_0 = arith.constant 0 : i32
    %c0_i32_1 = arith.constant 0 : i32
    return %c0_i32, %c0_i32_0 : i32, i32
  }
  func.func @transform_10(%arg0: i32) -> (i32, i32) {
    %c0_i32 = arith.constant 0 : i32
    %c0_i32_0 = arith.constant 0 : i32
    %c0_i32_1 = arith.constant 0 : i32
    return %c0_i32, %c0_i32_0 : i32, i32
  }
  func.func @transform_11(%arg0: i32) -> (i32, i32, i32) {
    %c0_i32 = arith.constant 0 : i32
    %c0_i32_0 = arith.constant 0 : i32
    %c0_i32_1 = arith.constant 0 : i32
    return %arg0, %c0_i32, %c0_i32_0 : i32, i32, i32
  }
}

</mosaic_0001>

<bundles_post_ra>
// kernel: convnet_forward.1
= control target key start
LH: loop header
LB: loop body
LE: loop exit
PB: predicated region body
PF: predicated region fallthrough
CT: control target
= control target key end

     0   :  { %s12221_s0 = inlined_call_operand.vmem [shape: f32[2,1,1024], index: 0, kind: input, shape index: {}]   ;;  %s12222_s1 = inlined_call_operand.vmem [shape: f32[7,9], index: 1, kind: input, shape index: {}]   ;;  %s12223_s2 = inlined_call_operand.vmem [shape: f32[7,1], index: 2, kind: input, shape index: {}]   ;;  %s12224_s3 = inlined_call_operand.vmem [shape: f32[9,49,7], index: 3, kind: input, shape index: {}]   ;;  %s12225_s4 = inlined_call_operand.vmem [shape: f32[49,1], index: 4, kind: input, shape index: {}]   ;;  %s12226_s5 = inlined_call_operand.hbm [shape: f32[4,900,290], index: 5, kind: input, shape index: {}]   ;;  %s12227_s6 = inlined_call_operand.hbm [shape: f32[4,256,49], index: 6, kind: input, shape index: {}]   ;;  %s12228_s7 = inlined_call_operand.vmem [shape: f32[49,49,10], index: 7, kind: input, shape index: {}]   ;;  %s12229_s8 = inlined_call_operand.hbm [shape: f32[1,10], index: 8, kind: input, shape index: {}]   ;;  %s12230_s9 = inlined_call_operand.vmem [shape: f32[10,10], index: 9, kind: input, shape index: {}]   ;;  %s12231_s10 = inlined_call_operand.hbm [shape: f32[1,10], index: 10, kind: input, shape index: {}]   ;;  %s12232_s11 = inlined_call_operand.hbm [shape: f32[2,1,10], index: 11, kind: output, shape index: {}]  }
   0x1   :  { %12239 = sst [smem:[#allocation50_spill]] %s12226_s5 }
   0x2   :  { %12240 = sst [smem:[#allocation51_spill]] %s12227_s6 }
   0x3   :  { %16 = vsyncpa [#allocation3], 0 }
   0x4   :  { %17 = vsyncpa [#allocation6], 0 }
   0x5   :  { %18 = vsyncpa [#allocation9], 0 }
   0x6   :  { %19 = vsyncpa [#allocation4], 0 }
   0x7   :  { %21 = vsyncpa [#allocation4 + $0x1], 0  ;;  %s8940_s17 = smov 0   ;;  %s8942_s18 = smov 0  }
   0x8   :  { %s8944_s19 = smov 0   ;;  %s8946_s20 = smov 0  }
   0x9 LB: > { %12241 = sst [smem:[#allocation15_spill]] %s8836_s17  ;;  %s8961_s21 = sadd.s32 4294967295, %s8848_s20   ;;  %s8848_s20 = sphi %s8946_s20, %s12346_s20   ;;  %s8844_s19 = sphi %s8944_s19, %s12348_s19   ;;  %s8840_s18 = sphi %s8942_s18, %s12350_s18   ;;  %s8836_s17 = sphi %s8940_s17, %s12349_s17  }
   0xa   : > { %12242 = sst [smem:[#allocation16_spill]] %s8844_s19  ;;  %s7858_s22 = sadd.s32 4294967294, %s8848_s20  }
   0xb   : > { %12243 = sst [smem:[#allocation17_spill]] %s8848_s20  ;;  %s8965_s23 = sadd.s32 1, %s8848_s20  }
   0xc   : > { %12244 = sst [smem:[#allocation18_spill]] %s8965_s23  ;;  %s270_s24 = sadd.s32 1, %s8844_s19 }
   0xd   : > { %s267_s25 = ssub.s32 %s8848_s20, %s8965_s23  ;;  %p280_p0 = scmp.ne.s32.totalorder %s8844_s19, %s8840_s18 }
   0xe   : > { %p268_p1 = scmp.eq.s32.totalorder %s267_s25, 0  ;;  %p281_p2 = scmp.eq.s32.totalorder %s8961_s21, 1 }
   0xf   : > { %p286_p3 = scmp.ne.s32.totalorder %s8840_s18, %s8836_s17  ;;  %p287_p4 = scmp.eq.s32.totalorder %s7858_s22, 1 }
  0x10   : > { %s8976_s26 = scalar_select %p268_p1, %s8844_s19, %s270_s24  }
  0x11   : > { %p8978_p5 = por %p281_p2, %p280_p0  ;;  %p8982_p6 = por %p287_p4, %p286_p3 }
  0x12   : > { %12245 = sst [smem:[#allocation19_spill]] %s8976_s26  ;;  %p7859_p7 = scmp.ge.s32.totalorder %s8848_s20, 1 }
  0x13   : > { %s12247_s28 = scalar_select %p8982_p6, 1, 0 }
  0x14   : > { %p294_p8 = scmp.lt.s32.totalorder %s8848_s20, 3  ;;  %p8568_p9 = scmp.eq.s32.totalorder %s8961_s21, 0 }
  0x15   : > { %12248 = sst [smem:[#allocation20_spill]] %s12247_s28  ;;  %s8850_s14 = smov [#allocation5]  }
  0x16   : > { %p8989_p10 = pnand %p7859_p7, %p294_p8  ;;  %s12250_s6 = sld [smem:[#allocation51_spill]] }
  0x17   : > { %s333_s15 = sshll.u32 %s8850_s14, 4  ;;  %s12252_s5 = sld [smem:[#allocation50_spill]]  ;;  %s334_s15 = int_to_ptr.vmem [resolvable:$true] %s333_s15 }
  0x18   : > { %p8551_p11 = pneg %p8989_p10  ;;  %s8851_s30 = smov 128  }
  0x19   : > { %s8852_s12 = smov 8   ;;  %s8854_s26 = smov 384  }
  0x1a   : > { %p9000_p12 = pnand %p8568_p9, %p8551_p11  ;;  %s8855_s19 = smov 24  }
  0x1b   : > { %s349_s22 = sshll.u32 %s12229_s8, 4  ;;  %s8856_s24 = smov [#allocation7]   ;;  %s350_s22 = int_to_ptr.hbm [resolvable:$true] %s349_s22 }
  0x1c   : > { %s331_s13 = sshll.u32 %s12250_s6, 4  ;;  %s8853_s6 = smov [#allocation2]   ;;  %s332_s13 = int_to_ptr.hbm [resolvable:$true] %s331_s13 }
  0x1d   : > { %s317_s25 = sshll.u32 %s12252_s5, 4  ;;  %s319_s14 = sshll.u32 %s8853_s6, 4  ;;  %s318_s25 = int_to_ptr.hbm [resolvable:$true] %s317_s25  ;;  %s320_s14 = int_to_ptr.vmem [resolvable:$true] %s319_s14 }
  0x1e   : > { %8557 = dma.hbm_to_vmem [thread:$0]  (!%p9000_p12), %s332_s13, 16384, %s334_s15, [#allocation6], %s8851_s30, %s8851_s30, %s8852_s12  }
  0x1f   : > { %8554 = dma.hbm_to_vmem [thread:$0]  (!%p9000_p12), %s318_s25, 173568, %s320_s14, [#allocation3], %s8854_s26, %s8854_s26, %s8855_s19  }
  0x20   : > { %s351_s5 = sshll.u32 %s8856_s24, 4  ;;  %s364_s13 = sshll.u32 %s12231_s10, 4  ;;  %s352_s5 = int_to_ptr.vmem [resolvable:$true] %s351_s5  ;;  %s365_s13 = int_to_ptr.hbm [resolvable:$true] %s364_s13 }
  0x21   : > { %8560 = dma.hbm_to_vmem [thread:$0]  (!%p9000_p12), %s350_s22, 16, %s352_s5, [#allocation6]  }
  0x22   : > { %s8857_s6 = smov [#allocation8]   ;;  %386 = sbr.rel (%p8989_p10) target bundleno = 2623 (0xa3f), region = 64 }
  0x23   : > { %s366_s15 = sshll.u32 %s8857_s6, 4  ;;  %s367_s15 = int_to_ptr.vmem [resolvable:$true] %s366_s15 }
  0x24   : > { %8563 = dma.hbm_to_vmem [thread:$0]  (!%p9000_p12), %s365_s13, 16, %s367_s15, [#allocation9]  }
  0x27   : > { %8819 = dma.done.wait (%p8568_p9), [#allocation3], 173568  }
  0x28   : > { %8821 = vsyncadd (%p8568_p9), [#allocation3], 4294793728 }
  0x29   : > { %8823 = dma.done.wait (%p8568_p9), [#allocation6], 16400  }
  0x2a   : > { %8825 = vsyncadd (%p8568_p9), [#allocation6], 4294950896 }
  0x2b   : > { %8827 = dma.done.wait (%p8568_p9), [#allocation9], 16  }
  0x2c   : > { %8829 = vsyncadd (%p8568_p9), [#allocation9], 4294967280  ;;  %v8858_v0 = vmov 1   ;;  %v8859_v1 = vmov 3   ;;  %v8860_v2 = vmov 5   ;;  %v8861_v4 = vmov 2  }
  0x2d   : > { %8639 = vset.pattern.permute.xlu0 %v8858_v0  ;;  %8641 = vset.pattern.permute.xlu1 %v8859_v1  ;;  %v446_v3 = vld [vmem:[%s12222_s1] sm:$0x7f]  ;;  %v8862_v5 = vmov 4   ;;  %v8863_v6 = vmov 6   ;;  %v8864_v7 = vmov 7   ;;  %v8865_v8 = vmov 0  }
  0x2e   : > { %8643 = vset.pattern.permute.xlu2 %v8860_v2  ;;  %491 = vperm.xlu0 %8639, %v446_v3   ;;  %v8866_v9 = vmov 8   ;;  %v445_v10 = vld [vmem:[%s12223_s2] sm:$0x7f]  ;;  %p440_p13 = scmp.lt.s32.totalorder %s8961_s21, 1  ;;  %s8867_s25 = smov 127   ;;  %vm526_vm0 = vcmask 1039360  }
  0x2f   : > { %611 = vperm.xlu1 %8641, %v446_v3   ;;  %731 = vperm.xlu2 %8643, %v446_v3   ;;  %s8868_s30 = smov 98   ;;  %s8869_s12 = smov 126   ;;  %vm586_vm1 = vcmask 1031168   ;;  %vm646_vm2 = vcmask 801792   ;;  %vm706_vm3 = vcmask 793600   ;;  %vm766_vm4 = vcmask 785408  }
  0x30   : > { %s441_s23 = scalar_select %p440_p13, %s8961_s21, 1  ;;  %vm826_vm5 = vcmask 556032   ;;  %vm886_vm6 = vcmask 547840   ;;  %vm946_vm7 = vcmask 539648   ;;  %vm1321_vm8 = vcmask 1043456  }
  0x31   : > { %s8870_s14 = smov 97   ;;  %s8871_s22 = smov 96   ;;  %vm1317_vm9 = vcmask 31744   ;;  %vm4355_vm10 = vcmask 1046528   ;;  %vm4333_vm11 = vcmask 56320   ;;  %vm4682_vm12 = vcmask 916480  }
  0x32   : > { %s7870_s26 = sshll.u32 %s441_s23, 3  ;;  %s8872_s24 = smov 68   ;;  %vm4814_vm13 = vcmask 908288   ;;  %vm4946_vm14 = vcmask 900096   ;;  %vm5209_vm15 = vcmask 777216  }
  0x33   : > { %s443_s16 = scalar_lea.vmem %s12221_s0, %s7870_s26  ;;  %s8873_s13 = smov 67  }
  0x34   : > { %v9046_v11 = vld [vmem:[%s443_s16] sm:$0xff]  ;;  %s8874_s6 = smov 66   ;;  %s8875_s15 = smov 112  }
  0x35   : > { %v9049_v12 = vperm.slane %v9046_v11, 3  ;;  %v9052_v13 = vperm.slane %v9046_v11, 2  ;;  %v9089_v27 = vperm.slane %v9046_v11, 4  ;;  %v9103_v32 = vperm.slane %v9046_v11, 1  ;;  %s8876_s5 = smov 111   ;;  %s8877_s17 = smov 110  }
  0x36   : > { %8640 = vset.pattern.permute.xlu0 %v8861_v4  ;;  %v9164_v53 = vperm.slane %v9046_v11, 7  ;;  %v9167_v54 = vperm.slane %v9046_v11, 6  ;;  %v9181_v59 = vperm.slane %v9046_v11, 5  ;;  %v9184_v60 = vperm.slane %v9046_v11, 0  ;;  %s8878_s19 = smov 95   ;;  %s8879_s20 = smov 94  }
  0x37   : > { %8642 = vset.pattern.permute.xlu1 %v8862_v5  ;;  %551 = vperm.xlu0 %8640, %v446_v3   ;;  %s8794_s23 = scalar_lea.hbm %s12232_s11, 2 }
  0x38   : > { %671 = vperm.xlu1 %8642, %v446_v3   ;;  %8644 = vset.pattern.permute.xlu2 %v8863_v6 }
  0x39   : > { %791 = vperm.xlu2 %8644, %v446_v3  }
  0x3f   : > { %8647 = vset.pattern.permute.xlu0 %v8865_v8 }
  0x40   : > { %8645 = vset.pattern.permute.xlu1 %v8864_v7  ;;  %449 = vperm.xlu0 %8647, %v446_v3  }
  0x41   : > { %851 = vperm.xlu1 %8645, %v446_v3   ;;  %8646 = vset.pattern.permute.xlu2 %v8866_v9 }
  0x42   : > { %911 = vperm.xlu2 %8646, %v446_v3  }
  0x49   : > { %8648 = vset.pattern.permute.xlu1 %v8865_v8 }
  0x4a   : > { %479 = vperm.xlu1 %8648, %v445_v10   ;;  %8649 = vset.pattern.permute.xlu2 %v8865_v8 }
  0x89   : > { %v9084_v26 = vpop.permute.xlu2 %731 }
  0x8a   : > { %v737_v28 = vmul.f32 %v9084_v26, %v9049_v12  ;;  %v736_v29 = vmul.f32 %v9084_v26, %v9052_v13  ;;  %v735_v47 = vmul.f32 %v9084_v26, %v9103_v32  ;;  %v738_v48 = vmul.f32 %v9084_v26, %v9089_v27 }
  0x93   : > { %v9100_v31 = vpop.permute.xlu2 %791 }
  0x94   : > { %v797_v33 = vmul.f32 %v9100_v31, %v9049_v12  ;;  %v796_v34 = vmul.f32 %v9100_v31, %v9052_v13  ;;  %v795_v51 = vmul.f32 %v9100_v31, %v9103_v32  ;;  %v798_v52 = vmul.f32 %v9100_v31, %v9089_v27 }
  0x9c   : > { %v9125_v40 = vpop.permute.xlu2 %911 }
  0x9d   : > { %v916_v41 = vmul.f32 %v9125_v40, %v9052_v13  ;;  %v917_v46 = vmul.f32 %v9125_v40, %v9049_v12 }
  0xa0   : > { %v9054_v14 = vpop.permute.xlu0 %491 }
  0xa1   : > { %v497_v15 = vmul.f32 %v9054_v14, %v9049_v12  ;;  %v496_v16 = vmul.f32 %v9054_v14, %v9052_v13  ;;  %v9060_v17 = vpop.permute.xlu1 %611  ;;  %v498_v30 = vmul.f32 %v9054_v14, %v9089_v27  ;;  %v495_v35 = vmul.f32 %v9054_v14, %v9103_v32 }
  0xa2   : > { %v616_v18 = vmul.f32 %v9060_v17, %v9052_v13  ;;  %v617_v25 = vmul.f32 %v9060_v17, %v9049_v12  ;;  %v618_v42 = vmul.f32 %v9060_v17, %v9089_v27  ;;  %v615_v45 = vmul.f32 %v9060_v17, %v9103_v32 }
  0xa3   : > { %516 = vrot.lane.b32.xlu1 %v497_v15, %s8867_s25  ;;  %514 = vrot.lane.b32.xlu2 %v496_v16, %s8867_s25  ;;  %v501_v56 = vmul.f32 %v9054_v14, %v9164_v53  ;;  %v500_v57 = vmul.f32 %v9054_v14, %v9167_v54  ;;  %v918_v15 = vmul.f32 %v9125_v40, %v9089_v27 }
  0xa9   : > { %v9066_v19 = vpop.permute.xlu0 %551 }
  0xaa   : > { %v557_v20 = vmul.f32 %v9066_v19, %v9049_v12  ;;  %v556_v21 = vmul.f32 %v9066_v19, %v9052_v13  ;;  %v9075_v22 = vpop.permute.xlu1 %671  ;;  %v558_v39 = vmul.f32 %v9066_v19, %v9089_v27  ;;  %v555_v43 = vmul.f32 %v9066_v19, %v9103_v32 }
  0xab   : > { %634 = vrot.lane.b32.xlu1 %v616_v18, %s8868_s30  ;;  %v677_v23 = vmul.f32 %v9075_v22, %v9049_v12  ;;  %v676_v24 = vmul.f32 %v9075_v22, %v9052_v13  ;;  %v678_v44 = vmul.f32 %v9075_v22, %v9089_v27  ;;  %v675_v49 = vmul.f32 %v9075_v22, %v9103_v32 }
  0xac   : > { %576 = vrot.lane.b32.xlu0 %v557_v20, %s8869_s12  ;;  %574 = vrot.lane.b32.xlu2 %v556_v21, %s8869_s12  ;;  %v561_v4 = vmul.f32 %v9066_v19, %v9164_v53  ;;  %v560_v11 = vmul.f32 %v9066_v19, %v9167_v54  ;;  %v621_v18 = vmul.f32 %v9060_v17, %v9164_v53 }
  0xad   : > { %v620_v20 = vmul.f32 %v9060_v17, %v9167_v54  ;;  %v915_v21 = vmul.f32 %v9125_v40, %v9103_v32 }
  0xb2   : > { %v9176_v58 = vpop.permute.xlu0 %449 }
  0xb3   : > { %696 = vrot.lane.b32.xlu1 %v677_v23, %s8870_s14  ;;  %v9114_v36 = vpop.permute.xlu1 %851  ;;  %v470_v61 = vmul.f32 %v9103_v32, %v9176_v58  ;;  %v475_v62 = vmul.f32 %v9167_v54, %v9176_v58  ;;  %v476_v0 = vmul.f32 %v9164_v53, %v9176_v58  ;;  %v473_v1 = vmul.f32 %v9089_v27, %v9176_v58 }
  0xb4   : > { %694 = vrot.lane.b32.xlu0 %v676_v24, %s8870_s14  ;;  %636 = vrot.lane.b32.xlu2 %v617_v25, %s8868_s30  ;;  %v857_v37 = vmul.f32 %v9114_v36, %v9049_v12  ;;  %v856_v38 = vmul.f32 %v9114_v36, %v9052_v13  ;;  %v858_v50 = vmul.f32 %v9114_v36, %v9089_v27 }
  0xb5   : > { %v855_v55 = vmul.f32 %v9114_v36, %v9103_v32  ;;  %v474_v2 = vmul.f32 %v9181_v59, %v9176_v58  ;;  %v469_v3 = vmul.f32 %v9184_v60, %v9176_v58  ;;  %v740_v24 = vmul.f32 %v9084_v26, %v9167_v54  ;;  %v1113_v32 = vld [vmem:[#allocation2 + $0x438] sm:$0xff] }
  0xb6   : > { %v681_v25 = vmul.f32 %v9075_v22, %v9164_v53  ;;  %v680_v27 = vmul.f32 %v9075_v22, %v9167_v54 }
  0xbb   : > { %518 = vrot.lane.b32.xlu1 %v498_v30, %s8867_s25  ;;  %v1116_v30 = vld [vmem:[#allocation2 + $0x450] sm:$0xff] }
  0xbc   : > { %756 = vrot.lane.b32.xlu0 %v737_v28, %s8871_s22  ;;  %754 = vrot.lane.b32.xlu2 %v736_v29, %s8871_s22  ;;  %v9190_v63 = vpop.permute.xlu1 %479  ;;  %v1119_v28 = vld [vmem:[#allocation2 + $0x468] sm:$0xff] }
  0xbd   : > { %v9203_v5 = vadd.f32 %v9190_v63, %v470_v61  ;;  %v9206_v6 = vadd.f32 %v9190_v63, %v475_v62  ;;  %v9209_v7 = vadd.f32 %v9190_v63, %v476_v0  ;;  %v9212_v8 = vadd.f32 %v9190_v63, %v473_v1  ;;  %1371 = vmatpush.msra.mxu2 %v1119_v28  ;;  %v1086_v62 = vld [vmem:[#allocation2 + $0x360] sm:$0xff]  ;;  %v1083_v0 = vld [vmem:[#allocation2 + $0x348] sm:$0xff] }
  0xbe   : > { %v9215_v9 = vadd.f32 %v9190_v63, %v474_v2  ;;  %v9218_v10 = vadd.f32 %v9190_v63, %v469_v3  ;;  %v559_v61 = vmul.f32 %v9066_v19, %v9181_v59  ;;  %v1080_v3 = vld [vmem:[#allocation2 + $0x330] sm:$0xff] }
  0xbf   : > { %1372 = vmatpush.msra.mxu2 %v1116_v30  ;;  %v1071_v30 = vld [vmem:[#allocation2 + $0x2e8] sm:$0xff] }
  0xc0   : > { %1351 = vmatpush.msra.mxu1 %v1071_v30 }
  0xc1   : > { %1373 = vmatpush.msra.mxu2 %v1113_v32  ;;  %v1155_v32 = vld [vmem:[#allocation2 + $0x588] sm:$0xff] }
  0xc3   : > { %512 = vrot.lane.b32.xlu1 %v495_v35, %s8867_s25  ;;  %v741_v35 = vmul.f32 %v9084_v26, %v9164_v53 }
  0xc4   : > { %816 = vrot.lane.b32.xlu0 %v797_v33, %s8872_s24  ;;  %814 = vrot.lane.b32.xlu2 %v796_v34, %s8872_s24  ;;  %v801_v33 = vmul.f32 %v9100_v31, %v9164_v53  ;;  %v800_v34 = vmul.f32 %v9100_v31, %v9167_v54 }
  0xcb   : > { %876 = vrot.lane.b32.xlu1 %v857_v37, %s8873_s13  ;;  %v1110_v37 = vld [vmem:[#allocation2 + $0x420] sm:$0xff] }
  0xcc   : > { %874 = vrot.lane.b32.xlu0 %v856_v38, %s8873_s13  ;;  %578 = vrot.lane.b32.xlu2 %v558_v39, %s8869_s12  ;;  %v1107_v38 = vld [vmem:[#allocation2 + $0x408] sm:$0xff] }
  0xcd   : > { %1374 = vmatpush.msra.mxu2 %v1110_v37  ;;  %v554_v37 = vmul.f32 %v9066_v19, %v9184_v60  ;;  %v1062_v19 = vld [vmem:[#allocation2 + $0x2a0] sm:$0xff] }
  0xcf   : > { %1375 = vmatpush.msra.mxu2 %v1107_v38  ;;  %v739_v38 = vmul.f32 %v9084_v26, %v9181_v59 }
  0xd3   : > { %934 = vrot.lane.b32.xlu1 %v916_v41, %s8874_s6 }
  0xd4   : > { %638 = vrot.lane.b32.xlu0 %v618_v42, %s8868_s30  ;;  %572 = vrot.lane.b32.xlu2 %v555_v43, %s8869_s12  ;;  %v1104_v42 = vld [vmem:[#allocation2 + $0x3f0] sm:$0xff]  ;;  %v1101_v43 = vld [vmem:[#allocation2 + $0x3d8] sm:$0xff] }
  0xd5   : > { %1376 = vmatpush.msra.mxu2 %v1104_v42  ;;  %v1152_v42 = vld [vmem:[#allocation2 + $0x570] sm:$0xff] }
  0xd7   : > { %1377 = vmatpush.msra.mxu2 %v1101_v43  ;;  %v1065_v43 = vld [vmem:[#allocation2 + $0x2b8] sm:$0xff] }
  0xdb   : > { %698 = vrot.lane.b32.xlu1 %v678_v44, %s8870_s14  ;;  %v861_v44 = vmul.f32 %v9114_v36, %v9164_v53 }
  0xdc   : > { %632 = vrot.lane.b32.xlu0 %v615_v45, %s8868_s30  ;;  %936 = vrot.lane.b32.xlu2 %v917_v46, %s8874_s6  ;;  %v860_v45 = vmul.f32 %v9114_v36, %v9167_v54  ;;  %v499_v46 = vmul.f32 %v9054_v14, %v9181_v59 }
  0xe3   : > { %752 = vrot.lane.b32.xlu1 %v735_v47, %s8871_s22  ;;  %v1098_v47 = vld [vmem:[#allocation2 + $0x3c0] sm:$0xff] }
  0xe4   : > { %758 = vrot.lane.b32.xlu0 %v738_v48, %s8871_s22  ;;  %692 = vrot.lane.b32.xlu2 %v675_v49, %s8870_s14  ;;  %v1095_v48 = vld [vmem:[#allocation2 + $0x3a8] sm:$0xff] }
  0xe5   : > { %1378 = vmatpush.msra.mxu2 %v1098_v47 }
  0xe7   : > { %1379 = vmatpush.msra.mxu2 %v1095_v48 }
  0xeb   : > { %878 = vrot.lane.b32.xlu1 %v858_v50, %s8873_s13 }
  0xec   : > { %812 = vrot.lane.b32.xlu0 %v795_v51, %s8872_s24  ;;  %818 = vrot.lane.b32.xlu2 %v798_v52, %s8872_s24  ;;  %v1092_v52 = vld [vmem:[#allocation2 + $0x390] sm:$0xff] }
  0xed   : > { %1380 = vmatpush.msra.mxu2 %v1092_v52 }
  0xf3   : > { %872 = vrot.lane.b32.xlu1 %v855_v55, %s8873_s13  ;;  %v1089_v55 = vld [vmem:[#allocation2 + $0x378] sm:$0xff] }
  0xf4   : > { %524 = vrot.lane.b32.xlu0 %v501_v56, %s8867_s25  ;;  %522 = vrot.lane.b32.xlu2 %v500_v57, %s8867_s25  ;;  %v921_v56 = vmul.f32 %v9125_v40, %v9164_v53  ;;  %v920_v57 = vmul.f32 %v9125_v40, %v9167_v54  ;;  %v679_v54 = vmul.f32 %v9075_v22, %v9181_v59 }
  0xf5   : > { %1381 = vmatpush.msra.mxu2 %v1089_v55  ;;  %v1146_v55 = vld [vmem:[#allocation2 + $0x540] sm:$0xff] }
  0xf7   : > { %1382 = vmatpush.msra.mxu2 %v1086_v62 }
  0xf9   : > { %1383 = vmatpush.msra.mxu2 %v1083_v0  ;;  %v859_v0 = vmul.f32 %v9114_v36, %v9181_v59 }
  0xfb   : > { %584 = vrot.lane.b32.xlu1 %v561_v4, %s8869_s12  ;;  %v1167_v4 = vld [vmem:[#allocation2 + $0x5e8] sm:$0xff]  ;;  %1384 = vmatpush.msra.mxu2 %v1080_v3 }
  0xfc   : > { %582 = vrot.lane.b32.xlu0 %v560_v11, %s8869_s12  ;;  %938 = vrot.lane.b32.xlu2 %v918_v15, %s8874_s6  ;;  %v619_v11 = vmul.f32 %v9060_v17, %v9181_v59  ;;  %v494_v15 = vmul.f32 %v9054_v14, %v9184_v60  ;;  %v1158_v14 = vld [vmem:[#allocation2 + $0x5a0] sm:$0xff] }
  0xfd   : > { %v9227_v16 = vpop.permute.xlu2 %514  ;;  %1391 = vmatpush.msra.mxu3 %v1167_v4  ;;  %v674_v4 = vmul.f32 %v9075_v22, %v9184_v60  ;;  %v1137_v22 = vld [vmem:[#allocation2 + $0x4f8] sm:$0xff] }
 0x103   : > { %644 = vrot.lane.b32.xlu1 %v621_v18, %s8868_s30  ;;  %v1077_v18 = vld [vmem:[#allocation2 + $0x318] sm:$0xff] }
 0x104   : > { %642 = vrot.lane.b32.xlu0 %v620_v20, %s8868_s30  ;;  %932 = vrot.lane.b32.xlu2 %v915_v21, %s8874_s6  ;;  %v1164_v20 = vld [vmem:[#allocation2 + $0x5d0] sm:$0xff]  ;;  %v1074_v21 = vld [vmem:[#allocation2 + $0x300] sm:$0xff] }
 0x105   : > { %1385 = vmatpush.msra.mxu2 %v1077_v18  ;;  %1392 = vmatpush.msra.mxu3 %v1164_v20  ;;  %v1053_v20 = vld [vmem:[#allocation2 + $0x258] sm:$0xff] }
 0x106   : > { %v9238_v23 = vpop.permute.xlu2 %574 }
 0x107   : > { %1386 = vmatpush.msra.mxu2 %v1074_v21 }
 0x10b   : > { %762 = vrot.lane.b32.xlu1 %v740_v24, %s8871_s22  ;;  %v1161_v24 = vld [vmem:[#allocation2 + $0x5b8] sm:$0xff] }
 0x10c   : > { %704 = vrot.lane.b32.xlu0 %v681_v25, %s8870_s14  ;;  %702 = vrot.lane.b32.xlu2 %v680_v27, %s8870_s14 }
 0x10d   : > { %1393 = vmatpush.msra.mxu3 %v1161_v24 }
 0x10e   : > { %v9249_v29 = vpop.permute.xlu2 %636 }
 0x10f   : > { %1394 = vmatpush.msra.mxu3 %v1158_v14 }
 0x111   : > { %1395 = vmatpush.msra.mxu3 %v1155_v32 }
 0x113   : > { %824 = vrot.lane.b32.xlu1 %v801_v33, %s8872_s24  ;;  %v1068_v33 = vld [vmem:[#allocation2 + $0x2d0] sm:$0xff]  ;;  %1396 = vmatpush.msra.mxu3 %v1152_v42  ;;  %v794_v42 = vmul.f32 %v9100_v31, %v9184_v60 }
 0x114   : > { %822 = vrot.lane.b32.xlu0 %v800_v34, %s8872_s24  ;;  %764 = vrot.lane.b32.xlu2 %v741_v35, %s8871_s22  ;;  %v471_v34 = vmul.f32 %v9052_v13, %v9176_v58  ;;  %v614_v35 = vmul.f32 %v9060_v17, %v9184_v60  ;;  %v1149_v17 = vld [vmem:[#allocation2 + $0x558] sm:$0xff] }
 0x115   : > { %v9260_v39 = vpop.permute.xlu1 %516  ;;  %1352 = vmatpush.msra.mxu1 %v1068_v33  ;;  %1397 = vmatpush.msra.mxu3 %v1149_v17  ;;  %v1050_v33 = vld [vmem:[#allocation2 + $0x240] sm:$0xff]  ;;  %v919_v17 = vmul.f32 %v9125_v40, %v9181_v59 }
 0x116   : > { %v9262_v41 = vpop.permute.xlu2 %754  ;;  %v529_v13 = vsel %vm526_vm0, %v9227_v16, %v9260_v39 }
 0x117   : > { %1353 = vmatpush.msra.mxu1 %v1065_v43  ;;  %1398 = vmatpush.msra.mxu3 %v1146_v55  ;;  %v1041_v55 = vld [vmem:[#allocation2 + $0x1f8] sm:$0xff] }
 0x119   : > { %1354 = vmatpush.msra.mxu1 %v1062_v19  ;;  %v1047_v19 = vld [vmem:[#allocation2 + $0x228] sm:$0xff] }
 0x11b   : > { %884 = vrot.lane.b32.xlu1 %v861_v44, %s8873_s13  ;;  %v484_v44 = vadd.f32 %v9190_v63, %v471_v34  ;;  %v1134_v34 = vld [vmem:[#allocation2 + $0x4e0] sm:$0xff] }
 0x11c   : > { %882 = vrot.lane.b32.xlu0 %v860_v45, %s8873_s13  ;;  %520 = vrot.lane.b32.xlu2 %v499_v46, %s8867_s25 }
 0x11d   : > { %v9273_v49 = vpop.permute.xlu1 %634 }
 0x11e   : > { %v9275_v50 = vpop.permute.xlu0 %576  ;;  %v9277_v51 = vpop.permute.xlu2 %814 }
 0x11f   : > { %v589_v46 = vsel %vm586_vm1, %v9238_v23, %v9275_v50 }
 0x123   : > { %944 = vrot.lane.b32.xlu1 %v921_v56, %s8874_s6  ;;  %v544_v56 = vadd.f32 %v529_v13, %v484_v44  ;;  %v734_v13 = vmul.f32 %v9084_v26, %v9184_v60  ;;  %v1131_v44 = vld [vmem:[#allocation2 + $0x4c8] sm:$0xff] }
 0x124   : > { %942 = vrot.lane.b32.xlu0 %v920_v57, %s8874_s6  ;;  %580 = vrot.lane.b32.xlu2 %v559_v61, %s8869_s12  ;;  %v1059_v61 = vld [vmem:[#allocation2 + $0x288] sm:$0xff] }
 0x125   : > { %v9288_v1 = vpop.permute.xlu1 %696  ;;  %1355 = vmatpush.msra.mxu1 %v1059_v61  ;;  %v1311_v26 = vld [vmem:[#allocation2 + $0xa68] sm:$0xff] }
 0x126   : > { %v9290_v53 = vpop.permute.xlu0 %694  ;;  %v9292_v2 = vpop.permute.xlu2 %578  ;;  %1451 = vmatpush.msrb.mxu2 %v1311_v26 }
 0x127   : > { %v709_v18 = vsel %vm706_vm3, %v9290_v53, %v9288_v1 }
 0x12b   : > { %700 = vrot.lane.b32.xlu1 %v679_v54, %s8870_s14  ;;  %v1143_v54 = vld [vmem:[#allocation2 + $0x528] sm:$0xff] }
 0x12c   : > { %640 = vrot.lane.b32.xlu2 %v619_v11, %s8868_s30  ;;  %510 = vrot.lane.b32.xlu0 %v494_v15, %s8867_s25  ;;  %v1056_v11 = vld [vmem:[#allocation2 + $0x270] sm:$0xff] }
 0x12d   : > { %v9303_v25 = vpop.permute.xlu1 %518  ;;  %v1140_v15 = vld [vmem:[#allocation2 + $0x510] sm:$0xff]  ;;  %1399 = vmatpush.msra.mxu3 %v1143_v54  ;;  %1356 = vmatpush.msra.mxu1 %v1056_v11  ;;  %v1038_v54 = vld [vmem:[#allocation2 + $0x1e0] sm:$0xff] }
 0x12e   : > { %v9305_v27 = vpop.permute.xlu0 %756  ;;  %v9307_v28 = vpop.permute.xlu2 %572 }
 0x12f   : > { %v588_v62 = vsel %vm586_vm1, %v9307_v28, %v9238_v23  ;;  %v649_v23 = vsel %vm646_vm2, %v9273_v49, %v9249_v29  ;;  %1400 = vmatpush.msra.mxu3 %v1140_v15  ;;  %v769_v14 = vsel %vm766_vm4, %v9262_v41, %v9305_v27  ;;  %1357 = vmatpush.msra.mxu1 %v1053_v20  ;;  %v1308_v20 = vld [vmem:[#allocation2 + $0xa50] sm:$0xff] }
 0x130   : > { %v854_v15 = vmul.f32 %v9114_v36, %v9184_v60  ;;  %1452 = vmatpush.msrb.mxu2 %v1308_v20  ;;  %v1275_v20 = vld [vmem:[#allocation2 + $0x948] sm:$0xff] }
 0x131   : > { %1401 = vmatpush.msra.mxu3 %v1137_v22  ;;  %1358 = vmatpush.msra.mxu1 %v1050_v33  ;;  %v530_v22 = vsel %vm526_vm0, %v9260_v39, %v9303_v25  ;;  %v1302_v33 = vld [vmem:[#allocation2 + $0xa20] sm:$0xff] }
 0x133   : > { %630 = vrot.lane.b32.xlu1 %v614_v35, %s8868_s30  ;;  %1402 = vmatpush.msra.mxu3 %v1134_v34 }
 0x134   : > { %570 = vrot.lane.b32.xlu2 %v554_v37, %s8869_s12  ;;  %760 = vrot.lane.b32.xlu0 %v739_v38, %s8871_s22 }
 0x135   : > { %v9324_v45 = vpop.permute.xlu1 %512  ;;  %1359 = vmatpush.msra.mxu1 %v1047_v19  ;;  %1403 = vmatpush.msra.mxu3 %v1131_v44 }
 0x136   : > { %v528_v47 = vsel %vm526_vm0, %v9324_v45, %v9227_v16  ;;  %v9332_v48 = vpop.permute.xlu0 %816  ;;  %v9334_v52 = vpop.permute.xlu2 %936  ;;  %v604_v16 = vadd.f32 %v589_v46, %v544_v56 }
 0x137   : > { %v543_v57 = vadd.f32 %v528_v47, %v9203_v5  ;;  %v799_v5 = vmul.f32 %v9100_v31, %v9181_v59  ;;  %v829_v37 = vsel %vm826_vm5, %v9277_v51, %v9332_v48  ;;  %v1044_v31 = vld [vmem:[#allocation2 + $0x210] sm:$0xff] }
 0x138   : > { %v664_v21 = vadd.f32 %v649_v23, %v604_v16  ;;  %v1128_v47 = vld [vmem:[#allocation2 + $0x4b0] sm:$0xff]  ;;  %1360 = vmatpush.msra.mxu1 %v1044_v31  ;;  %v914_v23 = vmul.f32 %v9125_v40, %v9184_v60 }
 0x139   : > { %v9342_v3 = vadd.f32 %v588_v62, %v543_v57  ;;  %1404 = vmatpush.msra.mxu3 %v1128_v47  ;;  %v1290_v47 = vld [vmem:[#allocation2 + $0x9c0] sm:$0xff] }
 0x13a   : > { %v724_v35 = vadd.f32 %v709_v18, %v664_v21  ;;  %1361 = vmatpush.msra.mxu1 %v1041_v55  ;;  %v1035_v18 = vld [vmem:[#allocation2 + $0x1c8] sm:$0xff] }
 0x13b   : > { %880 = vrot.lane.b32.xlu1 %v859_v0, %s8873_s13  ;;  %v1125_v0 = vld [vmem:[#allocation2 + $0x498] sm:$0xff] }
 0x13c   : > { %820 = vrot.lane.b32.xlu2 %v799_v5, %s8872_s24  ;;  %690 = vrot.lane.b32.xlu0 %v674_v4, %s8870_s14  ;;  %v784_v38 = vadd.f32 %v769_v14, %v724_v35  ;;  %v1122_v5 = vld [vmem:[#allocation2 + $0x480] sm:$0xff]  ;;  %v472_v4 = vmul.f32 %v9049_v12, %v9176_v58  ;;  %v1032_v12 = vld [vmem:[#allocation2 + $0x1b0] sm:$0xff]  ;;  %v1305_v58 = vld [vmem:[#allocation2 + $0xa38] sm:$0xff]  ;;  %s7758_s14 = scalar_lea.hbm %s12232_s11, %s8961_s21 }
 0x13d   : > { %v9357_v24 = vpop.permute.xlu1 %876  ;;  %1405 = vmatpush.msra.mxu3 %v1125_v0  ;;  %1362 = vmatpush.msra.mxu1 %v1038_v54  ;;  %v1029_v14 = vld [vmem:[#allocation2 + $0x198] sm:$0xff] }
 0x13e   : > { %v9362_v30 = vpop.permute.xlu0 %874  ;;  %v9364_v32 = vpop.permute.xlu2 %692  ;;  %v844_v46 = vadd.f32 %v829_v37, %v784_v38  ;;  %v485_v36 = vadd.f32 %v9190_v63, %v472_v4  ;;  %1453 = vmatpush.msrb.mxu2 %v1305_v58  ;;  %v1026_v63 = vld [vmem:[#allocation2 + $0x180] sm:$0xff]  ;;  %v1299_v37 = vld [vmem:[#allocation2 + $0xa08] sm:$0xff]  ;;  %v590_v38 = vsel %vm586_vm1, %v9275_v50, %v9292_v2  ;;  %v1281_v0 = vld [vmem:[#allocation2 + $0x978] sm:$0xff] }
 0x13f   : > { %v889_v43 = vsel %vm886_vm6, %v9362_v30, %v9357_v24  ;;  %1406 = vmatpush.msra.mxu3 %v1122_v5  ;;  %1363 = vmatpush.msra.mxu1 %v1035_v18  ;;  %v1257_v58 = vld [vmem:[#allocation2 + $0x8b8] sm:$0xff] }
 0x140   : > { %v904_v56 = vadd.f32 %v889_v43, %v844_v46  ;;  %v545_v34 = vadd.f32 %v530_v22, %v485_v36  ;;  %1454 = vmatpush.msrb.mxu2 %v1302_v33  ;;  %v1296_v43 = vld [vmem:[#allocation2 + $0x9f0] sm:$0xff] }
 0x141   : > { %1364 = vmatpush.msra.mxu1 %v1032_v12  ;;  %v1260_v22 = vld [vmem:[#allocation2 + $0x8d0] sm:$0xff] }
 0x142   : > { %1455 = vmatpush.msrb.mxu2 %v1299_v37  ;;  %v1272_v36 = vld [vmem:[#allocation2 + $0x930] sm:$0xff] }
 0x143   : > { %810 = vrot.lane.b32.xlu1 %v794_v42, %s8872_s24  ;;  %1365 = vmatpush.msra.mxu1 %v1029_v14  ;;  %v1314_v14 = vld [vmem:[#allocation2 + $0xa80] sm:$0xf] }
 0x144   : > { %750 = vrot.lane.b32.xlu2 %v734_v13, %s8871_s22  ;;  %940 = vrot.lane.b32.xlu0 %v919_v17, %s8874_s6  ;;  %v605_v13 = vadd.f32 %v590_v38, %v545_v34  ;;  %v1293_v17 = vld [vmem:[#allocation2 + $0x9d8] sm:$0xff]  ;;  %v1254_v34 = vld [vmem:[#allocation2 + $0x8a0] sm:$0xff] }
 0x145   : > { %v9381_v57 = vpop.permute.xlu1 %934  ;;  %1366 = vmatpush.msra.mxu1 %v1026_v63  ;;  %1456 = vmatpush.msrb.mxu2 %v1296_v43  ;;  %v1266_v38 = vld [vmem:[#allocation2 + $0x900] sm:$0xff]  ;;  %v1251_v43 = vld [vmem:[#allocation2 + $0x888] sm:$0xff] }
 0x146   : > { %v949_v59 = vsel %vm946_vm7, %v9381_v57, %v9334_v52  ;;  %v9386_v61 = vpop.permute.xlu0 %638  ;;  %v9388_v62 = vpop.permute.xlu2 %818  ;;  %7871 = vmatpush.msk.msrb.mxu3 %vm1321_vm8, %v1314_v14  ;;  %v1006_v14 = vld [vmem:[#allocation2 + $0xe0] sm:$0xff] }
 0x147   : > { %v964_v16 = vadd.f32 %v949_v59, %v904_v56  ;;  %v650_v42 = vsel %vm646_vm2, %v9249_v29, %v9386_v61  ;;  %1457 = vmatpush.msrb.mxu2 %v1293_v17  ;;  %v1287_v56 = vld [vmem:[#allocation2 + $0x9a8] sm:$0xff]  ;;  %v1284_v59 = vld [vmem:[#allocation2 + $0x990] sm:$0xff] }
 0x148   : > { %v665_v19 = vadd.f32 %v650_v42, %v605_v13  ;;  %v1023_v42 = vld [vmem:[#allocation2 + $0x168] sm:$0xff]  ;;  %v1024_v17 = vld [vmem:[#allocation2 + $0x170] sm:$0xff] }
 0x149   : > { %v9392_v11 = vmax.f32 %v964_v16, 0.0  ;;  %1458 = vmatpush.msrb.mxu2 %v1290_v47  ;;  %1331 = vmatpush.msra.mxu0 %v1023_v42  ;;  %v1021_v47 = vld [vmem:[#allocation2 + $0x158] sm:$0xff]  ;;  %v1147_v42 = vld [vmem:[#allocation2 + $0x548] sm:$0xff] }
 0x14b   : > { %1387 = vmatmul.f32.vlgmr.msra.gmra.mxu2 %v9392_v11 }
 0x14c   : > { %870 = vrot.lane.b32.xlu2 %v854_v15, %s8873_s13  ;;  %930 = vrot.lane.b32.xlu0 %v914_v23, %s8874_s6  ;;  %v1278_v15 = vld [vmem:[#allocation2 + $0x960] sm:$0xff]  ;;  %v1263_v23 = vld [vmem:[#allocation2 + $0x8e8] sm:$0xff] }
 0x14d   : > { %v9405_v21 = vpop.permute.xlu1 %698  ;;  %1459 = vmatpush.msrb.mxu2 %v1287_v56  ;;  %1431 = vmatpush.msrb.mxu1 %v1263_v23  ;;  %v1162_v56 = vld [vmem:[#allocation2 + $0x5c0] sm:$0xff]  ;;  %v1011_v23 = vld [vmem:[#allocation2 + $0x108] sm:$0xff] }
 0x14e   : > { %v9407_v40 = vpop.permute.xlu0 %632  ;;  %v9409_v60 = vpop.permute.xlu2 %522 }
 0x14f   : > { %v648_v39 = vsel %vm646_vm2, %v9407_v40, %v9273_v49  ;;  %v708_v49 = vsel %vm706_vm3, %v9364_v32, %v9290_v53  ;;  %1460 = vmatpush.msrb.mxu2 %v1284_v59  ;;  %1432 = vmatpush.msrb.mxu1 %v1260_v22  ;;  %v1015_v59 = vld [vmem:[#allocation2 + $0x128] sm:$0xff]  ;;  %v1008_v22 = vld [vmem:[#allocation2 + $0xf0] sm:$0xff] }
 0x150   : > { %v663_v35 = vadd.f32 %v648_v39, %v9342_v3  ;;  %v710_v3 = vsel %vm706_vm3, %v9288_v1, %v9405_v21  ;;  %v1269_v39 = vld [vmem:[#allocation2 + $0x918] sm:$0xff] }
 0x151   : > { %v725_v53 = vadd.f32 %v710_v3, %v665_v19  ;;  %1461 = vmatpush.msrb.mxu2 %v1281_v0  ;;  %1433 = vmatpush.msrb.mxu1 %v1257_v58  ;;  %v1020_v19 = vld [vmem:[#allocation2 + $0x150] sm:$0xff]  ;;  %v1159_v0 = vld [vmem:[#allocation2 + $0x5a8] sm:$0xff] }
 0x152   : > { %v723_v50 = vadd.f32 %v708_v49, %v663_v35  ;;  %v1168_v49 = vld [vmem:[#allocation2 + $0x5f0] sm:$0xff]  ;;  %1332 = vmatpush.msra.mxu0 %v1020_v19 }
 0x153   : > { %1462 = vmatpush.msrb.mxu2 %v1278_v15  ;;  %1434 = vmatpush.msrb.mxu1 %v1254_v34  ;;  %v1236_v58 = vld [vmem:[#allocation2 + $0x810] sm:$0xff]  ;;  %v1150_v34 = vld [vmem:[#allocation2 + $0x560] sm:$0xff] }
 0x155   : > { %v9427_v44 = vpop.permute.xlu1 %752  ;;  %1463 = vmatpush.msrb.mxu2 %v1275_v20  ;;  %1435 = vmatpush.msrb.mxu1 %v1251_v43  ;;  %v1012_v20 = vld [vmem:[#allocation2 + $0x110] sm:$0xff]  ;;  %v1230_v43 = vld [vmem:[#allocation2 + $0x7e0] sm:$0xff] }
 0x156   : > { %v768_v29 = vsel %vm766_vm4, %v9427_v44, %v9262_v41  ;;  %v9432_v46 = vpop.permute.xlu0 %758  ;;  %v9434_v31 = vpop.permute.xlu2 %938  ;;  %v830_v41 = vsel %vm826_vm5, %v9332_v48, %v9388_v62 }
 0x157   : > { %v783_v55 = vadd.f32 %v768_v29, %v723_v50  ;;  %v770_v1 = vsel %vm766_vm4, %v9305_v27, %v9432_v46  ;;  %v950_v48 = vsel %vm946_vm7, %v9334_v52, %v9434_v31  ;;  %1464 = vmatpush.msrb.mxu2 %v1272_v36  ;;  %v1165_v50 = vld [vmem:[#allocation2 + $0x5d8] sm:$0xff]  ;;  %v1248_v29 = vld [vmem:[#allocation2 + $0x870] sm:$0xff] }
 0x158   : > { %v785_v26 = vadd.f32 %v770_v1, %v725_v53  ;;  %v1017_v53 = vld [vmem:[#allocation2 + $0x138] sm:$0xff]  ;;  %1436 = vmatpush.msrb.mxu1 %v1248_v29  ;;  %v1000_v29 = vld [vmem:[#allocation2 + $0xb0] sm:$0xff] }
 0x159   : > { %1465 = vmatpush.msrb.mxu2 %v1269_v39  ;;  %1333 = vmatpush.msra.mxu0 %v1017_v53  ;;  %v1005_v36 = vld [vmem:[#allocation2 + $0xd8] sm:$0xff]  ;;  %v996_v53 = vld [vmem:[#allocation2 + $0x90] sm:$0xff] }
 0x15a   : > { %v845_v54 = vadd.f32 %v830_v41, %v785_v26  ;;  %v1245_v26 = vld [vmem:[#allocation2 + $0x858] sm:$0xff] }
 0x15b   : > { %1466 = vmatpush.msrb.mxu2 %v1266_v38  ;;  %1437 = vmatpush.msrb.mxu1 %v1245_v26  ;;  %v1233_v39 = vld [vmem:[#allocation2 + $0x7f8] sm:$0xff]  ;;  %v1138_v26 = vld [vmem:[#allocation2 + $0x500] sm:$0xff] }
 0x15d   : > { %v9442_v16 = vpop.permute.xlu1 %878  ;;  %1551 = vmatpush.msra.mxu2 %v1168_v49 }
 0x15e   : > { %v890_v5 = vsel %vm886_vm6, %v9357_v24, %v9442_v16  ;;  %v9447_v27 = vpop.permute.xlu0 %812  ;;  %v9449_v4 = vpop.permute.xlu2 %932 }
 0x15f   : > { %v905_v18 = vadd.f32 %v890_v5, %v845_v54  ;;  %v828_v24 = vsel %vm826_vm5, %v9447_v27, %v9277_v51  ;;  %v948_v3 = vsel %vm946_vm7, %v9449_v4, %v9381_v57  ;;  %1552 = vmatpush.msra.mxu2 %v1165_v50  ;;  %v1014_v57 = vld [vmem:[#allocation2 + $0x120] sm:$0xff]  ;;  %v1227_v50 = vld [vmem:[#allocation2 + $0x7c8] sm:$0xff] }
 0x160   : > { %v843_v52 = vadd.f32 %v828_v24, %v783_v55  ;;  %v1018_v55 = vld [vmem:[#allocation2 + $0x140] sm:$0xff]  ;;  %1334 = vmatpush.msra.mxu0 %v1014_v57  ;;  %v1009_v24 = vld [vmem:[#allocation2 + $0xf8] sm:$0xff] }
 0x161   : > { %v965_v12 = vadd.f32 %v950_v48, %v905_v18  ;;  %v1242_v54 = vld [vmem:[#allocation2 + $0x840] sm:$0xff]  ;;  %1553 = vmatpush.msra.mxu2 %v1162_v56  ;;  %v1156_v18 = vld [vmem:[#allocation2 + $0x590] sm:$0xff]  ;;  %v1239_v48 = vld [vmem:[#allocation2 + $0x828] sm:$0xff] }
 0x162   : > { %1438 = vmatpush.msrb.mxu1 %v1242_v54  ;;  %1335 = vmatpush.msra.mxu0 %v1011_v23  ;;  %v997_v56 = vld [vmem:[#allocation2 + $0x98] sm:$0xff]  ;;  %v1135_v54 = vld [vmem:[#allocation2 + $0x4e8] sm:$0xff]  ;;  %v990_v23 = vld [vmem:[#allocation2 + $0x60] sm:$0xff] }
 0x163   : > { %v9457_v33 = vmax.f32 %v965_v12, 0.0  ;;  %1554 = vmatpush.msra.mxu2 %v1159_v0  ;;  %v1153_v12 = vld [vmem:[#allocation2 + $0x578] sm:$0xff] }
 0x164   : > { %1439 = vmatpush.msrb.mxu1 %v1239_v48  ;;  %1336 = vmatpush.msra.mxu0 %v1008_v22  ;;  %v993_v57 = vld [vmem:[#allocation2 + $0x78] sm:$0xff]  ;;  %v991_v22 = vld [vmem:[#allocation2 + $0x68] sm:$0xff] }
 0x165   : > { %1407 = vmatmul.f32.vlgmr.msra.gmra.mxu3 %v9457_v33  ;;  %v9461_v35 = vpop.permute.xlu1 %872  ;;  %1555 = vmatpush.msra.mxu2 %v1156_v18 }
 0x166   : > { %v888_v51 = vsel %vm886_vm6, %v9461_v35, %v9362_v30  ;;  %v9466_v63 = vpop.permute.xlu0 %524  ;;  %v9468_v37 = vpop.permute.xlu2 %702  ;;  %1491 = vmatpush.msra.mxu3 %v1024_v17  ;;  %1440 = vmatpush.msrb.mxu1 %v1236_v58  ;;  %v1144_v17 = vld [vmem:[#allocation2 + $0x530] sm:$0xff] }
 0x167   : > { %v903_v13 = vadd.f32 %v888_v51, %v843_v52  ;;  %1556 = vmatpush.msra.mxu2 %v1153_v12  ;;  %v1002_v52 = vld [vmem:[#allocation2 + $0xc0] sm:$0xff]  ;;  %v1003_v51 = vld [vmem:[#allocation2 + $0xc8] sm:$0xff]  ;;  %1337 = vmatpush.msra.mxu0 %v1005_v36  ;;  %v1132_v12 = vld [vmem:[#allocation2 + $0x4d0] sm:$0xff] }
 0x168   : > { %1492 = vmatpush.msra.mxu3 %v1021_v47  ;;  %1441 = vmatpush.msrb.mxu1 %v1233_v39  ;;  %v1141_v47 = vld [vmem:[#allocation2 + $0x518] sm:$0xff]  ;;  %v1120_v58 = vld [vmem:[#allocation2 + $0x470] sm:$0xff] }
 0x169   : > { %v963_v30 = vadd.f32 %v948_v3, %v903_v13  ;;  %1557 = vmatpush.msra.mxu2 %v1150_v34  ;;  %1338 = vmatpush.msra.mxu0 %v1002_v52  ;;  %v988_v36 = vld [vmem:[#allocation2 + $0x50] sm:$0xff]  ;;  %v1129_v34 = vld [vmem:[#allocation2 + $0x4b8] sm:$0xff] }
 0x16a   : > { %1493 = vmatpush.msra.mxu3 %v1018_v55  ;;  %1442 = vmatpush.msrb.mxu1 %v1230_v43  ;;  %v1224_v55 = vld [vmem:[#allocation2 + $0x7b0] sm:$0xff]  ;;  %v1117_v39 = vld [vmem:[#allocation2 + $0x458] sm:$0xff]  ;;  %v1126_v43 = vld [vmem:[#allocation2 + $0x4a0] sm:$0xff] }
 0x16b   : > { %v9473_v1 = vmax.f32 %v963_v30, 0.0  ;;  %1558 = vmatpush.msra.mxu2 %v1147_v42  ;;  %v999_v30 = vld [vmem:[#allocation2 + $0xa8] sm:$0xff]  ;;  %v984_v52 = vld [vmem:[#allocation2 + $0x30] sm:$0xff] }
 0x16c   : > { %1494 = vmatpush.msra.mxu3 %v1015_v59  ;;  %1339 = vmatpush.msra.mxu0 %v999_v30  ;;  %v994_v59 = vld [vmem:[#allocation2 + $0x80] sm:$0xff]  ;;  %v533_v30 = vsel %vm526_vm0, %v9409_v60, %v9466_v63 }
 0x16d   : > { %v9475_v41 = vpop.permute.xlu1 %584  ;;  %1367 = vmatmul.f32.vlgmr.msra.gmra.mxu1 %v9473_v1  ;;  %1559 = vmatpush.msra.mxu2 %v1144_v17 }
 0x16e   : > { %v9478_v5 = vpop.permute.xlu0 %582  ;;  %v9480_v15 = vpop.permute.xlu2 %764  ;;  %1495 = vmatpush.msra.mxu3 %v1012_v20  ;;  %1443 = vmatpush.msrb.mxu1 %v1227_v50  ;;  %v1218_v20 = vld [vmem:[#allocation2 + $0x780] sm:$0xff] }
 0x16f   : > { %1340 = vmatpush.msra.mxu0 %v996_v53  ;;  %1560 = vmatpush.msra.mxu2 %v1141_v47  ;;  %v1111_v47 = vld [vmem:[#allocation2 + $0x428] sm:$0xff] }
 0x170   : > { %1496 = vmatpush.msra.mxu3 %v1009_v24  ;;  %1444 = vmatpush.msrb.mxu1 %v1224_v55  ;;  %v987_v24 = vld [vmem:[#allocation2 + $0x48] sm:$0xff] }
 0x171   : > { %1341 = vmatpush.msra.mxu0 %v993_v57  ;;  %1561 = vmatpush.msra.mxu2 %v1138_v26  ;;  %v979_v26 = vld [vmem:[#allocation2 + $0x8] sm:$0xff] }
 0x172   : > { %1497 = vmatpush.msra.mxu3 %v1006_v14 }
 0x173   : > { %1562 = vmatpush.msra.mxu2 %v1135_v54  ;;  %1342 = vmatpush.msra.mxu0 %v990_v23 }
 0x174   : > { %1498 = vmatpush.msra.mxu3 %v1003_v51  ;;  %v985_v51 = vld [vmem:[#allocation2 + $0x38] sm:$0xff] }
 0x175   : > { %v9482_v38 = vpop.permute.xlu1 %644  ;;  %1563 = vmatpush.msra.mxu2 %v1132_v12  ;;  %1343 = vmatpush.msra.mxu0 %v987_v24 }
 0x176   : > { %v9484_v13 = vpop.permute.xlu0 %642  ;;  %v521_v49 = vpop.permute.xlu2 %520  ;;  %1499 = vmatpush.msra.mxu3 %v1000_v29  ;;  %v1123_v29 = vld [vmem:[#allocation2 + $0x488] sm:$0xff] }
 0x177   : > { %v532_v3 = vsel %vm526_vm0, %v521_v49, %v9409_v60  ;;  %v531_v14 = vsel %vm526_vm0, %v9303_v25, %v521_v49  ;;  %1564 = vmatpush.msra.mxu2 %v1129_v34  ;;  %v981_v25 = vld [vmem:[#allocation2 + $0x18] sm:$0xff]  ;;  %v982_v49 = vld [vmem:[#allocation2 + $0x20] sm:$0xff]  ;;  %1344 = vmatpush.msra.mxu0 %v984_v52  ;;  %v593_v60 = vsel %vm586_vm1, %v9478_v5, %v9475_v41 }
 0x178   : > { %v9489_v19 = vadd.f32 %v532_v3, %v9215_v9  ;;  %v1221_v9 = vld [vmem:[#allocation2 + $0x798] sm:$0xff]  ;;  %1500 = vmatpush.msra.mxu3 %v997_v56  ;;  %v1114_v3 = vld [vmem:[#allocation2 + $0x440] sm:$0xff]  ;;  %v546_v17 = vadd.f32 %v531_v14, %v9212_v8  ;;  %v653_v23 = vsel %vm646_vm2, %v9484_v13, %v9482_v38 }
 0x179   : > { %1445 = vmatpush.msrb.mxu1 %v1221_v9  ;;  %1565 = vmatpush.msra.mxu2 %v1126_v43  ;;  %v978_v56 = vld [vmem:[#allocation2] sm:$0xff]  ;;  %v548_v9 = vadd.f32 %v533_v30, %v9206_v6 }
 0x17a   : > { %1501 = vmatpush.msra.mxu3 %v994_v59  ;;  %1345 = vmatpush.msra.mxu0 %v981_v25  ;;  %v1206_v34 = vld [vmem:[#allocation2 + $0x720] sm:$0xff]  ;;  %v1093_v25 = vld [vmem:[#allocation2 + $0x398] sm:$0xff] }
 0x17b   : > { %1446 = vmatpush.msrb.mxu1 %v1218_v20  ;;  %1566 = vmatpush.msra.mxu2 %v1123_v29  ;;  %v1212_v20 = vld [vmem:[#allocation2 + $0x750] sm:$0xff] }
 0x17c   : > { %1502 = vmatpush.msra.mxu3 %v991_v22  ;;  %1346 = vmatpush.msra.mxu0 %v978_v56  ;;  %v608_v22 = vadd.f32 %v593_v60, %v548_v9  ;;  %v1087_v60 = vld [vmem:[#allocation2 + $0x368] sm:$0xff] }
 0x17d   : > { %v9491_v0 = vpop.permute.xlu1 %762  ;;  %1531 = vmatpush.msra.mxu1 %v1120_v58  ;;  %v1102_v58 = vld [vmem:[#allocation2 + $0x3e0] sm:$0xff]  ;;  %v1191_v9 = vld [vmem:[#allocation2 + $0x6a8] sm:$0xff] }
 0x17e   : > { %v9493_v18 = vpop.permute.xlu0 %704  ;;  %v9495_v48 = vpop.permute.xlu2 %580  ;;  %1503 = vmatpush.msra.mxu3 %v988_v36  ;;  %v668_v24 = vadd.f32 %v653_v23, %v608_v22 }
 0x17f   : > { %v591_v42 = vsel %vm586_vm1, %v9292_v2, %v9495_v48  ;;  %1532 = vmatpush.msra.mxu1 %v1117_v39  ;;  %v549_v2 = vadd.f32 %v9466_v63, %v9209_v7  ;;  %v1215_v7 = vld [vmem:[#allocation2 + $0x768] sm:$0xff]  ;;  %v1108_v63 = vld [vmem:[#allocation2 + $0x410] sm:$0xff]  ;;  %v713_v6 = vsel %vm706_vm3, %v9468_v37, %v9493_v18 }
 0x180   : > { %1504 = vmatpush.msra.mxu3 %v985_v51  ;;  %v606_v53 = vadd.f32 %v591_v42, %v546_v17  ;;  %1411 = vmatpush.msrb.mxu0 %v1215_v7  ;;  %v1099_v39 = vld [vmem:[#allocation2 + $0x3c8] sm:$0xff]  ;;  %v728_v52 = vadd.f32 %v713_v6, %v668_v24  ;;  %v1096_v42 = vld [vmem:[#allocation2 + $0x3b0] sm:$0xff]  ;;  %v1213_v6 = vld [vmem:[#allocation2 + $0x758] sm:$0xff] }
 0x181   : > { %1533 = vmatpush.msra.mxu1 %v1114_v3  ;;  %v609_v59 = vadd.f32 %v9475_v41, %v549_v2  ;;  %v1209_v41 = vld [vmem:[#allocation2 + $0x738] sm:$0xff]  ;;  %v1200_v17 = vld [vmem:[#allocation2 + $0x6f0] sm:$0xff]  ;;  %v1090_v2 = vld [vmem:[#allocation2 + $0x380] sm:$0xff] }
 0x182   : > { %1505 = vmatpush.msra.mxu3 %v982_v49  ;;  %1412 = vmatpush.msrb.mxu0 %v1212_v20  ;;  %v1216_v20 = vld [vmem:[#allocation2 + $0x770] sm:$0xff]  ;;  %v1185_v24 = vld [vmem:[#allocation2 + $0x678] sm:$0xff] }
 0x183   : > { %1534 = vmatpush.msra.mxu1 %v1111_v47  ;;  %v669_v12 = vadd.f32 %v9482_v38, %v609_v59  ;;  %v1203_v38 = vld [vmem:[#allocation2 + $0x708] sm:$0xff]  ;;  %v1197_v47 = vld [vmem:[#allocation2 + $0x6d8] sm:$0xff] }
 0x184   : > { %1506 = vmatpush.msra.mxu3 %v979_v26  ;;  %1413 = vmatpush.msrb.mxu0 %v1209_v41  ;;  %v1188_v41 = vld [vmem:[#allocation2 + $0x690] sm:$0xff] }
 0x185   : > { %v825_v50 = vpop.permute.xlu1 %824  ;;  %1535 = vmatpush.msra.mxu1 %v1108_v63  ;;  %v729_v36 = vadd.f32 %v9493_v18, %v669_v12  ;;  %v773_v18 = vsel %vm766_vm4, %v9491_v0, %v9480_v15  ;;  %v1315_v12 = vld [vmem:[#allocation2 + $0xa88] sm:$0xf] }
 0x186   : > { %v9508_v55 = vpop.permute.xlu0 %822  ;;  %v9510_v8 = vpop.permute.xlu2 %640  ;;  %1414 = vmatpush.msrb.mxu0 %v1206_v34  ;;  %v788_v30 = vadd.f32 %v773_v18, %v728_v52  ;;  %v1182_v52 = vld [vmem:[#allocation2 + $0x660] sm:$0xff]  ;;  %v1179_v18 = vld [vmem:[#allocation2 + $0x648] sm:$0xff] }
 0x187   : > { %v651_v57 = vsel %vm646_vm2, %v9386_v61, %v9510_v8  ;;  %v1105_v61 = vld [vmem:[#allocation2 + $0x3f8] sm:$0xff]  ;;  %v789_v43 = vadd.f32 %v9480_v15, %v729_v36  ;;  %v833_v3 = vsel %vm826_vm5, %v9508_v55, %v825_v50  ;;  %v1194_v15 = vld [vmem:[#allocation2 + $0x6c0] sm:$0xff] }
 0x188   : > { %v9520_v54 = vadd.f32 %v651_v57, %v606_v53  ;;  %1536 = vmatpush.msra.mxu1 %v1105_v61  ;;  %1415 = vmatpush.msrb.mxu0 %v1203_v38  ;;  %v848_v53 = vadd.f32 %v833_v3, %v788_v30  ;;  %v1084_v61 = vld [vmem:[#allocation2 + $0x350] sm:$0xff]  ;;  %v1173_v30 = vld [vmem:[#allocation2 + $0x618] sm:$0xff] }
 0x189   : > { %v849_v49 = vadd.f32 %v825_v50, %v789_v43  ;;  %v1075_v43 = vld [vmem:[#allocation2 + $0x308] sm:$0xff]  ;;  %v1204_v3 = vld [vmem:[#allocation2 + $0x710] sm:$0xff] }
 0x18a   : > { %1537 = vmatpush.msra.mxu1 %v1102_v58  ;;  %1416 = vmatpush.msrb.mxu0 %v1200_v17  ;;  %v1081_v58 = vld [vmem:[#allocation2 + $0x338] sm:$0xff] }
 0x18b   : > { %v1025_v17 = vld [vmem:[#allocation2 + $0x178] sm:$0xff] }
 0x18c   : > { %1538 = vmatpush.msra.mxu1 %v1099_v39  ;;  %1417 = vmatpush.msrb.mxu0 %v1197_v47  ;;  %v1078_v39 = vld [vmem:[#allocation2 + $0x320] sm:$0xff] }
 0x18d   : > { %v885_v14 = vpop.permute.xlu1 %884 }
 0x18e   : > { %v9530_v51 = vpop.permute.xlu0 %882  ;;  %1539 = vmatpush.msra.mxu1 %v1096_v42  ;;  %v909_v56 = vadd.f32 %v885_v14, %v849_v49  ;;  %1418 = vmatpush.msrb.mxu0 %v1194_v15  ;;  %v9550_v36 = vpop.permute.xlu2 %570  ;;  %v1207_v42 = vld [vmem:[#allocation2 + $0x728] sm:$0xff]  ;;  %v1176_v49 = vld [vmem:[#allocation2 + $0x630] sm:$0xff] }
 0x18f   : > { %v893_v29 = vsel %vm886_vm6, %v9530_v51, %v885_v14  ;;  %v1210_v14 = vld [vmem:[#allocation2 + $0x740] sm:$0xff]  ;;  %v1019_v15 = vld [vmem:[#allocation2 + $0x148] sm:$0xff] }
 0x190   : > { %1540 = vmatpush.msra.mxu1 %v1093_v25  ;;  %v908_v57 = vadd.f32 %v893_v29, %v848_v53  ;;  %1419 = vmatpush.msrb.mxu0 %v1191_v9  ;;  %v1201_v25 = vld [vmem:[#allocation2 + $0x6f8] sm:$0xff]  ;;  %v1022_v29 = vld [vmem:[#allocation2 + $0x160] sm:$0xff] }
 0x191   : > { %v1170_v53 = vld [vmem:[#allocation2 + $0x600] sm:$0xff] }
 0x192   : > { %1541 = vmatpush.msra.mxu1 %v1090_v2  ;;  %1420 = vmatpush.msrb.mxu0 %v1188_v41  ;;  %v1198_v2 = vld [vmem:[#allocation2 + $0x6e0] sm:$0xff] }
 0x194   : > { %1542 = vmatpush.msra.mxu1 %v1087_v60  ;;  %1421 = vmatpush.msrb.mxu0 %v1185_v24  ;;  %v592_v60 = vsel %vm586_vm1, %v9495_v48, %v9478_v5  ;;  %v1189_v48 = vld [vmem:[#allocation2 + $0x698] sm:$0xff] }
 0x195   : > { %v945_v26 = vpop.permute.xlu1 %944 }
 0x196   : > { %v969_v7 = vadd.f32 %v945_v26, %v909_v56  ;;  %v9540_v63 = vpop.permute.xlu0 %942  ;;  %1543 = vmatpush.msra.mxu1 %v1084_v61  ;;  %1422 = vmatpush.msrb.mxu0 %v1182_v52  ;;  %v9557_v56 = vpop.permute.xlu2 %820  ;;  %v1013_v61 = vld [vmem:[#allocation2 + $0x118] sm:$0xff] }
 0x197   : > { %v953_v50 = vsel %vm946_vm7, %v9540_v63, %v945_v26 }
 0x198   : > { %v9544_v59 = vmax.f32 %v969_v7, 0.0  ;;  %v968_v23 = vadd.f32 %v953_v50, %v908_v57  ;;  %1544 = vmatpush.msra.mxu1 %v1081_v58  ;;  %1423 = vmatpush.msrb.mxu0 %v1179_v18  ;;  %v1195_v57 = vld [vmem:[#allocation2 + $0x6c8] sm:$0xff]  ;;  %v1016_v7 = vld [vmem:[#allocation2 + $0x130] sm:$0xff]  ;;  %v652_v50 = vsel %vm646_vm2, %v9510_v8, %v9484_v13  ;;  %v1010_v13 = vld [vmem:[#allocation2 + $0x100] sm:$0xff] }
 0x199   : > { %v1186_v8 = vld [vmem:[#allocation2 + $0x680] sm:$0xff]  ;;  %v1007_v58 = vld [vmem:[#allocation2 + $0xe8] sm:$0xff] }
 0x19a   : > { %v9546_v22 = vmax.f32 %v968_v23, 0.0  ;;  %7872 = vmatmul.msk.f32.vlgmr.msrb.gmra.mxu3 %vm1317_vm9, %v9544_v59  ;;  %1545 = vmatpush.msra.mxu1 %v1078_v39  ;;  %v1192_v23 = vld [vmem:[#allocation2 + $0x6b0] sm:$0xff] }
 0x19b   : > { %1571 = vmatpush.msrb.mxu3 %v1216_v20  ;;  %1424 = vmatpush.msrb.mxu0 %v1176_v49  ;;  %v607_v20 = vadd.f32 %v592_v60, %v9489_v19  ;;  %v998_v49 = vld [vmem:[#allocation2 + $0xa0] sm:$0xff] }
 0x19c   : > { %1467 = vmatmul.f32.vlgmr.msrb.gmra.mxu2 %v9546_v22  ;;  %1546 = vmatpush.msra.mxu1 %v1075_v43  ;;  %v1180_v43 = vld [vmem:[#allocation2 + $0x650] sm:$0xff] }
 0x19d   : > { %v9553_v34 = vpop.permute.xlu1 %700  ;;  %7873 = vmatpush.msk.msrb.mxu2 %vm1321_vm8, %v1315_v12  ;;  %1572 = vmatpush.msrb.mxu3 %v1213_v6  ;;  %v667_v12 = vadd.f32 %v652_v50, %v607_v20  ;;  %v1312_v20 = vld [vmem:[#allocation2 + $0xa70] sm:$0xff] }
 0x19e   : > { %v511_v38 = vpop.permute.xlu0 %510  ;;  %1425 = vmatpush.msrb.mxu0 %v1173_v30  ;;  %v712_v5 = vsel %vm706_vm3, %v9553_v34, %v9468_v37  ;;  %v751_v39 = vpop.permute.xlu2 %750  ;;  %v1174_v30 = vld [vmem:[#allocation2 + $0x620] sm:$0xff] }
 0x19f   : > { %1573 = vmatpush.msrb.mxu3 %v1210_v14  ;;  %v527_v9 = vsel %vm526_vm0, %v511_v38, %v9324_v45  ;;  %v727_v41 = vadd.f32 %v712_v5, %v667_v12  ;;  %v1183_v14 = vld [vmem:[#allocation2 + $0x668] sm:$0xff]  ;;  %v1004_v38 = vld [vmem:[#allocation2 + $0xd0] sm:$0xff] }
 0x1a0   : > { %1426 = vmatpush.msrb.mxu0 %v1170_v53  ;;  %v542_v6 = vadd.f32 %v527_v9, %v9218_v10  ;;  %v587_v10 = vsel %vm586_vm1, %v9550_v36, %v9307_v28  ;;  %v832_v28 = vsel %vm826_vm5, %v9557_v56, %v9508_v55  ;;  %v1177_v36 = vld [vmem:[#allocation2 + $0x638] sm:$0xff]  ;;  %v767_v55 = vsel %vm766_vm4, %v751_v39, %v9427_v44 }
 0x1a1   : > { %1574 = vmatpush.msrb.mxu3 %v1207_v42  ;;  %v711_v44 = vsel %vm706_vm3, %v9405_v21, %v9553_v34  ;;  %v983_v21 = vld [vmem:[#allocation2 + $0x28] sm:$0xff] }
 0x1a2   : > { %v602_v52 = vadd.f32 %v587_v10, %v542_v6  ;;  %v726_v12 = vadd.f32 %v711_v44, %v9520_v54  ;;  %v831_v54 = vsel %vm826_vm5, %v9388_v62, %v9557_v56  ;;  %v1069_v62 = vld [vmem:[#allocation2 + $0x2d8] sm:$0xff] }
 0x1a3   : > { %1575 = vmatpush.msrb.mxu3 %v1204_v3  ;;  %v1001_v3 = vld [vmem:[#allocation2 + $0xb8] sm:$0xff] }
 0x1a4   : > { %1567 = vmatmul.f32.vlgmr.msra.gmra.mxu2 %v9457_v33  ;;  %v1049_v44 = vld [vmem:[#allocation2 + $0x238] sm:$0xff] }
 0x1a5   : > { %1651 = vmatpush.msra.mxu2 %v1025_v17  ;;  %v631_v47 = vpop.permute.xlu1 %630  ;;  %1576 = vmatpush.msrb.mxu3 %v1201_v25 }
 0x1a6   : > { %v9559_v26 = vpop.permute.xlu0 %760  ;;  %v647_v24 = vsel %vm646_vm2, %v631_v47, %v9407_v40  ;;  %v871_v50 = vpop.permute.xlu2 %870  ;;  %vm5993_vm2 = vcmask 400384  }
 0x1a7   : > { %1652 = vmatpush.msra.mxu2 %v1022_v29  ;;  %1577 = vmatpush.msrb.mxu3 %v1198_v2  ;;  %v772_v45 = vsel %vm766_vm4, %v9559_v26, %v9491_v0  ;;  %v662_v18 = vadd.f32 %v647_v24, %v602_v52  ;;  %v995_v2 = vld [vmem:[#allocation2 + $0x88] sm:$0xff]  ;;  %v887_v5 = vsel %vm886_vm6, %v871_v50, %v9461_v35  ;;  %v1300_v24 = vld [vmem:[#allocation2 + $0xa10] sm:$0xff]  ;;  %v1214_v52 = vld [vmem:[#allocation2 + $0x760] sm:$0xff] }
 0x1a8   : > { %v787_v0 = vadd.f32 %v772_v45, %v727_v41  ;;  %v1306_v45 = vld [vmem:[#allocation2 + $0xa40] sm:$0xff]  ;;  %v1303_v35 = vld [vmem:[#allocation2 + $0xa28] sm:$0xff]  ;;  %v1052_v50 = vld [vmem:[#allocation2 + $0x250] sm:$0xff] }
 0x1a9   : > { %1653 = vmatpush.msra.mxu2 %v1019_v15  ;;  %1578 = vmatpush.msrb.mxu3 %v1195_v57  ;;  %v1171_v15 = vld [vmem:[#allocation2 + $0x608] sm:$0xff] }
 0x1aa   : > { %v847_v17 = vadd.f32 %v832_v28, %v787_v0  ;;  %v1211_v0 = vld [vmem:[#allocation2 + $0x748] sm:$0xff] }
 0x1ab   : > { %1654 = vmatpush.msra.mxu2 %v1016_v7  ;;  %1579 = vmatpush.msrb.mxu3 %v1192_v23  ;;  %v992_v7 = vld [vmem:[#allocation2 + $0x70] sm:$0xff]  ;;  %v1291_v28 = vld [vmem:[#allocation2 + $0x9c8] sm:$0xff] }
 0x1ac   : > { %7874 = vmatmul.msk.f32.vlgmr.msrb.gmra.mxu2 %vm1317_vm9, %v9544_v59 }
 0x1ad   : > { %1655 = vmatpush.msra.mxu2 %v1013_v61  ;;  %v9579_v19 = vpop.permute.xlu1 %880  ;;  %1580 = vmatpush.msrb.mxu3 %v1189_v48  ;;  %v989_v61 = vld [vmem:[#allocation2 + $0x58] sm:$0xff]  ;;  %v771_v48 = vsel %vm766_vm4, %v9432_v46, %v9559_v26 }
 0x1ae   : > { %v691_v37 = vpop.permute.xlu0 %690  ;;  %v892_v40 = vsel %vm886_vm6, %v9579_v19, %v9530_v51  ;;  %v1217_v46 = vld [vmem:[#allocation2 + $0x778] sm:$0xff]  ;;  %v891_v10 = vsel %vm886_vm6, %v9442_v16, %v9579_v19  ;;  %v1070_v19 = vld [vmem:[#allocation2 + $0x2e0] sm:$0xff] }
 0x1af   : > { %1656 = vmatpush.msra.mxu2 %v1010_v13  ;;  %1581 = vmatpush.msrb.mxu3 %v1186_v8  ;;  %v707_v42 = vsel %vm706_vm3, %v691_v37, %v9364_v32  ;;  %v907_v29 = vadd.f32 %v892_v40, %v847_v17  ;;  %v786_v8 = vadd.f32 %v771_v48, %v726_v12  ;;  %v980_v37 = vld [vmem:[#allocation2 + $0x10] sm:$0xff]  ;;  %v1297_v16 = vld [vmem:[#allocation2 + $0x9f8] sm:$0xff]  ;;  %v1046_v48 = vld [vmem:[#allocation2 + $0x220] sm:$0xff]  ;;  %vm7710_vm3 = vcmask 1041408  }
 0x1b0   : > { %v722_v25 = vadd.f32 %v707_v42, %v662_v18  ;;  %v1208_v18 = vld [vmem:[#allocation2 + $0x730] sm:$0xff]  ;;  %v1187_v12 = vld [vmem:[#allocation2 + $0x688] sm:$0xff] }
 0x1b1   : > { %1657 = vmatpush.msra.mxu2 %v1007_v58  ;;  %1582 = vmatpush.msrb.mxu3 %v1183_v14  ;;  %v1072_v58 = vld [vmem:[#allocation2 + $0x2f0] sm:$0xff]  ;;  %v1073_v14 = vld [vmem:[#allocation2 + $0x2f8] sm:$0xff] }
 0x1b2   : > { %v782_v60 = vadd.f32 %v767_v55, %v722_v25  ;;  %v1064_v40 = vld [vmem:[#allocation2 + $0x2b0] sm:$0xff]  ;;  %v1199_v55 = vld [vmem:[#allocation2 + $0x6e8] sm:$0xff] }
 0x1b3   : > { %1658 = vmatpush.msra.mxu2 %v1004_v38  ;;  %1583 = vmatpush.msrb.mxu3 %v1180_v43  ;;  %v1066_v38 = vld [vmem:[#allocation2 + $0x2c0] sm:$0xff]  ;;  %v1067_v43 = vld [vmem:[#allocation2 + $0x2c8] sm:$0xff]  ;;  %v1060_v25 = vld [vmem:[#allocation2 + $0x290] sm:$0xff] }
 0x1b5   : > { %1659 = vmatpush.msra.mxu2 %v1001_v3  ;;  %v811_v32 = vpop.permute.xlu1 %810  ;;  %1584 = vmatpush.msrb.mxu3 %v1177_v36  ;;  %v1063_v3 = vld [vmem:[#allocation2 + $0x2a8] sm:$0xff]  ;;  %v1205_v36 = vld [vmem:[#allocation2 + $0x718] sm:$0xff] }
 0x1b6   : > { %v941_v47 = vpop.permute.xlu0 %940  ;;  %v827_v53 = vsel %vm826_vm5, %v811_v32, %v9447_v27  ;;  %v1309_v27 = vld [vmem:[#allocation2 + $0xa58] sm:$0xff]  ;;  %vm7734_vm5 = vcmask 73728  }
 0x1b7   : > { %1660 = vmatpush.msra.mxu2 %v998_v49  ;;  %v952_v51 = vsel %vm946_vm7, %v941_v47, %v9540_v63  ;;  %1585 = vmatpush.msrb.mxu3 %v1174_v30  ;;  %v842_v9 = vadd.f32 %v827_v53, %v782_v60  ;;  %v986_v63 = vld [vmem:[#allocation2 + $0x40] sm:$0xff]  ;;  %v951_v39 = vsel %vm946_vm7, %v9434_v31, %v941_v47  ;;  %v1288_v49 = vld [vmem:[#allocation2 + $0x9b0] sm:$0xff]  ;;  %v1061_v32 = vld [vmem:[#allocation2 + $0x298] sm:$0xff] }
 0x1b8   : > { %v967_v57 = vadd.f32 %v952_v51, %v907_v29  ;;  %v1294_v31 = vld [vmem:[#allocation2 + $0x9e0] sm:$0xff]  ;;  %v1057_v29 = vld [vmem:[#allocation2 + $0x278] sm:$0xff]  ;;  %v1196_v60 = vld [vmem:[#allocation2 + $0x6d0] sm:$0xff] }
 0x1b9   : > { %1661 = vmatpush.msra.mxu2 %v995_v2  ;;  %1586 = vmatpush.msrb.mxu3 %v1171_v15  ;;  %v902_v13 = vadd.f32 %v887_v5, %v842_v9  ;;  %v1202_v30 = vld [vmem:[#allocation2 + $0x700] sm:$0xff]  ;;  %v1285_v47 = vld [vmem:[#allocation2 + $0x998] sm:$0xff]  ;;  %v1055_v15 = vld [vmem:[#allocation2 + $0x268] sm:$0xff] }
 0x1ba   : > { %v9600_v23 = vmax.f32 %v967_v57, 0.0  ;;  %v1058_v2 = vld [vmem:[#allocation2 + $0x280] sm:$0xff]  ;;  %v1051_v57 = vld [vmem:[#allocation2 + $0x248] sm:$0xff]  ;;  %v1193_v9 = vld [vmem:[#allocation2 + $0x6b8] sm:$0xff] }
 0x1bb   : > { %1662 = vmatpush.msra.mxu2 %v992_v7  ;;  %v1054_v53 = vld [vmem:[#allocation2 + $0x260] sm:$0xff]  ;;  %v1279_v7 = vld [vmem:[#allocation2 + $0x968] sm:$0xff]  ;;  %v1273_v5 = vld [vmem:[#allocation2 + $0x938] sm:$0xff] }
 0x1bc   : > { %1447 = vmatmul.f32.vlgmr.msrb.gmra.mxu1 %v9600_v23  ;;  %v1282_v51 = vld [vmem:[#allocation2 + $0x980] sm:$0xff] }
 0x1bd   : > { %1611 = vmatpush.msrb.mxu1 %v1312_v20  ;;  %1663 = vmatpush.msra.mxu2 %v989_v61  ;;  %v1048_v20 = vld [vmem:[#allocation2 + $0x230] sm:$0xff] }
 0x1be   : > { %v931_v6 = vpop.permute.xlu0 %930  ;;  %v1276_v61 = vld [vmem:[#allocation2 + $0x950] sm:$0xff] }
 0x1bf   : > { %1612 = vmatpush.msrb.mxu1 %v1309_v27  ;;  %1664 = vmatpush.msra.mxu2 %v986_v63  ;;  %v947_v34 = vsel %vm946_vm7, %v931_v6, %v9449_v4  ;;  %v846_v4 = vadd.f32 %v831_v54, %v786_v8  ;;  %v1190_v27 = vld [vmem:[#allocation2 + $0x6a0] sm:$0xff]  ;;  %v1045_v63 = vld [vmem:[#allocation2 + $0x218] sm:$0xff]  ;;  %v1267_v8 = vld [vmem:[#allocation2 + $0x908] sm:$0xff] }
 0x1c0   : > { %v962_v41 = vadd.f32 %v947_v34, %v902_v13  ;;  %v1042_v6 = vld [vmem:[#allocation2 + $0x200] sm:$0xff]  ;;  %v1039_v34 = vld [vmem:[#allocation2 + $0x1e8] sm:$0xff] }
 0x1c1   : > { %1613 = vmatpush.msrb.mxu1 %v1306_v45  ;;  %1665 = vmatpush.msra.mxu2 %v983_v21  ;;  %v906_v56 = vadd.f32 %v891_v10, %v846_v4  ;;  %v1270_v13 = vld [vmem:[#allocation2 + $0x920] sm:$0xff]  ;;  %v1043_v45 = vld [vmem:[#allocation2 + $0x208] sm:$0xff]  ;;  %v1184_v21 = vld [vmem:[#allocation2 + $0x670] sm:$0xff] }
 0x1c2   : > { %v9614_v26 = vmax.f32 %v962_v41, 0.0  ;;  %v1040_v41 = vld [vmem:[#allocation2 + $0x1f0] sm:$0xff]  ;;  %v1178_v54 = vld [vmem:[#allocation2 + $0x640] sm:$0xff]  ;;  %v1033_v4 = vld [vmem:[#allocation2 + $0x1b8] sm:$0xff] }
 0x1c3   : > { %1614 = vmatpush.msrb.mxu1 %v1303_v35  ;;  %1666 = vmatpush.msra.mxu2 %v980_v37  ;;  %v966_v42 = vadd.f32 %v951_v39, %v906_v56  ;;  %v1181_v35 = vld [vmem:[#allocation2 + $0x658] sm:$0xff]  ;;  %v1166_v10 = vld [vmem:[#allocation2 + $0x5e0] sm:$0xff]  ;;  %v1163_v39 = vld [vmem:[#allocation2 + $0x5c8] sm:$0xff] }
 0x1c4   : > { %1347 = vmatmul.f32.vlgmr.msra.gmra.mxu0 %v9614_v26  ;;  %1507 = vmatmul.f32.vlgmr.msra.gmra.mxu3 %v9614_v26  ;;  %v1169_v37 = vld [vmem:[#allocation2 + $0x5f8] sm:$0xff]  ;;  %v1172_v56 = vld [vmem:[#allocation2 + $0x610] sm:$0xff] }
 0x1c5   : > { %1731 = vmatpush.msrb.mxu2 %v1217_v46  ;;  %1511 = vmatpush.msra.mxu0 %v1072_v58  ;;  %v9628_v17 = vmax.f32 %v966_v42, 0.0  ;;  %v1036_v46 = vld [vmem:[#allocation2 + $0x1d0] sm:$0xff]  ;;  %v1037_v58 = vld [vmem:[#allocation2 + $0x1d8] sm:$0xff] }
 0x1c6   : > { %1547 = vmatmul.f32.vlgmr.msra.gmra.mxu1 %v9392_v11  ;;  %1667 = vmatmul.f32.vlgmr.msra.gmra.mxu2 %v9614_v26  ;;  %v1264_v42 = vld [vmem:[#allocation2 + $0x8f0] sm:$0xff] }
 0x1c7   : > { %1615 = vmatpush.msrb.mxu1 %v1300_v24  ;;  %1671 = vmatpush.msra.mxu3 %v1073_v14  ;;  %v1034_v24 = vld [vmem:[#allocation2 + $0x1c0] sm:$0xff]  ;;  %v1175_v14 = vld [vmem:[#allocation2 + $0x628] sm:$0xff] }
 0x1c8   : > { %1732 = vmatpush.msrb.mxu2 %v1214_v52  ;;  %1512 = vmatpush.msra.mxu0 %v1069_v62  ;;  %v1030_v52 = vld [vmem:[#allocation2 + $0x1a0] sm:$0xff]  ;;  %v1031_v62 = vld [vmem:[#allocation2 + $0x1a8] sm:$0xff] }
 0x1c9   : > { %1616 = vmatpush.msrb.mxu1 %v1297_v16  ;;  %1672 = vmatpush.msra.mxu3 %v1070_v19  ;;  %v1160_v16 = vld [vmem:[#allocation2 + $0x5b0] sm:$0xff]  ;;  %v1027_v19 = vld [vmem:[#allocation2 + $0x188] sm:$0xff] }
 0x1ca   : > { %1733 = vmatpush.msrb.mxu2 %v1211_v0  ;;  %1513 = vmatpush.msra.mxu0 %v1066_v38  ;;  %v1028_v0 = vld [vmem:[#allocation2 + $0x190] sm:$0xff]  ;;  %v1905_v38 = vld [vmem:[#allocation2 + $0xd80] sm:$0xff] }
 0x1cb   : > { %1617 = vmatpush.msrb.mxu1 %v1294_v31  ;;  %1673 = vmatpush.msra.mxu3 %v1067_v43  ;;  %v1157_v31 = vld [vmem:[#allocation2 + $0x598] sm:$0xff] }
 0x1cc   : > { %1734 = vmatpush.msrb.mxu2 %v1208_v18  ;;  %1514 = vmatpush.msra.mxu0 %v1063_v3  ;;  %v1265_v43 = vld [vmem:[#allocation2 + $0x8f8] sm:$0xff]  ;;  %v1902_v18 = vld [vmem:[#allocation2 + $0xd68] sm:$0xff] }
 0x1cd   : > { %1618 = vmatpush.msrb.mxu1 %v1291_v28  ;;  %1674 = vmatpush.msra.mxu3 %v1064_v40  ;;  %v1261_v3 = vld [vmem:[#allocation2 + $0x8d8] sm:$0xff]  ;;  %v1154_v28 = vld [vmem:[#allocation2 + $0x580] sm:$0xff] }
 0x1ce   : > { %1735 = vmatpush.msrb.mxu2 %v1205_v36  ;;  %1427 = vmatmul.f32.vlgmr.msrb.gmra.mxu0 %v9628_v17  ;;  %v1262_v40 = vld [vmem:[#allocation2 + $0x8e0] sm:$0xff]  ;;  %v1899_v36 = vld [vmem:[#allocation2 + $0xd50] sm:$0xff] }
 0x1cf   : > { %1515 = vmatpush.msra.mxu0 %v1060_v25  ;;  %1587 = vmatmul.f32.vlgmr.msrb.gmra.mxu3 %v9628_v17  ;;  %v1258_v25 = vld [vmem:[#allocation2 + $0x8c0] sm:$0xff] }
 0x1d0   : > { %1619 = vmatpush.msrb.mxu1 %v1288_v49  ;;  %1675 = vmatpush.msra.mxu3 %v1061_v32  ;;  %v1151_v49 = vld [vmem:[#allocation2 + $0x568] sm:$0xff] }
 0x1d1   : > { %1736 = vmatpush.msrb.mxu2 %v1202_v30  ;;  %1516 = vmatpush.msra.mxu0 %v1057_v29  ;;  %v1259_v32 = vld [vmem:[#allocation2 + $0x8c8] sm:$0xff]  ;;  %v1896_v30 = vld [vmem:[#allocation2 + $0xd38] sm:$0xff] }
 0x1d2   : > { %1620 = vmatpush.msrb.mxu1 %v1285_v47  ;;  %1676 = vmatpush.msra.mxu3 %v1058_v2  ;;  %v1255_v29 = vld [vmem:[#allocation2 + $0x8a8] sm:$0xff]  ;;  %v1148_v47 = vld [vmem:[#allocation2 + $0x550] sm:$0xff] }
 0x1d3   : > { %1737 = vmatpush.msrb.mxu2 %v1199_v55  ;;  %1517 = vmatpush.msra.mxu0 %v1054_v53  ;;  %v1256_v2 = vld [vmem:[#allocation2 + $0x8b0] sm:$0xff]  ;;  %v1893_v55 = vld [vmem:[#allocation2 + $0xd20] sm:$0xff] }
 0x1d4   : > { %1621 = vmatpush.msrb.mxu1 %v1282_v51  ;;  %1677 = vmatpush.msra.mxu3 %v1055_v15  ;;  %v1252_v53 = vld [vmem:[#allocation2 + $0x890] sm:$0xff]  ;;  %v1145_v51 = vld [vmem:[#allocation2 + $0x538] sm:$0xff] }
 0x1d5   : > { %1738 = vmatpush.msrb.mxu2 %v1196_v60  ;;  %1518 = vmatpush.msra.mxu0 %v1051_v57  ;;  %v1253_v15 = vld [vmem:[#allocation2 + $0x898] sm:$0xff]  ;;  %v1890_v60 = vld [vmem:[#allocation2 + $0xd08] sm:$0xff] }
 0x1d6   : > { %1622 = vmatpush.msrb.mxu1 %v1279_v7  ;;  %1678 = vmatpush.msra.mxu3 %v1052_v50  ;;  %v1249_v57 = vld [vmem:[#allocation2 + $0x878] sm:$0xff]  ;;  %v1142_v7 = vld [vmem:[#allocation2 + $0x520] sm:$0xff] }
 0x1d7   : > { %1739 = vmatpush.msrb.mxu2 %v1193_v9  ;;  %1519 = vmatpush.msra.mxu0 %v1048_v20  ;;  %v1250_v50 = vld [vmem:[#allocation2 + $0x880] sm:$0xff]  ;;  %v1887_v9 = vld [vmem:[#allocation2 + $0xcf0] sm:$0xff] }
 0x1d8   : > { %1623 = vmatpush.msrb.mxu1 %v1276_v61  ;;  %1679 = vmatpush.msra.mxu3 %v1049_v44  ;;  %v1246_v20 = vld [vmem:[#allocation2 + $0x860] sm:$0xff]  ;;  %v1139_v61 = vld [vmem:[#allocation2 + $0x508] sm:$0xff] }
 0x1d9   : > { %1740 = vmatpush.msrb.mxu2 %v1190_v27  ;;  %1520 = vmatpush.msra.mxu0 %v1045_v63  ;;  %v1247_v44 = vld [vmem:[#allocation2 + $0x868] sm:$0xff]  ;;  %v1884_v27 = vld [vmem:[#allocation2 + $0xcd8] sm:$0xff] }
 0x1da   : > { %1624 = vmatpush.msrb.mxu1 %v1273_v5  ;;  %1680 = vmatpush.msra.mxu3 %v1046_v48  ;;  %v1243_v63 = vld [vmem:[#allocation2 + $0x848] sm:$0xff]  ;;  %v1136_v5 = vld [vmem:[#allocation2 + $0x4f0] sm:$0xff] }
 0x1db   : > { %1741 = vmatpush.msrb.mxu2 %v1187_v12  ;;  %1521 = vmatpush.msra.mxu0 %v1042_v6  ;;  %v1244_v48 = vld [vmem:[#allocation2 + $0x850] sm:$0xff]  ;;  %v1881_v12 = vld [vmem:[#allocation2 + $0xcc0] sm:$0xff] }
 0x1dc   : > { %1625 = vmatpush.msrb.mxu1 %v1270_v13  ;;  %1681 = vmatpush.msra.mxu3 %v1043_v45  ;;  %v1240_v6 = vld [vmem:[#allocation2 + $0x830] sm:$0xff]  ;;  %v1133_v13 = vld [vmem:[#allocation2 + $0x4d8] sm:$0xff] }
 0x1dd   : > { %1742 = vmatpush.msrb.mxu2 %v1184_v21  ;;  %1522 = vmatpush.msra.mxu0 %v1039_v34  ;;  %v1241_v45 = vld [vmem:[#allocation2 + $0x838] sm:$0xff]  ;;  %v1878_v21 = vld [vmem:[#allocation2 + $0xca8] sm:$0xff] }
 0x1de   : > { %1626 = vmatpush.msrb.mxu1 %v1267_v8  ;;  %1682 = vmatpush.msra.mxu3 %v1040_v41  ;;  %v1237_v34 = vld [vmem:[#allocation2 + $0x818] sm:$0xff]  ;;  %v1130_v8 = vld [vmem:[#allocation2 + $0x4c0] sm:$0xff] }
 0x1df   : > { %1627 = vmatmul.f32.vlgmr.msrb.gmra.mxu1 %v9546_v22  ;;  %1743 = vmatpush.msrb.mxu2 %v1181_v35  ;;  %v1238_v41 = vld [vmem:[#allocation2 + $0x820] sm:$0xff]  ;;  %v1875_v35 = vld [vmem:[#allocation2 + $0xc90] sm:$0xff] }
 0x1e0   : > { %1711 = vmatpush.msra.mxu1 %v1169_v37  ;;  %1523 = vmatpush.msra.mxu0 %v1036_v46  ;;  %v1234_v37 = vld [vmem:[#allocation2 + $0x800] sm:$0xff]  ;;  %v1127_v46 = vld [vmem:[#allocation2 + $0x4a8] sm:$0xff] }
 0x1e1   : > { %1683 = vmatpush.msra.mxu3 %v1037_v58  ;;  %1744 = vmatpush.msrb.mxu2 %v1178_v54  ;;  %v1235_v58 = vld [vmem:[#allocation2 + $0x808] sm:$0xff]  ;;  %v1872_v54 = vld [vmem:[#allocation2 + $0xc78] sm:$0xff] }
 0x1e2   : > { %1712 = vmatpush.msra.mxu1 %v1166_v10  ;;  %1524 = vmatpush.msra.mxu0 %v1033_v4  ;;  %v1231_v10 = vld [vmem:[#allocation2 + $0x7e8] sm:$0xff]  ;;  %v1124_v4 = vld [vmem:[#allocation2 + $0x490] sm:$0xff] }
 0x1e3   : > { %1684 = vmatpush.msra.mxu3 %v1034_v24  ;;  %1745 = vmatpush.msrb.mxu2 %v1175_v14  ;;  %v1232_v24 = vld [vmem:[#allocation2 + $0x7f0] sm:$0xff]  ;;  %v1869_v14 = vld [vmem:[#allocation2 + $0xc60] sm:$0xff] }
 0x1e4   : > { %1713 = vmatpush.msra.mxu1 %v1163_v39  ;;  %1525 = vmatpush.msra.mxu0 %v1030_v52  ;;  %v1316_v39 = vld [vmem:[#allocation2 + $0xa90] sm:$0xf] }
 0x1e5   : > { %1685 = vmatpush.msra.mxu3 %v1031_v62  ;;  %1746 = vmatpush.msrb.mxu2 %v1172_v56  ;;  %v1228_v52 = vld [vmem:[#allocation2 + $0x7d0] sm:$0xff]  ;;  %v1229_v62 = vld [vmem:[#allocation2 + $0x7d8] sm:$0xff]  ;;  %v1857_v56 = vld [vmem:[#allocation2 + $0xc00] sm:$0xff] }
 0x1e6   : > { %1714 = vmatpush.msra.mxu1 %v1160_v16  ;;  %1526 = vmatpush.msra.mxu0 %v1027_v19  ;;  %v1866_v16 = vld [vmem:[#allocation2 + $0xc48] sm:$0xff]  ;;  %v1225_v19 = vld [vmem:[#allocation2 + $0x7b8] sm:$0xff] }
 0x1e7   : > { %1686 = vmatpush.msra.mxu3 %v1028_v0  ;;  %1747 = vmatmul.f32.vlgmr.msrb.gmra.mxu2 %v9628_v17  ;;  %v1226_v0 = vld [vmem:[#allocation2 + $0x7c0] sm:$0xff] }
 0x1e8   : > { %2180 = vmatpush.msra.mxu2 %v1905_v38  ;;  %1527 = vmatmul.f32.vlgmr.msra.gmra.mxu0 %v9473_v1  ;;  %v1854_v38 = vld [vmem:[#allocation2 + $0xbe8] sm:$0xff] }
 0x1e9   : > { %1591 = vmatpush.msrb.mxu0 %v1264_v42  ;;  %1687 = vmatmul.f32.vlgmr.msra.gmra.mxu3 %v9473_v1  ;;  %v1863_v42 = vld [vmem:[#allocation2 + $0xc30] sm:$0xff] }
 0x1ea   : > { %1715 = vmatpush.msra.mxu1 %v1157_v31  ;;  %1751 = vmatpush.msrb.mxu3 %v1265_v43  ;;  %v1222_v31 = vld [vmem:[#allocation2 + $0x7a0] sm:$0xff]  ;;  %v1223_v43 = vld [vmem:[#allocation2 + $0x7a8] sm:$0xff] }
 0x1eb   : > { %2181 = vmatpush.msra.mxu2 %v1902_v18  ;;  %1592 = vmatpush.msrb.mxu0 %v1261_v3  ;;  %v1851_v18 = vld [vmem:[#allocation2 + $0xbd0] sm:$0xff]  ;;  %v1860_v3 = vld [vmem:[#allocation2 + $0xc18] sm:$0xff] }
 0x1ec   : > { %1716 = vmatpush.msra.mxu1 %v1154_v28  ;;  %1752 = vmatpush.msrb.mxu3 %v1262_v40  ;;  %v1219_v28 = vld [vmem:[#allocation2 + $0x788] sm:$0xff]  ;;  %v1220_v40 = vld [vmem:[#allocation2 + $0x790] sm:$0xff] }
 0x1ed   : > { %2182 = vmatpush.msra.mxu2 %v1899_v36  ;;  %1593 = vmatpush.msrb.mxu0 %v1258_v25  ;;  %v1848_v36 = vld [vmem:[#allocation2 + $0xbb8] sm:$0xff]  ;;  %v2097_v25 = vld [vmem:[#allocation2 + $0x1380] sm:$0xff] }
 0x1ee   : > { %1717 = vmatpush.msra.mxu1 %v1151_v49  ;;  %1753 = vmatpush.msrb.mxu3 %v1259_v32  ;;  %v1121_v49 = vld [vmem:[#allocation2 + $0x478] sm:$0xff]  ;;  %v1953_v32 = vld [vmem:[#allocation2 + $0xf00] sm:$0xff] }
 0x1ef   : > { %2183 = vmatpush.msra.mxu2 %v1896_v30  ;;  %1594 = vmatpush.msrb.mxu0 %v1255_v29  ;;  %v1845_v30 = vld [vmem:[#allocation2 + $0xba0] sm:$0xff]  ;;  %v2094_v29 = vld [vmem:[#allocation2 + $0x1368] sm:$0xff] }
 0x1f0   : > { %1718 = vmatpush.msra.mxu1 %v1148_v47  ;;  %1754 = vmatpush.msrb.mxu3 %v1256_v2  ;;  %v1118_v47 = vld [vmem:[#allocation2 + $0x460] sm:$0xff]  ;;  %v1950_v2 = vld [vmem:[#allocation2 + $0xee8] sm:$0xff] }
 0x1f1   : > { %2184 = vmatpush.msra.mxu2 %v1893_v55  ;;  %1595 = vmatpush.msrb.mxu0 %v1252_v53  ;;  %v1842_v55 = vld [vmem:[#allocation2 + $0xb88] sm:$0xff]  ;;  %v2091_v53 = vld [vmem:[#allocation2 + $0x1350] sm:$0xff] }
 0x1f2   : > { %1719 = vmatpush.msra.mxu1 %v1145_v51  ;;  %1755 = vmatpush.msrb.mxu3 %v1253_v15  ;;  %v1115_v51 = vld [vmem:[#allocation2 + $0x448] sm:$0xff]  ;;  %v1947_v15 = vld [vmem:[#allocation2 + $0xed0] sm:$0xff] }
 0x1f3   : > { %2185 = vmatpush.msra.mxu2 %v1890_v60  ;;  %1596 = vmatpush.msrb.mxu0 %v1249_v57  ;;  %v1839_v60 = vld [vmem:[#allocation2 + $0xb70] sm:$0xff]  ;;  %v2088_v57 = vld [vmem:[#allocation2 + $0x1338] sm:$0xff] }
 0x1f4   : > { %1720 = vmatpush.msra.mxu1 %v1142_v7  ;;  %1756 = vmatpush.msrb.mxu3 %v1250_v50  ;;  %v1112_v7 = vld [vmem:[#allocation2 + $0x430] sm:$0xff]  ;;  %v1944_v50 = vld [vmem:[#allocation2 + $0xeb8] sm:$0xff] }
 0x1f5   : > { %2186 = vmatpush.msra.mxu2 %v1887_v9  ;;  %1597 = vmatpush.msrb.mxu0 %v1246_v20  ;;  %v1836_v9 = vld [vmem:[#allocation2 + $0xb58] sm:$0xff]  ;;  %v2085_v20 = vld [vmem:[#allocation2 + $0x1320] sm:$0xff] }
 0x1f6   : > { %1721 = vmatpush.msra.mxu1 %v1139_v61  ;;  %1757 = vmatpush.msrb.mxu3 %v1247_v44  ;;  %v1109_v61 = vld [vmem:[#allocation2 + $0x418] sm:$0xff]  ;;  %v1941_v44 = vld [vmem:[#allocation2 + $0xea0] sm:$0xff] }
 0x1f7   : > { %2187 = vmatpush.msra.mxu2 %v1884_v27  ;;  %1598 = vmatpush.msrb.mxu0 %v1243_v63  ;;  %v1833_v27 = vld [vmem:[#allocation2 + $0xb40] sm:$0xff]  ;;  %v2082_v63 = vld [vmem:[#allocation2 + $0x1308] sm:$0xff] }
 0x1f8   : > { %1722 = vmatpush.msra.mxu1 %v1136_v5  ;;  %1758 = vmatpush.msrb.mxu3 %v1244_v48  ;;  %v1106_v5 = vld [vmem:[#allocation2 + $0x400] sm:$0xff]  ;;  %v1938_v48 = vld [vmem:[#allocation2 + $0xe88] sm:$0xff] }
 0x1f9   : > { %2188 = vmatpush.msra.mxu2 %v1881_v12  ;;  %1599 = vmatpush.msrb.mxu0 %v1240_v6  ;;  %v1830_v12 = vld [vmem:[#allocation2 + $0xb28] sm:$0xff]  ;;  %v2079_v6 = vld [vmem:[#allocation2 + $0x12f0] sm:$0xff] }
 0x1fa   : > { %1723 = vmatpush.msra.mxu1 %v1133_v13  ;;  %1759 = vmatpush.msrb.mxu3 %v1241_v45  ;;  %v1103_v13 = vld [vmem:[#allocation2 + $0x3e8] sm:$0xff]  ;;  %v1935_v45 = vld [vmem:[#allocation2 + $0xe70] sm:$0xff] }
 0x1fb   : > { %2189 = vmatpush.msra.mxu2 %v1878_v21  ;;  %1600 = vmatpush.msrb.mxu0 %v1237_v34  ;;  %v1827_v21 = vld [vmem:[#allocation2 + $0xb10] sm:$0xff]  ;;  %v2076_v34 = vld [vmem:[#allocation2 + $0x12d8] sm:$0xff] }
 0x1fc   : > { %1724 = vmatpush.msra.mxu1 %v1130_v8  ;;  %1760 = vmatpush.msrb.mxu3 %v1238_v41  ;;  %v1100_v8 = vld [vmem:[#allocation2 + $0x3d0] sm:$0xff]  ;;  %v1932_v41 = vld [vmem:[#allocation2 + $0xe58] sm:$0xff] }
 0x1fd   : > { %2190 = vmatpush.msra.mxu2 %v1875_v35  ;;  %1601 = vmatpush.msrb.mxu0 %v1234_v37  ;;  %v1824_v35 = vld [vmem:[#allocation2 + $0xaf8] sm:$0xff]  ;;  %v2073_v37 = vld [vmem:[#allocation2 + $0x12c0] sm:$0xff] }
 0x1fe   : > { %1725 = vmatpush.msra.mxu1 %v1127_v46  ;;  %1761 = vmatpush.msrb.mxu3 %v1235_v58  ;;  %v1097_v46 = vld [vmem:[#allocation2 + $0x3b8] sm:$0xff]  ;;  %v1929_v58 = vld [vmem:[#allocation2 + $0xe40] sm:$0xff] }
 0x1ff   : > { %2191 = vmatpush.msra.mxu2 %v1872_v54  ;;  %1602 = vmatpush.msrb.mxu0 %v1231_v10  ;;  %v1821_v54 = vld [vmem:[#allocation2 + $0xae0] sm:$0xff]  ;;  %v2070_v10 = vld [vmem:[#allocation2 + $0x12a8] sm:$0xff] }
 0x200   : > { %1726 = vmatpush.msra.mxu1 %v1124_v4  ;;  %1762 = vmatpush.msrb.mxu3 %v1232_v24  ;;  %v1094_v4 = vld [vmem:[#allocation2 + $0x3a0] sm:$0xff]  ;;  %v1926_v24 = vld [vmem:[#allocation2 + $0xe28] sm:$0xff] }
 0x201   : > { %1727 = vmatmul.f32.vlgmr.msra.gmra.mxu1 %v9457_v33  ;;  %2192 = vmatpush.msra.mxu2 %v1869_v14  ;;  %v1818_v14 = vld [vmem:[#allocation2 + $0xac8] sm:$0xff] }
 0x202   : > { %7875 = vmatpush.msk.msrb.mxu1 %vm1321_vm8, %v1316_v39  ;;  %1603 = vmatpush.msrb.mxu0 %v1228_v52  ;;  %v2067_v39 = vld [vmem:[#allocation2 + $0x1290] sm:$0xff]  ;;  %v1091_v52 = vld [vmem:[#allocation2 + $0x388] sm:$0xff] }
 0x203   : > { %1763 = vmatpush.msrb.mxu3 %v1229_v62  ;;  %2193 = vmatpush.msra.mxu2 %v1866_v16  ;;  %v1923_v62 = vld [vmem:[#allocation2 + $0xe10] sm:$0xff]  ;;  %v2064_v16 = vld [vmem:[#allocation2 + $0x1278] sm:$0xff] }
 0x204   : > { %2160 = vmatpush.msra.mxu1 %v1857_v56  ;;  %1604 = vmatpush.msrb.mxu0 %v1225_v19  ;;  %v1815_v56 = vld [vmem:[#allocation2 + $0xab0] sm:$0xff] }
 0x205   : > { %1764 = vmatpush.msrb.mxu3 %v1226_v0  ;;  %2194 = vmatpush.msra.mxu2 %v1863_v42  ;;  %v1088_v19 = vld [vmem:[#allocation2 + $0x370] sm:$0xff]  ;;  %v1920_v0 = vld [vmem:[#allocation2 + $0xdf8] sm:$0xff]  ;;  %v2061_v42 = vld [vmem:[#allocation2 + $0x1260] sm:$0xff] }
 0x206   : > { %2161 = vmatpush.msra.mxu1 %v1854_v38  ;;  %1605 = vmatpush.msrb.mxu0 %v1222_v31  ;;  %v1812_v38 = vld [vmem:[#allocation2 + $0xa98] sm:$0xff] }
 0x207   : > { %1765 = vmatpush.msrb.mxu3 %v1223_v43  ;;  %2195 = vmatpush.msra.mxu2 %v1860_v3  ;;  %v1085_v31 = vld [vmem:[#allocation2 + $0x358] sm:$0xff]  ;;  %v1917_v43 = vld [vmem:[#allocation2 + $0xde0] sm:$0xff]  ;;  %v2058_v3 = vld [vmem:[#allocation2 + $0x1248] sm:$0xff] }
 0x208   : > { %2162 = vmatpush.msra.mxu1 %v1851_v18  ;;  %1606 = vmatpush.msrb.mxu0 %v1219_v28  ;;  %v2049_v18 = vld [vmem:[#allocation2 + $0x1200] sm:$0xff] }
 0x209   : > { %1766 = vmatpush.msrb.mxu3 %v1220_v40  ;;  %2196 = vmatmul.f32.vlgmr.msra.gmra.mxu2 %v9473_v1  ;;  %v1082_v28 = vld [vmem:[#allocation2 + $0x340] sm:$0xff]  ;;  %v1914_v40 = vld [vmem:[#allocation2 + $0xdc8] sm:$0xff] }
 0x20a   : > { %2163 = vmatpush.msra.mxu1 %v1848_v36  ;;  %1607 = vmatmul.f32.vlgmr.msrb.gmra.mxu0 %v9600_v23  ;;  %v2046_v36 = vld [vmem:[#allocation2 + $0x11e8] sm:$0xff] }
 0x20b   : > { %2260 = vmatpush.msrb.mxu2 %v2097_v25  ;;  %1691 = vmatpush.msra.mxu0 %v1121_v49  ;;  %v2055_v25 = vld [vmem:[#allocation2 + $0x1230] sm:$0xff]  ;;  %v1079_v49 = vld [vmem:[#allocation2 + $0x328] sm:$0xff] }
 0x20c   : > { %1767 = vmatmul.f32.vlgmr.msrb.gmra.mxu3 %v9600_v23  ;;  %7876 = vmatmul.msk.f32.vlgmr.msrb.gmra.mxu1 %vm1317_vm9, %v9544_v59 }
 0x20d   : > { %2200 = vmatpush.msra.mxu3 %v1953_v32  ;;  %2164 = vmatpush.msra.mxu1 %v1845_v30  ;;  %v1911_v32 = vld [vmem:[#allocation2 + $0xdb0] sm:$0xff] }
 0x20e   : > { %2261 = vmatpush.msrb.mxu2 %v2094_v29  ;;  %1692 = vmatpush.msra.mxu0 %v1118_v47  ;;  %v2043_v30 = vld [vmem:[#allocation2 + $0x11d0] sm:$0xff]  ;;  %v2052_v29 = vld [vmem:[#allocation2 + $0x1218] sm:$0xff] }
 0x20f   : > { %2201 = vmatpush.msra.mxu3 %v1950_v2  ;;  %2165 = vmatpush.msra.mxu1 %v1842_v55  ;;  %v1076_v47 = vld [vmem:[#allocation2 + $0x310] sm:$0xff]  ;;  %v1908_v2 = vld [vmem:[#allocation2 + $0xd98] sm:$0xff] }
 0x210   : > { %2262 = vmatpush.msrb.mxu2 %v2091_v53  ;;  %1693 = vmatpush.msra.mxu0 %v1115_v51  ;;  %v2040_v55 = vld [vmem:[#allocation2 + $0x11b8] sm:$0xff] }
 0x211   : > { %2202 = vmatpush.msra.mxu3 %v1947_v15  ;;  %2166 = vmatpush.msra.mxu1 %v1839_v60  ;;  %v2148_v53 = vld [vmem:[#allocation2 + $0x1518] sm:$0xf]  ;;  %v2145_v15 = vld [vmem:[#allocation2 + $0x1500] sm:$0xff]  ;;  %v1954_v60 = vld [vmem:[#allocation2 + $0xf08] sm:$0xff] }
 0x212   : > { %2263 = vmatpush.msrb.mxu2 %v2088_v57  ;;  %1694 = vmatpush.msra.mxu0 %v1112_v7  ;;  %v1313_v51 = vld [vmem:[#allocation2 + $0xa78] sm:$0xff]  ;;  %v2037_v57 = vld [vmem:[#allocation2 + $0x11a0] sm:$0xff] }
 0x213   : > { %2203 = vmatpush.msra.mxu3 %v1944_v50  ;;  %2167 = vmatpush.msra.mxu1 %v1836_v9  ;;  %v1310_v7 = vld [vmem:[#allocation2 + $0xa60] sm:$0xff]  ;;  %v2142_v50 = vld [vmem:[#allocation2 + $0x14e8] sm:$0xff]  ;;  %v1951_v9 = vld [vmem:[#allocation2 + $0xef0] sm:$0xff] }
 0x214   : > { %2264 = vmatpush.msrb.mxu2 %v2085_v20  ;;  %1695 = vmatpush.msra.mxu0 %v1109_v61  ;;  %v2034_v20 = vld [vmem:[#allocation2 + $0x1188] sm:$0xff] }
 0x215   : > { %2204 = vmatpush.msra.mxu3 %v1941_v44  ;;  %2168 = vmatpush.msra.mxu1 %v1833_v27  ;;  %v1307_v61 = vld [vmem:[#allocation2 + $0xa48] sm:$0xff]  ;;  %v2139_v44 = vld [vmem:[#allocation2 + $0x14d0] sm:$0xff]  ;;  %v1948_v27 = vld [vmem:[#allocation2 + $0xed8] sm:$0xff] }
 0x216   : > { %2265 = vmatpush.msrb.mxu2 %v2082_v63  ;;  %1696 = vmatpush.msra.mxu0 %v1106_v5  ;;  %v2031_v63 = vld [vmem:[#allocation2 + $0x1170] sm:$0xff] }
 0x217   : > { %2205 = vmatpush.msra.mxu3 %v1938_v48  ;;  %2169 = vmatpush.msra.mxu1 %v1830_v12  ;;  %v1304_v5 = vld [vmem:[#allocation2 + $0xa30] sm:$0xff]  ;;  %v2136_v48 = vld [vmem:[#allocation2 + $0x14b8] sm:$0xff]  ;;  %v1945_v12 = vld [vmem:[#allocation2 + $0xec0] sm:$0xff] }
 0x218   : > { %2266 = vmatpush.msrb.mxu2 %v2079_v6  ;;  %1697 = vmatpush.msra.mxu0 %v1103_v13  ;;  %v2028_v6 = vld [vmem:[#allocation2 + $0x1158] sm:$0xff] }
 0x219   : > { %2206 = vmatpush.msra.mxu3 %v1935_v45  ;;  %2170 = vmatpush.msra.mxu1 %v1827_v21  ;;  %v1301_v13 = vld [vmem:[#allocation2 + $0xa18] sm:$0xff]  ;;  %v2133_v45 = vld [vmem:[#allocation2 + $0x14a0] sm:$0xff]  ;;  %v1942_v21 = vld [vmem:[#allocation2 + $0xea8] sm:$0xff] }
 0x21a   : > { %2267 = vmatpush.msrb.mxu2 %v2076_v34  ;;  %1698 = vmatpush.msra.mxu0 %v1100_v8  ;;  %v2025_v34 = vld [vmem:[#allocation2 + $0x1140] sm:$0xff] }
 0x21b   : > { %2207 = vmatpush.msra.mxu3 %v1932_v41  ;;  %2171 = vmatpush.msra.mxu1 %v1824_v35  ;;  %v1298_v8 = vld [vmem:[#allocation2 + $0xa00] sm:$0xff]  ;;  %v2130_v41 = vld [vmem:[#allocation2 + $0x1488] sm:$0xff]  ;;  %v1939_v35 = vld [vmem:[#allocation2 + $0xe90] sm:$0xff] }
 0x21c   : > { %2268 = vmatpush.msrb.mxu2 %v2073_v37  ;;  %1699 = vmatpush.msra.mxu0 %v1097_v46  ;;  %v2022_v37 = vld [vmem:[#allocation2 + $0x1128] sm:$0xff] }
 0x21d   : > { %2208 = vmatpush.msra.mxu3 %v1929_v58  ;;  %2172 = vmatpush.msra.mxu1 %v1821_v54  ;;  %v1295_v46 = vld [vmem:[#allocation2 + $0x9e8] sm:$0xff]  ;;  %v2127_v58 = vld [vmem:[#allocation2 + $0x1470] sm:$0xff]  ;;  %v1936_v54 = vld [vmem:[#allocation2 + $0xe78] sm:$0xff] }
 0x21e   : > { %2269 = vmatpush.msrb.mxu2 %v2070_v10  ;;  %1700 = vmatpush.msra.mxu0 %v1094_v4  ;;  %v2019_v10 = vld [vmem:[#allocation2 + $0x1110] sm:$0xff] }
 0x21f   : > { %2209 = vmatpush.msra.mxu3 %v1926_v24  ;;  %2173 = vmatpush.msra.mxu1 %v1818_v14  ;;  %v1292_v4 = vld [vmem:[#allocation2 + $0x9d0] sm:$0xff]  ;;  %v2124_v24 = vld [vmem:[#allocation2 + $0x1458] sm:$0xff]  ;;  %v1933_v14 = vld [vmem:[#allocation2 + $0xe60] sm:$0xff] }
 0x220   : > { %2270 = vmatpush.msrb.mxu2 %v2067_v39  ;;  %1701 = vmatpush.msra.mxu0 %v1091_v52  ;;  %v2016_v39 = vld [vmem:[#allocation2 + $0x10f8] sm:$0xff] }
 0x221   : > { %2210 = vmatpush.msra.mxu3 %v1923_v62  ;;  %2174 = vmatpush.msra.mxu1 %v1815_v56  ;;  %v1289_v52 = vld [vmem:[#allocation2 + $0x9b8] sm:$0xff]  ;;  %v2121_v62 = vld [vmem:[#allocation2 + $0x1440] sm:$0xff]  ;;  %v1930_v56 = vld [vmem:[#allocation2 + $0xe48] sm:$0xff] }
 0x222   : > { %2271 = vmatpush.msrb.mxu2 %v2064_v16  ;;  %1702 = vmatpush.msra.mxu0 %v1088_v19  ;;  %v2013_v16 = vld [vmem:[#allocation2 + $0x10e0] sm:$0xff] }
 0x223   : > { %2211 = vmatpush.msra.mxu3 %v1920_v0  ;;  %2175 = vmatpush.msra.mxu1 %v1812_v38  ;;  %v1286_v19 = vld [vmem:[#allocation2 + $0x9a0] sm:$0xff]  ;;  %v2118_v0 = vld [vmem:[#allocation2 + $0x1428] sm:$0xff]  ;;  %v1927_v38 = vld [vmem:[#allocation2 + $0xe30] sm:$0xff] }
 0x224   : > { %2272 = vmatpush.msrb.mxu2 %v2061_v42  ;;  %1703 = vmatpush.msra.mxu0 %v1085_v31  ;;  %v2010_v42 = vld [vmem:[#allocation2 + $0x10c8] sm:$0xff] }
 0x225   : > { %2176 = vmatmul.f32.vlgmr.msra.gmra.mxu1 %v9614_v26  ;;  %2212 = vmatpush.msra.mxu3 %v1917_v43  ;;  %v1283_v31 = vld [vmem:[#allocation2 + $0x988] sm:$0xff]  ;;  %v2115_v43 = vld [vmem:[#allocation2 + $0x1410] sm:$0xff] }
 0x226   : > { %2240 = vmatpush.msrb.mxu1 %v2049_v18  ;;  %2273 = vmatpush.msrb.mxu2 %v2058_v3  ;;  %v1924_v18 = vld [vmem:[#allocation2 + $0xe18] sm:$0xff]  ;;  %v2007_v3 = vld [vmem:[#allocation2 + $0x10b0] sm:$0xff] }
 0x227   : > { %1704 = vmatpush.msra.mxu0 %v1082_v28  ;;  %2213 = vmatpush.msra.mxu3 %v1914_v40  ;;  %v1280_v28 = vld [vmem:[#allocation2 + $0x970] sm:$0xff]  ;;  %v2112_v40 = vld [vmem:[#allocation2 + $0x13f8] sm:$0xff] }
 0x228   : > { %2241 = vmatpush.msrb.mxu1 %v2046_v36  ;;  %2274 = vmatpush.msrb.mxu2 %v2055_v25  ;;  %v1921_v36 = vld [vmem:[#allocation2 + $0xe00] sm:$0xff]  ;;  %v2004_v25 = vld [vmem:[#allocation2 + $0x1098] sm:$0xff] }
 0x229   : > { %1705 = vmatpush.msra.mxu0 %v1079_v49  ;;  %2214 = vmatpush.msra.mxu3 %v1911_v32  ;;  %v1277_v49 = vld [vmem:[#allocation2 + $0x958] sm:$0xff]  ;;  %v2109_v32 = vld [vmem:[#allocation2 + $0x13e0] sm:$0xff] }
 0x22a   : > { %2242 = vmatpush.msrb.mxu1 %v2043_v30  ;;  %2275 = vmatpush.msrb.mxu2 %v2052_v29  ;;  %v1906_v30 = vld [vmem:[#allocation2 + $0xd88] sm:$0xff] }
 0x22b   : > { %1706 = vmatpush.msra.mxu0 %v1076_v47  ;;  %2215 = vmatpush.msra.mxu3 %v1908_v2  ;;  %v1918_v29 = vld [vmem:[#allocation2 + $0xde8] sm:$0xff]  ;;  %v1274_v47 = vld [vmem:[#allocation2 + $0x940] sm:$0xff] }
 0x22c   : > { %2243 = vmatpush.msrb.mxu1 %v2040_v55  ;;  %2276 = vmatmul.f32.vlgmr.msrb.gmra.mxu2 %v9600_v23  ;;  %v2106_v2 = vld [vmem:[#allocation2 + $0x13c8] sm:$0xff]  ;;  %v1903_v55 = vld [vmem:[#allocation2 + $0xd70] sm:$0xff] }
 0x22d   : > { %7877 = vmatpush.msk.msra.mxu2 %vm1321_vm8, %v2148_v53  ;;  %1707 = vmatmul.f32.vlgmr.msra.gmra.mxu0 %v9392_v11  ;;  %v1915_v53 = vld [vmem:[#allocation2 + $0xdd0] sm:$0xff] }
 0x22e   : > { %1771 = vmatpush.msrb.mxu0 %v1313_v51  ;;  %2216 = vmatmul.f32.vlgmr.msra.gmra.mxu3 %v9392_v11  ;;  %v1271_v51 = vld [vmem:[#allocation2 + $0x928] sm:$0xff] }
 0x22f   : > { %2280 = vmatpush.msrb.mxu3 %v2145_v15  ;;  %2360 = vmatpush.msrb.mxu2 %v1954_v60  ;;  %v2103_v15 = vld [vmem:[#allocation2 + $0x13b0] sm:$0xff]  ;;  %v1900_v60 = vld [vmem:[#allocation2 + $0xd58] sm:$0xff] }
 0x230   : > { %2244 = vmatpush.msrb.mxu1 %v2037_v57  ;;  %1772 = vmatpush.msrb.mxu0 %v1310_v7  ;;  %v1912_v57 = vld [vmem:[#allocation2 + $0xdb8] sm:$0xff]  ;;  %v1268_v7 = vld [vmem:[#allocation2 + $0x910] sm:$0xff] }
 0x231   : > { %2281 = vmatpush.msrb.mxu3 %v2142_v50  ;;  %2361 = vmatpush.msrb.mxu2 %v1951_v9  ;;  %v2100_v50 = vld [vmem:[#allocation2 + $0x1398] sm:$0xff]  ;;  %v1897_v9 = vld [vmem:[#allocation2 + $0xd40] sm:$0xff] }
 0x232   : > { %2245 = vmatpush.msrb.mxu1 %v2034_v20  ;;  %1773 = vmatpush.msrb.mxu0 %v1307_v61  ;;  %v1909_v20 = vld [vmem:[#allocation2 + $0xda0] sm:$0xff] }
 0x233   : > { %2282 = vmatpush.msrb.mxu3 %v2139_v44  ;;  %2362 = vmatpush.msrb.mxu2 %v1948_v27  ;;  %v2001_v61 = vld [vmem:[#allocation2 + $0x1080] sm:$0xff]  ;;  %v2002_v44 = vld [vmem:[#allocation2 + $0x1088] sm:$0xff] }
 0x234   : > { %2246 = vmatpush.msrb.mxu1 %v2031_v63  ;;  %1774 = vmatpush.msrb.mxu0 %v1304_v5  ;;  %v2146_v27 = vld [vmem:[#allocation2 + $0x1508] sm:$0xff] }
 0x235   : > { %2283 = vmatpush.msrb.mxu3 %v2136_v48  ;;  %2363 = vmatpush.msrb.mxu2 %v1945_v12  ;;  %v1894_v63 = vld [vmem:[#allocation2 + $0xd28] sm:$0xff]  ;;  %v1999_v48 = vld [vmem:[#allocation2 + $0x1070] sm:$0xff] }
 0x236   : > { %2247 = vmatpush.msrb.mxu1 %v2028_v6  ;;  %7878 = vmatmul.msk.f32.vlgmr.msra.gmra.mxu2 %vm1317_vm9, %v9544_v59  ;;  %v1998_v5 = vld [vmem:[#allocation2 + $0x1068] sm:$0xff]  ;;  %v2143_v12 = vld [vmem:[#allocation2 + $0x14f0] sm:$0xff] }
 0x237   : > { %1775 = vmatpush.msrb.mxu0 %v1301_v13  ;;  %2284 = vmatpush.msrb.mxu3 %v2133_v45  ;;  %v1891_v6 = vld [vmem:[#allocation2 + $0xd10] sm:$0xff]  ;;  %v1996_v45 = vld [vmem:[#allocation2 + $0x1058] sm:$0xff] }
 0x238   : > { %2364 = vmatpush.msrb.mxu2 %v1942_v21  ;;  %2248 = vmatpush.msrb.mxu1 %v2025_v34  ;;  %v1995_v13 = vld [vmem:[#allocation2 + $0x1050] sm:$0xff]  ;;  %v2140_v21 = vld [vmem:[#allocation2 + $0x14d8] sm:$0xff] }
 0x239   : > { %1776 = vmatpush.msrb.mxu0 %v1298_v8  ;;  %2285 = vmatpush.msrb.mxu3 %v2130_v41  ;;  %v1888_v34 = vld [vmem:[#allocation2 + $0xcf8] sm:$0xff]  ;;  %v1993_v41 = vld [vmem:[#allocation2 + $0x1040] sm:$0xff] }
 0x23a   : > { %2365 = vmatpush.msrb.mxu2 %v1939_v35  ;;  %2249 = vmatpush.msrb.mxu1 %v2022_v37  ;;  %v1992_v8 = vld [vmem:[#allocation2 + $0x1038] sm:$0xff]  ;;  %v2137_v35 = vld [vmem:[#allocation2 + $0x14c0] sm:$0xff] }
 0x23b   : > { %1777 = vmatpush.msrb.mxu0 %v1295_v46  ;;  %2286 = vmatpush.msrb.mxu3 %v2127_v58  ;;  %v1885_v37 = vld [vmem:[#allocation2 + $0xce0] sm:$0xff]  ;;  %v1990_v58 = vld [vmem:[#allocation2 + $0x1028] sm:$0xff] }
 0x23c   : > { %2366 = vmatpush.msrb.mxu2 %v1936_v54  ;;  %2250 = vmatpush.msrb.mxu1 %v2019_v10  ;;  %v1989_v46 = vld [vmem:[#allocation2 + $0x1020] sm:$0xff]  ;;  %v2134_v54 = vld [vmem:[#allocation2 + $0x14a8] sm:$0xff] }
 0x23d   : > { %1778 = vmatpush.msrb.mxu0 %v1292_v4  ;;  %2287 = vmatpush.msrb.mxu3 %v2124_v24  ;;  %v1882_v10 = vld [vmem:[#allocation2 + $0xcc8] sm:$0xff]  ;;  %v1987_v24 = vld [vmem:[#allocation2 + $0x1010] sm:$0xff] }
 0x23e   : > { %2367 = vmatpush.msrb.mxu2 %v1933_v14  ;;  %2251 = vmatpush.msrb.mxu1 %v2016_v39  ;;  %v1986_v4 = vld [vmem:[#allocation2 + $0x1008] sm:$0xff]  ;;  %v2131_v14 = vld [vmem:[#allocation2 + $0x1490] sm:$0xff] }
 0x23f   : > { %1779 = vmatpush.msrb.mxu0 %v1289_v52  ;;  %2288 = vmatpush.msrb.mxu3 %v2121_v62  ;;  %v1879_v39 = vld [vmem:[#allocation2 + $0xcb0] sm:$0xff]  ;;  %v1984_v62 = vld [vmem:[#allocation2 + $0xff8] sm:$0xff] }
 0x240   : > { %2368 = vmatpush.msrb.mxu2 %v1930_v56  ;;  %2252 = vmatpush.msrb.mxu1 %v2013_v16  ;;  %v1983_v52 = vld [vmem:[#allocation2 + $0xff0] sm:$0xff]  ;;  %v2128_v56 = vld [vmem:[#allocation2 + $0x1478] sm:$0xff] }
 0x241   : > { %1780 = vmatpush.msrb.mxu0 %v1286_v19  ;;  %2289 = vmatpush.msrb.mxu3 %v2118_v0  ;;  %v1876_v16 = vld [vmem:[#allocation2 + $0xc98] sm:$0xff]  ;;  %v1981_v0 = vld [vmem:[#allocation2 + $0xfe0] sm:$0xff] }
 0x242   : > { %2369 = vmatpush.msrb.mxu2 %v1927_v38  ;;  %2253 = vmatpush.msrb.mxu1 %v2010_v42  ;;  %v1980_v19 = vld [vmem:[#allocation2 + $0xfd8] sm:$0xff]  ;;  %v2125_v38 = vld [vmem:[#allocation2 + $0x1460] sm:$0xff] }
 0x243   : > { %1781 = vmatpush.msrb.mxu0 %v1283_v31  ;;  %2290 = vmatpush.msrb.mxu3 %v2115_v43  ;;  %v1873_v42 = vld [vmem:[#allocation2 + $0xc80] sm:$0xff]  ;;  %v1978_v43 = vld [vmem:[#allocation2 + $0xfc8] sm:$0xff] }
 0x244   : > { %2370 = vmatpush.msrb.mxu2 %v1924_v18  ;;  %2254 = vmatpush.msrb.mxu1 %v2007_v3  ;;  %v1977_v31 = vld [vmem:[#allocation2 + $0xfc0] sm:$0xff]  ;;  %v2122_v18 = vld [vmem:[#allocation2 + $0x1448] sm:$0xff] }
 0x245   : > { %1782 = vmatpush.msrb.mxu0 %v1280_v28  ;;  %2291 = vmatpush.msrb.mxu3 %v2112_v40  ;;  %v1870_v3 = vld [vmem:[#allocation2 + $0xc68] sm:$0xff]  ;;  %v1975_v40 = vld [vmem:[#allocation2 + $0xfb0] sm:$0xff] }
 0x246   : > { %2371 = vmatpush.msrb.mxu2 %v1921_v36  ;;  %2255 = vmatpush.msrb.mxu1 %v2004_v25  ;;  %v1974_v28 = vld [vmem:[#allocation2 + $0xfa8] sm:$0xff]  ;;  %v2119_v36 = vld [vmem:[#allocation2 + $0x1430] sm:$0xff] }
 0x247   : > { %1783 = vmatpush.msrb.mxu0 %v1277_v49  ;;  %2256 = vmatmul.f32.vlgmr.msrb.gmra.mxu1 %v9628_v17  ;;  %v1867_v25 = vld [vmem:[#allocation2 + $0xc50] sm:$0xff] }
 0x248   : > { %2292 = vmatpush.msrb.mxu3 %v2109_v32  ;;  %2340 = vmatpush.msra.mxu1 %v1906_v30  ;;  %v1971_v49 = vld [vmem:[#allocation2 + $0xf90] sm:$0xff]  ;;  %v1972_v32 = vld [vmem:[#allocation2 + $0xf98] sm:$0xff] }
 0x249   : > { %2372 = vmatpush.msrb.mxu2 %v1918_v29  ;;  %1784 = vmatpush.msrb.mxu0 %v1274_v47  ;;  %v2116_v30 = vld [vmem:[#allocation2 + $0x1418] sm:$0xff] }
 0x24a   : > { %2293 = vmatpush.msrb.mxu3 %v2106_v2  ;;  %2341 = vmatpush.msra.mxu1 %v1903_v55  ;;  %v1864_v29 = vld [vmem:[#allocation2 + $0xc38] sm:$0xff]  ;;  %v1969_v2 = vld [vmem:[#allocation2 + $0xf80] sm:$0xff] }
 0x24b   : > { %2373 = vmatpush.msrb.mxu2 %v1915_v53  ;;  %1785 = vmatpush.msrb.mxu0 %v1271_v51  ;;  %v1968_v47 = vld [vmem:[#allocation2 + $0xf78] sm:$0xff]  ;;  %v2113_v55 = vld [vmem:[#allocation2 + $0x1400] sm:$0xff] }
 0x24c   : > { %2294 = vmatpush.msrb.mxu3 %v2103_v15  ;;  %2342 = vmatpush.msra.mxu1 %v1900_v60  ;;  %v1861_v53 = vld [vmem:[#allocation2 + $0xc20] sm:$0xff]  ;;  %v1966_v15 = vld [vmem:[#allocation2 + $0xf68] sm:$0xff] }
 0x24d   : > { %2374 = vmatpush.msrb.mxu2 %v1912_v57  ;;  %1786 = vmatpush.msrb.mxu0 %v1268_v7  ;;  %v1965_v51 = vld [vmem:[#allocation2 + $0xf60] sm:$0xff]  ;;  %v2098_v60 = vld [vmem:[#allocation2 + $0x1388] sm:$0xff] }
 0x24e   : > { %2295 = vmatpush.msrb.mxu3 %v2100_v50  ;;  %2343 = vmatpush.msra.mxu1 %v1897_v9  ;;  %v2110_v57 = vld [vmem:[#allocation2 + $0x13e8] sm:$0xff]  ;;  %v1963_v50 = vld [vmem:[#allocation2 + $0xf50] sm:$0xff] }
 0x24f   : > { %2375 = vmatpush.msrb.mxu2 %v1909_v20  ;;  %1787 = vmatmul.f32.vlgmr.msrb.gmra.mxu0 %v9546_v22  ;;  %v1962_v7 = vld [vmem:[#allocation2 + $0xf48] sm:$0xff]  ;;  %v2095_v9 = vld [vmem:[#allocation2 + $0x1370] sm:$0xff] }
 0x250   : > { %2220 = vmatpush.msra.mxu0 %v2001_v61  ;;  %2296 = vmatmul.f32.vlgmr.msrb.gmra.mxu3 %v9546_v22  ;;  %v2107_v20 = vld [vmem:[#allocation2 + $0x13d0] sm:$0xff] }
 0x251   : > { %2376 = vmatmul.f32.vlgmr.msrb.gmra.mxu2 %v9392_v11  ;;  %2380 = vmatpush.msra.mxu3 %v2002_v44  ;;  %v1959_v61 = vld [vmem:[#allocation2 + $0xf30] sm:$0xff]  ;;  %v1960_v44 = vld [vmem:[#allocation2 + $0xf38] sm:$0xff] }
 0x252   : > { %2440 = vmatpush.msra.mxu2 %v2146_v27  ;;  %2344 = vmatpush.msra.mxu1 %v1894_v63  ;;  %v2092_v27 = vld [vmem:[#allocation2 + $0x1358] sm:$0xff] }
 0x253   : > { %2221 = vmatpush.msra.mxu0 %v1998_v5  ;;  %2381 = vmatpush.msra.mxu3 %v1999_v48  ;;  %v2104_v63 = vld [vmem:[#allocation2 + $0x13b8] sm:$0xff]  ;;  %v1957_v48 = vld [vmem:[#allocation2 + $0xf20] sm:$0xff] }
 0x254   : > { %2441 = vmatpush.msra.mxu2 %v2143_v12  ;;  %2345 = vmatpush.msra.mxu1 %v1891_v6  ;;  %v1956_v5 = vld [vmem:[#allocation2 + $0xf18] sm:$0xff]  ;;  %v2089_v12 = vld [vmem:[#allocation2 + $0x1340] sm:$0xff] }
 0x255   : > { %2222 = vmatpush.msra.mxu0 %v1995_v13  ;;  %2382 = vmatpush.msra.mxu3 %v1996_v45  ;;  %v2101_v6 = vld [vmem:[#allocation2 + $0x13a0] sm:$0xff]  ;;  %v1858_v13 = vld [vmem:[#allocation2 + $0xc08] sm:$0xff] }
 0x256   : > { %2442 = vmatpush.msra.mxu2 %v2140_v21  ;;  %2346 = vmatpush.msra.mxu1 %v1888_v34  ;;  %v2149_v45 = vld [vmem:[#allocation2 + $0x1520] sm:$0xf]  ;;  %v2003_v21 = vld [vmem:[#allocation2 + $0x1090] sm:$0xff]  ;;  %v2086_v34 = vld [vmem:[#allocation2 + $0x1328] sm:$0xff] }
 0x257   : > { %2223 = vmatpush.msra.mxu0 %v1992_v8  ;;  %2383 = vmatpush.msra.mxu3 %v1993_v41  ;;  %v1859_v8 = vld [vmem:[#allocation2 + $0xc10] sm:$0xff] }
 0x258   : > { %2443 = vmatpush.msra.mxu2 %v2137_v35  ;;  %2347 = vmatpush.msra.mxu1 %v1885_v37  ;;  %v1855_v41 = vld [vmem:[#allocation2 + $0xbf0] sm:$0xff]  ;;  %v2000_v35 = vld [vmem:[#allocation2 + $0x1078] sm:$0xff] }
 0x259   : > { %2224 = vmatpush.msra.mxu0 %v1989_v46  ;;  %2384 = vmatpush.msra.mxu3 %v1990_v58  ;;  %v2083_v37 = vld [vmem:[#allocation2 + $0x1310] sm:$0xff]  ;;  %v1856_v46 = vld [vmem:[#allocation2 + $0xbf8] sm:$0xff] }
 0x25a   : > { %2444 = vmatpush.msra.mxu2 %v2134_v54  ;;  %2348 = vmatpush.msra.mxu1 %v1882_v10  ;;  %v1852_v58 = vld [vmem:[#allocation2 + $0xbd8] sm:$0xff]  ;;  %v1997_v54 = vld [vmem:[#allocation2 + $0x1060] sm:$0xff] }
 0x25b   : > { %2225 = vmatpush.msra.mxu0 %v1986_v4  ;;  %2385 = vmatpush.msra.mxu3 %v1987_v24  ;;  %v2080_v10 = vld [vmem:[#allocation2 + $0x12f8] sm:$0xff]  ;;  %v1853_v4 = vld [vmem:[#allocation2 + $0xbe0] sm:$0xff] }
 0x25c   : > { %2445 = vmatpush.msra.mxu2 %v2131_v14  ;;  %2349 = vmatpush.msra.mxu1 %v1879_v39  ;;  %v1849_v24 = vld [vmem:[#allocation2 + $0xbc0] sm:$0xff]  ;;  %v1994_v14 = vld [vmem:[#allocation2 + $0x1048] sm:$0xff] }
 0x25d   : > { %2226 = vmatpush.msra.mxu0 %v1983_v52  ;;  %2386 = vmatpush.msra.mxu3 %v1984_v62  ;;  %v2077_v39 = vld [vmem:[#allocation2 + $0x12e0] sm:$0xff]  ;;  %v1850_v52 = vld [vmem:[#allocation2 + $0xbc8] sm:$0xff] }
 0x25e   : > { %2446 = vmatpush.msra.mxu2 %v2128_v56  ;;  %2350 = vmatpush.msra.mxu1 %v1876_v16  ;;  %v1846_v62 = vld [vmem:[#allocation2 + $0xba8] sm:$0xff]  ;;  %v1991_v56 = vld [vmem:[#allocation2 + $0x1030] sm:$0xff] }
 0x25f   : > { %2227 = vmatpush.msra.mxu0 %v1980_v19  ;;  %2387 = vmatpush.msra.mxu3 %v1981_v0  ;;  %v2074_v16 = vld [vmem:[#allocation2 + $0x12c8] sm:$0xff]  ;;  %v1847_v19 = vld [vmem:[#allocation2 + $0xbb0] sm:$0xff] }
 0x260   : > { %2447 = vmatpush.msra.mxu2 %v2125_v38  ;;  %2351 = vmatpush.msra.mxu1 %v1873_v42  ;;  %v1843_v0 = vld [vmem:[#allocation2 + $0xb90] sm:$0xff]  ;;  %v1988_v38 = vld [vmem:[#allocation2 + $0x1018] sm:$0xff] }
 0x261   : > { %2228 = vmatpush.msra.mxu0 %v1977_v31  ;;  %2388 = vmatpush.msra.mxu3 %v1978_v43  ;;  %v2071_v42 = vld [vmem:[#allocation2 + $0x12b0] sm:$0xff]  ;;  %v1844_v31 = vld [vmem:[#allocation2 + $0xb98] sm:$0xff] }
 0x262   : > { %2448 = vmatpush.msra.mxu2 %v2122_v18  ;;  %2352 = vmatpush.msra.mxu1 %v1870_v3  ;;  %v1840_v43 = vld [vmem:[#allocation2 + $0xb78] sm:$0xff]  ;;  %v1985_v18 = vld [vmem:[#allocation2 + $0x1000] sm:$0xff] }
 0x263   : > { %2229 = vmatpush.msra.mxu0 %v1974_v28  ;;  %2389 = vmatpush.msra.mxu3 %v1975_v40  ;;  %v2068_v3 = vld [vmem:[#allocation2 + $0x1298] sm:$0xff]  ;;  %v1841_v28 = vld [vmem:[#allocation2 + $0xb80] sm:$0xff] }
 0x264   : > { %2449 = vmatpush.msra.mxu2 %v2119_v36  ;;  %2353 = vmatpush.msra.mxu1 %v1867_v25  ;;  %v1837_v40 = vld [vmem:[#allocation2 + $0xb60] sm:$0xff]  ;;  %v1982_v36 = vld [vmem:[#allocation2 + $0xfe8] sm:$0xff] }
 0x265   : > { %2230 = vmatpush.msra.mxu0 %v1971_v49  ;;  %2390 = vmatpush.msra.mxu3 %v1972_v32  ;;  %v2065_v25 = vld [vmem:[#allocation2 + $0x1280] sm:$0xff]  ;;  %v1838_v49 = vld [vmem:[#allocation2 + $0xb68] sm:$0xff] }
 0x266   : > { %2450 = vmatpush.msra.mxu2 %v2116_v30  ;;  %2354 = vmatpush.msra.mxu1 %v1864_v29  ;;  %v1834_v32 = vld [vmem:[#allocation2 + $0xb48] sm:$0xff]  ;;  %v1979_v30 = vld [vmem:[#allocation2 + $0xfd0] sm:$0xff] }
 0x267   : > { %2231 = vmatpush.msra.mxu0 %v1968_v47  ;;  %2391 = vmatpush.msra.mxu3 %v1969_v2  ;;  %v2062_v29 = vld [vmem:[#allocation2 + $0x1268] sm:$0xff]  ;;  %v1835_v47 = vld [vmem:[#allocation2 + $0xb50] sm:$0xff] }
 0x268   : > { %2451 = vmatpush.msra.mxu2 %v2113_v55  ;;  %2355 = vmatpush.msra.mxu1 %v1861_v53  ;;  %v1831_v2 = vld [vmem:[#allocation2 + $0xb30] sm:$0xff]  ;;  %v1976_v55 = vld [vmem:[#allocation2 + $0xfb8] sm:$0xff] }
 0x269   : > { %2232 = vmatpush.msra.mxu0 %v1965_v51  ;;  %2356 = vmatmul.f32.vlgmr.msra.gmra.mxu1 %v9473_v1  ;;  %v2059_v53 = vld [vmem:[#allocation2 + $0x1250] sm:$0xff]  ;;  %v1832_v51 = vld [vmem:[#allocation2 + $0xb38] sm:$0xff] }
 0x26a   : > { %2392 = vmatpush.msra.mxu3 %v1966_v15  ;;  %2420 = vmatpush.msrb.mxu1 %v2098_v60  ;;  %v1828_v15 = vld [vmem:[#allocation2 + $0xb18] sm:$0xff]  ;;  %v1973_v60 = vld [vmem:[#allocation2 + $0xfa0] sm:$0xff] }
 0x26b   : > { %2452 = vmatpush.msra.mxu2 %v2110_v57  ;;  %2233 = vmatpush.msra.mxu0 %v1962_v7  ;;  %v2056_v57 = vld [vmem:[#allocation2 + $0x1238] sm:$0xff]  ;;  %v1829_v7 = vld [vmem:[#allocation2 + $0xb20] sm:$0xff] }
 0x26c   : > { %2393 = vmatpush.msra.mxu3 %v1963_v50  ;;  %2421 = vmatpush.msrb.mxu1 %v2095_v9  ;;  %v1825_v50 = vld [vmem:[#allocation2 + $0xb00] sm:$0xff]  ;;  %v1970_v9 = vld [vmem:[#allocation2 + $0xf88] sm:$0xff] }
 0x26d   : > { %2453 = vmatpush.msra.mxu2 %v2107_v20  ;;  %2234 = vmatpush.msra.mxu0 %v1959_v61  ;;  %v2053_v20 = vld [vmem:[#allocation2 + $0x1220] sm:$0xff]  ;;  %v1826_v61 = vld [vmem:[#allocation2 + $0xb08] sm:$0xff] }
 0x26e   : > { %2394 = vmatpush.msra.mxu3 %v1960_v44  ;;  %2422 = vmatpush.msrb.mxu1 %v2092_v27  ;;  %v1822_v44 = vld [vmem:[#allocation2 + $0xae8] sm:$0xff]  ;;  %v1955_v27 = vld [vmem:[#allocation2 + $0xf10] sm:$0xff] }
 0x26f   : > { %2454 = vmatpush.msra.mxu2 %v2104_v63  ;;  %2235 = vmatpush.msra.mxu0 %v1956_v5  ;;  %v1967_v63 = vld [vmem:[#allocation2 + $0xf70] sm:$0xff] }
 0x270   : > { %2395 = vmatpush.msra.mxu3 %v1957_v48  ;;  %2423 = vmatpush.msrb.mxu1 %v2089_v12  ;;  %v1823_v5 = vld [vmem:[#allocation2 + $0xaf0] sm:$0xff]  ;;  %v1952_v12 = vld [vmem:[#allocation2 + $0xef8] sm:$0xff] }
 0x271   : > { %2455 = vmatpush.msra.mxu2 %v2101_v6  ;;  %2236 = vmatmul.f32.vlgmr.msra.gmra.mxu0 %v9457_v33  ;;  %v1819_v48 = vld [vmem:[#allocation2 + $0xad0] sm:$0xff]  ;;  %v1964_v6 = vld [vmem:[#allocation2 + $0xf58] sm:$0xff] }
 0x272   : > { %2320 = vmatpush.msrb.mxu0 %v1858_v13  ;;  %2396 = vmatmul.f32.vlgmr.msra.gmra.mxu3 %v9457_v33  ;;  %v1820_v13 = vld [vmem:[#allocation2 + $0xad8] sm:$0xff] }
 0x273   : > { %2456 = vmatmul.f32.vlgmr.msra.gmra.mxu2 %v9546_v22  ;;  %7879 = vmatpush.msk.msrb.mxu3 %vm1321_vm8, %v2149_v45  ;;  %v1816_v45 = vld [vmem:[#allocation2 + $0xab8] sm:$0xff] }
 0x274   : > { %2540 = vmatpush.msrb.mxu2 %v2003_v21  ;;  %2424 = vmatpush.msrb.mxu1 %v2086_v34  ;;  %v1949_v21 = vld [vmem:[#allocation2 + $0xee0] sm:$0xff] }
 0x275   : > { %2480 = vmatpush.msra.mxu3 %v1859_v8  ;;  %2321 = vmatpush.msrb.mxu0 %v1855_v41  ;;  %v1961_v34 = vld [vmem:[#allocation2 + $0xf40] sm:$0xff] }
 0x276   : > { %2541 = vmatpush.msrb.mxu2 %v2000_v35  ;;  %2425 = vmatpush.msrb.mxu1 %v2083_v37  ;;  %v1817_v8 = vld [vmem:[#allocation2 + $0xac0] sm:$0xff]  ;;  %v1946_v35 = vld [vmem:[#allocation2 + $0xec8] sm:$0xff] }
 0x277   : > { %2481 = vmatpush.msra.mxu3 %v1856_v46  ;;  %2322 = vmatpush.msrb.mxu0 %v1852_v58  ;;  %v1813_v41 = vld [vmem:[#allocation2 + $0xaa0] sm:$0xff]  ;;  %v1958_v37 = vld [vmem:[#allocation2 + $0xf28] sm:$0xff] }
 0x278   : > { %2542 = vmatpush.msrb.mxu2 %v1997_v54  ;;  %2426 = vmatpush.msrb.mxu1 %v2080_v10  ;;  %v1814_v46 = vld [vmem:[#allocation2 + $0xaa8] sm:$0xff]  ;;  %v1943_v10 = vld [vmem:[#allocation2 + $0xeb0] sm:$0xff] }
 0x279   : > { %2482 = vmatpush.msra.mxu3 %v1853_v4  ;;  %2323 = vmatpush.msrb.mxu0 %v1849_v24  ;;  %v2050_v58 = vld [vmem:[#allocation2 + $0x1208] sm:$0xff]  ;;  %v2051_v4 = vld [vmem:[#allocation2 + $0x1210] sm:$0xff]  ;;  %v2689_v24 = vld [vmem:[#allocation2 + $0x1698] sm:$0xff] }
 0x27a   : > { %2543 = vmatpush.msrb.mxu2 %v1994_v14  ;;  %2427 = vmatpush.msrb.mxu1 %v2077_v39  ;;  %v2150_v54 = vld [vmem:[#allocation2 + $0x1528] sm:$0xf]  ;;  %v2047_v14 = vld [vmem:[#allocation2 + $0x11f0] sm:$0xff]  ;;  %v1940_v39 = vld [vmem:[#allocation2 + $0xe98] sm:$0xff] }
 0x27b   : > { %2483 = vmatpush.msra.mxu3 %v1850_v52  ;;  %2324 = vmatpush.msrb.mxu0 %v1846_v62  ;;  %v2048_v52 = vld [vmem:[#allocation2 + $0x11f8] sm:$0xff]  ;;  %v2686_v62 = vld [vmem:[#allocation2 + $0x1680] sm:$0xff] }
 0x27c   : > { %7880 = vmatmul.msk.f32.vlgmr.msrb.gmra.mxu3 %vm1317_vm9, %v9544_v59  ;;  %2544 = vmatpush.msrb.mxu2 %v1991_v56  ;;  %v2044_v56 = vld [vmem:[#allocation2 + $0x11d8] sm:$0xff] }
 0x27d   : > { %2428 = vmatpush.msrb.mxu1 %v2074_v16  ;;  %2484 = vmatpush.msra.mxu3 %v1847_v19  ;;  %v1937_v16 = vld [vmem:[#allocation2 + $0xe80] sm:$0xff] }
 0x27e   : > { %2325 = vmatpush.msrb.mxu0 %v1843_v0  ;;  %2545 = vmatpush.msrb.mxu2 %v1988_v38  ;;  %v2045_v19 = vld [vmem:[#allocation2 + $0x11e0] sm:$0xff]  ;;  %v2683_v0 = vld [vmem:[#allocation2 + $0x1668] sm:$0xff] }
 0x27f   : > { %2429 = vmatpush.msrb.mxu1 %v2071_v42  ;;  %2485 = vmatpush.msra.mxu3 %v1844_v31  ;;  %v2041_v38 = vld [vmem:[#allocation2 + $0x11c0] sm:$0xff]  ;;  %v1934_v42 = vld [vmem:[#allocation2 + $0xe68] sm:$0xff] }
 0x280   : > { %2326 = vmatpush.msrb.mxu0 %v1840_v43  ;;  %2546 = vmatpush.msrb.mxu2 %v1985_v18  ;;  %v2042_v31 = vld [vmem:[#allocation2 + $0x11c8] sm:$0xff]  ;;  %v2680_v43 = vld [vmem:[#allocation2 + $0x1650] sm:$0xff] }
 0x281   : > { %2430 = vmatpush.msrb.mxu1 %v2068_v3  ;;  %2486 = vmatpush.msra.mxu3 %v1841_v28  ;;  %v2038_v18 = vld [vmem:[#allocation2 + $0x11a8] sm:$0xff]  ;;  %v1931_v3 = vld [vmem:[#allocation2 + $0xe50] sm:$0xff] }
 0x282   : > { %2327 = vmatpush.msrb.mxu0 %v1837_v40  ;;  %2547 = vmatpush.msrb.mxu2 %v1982_v36  ;;  %v2039_v28 = vld [vmem:[#allocation2 + $0x11b0] sm:$0xff]  ;;  %v2677_v40 = vld [vmem:[#allocation2 + $0x1638] sm:$0xff] }
 0x283   : > { %2431 = vmatpush.msrb.mxu1 %v2065_v25  ;;  %2487 = vmatpush.msra.mxu3 %v1838_v49  ;;  %v2035_v36 = vld [vmem:[#allocation2 + $0x1190] sm:$0xff]  ;;  %v1928_v25 = vld [vmem:[#allocation2 + $0xe38] sm:$0xff] }
 0x284   : > { %2328 = vmatpush.msrb.mxu0 %v1834_v32  ;;  %2548 = vmatpush.msrb.mxu2 %v1979_v30  ;;  %v2036_v49 = vld [vmem:[#allocation2 + $0x1198] sm:$0xff]  ;;  %v2674_v32 = vld [vmem:[#allocation2 + $0x1620] sm:$0xff] }
 0x285   : > { %2432 = vmatpush.msrb.mxu1 %v2062_v29  ;;  %2488 = vmatpush.msra.mxu3 %v1835_v47  ;;  %v2032_v30 = vld [vmem:[#allocation2 + $0x1178] sm:$0xff]  ;;  %v1925_v29 = vld [vmem:[#allocation2 + $0xe20] sm:$0xff] }
 0x286   : > { %2329 = vmatpush.msrb.mxu0 %v1831_v2  ;;  %2549 = vmatpush.msrb.mxu2 %v1976_v55  ;;  %v2033_v47 = vld [vmem:[#allocation2 + $0x1180] sm:$0xff]  ;;  %v2671_v2 = vld [vmem:[#allocation2 + $0x1608] sm:$0xff] }
 0x287   : > { %2433 = vmatpush.msrb.mxu1 %v2059_v53  ;;  %2489 = vmatpush.msra.mxu3 %v1832_v51  ;;  %v2029_v55 = vld [vmem:[#allocation2 + $0x1160] sm:$0xff]  ;;  %v1922_v53 = vld [vmem:[#allocation2 + $0xe08] sm:$0xff] }
 0x288   : > { %2330 = vmatpush.msrb.mxu0 %v1828_v15  ;;  %2550 = vmatpush.msrb.mxu2 %v1973_v60  ;;  %v2030_v51 = vld [vmem:[#allocation2 + $0x1168] sm:$0xff]  ;;  %v2668_v15 = vld [vmem:[#allocation2 + $0x15f0] sm:$0xff] }
 0x289   : > { %2434 = vmatpush.msrb.mxu1 %v2056_v57  ;;  %2490 = vmatpush.msra.mxu3 %v1829_v7  ;;  %v2026_v60 = vld [vmem:[#allocation2 + $0x1148] sm:$0xff]  ;;  %v1919_v57 = vld [vmem:[#allocation2 + $0xdf0] sm:$0xff] }
 0x28a   : > { %2331 = vmatpush.msrb.mxu0 %v1825_v50  ;;  %2551 = vmatpush.msrb.mxu2 %v1970_v9  ;;  %v2027_v7 = vld [vmem:[#allocation2 + $0x1150] sm:$0xff]  ;;  %v2665_v50 = vld [vmem:[#allocation2 + $0x15d8] sm:$0xff] }
 0x28b   : > { %2435 = vmatpush.msrb.mxu1 %v2053_v20  ;;  %2491 = vmatpush.msra.mxu3 %v1826_v61  ;;  %v2023_v9 = vld [vmem:[#allocation2 + $0x1130] sm:$0xff]  ;;  %v1916_v20 = vld [vmem:[#allocation2 + $0xdd8] sm:$0xff] }
 0x28c   : > { %2332 = vmatpush.msrb.mxu0 %v1822_v44  ;;  %2436 = vmatmul.f32.vlgmr.msrb.gmra.mxu1 %v9600_v23  ;;  %v2024_v61 = vld [vmem:[#allocation2 + $0x1138] sm:$0xff]  ;;  %v2662_v44 = vld [vmem:[#allocation2 + $0x15c0] sm:$0xff] }
 0x28d   : > { %2520 = vmatpush.msra.mxu1 %v1955_v27  ;;  %2552 = vmatpush.msrb.mxu2 %v1967_v63  ;;  %v2020_v27 = vld [vmem:[#allocation2 + $0x1118] sm:$0xff]  ;;  %v1913_v63 = vld [vmem:[#allocation2 + $0xdc0] sm:$0xff] }
 0x28e   : > { %2492 = vmatpush.msra.mxu3 %v1823_v5  ;;  %2333 = vmatpush.msrb.mxu0 %v1819_v48  ;;  %v2021_v5 = vld [vmem:[#allocation2 + $0x1120] sm:$0xff]  ;;  %v2659_v48 = vld [vmem:[#allocation2 + $0x15a8] sm:$0xff] }
 0x28f   : > { %2521 = vmatpush.msra.mxu1 %v1952_v12  ;;  %2553 = vmatpush.msrb.mxu2 %v1964_v6  ;;  %v2017_v12 = vld [vmem:[#allocation2 + $0x1100] sm:$0xff]  ;;  %v1910_v6 = vld [vmem:[#allocation2 + $0xda8] sm:$0xff] }
 0x290   : > { %2493 = vmatpush.msra.mxu3 %v1820_v13  ;;  %2334 = vmatpush.msrb.mxu0 %v1816_v45  ;;  %v2018_v13 = vld [vmem:[#allocation2 + $0x1108] sm:$0xff]  ;;  %v2656_v45 = vld [vmem:[#allocation2 + $0x1590] sm:$0xff] }
 0x291   : > { %2522 = vmatpush.msra.mxu1 %v1949_v21  ;;  %2554 = vmatpush.msrb.mxu2 %v1961_v34  ;;  %v2014_v21 = vld [vmem:[#allocation2 + $0x10e8] sm:$0xff]  ;;  %v2147_v34 = vld [vmem:[#allocation2 + $0x1510] sm:$0xff] }
 0x292   : > { %2494 = vmatpush.msra.mxu3 %v1817_v8  ;;  %2335 = vmatpush.msrb.mxu0 %v1813_v41  ;;  %v2015_v8 = vld [vmem:[#allocation2 + $0x10f0] sm:$0xff]  ;;  %v2653_v41 = vld [vmem:[#allocation2 + $0x1578] sm:$0xff] }
 0x293   : > { %2523 = vmatpush.msra.mxu1 %v1946_v35  ;;  %2555 = vmatpush.msrb.mxu2 %v1958_v37  ;;  %v2011_v35 = vld [vmem:[#allocation2 + $0x10d0] sm:$0xff]  ;;  %v2144_v37 = vld [vmem:[#allocation2 + $0x14f8] sm:$0xff] }
 0x294   : > { %2336 = vmatmul.f32.vlgmr.msrb.gmra.mxu0 %v9614_v26  ;;  %2495 = vmatpush.msra.mxu3 %v1814_v46  ;;  %v2012_v46 = vld [vmem:[#allocation2 + $0x10d8] sm:$0xff] }
 0x295   : > { %2400 = vmatpush.msra.mxu0 %v2050_v58  ;;  %2556 = vmatmul.f32.vlgmr.msrb.gmra.mxu2 %v9457_v33  ;;  %v2650_v58 = vld [vmem:[#allocation2 + $0x1560] sm:$0xff] }
 0x296   : > { %7881 = vmatpush.msk.msra.mxu2 %vm1321_vm8, %v2150_v54  ;;  %2496 = vmatmul.f32.vlgmr.msra.gmra.mxu3 %v9614_v26  ;;  %v2008_v54 = vld [vmem:[#allocation2 + $0x10b8] sm:$0xff] }
 0x297   : > { %2524 = vmatpush.msra.mxu1 %v1943_v10  ;;  %2560 = vmatpush.msrb.mxu3 %v2051_v4  ;;  %v2141_v10 = vld [vmem:[#allocation2 + $0x14e0] sm:$0xff] }
 0x298   : > { %2992 = vmatpush.msrb.mxu2 %v2689_v24  ;;  %2401 = vmatpush.msra.mxu0 %v2047_v14  ;;  %v2009_v4 = vld [vmem:[#allocation2 + $0x10c0] sm:$0xff]  ;;  %v2647_v24 = vld [vmem:[#allocation2 + $0x1548] sm:$0xff] }
 0x299   : > { %2525 = vmatpush.msra.mxu1 %v1940_v39  ;;  %2561 = vmatpush.msrb.mxu3 %v2048_v52  ;;  %v2005_v14 = vld [vmem:[#allocation2 + $0x10a0] sm:$0xff]  ;;  %v2138_v39 = vld [vmem:[#allocation2 + $0x14c8] sm:$0xff]  ;;  %v1907_v52 = vld [vmem:[#allocation2 + $0xd90] sm:$0xff] }
 0x29a   : > { %2993 = vmatpush.msrb.mxu2 %v2686_v62  ;;  %2402 = vmatpush.msra.mxu0 %v2044_v56  ;;  %v2006_v62 = vld [vmem:[#allocation2 + $0x10a8] sm:$0xff]  ;;  %v2644_v56 = vld [vmem:[#allocation2 + $0x1530] sm:$0xff] }
 0x29b   : > { %2526 = vmatpush.msra.mxu1 %v1937_v16  ;;  %2562 = vmatpush.msrb.mxu3 %v2045_v19  ;;  %v2135_v16 = vld [vmem:[#allocation2 + $0x14b0] sm:$0xff]  ;;  %v2737_v19 = vld [vmem:[#allocation2 + $0x1818] sm:$0xff] }
 0x29c   : > { %2994 = vmatpush.msrb.mxu2 %v2683_v0  ;;  %2403 = vmatpush.msra.mxu0 %v2041_v38  ;;  %v2881_v0 = vld [vmem:[#allocation2 + $0x1c98] sm:$0xff] }
 0x29d   : > { %2527 = vmatpush.msra.mxu1 %v1934_v42  ;;  %2563 = vmatpush.msrb.mxu3 %v2042_v31  ;;  %v1904_v38 = vld [vmem:[#allocation2 + $0xd78] sm:$0xff]  ;;  %v2734_v31 = vld [vmem:[#allocation2 + $0x1800] sm:$0xff] }
 0x29e   : > { %2995 = vmatpush.msrb.mxu2 %v2680_v43  ;;  %2404 = vmatpush.msra.mxu0 %v2038_v18  ;;  %v2132_v42 = vld [vmem:[#allocation2 + $0x1498] sm:$0xff]  ;;  %v2878_v43 = vld [vmem:[#allocation2 + $0x1c80] sm:$0xff] }
 0x29f   : > { %7882 = vmatmul.msk.f32.vlgmr.msra.gmra.mxu2 %vm1317_vm9, %v9544_v59  ;;  %2528 = vmatpush.msra.mxu1 %v1931_v3  ;;  %v1901_v18 = vld [vmem:[#allocation2 + $0xd60] sm:$0xff] }
 0x2a0   : > { %2564 = vmatpush.msrb.mxu3 %v2039_v28  ;;  %2996 = vmatpush.msrb.mxu2 %v2677_v40  ;;  %v2129_v3 = vld [vmem:[#allocation2 + $0x1480] sm:$0xff]  ;;  %v2731_v28 = vld [vmem:[#allocation2 + $0x17e8] sm:$0xff] }
 0x2a1   : > { %2405 = vmatpush.msra.mxu0 %v2035_v36  ;;  %2529 = vmatpush.msra.mxu1 %v1928_v25  ;;  %v2875_v40 = vld [vmem:[#allocation2 + $0x1c68] sm:$0xff] }
 0x2a2   : > { %2565 = vmatpush.msrb.mxu3 %v2036_v49  ;;  %2997 = vmatpush.msrb.mxu2 %v2674_v32  ;;  %v1898_v36 = vld [vmem:[#allocation2 + $0xd48] sm:$0xff]  ;;  %v2728_v49 = vld [vmem:[#allocation2 + $0x17d0] sm:$0xff] }
 0x2a3   : > { %2406 = vmatpush.msra.mxu0 %v2032_v30  ;;  %2530 = vmatpush.msra.mxu1 %v1925_v29  ;;  %v2126_v25 = vld [vmem:[#allocation2 + $0x1468] sm:$0xff]  ;;  %v2872_v32 = vld [vmem:[#allocation2 + $0x1c50] sm:$0xff] }
 0x2a4   : > { %2566 = vmatpush.msrb.mxu3 %v2033_v47  ;;  %2998 = vmatpush.msrb.mxu2 %v2671_v2  ;;  %v1895_v30 = vld [vmem:[#allocation2 + $0xd30] sm:$0xff]  ;;  %v2725_v47 = vld [vmem:[#allocation2 + $0x17b8] sm:$0xff] }
 0x2a5   : > { %2407 = vmatpush.msra.mxu0 %v2029_v55  ;;  %2531 = vmatpush.msra.mxu1 %v1922_v53  ;;  %v2123_v29 = vld [vmem:[#allocation2 + $0x1450] sm:$0xff]  ;;  %v2869_v2 = vld [vmem:[#allocation2 + $0x1c38] sm:$0xff] }
 0x2a6   : > { %2567 = vmatpush.msrb.mxu3 %v2030_v51  ;;  %2999 = vmatpush.msrb.mxu2 %v2668_v15  ;;  %v1892_v55 = vld [vmem:[#allocation2 + $0xd18] sm:$0xff]  ;;  %v2722_v51 = vld [vmem:[#allocation2 + $0x17a0] sm:$0xff] }
 0x2a7   : > { %2408 = vmatpush.msra.mxu0 %v2026_v60  ;;  %2532 = vmatpush.msra.mxu1 %v1919_v57  ;;  %v2120_v53 = vld [vmem:[#allocation2 + $0x1438] sm:$0xff]  ;;  %v2866_v15 = vld [vmem:[#allocation2 + $0x1c20] sm:$0xff] }
 0x2a8   : > { %2568 = vmatpush.msrb.mxu3 %v2027_v7  ;;  %3000 = vmatpush.msrb.mxu2 %v2665_v50  ;;  %v1889_v60 = vld [vmem:[#allocation2 + $0xd00] sm:$0xff]  ;;  %v2719_v7 = vld [vmem:[#allocation2 + $0x1788] sm:$0xff] }
 0x2a9   : > { %2409 = vmatpush.msra.mxu0 %v2023_v9  ;;  %2533 = vmatpush.msra.mxu1 %v1916_v20  ;;  %v2117_v57 = vld [vmem:[#allocation2 + $0x1420] sm:$0xff]  ;;  %v2863_v50 = vld [vmem:[#allocation2 + $0x1c08] sm:$0xff] }
 0x2aa   : > { %2569 = vmatpush.msrb.mxu3 %v2024_v61  ;;  %3001 = vmatpush.msrb.mxu2 %v2662_v44  ;;  %v1886_v9 = vld [vmem:[#allocation2 + $0xce8] sm:$0xff]  ;;  %v2716_v61 = vld [vmem:[#allocation2 + $0x1770] sm:$0xff] }
 0x2ab   : > { %2410 = vmatpush.msra.mxu0 %v2020_v27  ;;  %2534 = vmatpush.msra.mxu1 %v1913_v63  ;;  %v2114_v20 = vld [vmem:[#allocation2 + $0x1408] sm:$0xff]  ;;  %v2860_v44 = vld [vmem:[#allocation2 + $0x1bf0] sm:$0xff] }
 0x2ac   : > { %2570 = vmatpush.msrb.mxu3 %v2021_v5  ;;  %3002 = vmatpush.msrb.mxu2 %v2659_v48  ;;  %v1883_v27 = vld [vmem:[#allocation2 + $0xcd0] sm:$0xff]  ;;  %v2713_v5 = vld [vmem:[#allocation2 + $0x1758] sm:$0xff] }
 0x2ad   : > { %2411 = vmatpush.msra.mxu0 %v2017_v12  ;;  %2535 = vmatpush.msra.mxu1 %v1910_v6  ;;  %v2111_v63 = vld [vmem:[#allocation2 + $0x13f0] sm:$0xff]  ;;  %v2857_v48 = vld [vmem:[#allocation2 + $0x1bd8] sm:$0xff] }
 0x2ae   : > { %2571 = vmatpush.msrb.mxu3 %v2018_v13  ;;  %3003 = vmatpush.msrb.mxu2 %v2656_v45  ;;  %v1880_v12 = vld [vmem:[#allocation2 + $0xcb8] sm:$0xff]  ;;  %v2710_v13 = vld [vmem:[#allocation2 + $0x1740] sm:$0xff] }
 0x2af   : > { %2412 = vmatpush.msra.mxu0 %v2014_v21  ;;  %2536 = vmatmul.f32.vlgmr.msra.gmra.mxu1 %v9392_v11  ;;  %v2108_v6 = vld [vmem:[#allocation2 + $0x13d8] sm:$0xff]  ;;  %v2854_v45 = vld [vmem:[#allocation2 + $0x1bc0] sm:$0xff] }
 0x2b0   : > { %2600 = vmatpush.msrb.mxu1 %v2147_v34  ;;  %2572 = vmatpush.msrb.mxu3 %v2015_v8  ;;  %v1877_v21 = vld [vmem:[#allocation2 + $0xca0] sm:$0xff]  ;;  %v2707_v8 = vld [vmem:[#allocation2 + $0x1728] sm:$0xff] }
 0x2b1   : > { %3004 = vmatpush.msrb.mxu2 %v2653_v41  ;;  %2413 = vmatpush.msra.mxu0 %v2011_v35  ;;  %v2105_v34 = vld [vmem:[#allocation2 + $0x13c0] sm:$0xff]  ;;  %v2851_v41 = vld [vmem:[#allocation2 + $0x1ba8] sm:$0xff] }
 0x2b2   : > { %2601 = vmatpush.msrb.mxu1 %v2144_v37  ;;  %2573 = vmatpush.msrb.mxu3 %v2012_v46  ;;  %v1874_v35 = vld [vmem:[#allocation2 + $0xc88] sm:$0xff]  ;;  %v2704_v46 = vld [vmem:[#allocation2 + $0x1710] sm:$0xff] }
 0x2b3   : > { %3005 = vmatpush.msrb.mxu2 %v2650_v58  ;;  %2414 = vmatpush.msra.mxu0 %v2008_v54  ;;  %v2102_v37 = vld [vmem:[#allocation2 + $0x13a8] sm:$0xff]  ;;  %v2848_v58 = vld [vmem:[#allocation2 + $0x1b90] sm:$0xff] }
 0x2b4   : > { %2602 = vmatpush.msrb.mxu1 %v2141_v10  ;;  %2574 = vmatpush.msrb.mxu3 %v2009_v4  ;;  %v1871_v54 = vld [vmem:[#allocation2 + $0xc70] sm:$0xff]  ;;  %v2833_v10 = vld [vmem:[#allocation2 + $0x1b18] sm:$0xff] }
 0x2b5   : > { %3006 = vmatpush.msrb.mxu2 %v2647_v24  ;;  %2415 = vmatpush.msra.mxu0 %v2005_v14  ;;  %v2701_v4 = vld [vmem:[#allocation2 + $0x16f8] sm:$0xff] }
 0x2b6   : > { %2603 = vmatpush.msrb.mxu1 %v2138_v39  ;;  %2416 = vmatmul.f32.vlgmr.msra.gmra.mxu0 %v9628_v17  ;;  %v2845_v24 = vld [vmem:[#allocation2 + $0x1b78] sm:$0xff]  ;;  %v2830_v39 = vld [vmem:[#allocation2 + $0x1b00] sm:$0xff] }
 0x2b7   : > { %2500 = vmatpush.msrb.mxu0 %v1907_v52  ;;  %2575 = vmatpush.msrb.mxu3 %v2006_v62  ;;  %v1868_v14 = vld [vmem:[#allocation2 + $0xc58] sm:$0xff]  ;;  %v2698_v52 = vld [vmem:[#allocation2 + $0x16e0] sm:$0xff] }
 0x2b8   : > { %3007 = vmatpush.msrb.mxu2 %v2644_v56  ;;  %2576 = vmatmul.f32.vlgmr.msrb.gmra.mxu3 %v9628_v17  ;;  %v2842_v62 = vld [vmem:[#allocation2 + $0x1b60] sm:$0xff] }
 0x2b9   : > { %2604 = vmatpush.msrb.mxu1 %v2135_v16  ;;  %3008 = vmatmul.f32.vlgmr.msrb.gmra.mxu2 %v9614_v26  ;;  %v1865_v56 = vld [vmem:[#allocation2 + $0xc40] sm:$0xff]  ;;  %v2827_v16 = vld [vmem:[#allocation2 + $0x1ae8] sm:$0xff] }
 0x2ba   : > { %3012 = vmatpush.msra.mxu3 %v2737_v19  ;;  %3072 = vmatpush.msra.mxu2 %v2881_v0  ;;  %v2695_v19 = vld [vmem:[#allocation2 + $0x16c8] sm:$0xff] }
 0x2bb   : > { %2501 = vmatpush.msrb.mxu0 %v1904_v38  ;;  %2605 = vmatpush.msrb.mxu1 %v2132_v42  ;;  %v2839_v0 = vld [vmem:[#allocation2 + $0x1b48] sm:$0xff]  ;;  %v2824_v42 = vld [vmem:[#allocation2 + $0x1ad0] sm:$0xff] }
 0x2bc   : > { %3013 = vmatpush.msra.mxu3 %v2734_v31  ;;  %3073 = vmatpush.msra.mxu2 %v2878_v43  ;;  %v1862_v38 = vld [vmem:[#allocation2 + $0xc28] sm:$0xff]  ;;  %v2099_v31 = vld [vmem:[#allocation2 + $0x1390] sm:$0xff] }
 0x2bd   : > { %2502 = vmatpush.msrb.mxu0 %v1901_v18  ;;  %2606 = vmatpush.msrb.mxu1 %v2129_v3  ;;  %v2692_v43 = vld [vmem:[#allocation2 + $0x16b0] sm:$0xff]  ;;  %v2821_v3 = vld [vmem:[#allocation2 + $0x1ab8] sm:$0xff] }
 0x2be   : > { %3014 = vmatpush.msra.mxu3 %v2731_v28  ;;  %3074 = vmatpush.msra.mxu2 %v2875_v40  ;;  %v2836_v18 = vld [vmem:[#allocation2 + $0x1b30] sm:$0xff]  ;;  %v2929_v28 = vld [vmem:[#allocation2 + $0x1e18] sm:$0xff]  ;;  %v2738_v40 = vld [vmem:[#allocation2 + $0x1820] sm:$0xff] }
 0x2bf   : > { %2503 = vmatpush.msrb.mxu0 %v1898_v36  ;;  %2607 = vmatpush.msrb.mxu1 %v2126_v25  ;;  %v2096_v36 = vld [vmem:[#allocation2 + $0x1378] sm:$0xff]  ;;  %v2818_v25 = vld [vmem:[#allocation2 + $0x1aa0] sm:$0xff] }
 0x2c0   : > { %3015 = vmatpush.msra.mxu3 %v2728_v49  ;;  %3075 = vmatpush.msra.mxu2 %v2872_v32  ;;  %v2926_v49 = vld [vmem:[#allocation2 + $0x1e00] sm:$0xff]  ;;  %v2735_v32 = vld [vmem:[#allocation2 + $0x1808] sm:$0xff] }
 0x2c1   : > { %2504 = vmatpush.msrb.mxu0 %v1895_v30  ;;  %2608 = vmatpush.msrb.mxu1 %v2123_v29  ;;  %v2093_v30 = vld [vmem:[#allocation2 + $0x1360] sm:$0xff]  ;;  %v2815_v29 = vld [vmem:[#allocation2 + $0x1a88] sm:$0xff] }
 0x2c2   : > { %3016 = vmatpush.msra.mxu3 %v2725_v47  ;;  %3076 = vmatpush.msra.mxu2 %v2869_v2  ;;  %v2923_v47 = vld [vmem:[#allocation2 + $0x1de8] sm:$0xff]  ;;  %v2732_v2 = vld [vmem:[#allocation2 + $0x17f0] sm:$0xff] }
 0x2c3   : > { %2505 = vmatpush.msrb.mxu0 %v1892_v55  ;;  %2609 = vmatpush.msrb.mxu1 %v2120_v53  ;;  %v2090_v55 = vld [vmem:[#allocation2 + $0x1348] sm:$0xff]  ;;  %v2812_v53 = vld [vmem:[#allocation2 + $0x1a70] sm:$0xff] }
 0x2c4   : > { %3017 = vmatpush.msra.mxu3 %v2722_v51  ;;  %3077 = vmatpush.msra.mxu2 %v2866_v15  ;;  %v2920_v51 = vld [vmem:[#allocation2 + $0x1dd0] sm:$0xff]  ;;  %v2729_v15 = vld [vmem:[#allocation2 + $0x17d8] sm:$0xff] }
 0x2c5   : > { %2506 = vmatpush.msrb.mxu0 %v1889_v60  ;;  %2610 = vmatpush.msrb.mxu1 %v2117_v57  ;;  %v2087_v60 = vld [vmem:[#allocation2 + $0x1330] sm:$0xff]  ;;  %v2809_v57 = vld [vmem:[#allocation2 + $0x1a58] sm:$0xff] }
 0x2c6   : > { %3018 = vmatpush.msra.mxu3 %v2719_v7  ;;  %3078 = vmatpush.msra.mxu2 %v2863_v50  ;;  %v2917_v7 = vld [vmem:[#allocation2 + $0x1db8] sm:$0xff]  ;;  %v2726_v50 = vld [vmem:[#allocation2 + $0x17c0] sm:$0xff] }
 0x2c7   : > { %2507 = vmatpush.msrb.mxu0 %v1886_v9  ;;  %2611 = vmatpush.msrb.mxu1 %v2114_v20  ;;  %v2084_v9 = vld [vmem:[#allocation2 + $0x1318] sm:$0xff]  ;;  %v2806_v20 = vld [vmem:[#allocation2 + $0x1a40] sm:$0xff] }
 0x2c8   : > { %3019 = vmatpush.msra.mxu3 %v2716_v61  ;;  %3079 = vmatpush.msra.mxu2 %v2860_v44  ;;  %v2914_v61 = vld [vmem:[#allocation2 + $0x1da0] sm:$0xff]  ;;  %v2723_v44 = vld [vmem:[#allocation2 + $0x17a8] sm:$0xff] }
 0x2c9   : > { %2508 = vmatpush.msrb.mxu0 %v1883_v27  ;;  %2612 = vmatpush.msrb.mxu1 %v2111_v63  ;;  %v2081_v27 = vld [vmem:[#allocation2 + $0x1300] sm:$0xff]  ;;  %v2803_v63 = vld [vmem:[#allocation2 + $0x1a28] sm:$0xff] }
 0x2ca   : > { %3020 = vmatpush.msra.mxu3 %v2713_v5  ;;  %3080 = vmatpush.msra.mxu2 %v2857_v48  ;;  %v2911_v5 = vld [vmem:[#allocation2 + $0x1d88] sm:$0xff]  ;;  %v2720_v48 = vld [vmem:[#allocation2 + $0x1790] sm:$0xff] }
 0x2cb   : > { %2509 = vmatpush.msrb.mxu0 %v1880_v12  ;;  %2613 = vmatpush.msrb.mxu1 %v2108_v6  ;;  %v2078_v12 = vld [vmem:[#allocation2 + $0x12e8] sm:$0xff]  ;;  %v2800_v6 = vld [vmem:[#allocation2 + $0x1a10] sm:$0xff] }
 0x2cc   : > { %3021 = vmatpush.msra.mxu3 %v2710_v13  ;;  %3081 = vmatpush.msra.mxu2 %v2854_v45  ;;  %v2908_v13 = vld [vmem:[#allocation2 + $0x1d70] sm:$0xff]  ;;  %v2717_v45 = vld [vmem:[#allocation2 + $0x1778] sm:$0xff] }
 0x2cd   : > { %2510 = vmatpush.msrb.mxu0 %v1877_v21  ;;  %2614 = vmatpush.msrb.mxu1 %v2105_v34  ;;  %v2075_v21 = vld [vmem:[#allocation2 + $0x12d0] sm:$0xff]  ;;  %v2797_v34 = vld [vmem:[#allocation2 + $0x19f8] sm:$0xff] }
 0x2ce   : > { %3022 = vmatpush.msra.mxu3 %v2707_v8  ;;  %3082 = vmatpush.msra.mxu2 %v2851_v41  ;;  %v2905_v8 = vld [vmem:[#allocation2 + $0x1d58] sm:$0xff]  ;;  %v2714_v41 = vld [vmem:[#allocation2 + $0x1760] sm:$0xff] }
 0x2cf   : > { %2511 = vmatpush.msrb.mxu0 %v1874_v35  ;;  %2615 = vmatpush.msrb.mxu1 %v2102_v37  ;;  %v2072_v35 = vld [vmem:[#allocation2 + $0x12b8] sm:$0xff]  ;;  %v2794_v37 = vld [vmem:[#allocation2 + $0x19e0] sm:$0xff] }
 0x2d0   : > { %3023 = vmatpush.msra.mxu3 %v2704_v46  ;;  %3083 = vmatpush.msra.mxu2 %v2848_v58  ;;  %v2902_v46 = vld [vmem:[#allocation2 + $0x1d40] sm:$0xff]  ;;  %v2711_v58 = vld [vmem:[#allocation2 + $0x1748] sm:$0xff] }
 0x2d1   : > { %2512 = vmatpush.msrb.mxu0 %v1871_v54  ;;  %2616 = vmatmul.f32.vlgmr.msrb.gmra.mxu1 %v9546_v22  ;;  %v2069_v54 = vld [vmem:[#allocation2 + $0x12a0] sm:$0xff] }
 0x2d2   : > { %3052 = vmatpush.msra.mxu1 %v2833_v10  ;;  %3024 = vmatpush.msra.mxu3 %v2701_v4  ;;  %v2791_v10 = vld [vmem:[#allocation2 + $0x19c8] sm:$0xff] }
 0x2d3   : > { %3084 = vmatpush.msra.mxu2 %v2845_v24  ;;  %2513 = vmatpush.msrb.mxu0 %v1868_v14  ;;  %v2899_v4 = vld [vmem:[#allocation2 + $0x1d28] sm:$0xff]  ;;  %v2708_v24 = vld [vmem:[#allocation2 + $0x1730] sm:$0xff] }
 0x2d4   : > { %3053 = vmatpush.msra.mxu1 %v2830_v39  ;;  %3025 = vmatpush.msra.mxu3 %v2698_v52  ;;  %v2066_v14 = vld [vmem:[#allocation2 + $0x1288] sm:$0xff]  ;;  %v2788_v39 = vld [vmem:[#allocation2 + $0x19b0] sm:$0xff] }
 0x2d5   : > { %3085 = vmatpush.msra.mxu2 %v2842_v62  ;;  %2514 = vmatpush.msrb.mxu0 %v1865_v56  ;;  %v2896_v52 = vld [vmem:[#allocation2 + $0x1d10] sm:$0xff]  ;;  %v2705_v62 = vld [vmem:[#allocation2 + $0x1718] sm:$0xff] }
 0x2d6   : > { %3054 = vmatpush.msra.mxu1 %v2827_v16  ;;  %3026 = vmatpush.msra.mxu3 %v2695_v19  ;;  %v2063_v56 = vld [vmem:[#allocation2 + $0x1270] sm:$0xff]  ;;  %v2893_v19 = vld [vmem:[#allocation2 + $0x1cf8] sm:$0xff] }
 0x2d7   : > { %3086 = vmatpush.msra.mxu2 %v2839_v0  ;;  %2515 = vmatpush.msrb.mxu0 %v1862_v38  ;;  %v2980_v16 = vld [vmem:[#allocation2 + $0x1fb0] sm:$0xf]  ;;  %v2690_v0 = vld [vmem:[#allocation2 + $0x16a0] sm:$0xff] }
 0x2d8   : > { %3055 = vmatpush.msra.mxu1 %v2824_v42  ;;  %2516 = vmatmul.f32.vlgmr.msrb.gmra.mxu0 %v9473_v1  ;;  %v2702_v38 = vld [vmem:[#allocation2 + $0x1700] sm:$0xff]  ;;  %v2060_v42 = vld [vmem:[#allocation2 + $0x1258] sm:$0xff] }
 0x2d9   : > { %2580 = vmatpush.msra.mxu0 %v2099_v31  ;;  %3027 = vmatpush.msra.mxu3 %v2692_v43  ;;  %v2890_v31 = vld [vmem:[#allocation2 + $0x1ce0] sm:$0xff]  ;;  %v2687_v43 = vld [vmem:[#allocation2 + $0x1688] sm:$0xff] }
 0x2da   : > { %3087 = vmatpush.msra.mxu2 %v2836_v18  ;;  %3028 = vmatmul.f32.vlgmr.msra.gmra.mxu3 %v9473_v1  ;;  %v2699_v18 = vld [vmem:[#allocation2 + $0x16e8] sm:$0xff] }
 0x2db   : > { %3056 = vmatpush.msra.mxu1 %v2821_v3  ;;  %3088 = vmatmul.f32.vlgmr.msra.gmra.mxu2 %v9628_v17  ;;  %v2057_v3 = vld [vmem:[#allocation2 + $0x1240] sm:$0xff] }
 0x2dc   : > { %3092 = vmatpush.msrb.mxu3 %v2929_v28  ;;  %3172 = vmatpush.msrb.mxu2 %v2738_v40  ;;  %v2887_v28 = vld [vmem:[#allocation2 + $0x1cc8] sm:$0xff]  ;;  %v2684_v40 = vld [vmem:[#allocation2 + $0x1670] sm:$0xff] }
 0x2dd   : > { %2581 = vmatpush.msra.mxu0 %v2096_v36  ;;  %3057 = vmatpush.msra.mxu1 %v2818_v25  ;;  %v2696_v36 = vld [vmem:[#allocation2 + $0x16d0] sm:$0xff]  ;;  %v2054_v25 = vld [vmem:[#allocation2 + $0x1228] sm:$0xff] }
 0x2de   : > { %3093 = vmatpush.msrb.mxu3 %v2926_v49  ;;  %3173 = vmatpush.msrb.mxu2 %v2735_v32  ;;  %v2884_v49 = vld [vmem:[#allocation2 + $0x1cb0] sm:$0xff]  ;;  %v2681_v32 = vld [vmem:[#allocation2 + $0x1658] sm:$0xff] }
 0x2df   : > { %2582 = vmatpush.msra.mxu0 %v2093_v30  ;;  %3058 = vmatpush.msra.mxu1 %v2815_v29  ;;  %v2785_v30 = vld [vmem:[#allocation2 + $0x1998] sm:$0xff] }
 0x2e0   : > { %3094 = vmatpush.msrb.mxu3 %v2923_v47  ;;  %3174 = vmatpush.msrb.mxu2 %v2732_v2  ;;  %v2693_v29 = vld [vmem:[#allocation2 + $0x16b8] sm:$0xff]  ;;  %v2786_v47 = vld [vmem:[#allocation2 + $0x19a0] sm:$0xff] }
 0x2e1   : > { %2583 = vmatpush.msra.mxu0 %v2090_v55  ;;  %3059 = vmatpush.msra.mxu1 %v2812_v53  ;;  %v2930_v2 = vld [vmem:[#allocation2 + $0x1e20] sm:$0xff] }
 0x2e2   : > { %3095 = vmatpush.msrb.mxu3 %v2920_v51  ;;  %3175 = vmatpush.msrb.mxu2 %v2729_v15  ;;  %v2782_v55 = vld [vmem:[#allocation2 + $0x1980] sm:$0xff]  ;;  %v2783_v51 = vld [vmem:[#allocation2 + $0x1988] sm:$0xff] }
 0x2e3   : > { %2584 = vmatpush.msra.mxu0 %v2087_v60  ;;  %3060 = vmatpush.msra.mxu1 %v2809_v57  ;;  %v2678_v53 = vld [vmem:[#allocation2 + $0x1640] sm:$0xff]  ;;  %v2927_v15 = vld [vmem:[#allocation2 + $0x1e08] sm:$0xff] }
 0x2e4   : > { %3096 = vmatpush.msrb.mxu3 %v2917_v7  ;;  %3176 = vmatpush.msrb.mxu2 %v2726_v50  ;;  %v2779_v60 = vld [vmem:[#allocation2 + $0x1968] sm:$0xff]  ;;  %v2780_v7 = vld [vmem:[#allocation2 + $0x1970] sm:$0xff] }
 0x2e5   : > { %2585 = vmatpush.msra.mxu0 %v2084_v9  ;;  %3061 = vmatpush.msra.mxu1 %v2806_v20  ;;  %v2675_v57 = vld [vmem:[#allocation2 + $0x1628] sm:$0xff]  ;;  %v2924_v50 = vld [vmem:[#allocation2 + $0x1df0] sm:$0xff] }
 0x2e6   : > { %3097 = vmatpush.msrb.mxu3 %v2914_v61  ;;  %3177 = vmatpush.msrb.mxu2 %v2723_v44  ;;  %v2776_v9 = vld [vmem:[#allocation2 + $0x1950] sm:$0xff]  ;;  %v2777_v61 = vld [vmem:[#allocation2 + $0x1958] sm:$0xff] }
 0x2e7   : > { %2586 = vmatpush.msra.mxu0 %v2081_v27  ;;  %3062 = vmatpush.msra.mxu1 %v2803_v63  ;;  %v2672_v20 = vld [vmem:[#allocation2 + $0x1610] sm:$0xff]  ;;  %v2921_v44 = vld [vmem:[#allocation2 + $0x1dd8] sm:$0xff] }
 0x2e8   : > { %3098 = vmatpush.msrb.mxu3 %v2911_v5  ;;  %3178 = vmatpush.msrb.mxu2 %v2720_v48  ;;  %v2773_v27 = vld [vmem:[#allocation2 + $0x1938] sm:$0xff]  ;;  %v2774_v5 = vld [vmem:[#allocation2 + $0x1940] sm:$0xff] }
 0x2e9   : > { %2587 = vmatpush.msra.mxu0 %v2078_v12  ;;  %3063 = vmatpush.msra.mxu1 %v2800_v6  ;;  %v2669_v63 = vld [vmem:[#allocation2 + $0x15f8] sm:$0xff]  ;;  %v2918_v48 = vld [vmem:[#allocation2 + $0x1dc0] sm:$0xff] }
 0x2ea   : > { %3099 = vmatpush.msrb.mxu3 %v2908_v13  ;;  %3179 = vmatpush.msrb.mxu2 %v2717_v45  ;;  %v2770_v12 = vld [vmem:[#allocation2 + $0x1920] sm:$0xff]  ;;  %v2771_v13 = vld [vmem:[#allocation2 + $0x1928] sm:$0xff] }
 0x2eb   : > { %2588 = vmatpush.msra.mxu0 %v2075_v21  ;;  %3064 = vmatpush.msra.mxu1 %v2797_v34  ;;  %v2666_v6 = vld [vmem:[#allocation2 + $0x15e0] sm:$0xff]  ;;  %v2915_v45 = vld [vmem:[#allocation2 + $0x1da8] sm:$0xff] }
 0x2ec   : > { %3100 = vmatpush.msrb.mxu3 %v2905_v8  ;;  %3180 = vmatpush.msrb.mxu2 %v2714_v41  ;;  %v2767_v21 = vld [vmem:[#allocation2 + $0x1908] sm:$0xff]  ;;  %v2768_v8 = vld [vmem:[#allocation2 + $0x1910] sm:$0xff] }
 0x2ed   : > { %2589 = vmatpush.msra.mxu0 %v2072_v35  ;;  %3065 = vmatpush.msra.mxu1 %v2794_v37  ;;  %v2663_v34 = vld [vmem:[#allocation2 + $0x15c8] sm:$0xff]  ;;  %v2912_v41 = vld [vmem:[#allocation2 + $0x1d90] sm:$0xff] }
 0x2ee   : > { %3101 = vmatpush.msrb.mxu3 %v2902_v46  ;;  %3181 = vmatpush.msrb.mxu2 %v2711_v58  ;;  %v2764_v35 = vld [vmem:[#allocation2 + $0x18f0] sm:$0xff]  ;;  %v2765_v46 = vld [vmem:[#allocation2 + $0x18f8] sm:$0xff] }
 0x2ef   : > { %2590 = vmatpush.msra.mxu0 %v2069_v54  ;;  %3066 = vmatpush.msra.mxu1 %v2791_v10  ;;  %v2660_v37 = vld [vmem:[#allocation2 + $0x15b0] sm:$0xff]  ;;  %v2909_v58 = vld [vmem:[#allocation2 + $0x1d78] sm:$0xff] }
 0x2f0   : > { %3102 = vmatpush.msrb.mxu3 %v2899_v4  ;;  %3182 = vmatpush.msrb.mxu2 %v2708_v24  ;;  %v2761_v54 = vld [vmem:[#allocation2 + $0x18d8] sm:$0xff]  ;;  %v2762_v4 = vld [vmem:[#allocation2 + $0x18e0] sm:$0xff] }
 0x2f1   : > { %2591 = vmatpush.msra.mxu0 %v2066_v14  ;;  %3067 = vmatpush.msra.mxu1 %v2788_v39  ;;  %v2657_v10 = vld [vmem:[#allocation2 + $0x1598] sm:$0xff]  ;;  %v2906_v24 = vld [vmem:[#allocation2 + $0x1d60] sm:$0xff] }
 0x2f2   : > { %3103 = vmatpush.msrb.mxu3 %v2896_v52  ;;  %3183 = vmatpush.msrb.mxu2 %v2705_v62  ;;  %v2758_v14 = vld [vmem:[#allocation2 + $0x18c0] sm:$0xff]  ;;  %v2759_v52 = vld [vmem:[#allocation2 + $0x18c8] sm:$0xff] }
 0x2f3   : > { %2592 = vmatpush.msra.mxu0 %v2063_v56  ;;  %3068 = vmatmul.f32.vlgmr.msra.gmra.mxu1 %v9457_v33  ;;  %v2654_v39 = vld [vmem:[#allocation2 + $0x1580] sm:$0xff]  ;;  %v2903_v62 = vld [vmem:[#allocation2 + $0x1d48] sm:$0xff] }
 0x2f4   : > { %7883 = vmatpush.msk.msrb.mxu1 %vm1321_vm8, %v2980_v16  ;;  %3104 = vmatpush.msrb.mxu3 %v2893_v19  ;;  %v2755_v56 = vld [vmem:[#allocation2 + $0x18a8] sm:$0xff]  ;;  %v2756_v19 = vld [vmem:[#allocation2 + $0x18b0] sm:$0xff] }
 0x2f5   : > { %3184 = vmatpush.msrb.mxu2 %v2702_v38  ;;  %2593 = vmatpush.msra.mxu0 %v2060_v42  ;;  %v2651_v16 = vld [vmem:[#allocation2 + $0x1568] sm:$0xff]  ;;  %v2752_v38 = vld [vmem:[#allocation2 + $0x1890] sm:$0xff] }
 0x2f6   : > { %3152 = vmatpush.msra.mxu1 %v2690_v0  ;;  %3105 = vmatpush.msrb.mxu3 %v2890_v31  ;;  %v2900_v0 = vld [vmem:[#allocation2 + $0x1d30] sm:$0xff]  ;;  %v2753_v31 = vld [vmem:[#allocation2 + $0x1898] sm:$0xff] }
 0x2f7   : > { %3185 = vmatpush.msrb.mxu2 %v2699_v18  ;;  %2594 = vmatpush.msra.mxu0 %v2057_v3  ;;  %v2648_v42 = vld [vmem:[#allocation2 + $0x1550] sm:$0xff]  ;;  %v2749_v18 = vld [vmem:[#allocation2 + $0x1878] sm:$0xff] }
 0x2f8   : > { %3153 = vmatpush.msra.mxu1 %v2687_v43  ;;  %3106 = vmatpush.msrb.mxu3 %v2887_v28  ;;  %v2897_v43 = vld [vmem:[#allocation2 + $0x1d18] sm:$0xff]  ;;  %v2750_v28 = vld [vmem:[#allocation2 + $0x1880] sm:$0xff] }
 0x2f9   : > { %3186 = vmatpush.msrb.mxu2 %v2696_v36  ;;  %2595 = vmatpush.msra.mxu0 %v2054_v25  ;;  %v2645_v3 = vld [vmem:[#allocation2 + $0x1538] sm:$0xff]  ;;  %v2882_v36 = vld [vmem:[#allocation2 + $0x1ca0] sm:$0xff] }
 0x2fa   : > { %3154 = vmatpush.msra.mxu1 %v2684_v40  ;;  %3107 = vmatpush.msrb.mxu3 %v2884_v49  ;;  %v2894_v40 = vld [vmem:[#allocation2 + $0x1d00] sm:$0xff]  ;;  %v2747_v49 = vld [vmem:[#allocation2 + $0x1868] sm:$0xff] }
 0x2fb   : > { %2596 = vmatmul.f32.vlgmr.msra.gmra.mxu0 %v9600_v23  ;;  %3187 = vmatpush.msrb.mxu2 %v2693_v29  ;;  %v2746_v25 = vld [vmem:[#allocation2 + $0x1860] sm:$0xff]  ;;  %v2743_v29 = vld [vmem:[#allocation2 + $0x1848] sm:$0xff] }
 0x2fc   : > { %3155 = vmatpush.msra.mxu1 %v2681_v32  ;;  %3032 = vmatpush.msrb.mxu0 %v2785_v30  ;;  %v2891_v32 = vld [vmem:[#allocation2 + $0x1ce8] sm:$0xff] }
 0x2fd   : > { %3108 = vmatmul.f32.vlgmr.msrb.gmra.mxu3 %v9600_v23  ;;  %7884 = vmatmul.msk.f32.vlgmr.msrb.gmra.mxu1 %vm1317_vm9, %v9544_v59  ;;  %v2879_v30 = vld [vmem:[#allocation2 + $0x1c88] sm:$0xff] }
 0x2fe   : > { %3188 = vmatmul.f32.vlgmr.msrb.gmra.mxu2 %v9473_v1  ;;  %3192 = vmatpush.msra.mxu3 %v2786_v47  ;;  %v2744_v47 = vld [vmem:[#allocation2 + $0x1850] sm:$0xff] }
 0x2ff   : > { %3252 = vmatpush.msra.mxu2 %v2930_v2  ;;  %3033 = vmatpush.msrb.mxu0 %v2782_v55  ;;  %v2888_v2 = vld [vmem:[#allocation2 + $0x1cd0] sm:$0xff] }
 0x300   : > { %3156 = vmatpush.msra.mxu1 %v2678_v53  ;;  %3193 = vmatpush.msra.mxu3 %v2783_v51  ;;  %v2876_v55 = vld [vmem:[#allocation2 + $0x1c70] sm:$0xff]  ;;  %v2741_v51 = vld [vmem:[#allocation2 + $0x1838] sm:$0xff] }
 0x301   : > { %3253 = vmatpush.msra.mxu2 %v2927_v15  ;;  %3034 = vmatpush.msrb.mxu0 %v2779_v60  ;;  %v2740_v53 = vld [vmem:[#allocation2 + $0x1830] sm:$0xff]  ;;  %v2977_v15 = vld [vmem:[#allocation2 + $0x1f98] sm:$0xff] }
 0x302   : > { %3157 = vmatpush.msra.mxu1 %v2675_v57  ;;  %3194 = vmatpush.msra.mxu3 %v2780_v7  ;;  %v2873_v60 = vld [vmem:[#allocation2 + $0x1c58] sm:$0xff]  ;;  %v2978_v7 = vld [vmem:[#allocation2 + $0x1fa0] sm:$0xff] }
 0x303   : > { %3254 = vmatpush.msra.mxu2 %v2924_v50  ;;  %3035 = vmatpush.msrb.mxu0 %v2776_v9  ;;  %v2885_v57 = vld [vmem:[#allocation2 + $0x1cb8] sm:$0xff]  ;;  %v2787_v50 = vld [vmem:[#allocation2 + $0x19a8] sm:$0xff]  ;;  %v2974_v9 = vld [vmem:[#allocation2 + $0x1f80] sm:$0xff] }
 0x304   : > { %3158 = vmatpush.msra.mxu1 %v2672_v20  ;;  %3195 = vmatpush.msra.mxu3 %v2777_v61  ;;  %v2870_v20 = vld [vmem:[#allocation2 + $0x1c40] sm:$0xff]  ;;  %v2975_v61 = vld [vmem:[#allocation2 + $0x1f88] sm:$0xff] }
 0x305   : > { %3255 = vmatpush.msra.mxu2 %v2921_v44  ;;  %3036 = vmatpush.msrb.mxu0 %v2773_v27  ;;  %v2784_v44 = vld [vmem:[#allocation2 + $0x1990] sm:$0xff]  ;;  %v2971_v27 = vld [vmem:[#allocation2 + $0x1f68] sm:$0xff] }
 0x306   : > { %3159 = vmatpush.msra.mxu1 %v2669_v63  ;;  %3196 = vmatpush.msra.mxu3 %v2774_v5  ;;  %v2867_v63 = vld [vmem:[#allocation2 + $0x1c28] sm:$0xff]  ;;  %v2972_v5 = vld [vmem:[#allocation2 + $0x1f70] sm:$0xff] }
 0x307   : > { %3256 = vmatpush.msra.mxu2 %v2918_v48  ;;  %3037 = vmatpush.msrb.mxu0 %v2770_v12  ;;  %v2781_v48 = vld [vmem:[#allocation2 + $0x1978] sm:$0xff]  ;;  %v2968_v12 = vld [vmem:[#allocation2 + $0x1f50] sm:$0xff] }
 0x308   : > { %3160 = vmatpush.msra.mxu1 %v2666_v6  ;;  %3197 = vmatpush.msra.mxu3 %v2771_v13  ;;  %v2864_v6 = vld [vmem:[#allocation2 + $0x1c10] sm:$0xff]  ;;  %v2969_v13 = vld [vmem:[#allocation2 + $0x1f58] sm:$0xff] }
 0x309   : > { %3257 = vmatpush.msra.mxu2 %v2915_v45  ;;  %3038 = vmatpush.msrb.mxu0 %v2767_v21  ;;  %v2778_v45 = vld [vmem:[#allocation2 + $0x1960] sm:$0xff]  ;;  %v2965_v21 = vld [vmem:[#allocation2 + $0x1f38] sm:$0xff] }
 0x30a   : > { %3161 = vmatpush.msra.mxu1 %v2663_v34  ;;  %3198 = vmatpush.msra.mxu3 %v2768_v8  ;;  %v2861_v34 = vld [vmem:[#allocation2 + $0x1bf8] sm:$0xff]  ;;  %v2966_v8 = vld [vmem:[#allocation2 + $0x1f40] sm:$0xff] }
 0x30b   : > { %3258 = vmatpush.msra.mxu2 %v2912_v41  ;;  %3039 = vmatpush.msrb.mxu0 %v2764_v35  ;;  %v2775_v41 = vld [vmem:[#allocation2 + $0x1948] sm:$0xff]  ;;  %v2962_v35 = vld [vmem:[#allocation2 + $0x1f20] sm:$0xff] }
 0x30c   : > { %3162 = vmatpush.msra.mxu1 %v2660_v37  ;;  %3199 = vmatpush.msra.mxu3 %v2765_v46  ;;  %v2858_v37 = vld [vmem:[#allocation2 + $0x1be0] sm:$0xff]  ;;  %v2963_v46 = vld [vmem:[#allocation2 + $0x1f28] sm:$0xff] }
 0x30d   : > { %3259 = vmatpush.msra.mxu2 %v2909_v58  ;;  %3040 = vmatpush.msrb.mxu0 %v2761_v54  ;;  %v2772_v58 = vld [vmem:[#allocation2 + $0x1930] sm:$0xff]  ;;  %v2959_v54 = vld [vmem:[#allocation2 + $0x1f08] sm:$0xff] }
 0x30e   : > { %3163 = vmatpush.msra.mxu1 %v2657_v10  ;;  %3200 = vmatpush.msra.mxu3 %v2762_v4  ;;  %v2855_v10 = vld [vmem:[#allocation2 + $0x1bc8] sm:$0xff]  ;;  %v2960_v4 = vld [vmem:[#allocation2 + $0x1f10] sm:$0xff] }
 0x30f   : > { %3260 = vmatpush.msra.mxu2 %v2906_v24  ;;  %3041 = vmatpush.msrb.mxu0 %v2758_v14  ;;  %v2769_v24 = vld [vmem:[#allocation2 + $0x1918] sm:$0xff]  ;;  %v2956_v14 = vld [vmem:[#allocation2 + $0x1ef0] sm:$0xff] }
 0x310   : > { %3164 = vmatpush.msra.mxu1 %v2654_v39  ;;  %3201 = vmatpush.msra.mxu3 %v2759_v52  ;;  %v2852_v39 = vld [vmem:[#allocation2 + $0x1bb0] sm:$0xff]  ;;  %v2957_v52 = vld [vmem:[#allocation2 + $0x1ef8] sm:$0xff] }
 0x311   : > { %3261 = vmatpush.msra.mxu2 %v2903_v62  ;;  %3042 = vmatpush.msrb.mxu0 %v2755_v56  ;;  %v2766_v62 = vld [vmem:[#allocation2 + $0x1900] sm:$0xff]  ;;  %v2953_v56 = vld [vmem:[#allocation2 + $0x1ed8] sm:$0xff] }
 0x312   : > { %3165 = vmatpush.msra.mxu1 %v2651_v16  ;;  %3202 = vmatpush.msra.mxu3 %v2756_v19  ;;  %v2849_v16 = vld [vmem:[#allocation2 + $0x1b98] sm:$0xff]  ;;  %v2954_v19 = vld [vmem:[#allocation2 + $0x1ee0] sm:$0xff] }
 0x313   : > { %3262 = vmatpush.msra.mxu2 %v2900_v0  ;;  %3043 = vmatpush.msrb.mxu0 %v2752_v38  ;;  %v2763_v0 = vld [vmem:[#allocation2 + $0x18e8] sm:$0xff]  ;;  %v2950_v38 = vld [vmem:[#allocation2 + $0x1ec0] sm:$0xff] }
 0x314   : > { %3166 = vmatpush.msra.mxu1 %v2648_v42  ;;  %3203 = vmatpush.msra.mxu3 %v2753_v31  ;;  %v2846_v42 = vld [vmem:[#allocation2 + $0x1b80] sm:$0xff]  ;;  %v2951_v31 = vld [vmem:[#allocation2 + $0x1ec8] sm:$0xff] }
 0x315   : > { %3263 = vmatpush.msra.mxu2 %v2897_v43  ;;  %3044 = vmatpush.msrb.mxu0 %v2749_v18  ;;  %v2760_v43 = vld [vmem:[#allocation2 + $0x18d0] sm:$0xff]  ;;  %v2947_v18 = vld [vmem:[#allocation2 + $0x1ea8] sm:$0xff] }
 0x316   : > { %3167 = vmatpush.msra.mxu1 %v2645_v3  ;;  %3204 = vmatpush.msra.mxu3 %v2750_v28  ;;  %v2843_v3 = vld [vmem:[#allocation2 + $0x1b68] sm:$0xff]  ;;  %v2948_v28 = vld [vmem:[#allocation2 + $0x1eb0] sm:$0xff] }
 0x317   : > { %3168 = vmatmul.f32.vlgmr.msra.gmra.mxu1 %v9614_v26  ;;  %3264 = vmatpush.msra.mxu2 %v2894_v40  ;;  %v2757_v40 = vld [vmem:[#allocation2 + $0x18b8] sm:$0xff] }
 0x318   : > { %3232 = vmatpush.msrb.mxu1 %v2882_v36  ;;  %3045 = vmatpush.msrb.mxu0 %v2746_v25  ;;  %v2944_v36 = vld [vmem:[#allocation2 + $0x1e90] sm:$0xff] }
 0x319   : > { %3205 = vmatpush.msra.mxu3 %v2747_v49  ;;  %3265 = vmatpush.msra.mxu2 %v2891_v32  ;;  %v2840_v25 = vld [vmem:[#allocation2 + $0x1b50] sm:$0xff]  ;;  %v2945_v49 = vld [vmem:[#allocation2 + $0x1e98] sm:$0xff]  ;;  %v2754_v32 = vld [vmem:[#allocation2 + $0x18a0] sm:$0xff] }
 0x31a   : > { %3233 = vmatpush.msrb.mxu1 %v2879_v30  ;;  %3046 = vmatpush.msrb.mxu0 %v2743_v29  ;;  %v2941_v30 = vld [vmem:[#allocation2 + $0x1e78] sm:$0xff] }
 0x31b   : > { %3206 = vmatpush.msra.mxu3 %v2744_v47  ;;  %3266 = vmatpush.msra.mxu2 %v2888_v2  ;;  %v2837_v29 = vld [vmem:[#allocation2 + $0x1b38] sm:$0xff]  ;;  %v2942_v47 = vld [vmem:[#allocation2 + $0x1e80] sm:$0xff]  ;;  %v2751_v2 = vld [vmem:[#allocation2 + $0x1888] sm:$0xff] }
 0x31c   : > { %3234 = vmatpush.msrb.mxu1 %v2876_v55  ;;  %3047 = vmatpush.msrb.mxu0 %v2740_v53  ;;  %v2739_v55 = vld [vmem:[#allocation2 + $0x1828] sm:$0xff]  ;;  %v2938_v53 = vld [vmem:[#allocation2 + $0x1e60] sm:$0xff] }
 0x31d   : > { %3048 = vmatmul.f32.vlgmr.msrb.gmra.mxu0 %v9392_v11  ;;  %3207 = vmatpush.msra.mxu3 %v2741_v51  ;;  %v2939_v51 = vld [vmem:[#allocation2 + $0x1e68] sm:$0xff] }
 0x31e   : > { %3112 = vmatpush.msra.mxu0 %v2977_v15  ;;  %3235 = vmatpush.msrb.mxu1 %v2873_v60  ;;  %v2748_v15 = vld [vmem:[#allocation2 + $0x1870] sm:$0xff] }
 0x31f   : > { %3267 = vmatpush.msra.mxu2 %v2885_v57  ;;  %3208 = vmatmul.f32.vlgmr.msra.gmra.mxu3 %v9392_v11  ;;  %v2736_v60 = vld [vmem:[#allocation2 + $0x1810] sm:$0xff]  ;;  %v2935_v57 = vld [vmem:[#allocation2 + $0x1e48] sm:$0xff] }
 0x320   : > { %3268 = vmatmul.f32.vlgmr.msra.gmra.mxu2 %v9600_v23  ;;  %3272 = vmatpush.msrb.mxu3 %v2978_v7  ;;  %v2936_v7 = vld [vmem:[#allocation2 + $0x1e50] sm:$0xff] }
 0x321   : > { %3352 = vmatpush.msrb.mxu2 %v2787_v50  ;;  %3113 = vmatpush.msra.mxu0 %v2974_v9  ;;  %v2745_v50 = vld [vmem:[#allocation2 + $0x1858] sm:$0xff] }
 0x322   : > { %3236 = vmatpush.msrb.mxu1 %v2870_v20  ;;  %3273 = vmatpush.msrb.mxu3 %v2975_v61  ;;  %v2733_v9 = vld [vmem:[#allocation2 + $0x17f8] sm:$0xff]  ;;  %v2932_v20 = vld [vmem:[#allocation2 + $0x1e30] sm:$0xff] }
 0x323   : > { %3353 = vmatpush.msrb.mxu2 %v2784_v44  ;;  %3114 = vmatpush.msra.mxu0 %v2971_v27  ;;  %v2933_v61 = vld [vmem:[#allocation2 + $0x1e38] sm:$0xff]  ;;  %v2834_v44 = vld [vmem:[#allocation2 + $0x1b20] sm:$0xff] }
 0x324   : > { %3237 = vmatpush.msrb.mxu1 %v2867_v63  ;;  %3274 = vmatpush.msrb.mxu3 %v2972_v5  ;;  %v2730_v27 = vld [vmem:[#allocation2 + $0x17e0] sm:$0xff]  ;;  %v2835_v5 = vld [vmem:[#allocation2 + $0x1b28] sm:$0xff] }
 0x325   : > { %3354 = vmatpush.msrb.mxu2 %v2781_v48  ;;  %3115 = vmatpush.msra.mxu0 %v2968_v12  ;;  %v2742_v63 = vld [vmem:[#allocation2 + $0x1840] sm:$0xff]  ;;  %v2979_v48 = vld [vmem:[#allocation2 + $0x1fa8] sm:$0xff] }
 0x326   : > { %3238 = vmatpush.msrb.mxu1 %v2864_v6  ;;  %3275 = vmatpush.msrb.mxu3 %v2969_v13  ;;  %v2831_v12 = vld [vmem:[#allocation2 + $0x1b08] sm:$0xff]  ;;  %v2832_v13 = vld [vmem:[#allocation2 + $0x1b10] sm:$0xff] }
 0x327   : > { %3355 = vmatpush.msrb.mxu2 %v2778_v45  ;;  %3116 = vmatpush.msra.mxu0 %v2965_v21  ;;  %v2727_v6 = vld [vmem:[#allocation2 + $0x17c8] sm:$0xff]  ;;  %v2976_v45 = vld [vmem:[#allocation2 + $0x1f90] sm:$0xff] }
 0x328   : > { %3239 = vmatpush.msrb.mxu1 %v2861_v34  ;;  %3276 = vmatpush.msrb.mxu3 %v2966_v8  ;;  %v2828_v21 = vld [vmem:[#allocation2 + $0x1af0] sm:$0xff]  ;;  %v2829_v8 = vld [vmem:[#allocation2 + $0x1af8] sm:$0xff] }
 0x329   : > { %3356 = vmatpush.msrb.mxu2 %v2775_v41  ;;  %3117 = vmatpush.msra.mxu0 %v2962_v35  ;;  %v2724_v34 = vld [vmem:[#allocation2 + $0x17b0] sm:$0xff]  ;;  %v2973_v41 = vld [vmem:[#allocation2 + $0x1f78] sm:$0xff] }
 0x32a   : > { %3240 = vmatpush.msrb.mxu1 %v2858_v37  ;;  %3277 = vmatpush.msrb.mxu3 %v2963_v46  ;;  %v2825_v35 = vld [vmem:[#allocation2 + $0x1ad8] sm:$0xff]  ;;  %v2826_v46 = vld [vmem:[#allocation2 + $0x1ae0] sm:$0xff] }
 0x32b   : > { %3357 = vmatpush.msrb.mxu2 %v2772_v58  ;;  %3118 = vmatpush.msra.mxu0 %v2959_v54  ;;  %v2721_v37 = vld [vmem:[#allocation2 + $0x1798] sm:$0xff]  ;;  %v2970_v58 = vld [vmem:[#allocation2 + $0x1f60] sm:$0xff] }
 0x32c   : > { %3241 = vmatpush.msrb.mxu1 %v2855_v10  ;;  %3278 = vmatpush.msrb.mxu3 %v2960_v4  ;;  %v2822_v54 = vld [vmem:[#allocation2 + $0x1ac0] sm:$0xff]  ;;  %v2823_v4 = vld [vmem:[#allocation2 + $0x1ac8] sm:$0xff] }
 0x32d   : > { %3358 = vmatpush.msrb.mxu2 %v2769_v24  ;;  %3119 = vmatpush.msra.mxu0 %v2956_v14  ;;  %v2718_v10 = vld [vmem:[#allocation2 + $0x1780] sm:$0xff]  ;;  %v2967_v24 = vld [vmem:[#allocation2 + $0x1f48] sm:$0xff] }
 0x32e   : > { %3242 = vmatpush.msrb.mxu1 %v2852_v39  ;;  %3279 = vmatpush.msrb.mxu3 %v2957_v52  ;;  %v2819_v14 = vld [vmem:[#allocation2 + $0x1aa8] sm:$0xff]  ;;  %v2820_v52 = vld [vmem:[#allocation2 + $0x1ab0] sm:$0xff] }
 0x32f   : > { %3359 = vmatpush.msrb.mxu2 %v2766_v62  ;;  %3120 = vmatpush.msra.mxu0 %v2953_v56  ;;  %v2715_v39 = vld [vmem:[#allocation2 + $0x1768] sm:$0xff]  ;;  %v2964_v62 = vld [vmem:[#allocation2 + $0x1f30] sm:$0xff] }
 0x330   : > { %3243 = vmatpush.msrb.mxu1 %v2849_v16  ;;  %3280 = vmatpush.msrb.mxu3 %v2954_v19  ;;  %v2816_v56 = vld [vmem:[#allocation2 + $0x1a90] sm:$0xff]  ;;  %v2817_v19 = vld [vmem:[#allocation2 + $0x1a98] sm:$0xff] }
 0x331   : > { %3360 = vmatpush.msrb.mxu2 %v2763_v0  ;;  %3121 = vmatpush.msra.mxu0 %v2950_v38  ;;  %v2712_v16 = vld [vmem:[#allocation2 + $0x1750] sm:$0xff]  ;;  %v2961_v0 = vld [vmem:[#allocation2 + $0x1f18] sm:$0xff] }
 0x332   : > { %3244 = vmatpush.msrb.mxu1 %v2846_v42  ;;  %3281 = vmatpush.msrb.mxu3 %v2951_v31  ;;  %v2813_v38 = vld [vmem:[#allocation2 + $0x1a78] sm:$0xff]  ;;  %v2814_v31 = vld [vmem:[#allocation2 + $0x1a80] sm:$0xff] }
 0x333   : > { %3361 = vmatpush.msrb.mxu2 %v2760_v43  ;;  %3122 = vmatpush.msra.mxu0 %v2947_v18  ;;  %v2709_v42 = vld [vmem:[#allocation2 + $0x1738] sm:$0xff]  ;;  %v2958_v43 = vld [vmem:[#allocation2 + $0x1f00] sm:$0xff] }
 0x334   : > { %3245 = vmatpush.msrb.mxu1 %v2843_v3  ;;  %3282 = vmatpush.msrb.mxu3 %v2948_v28  ;;  %v2810_v18 = vld [vmem:[#allocation2 + $0x1a60] sm:$0xff]  ;;  %v2811_v28 = vld [vmem:[#allocation2 + $0x1a68] sm:$0xff] }
 0x335   : > { %3362 = vmatpush.msrb.mxu2 %v2757_v40  ;;  %3123 = vmatpush.msra.mxu0 %v2944_v36  ;;  %v2706_v3 = vld [vmem:[#allocation2 + $0x1720] sm:$0xff]  ;;  %v2955_v40 = vld [vmem:[#allocation2 + $0x1ee8] sm:$0xff] }
 0x336   : > { %3246 = vmatpush.msrb.mxu1 %v2840_v25  ;;  %3283 = vmatpush.msrb.mxu3 %v2945_v49  ;;  %v2807_v36 = vld [vmem:[#allocation2 + $0x1a48] sm:$0xff]  ;;  %v2808_v49 = vld [vmem:[#allocation2 + $0x1a50] sm:$0xff] }
 0x337   : > { %3363 = vmatpush.msrb.mxu2 %v2754_v32  ;;  %3124 = vmatpush.msra.mxu0 %v2941_v30  ;;  %v2703_v25 = vld [vmem:[#allocation2 + $0x1708] sm:$0xff]  ;;  %v2952_v32 = vld [vmem:[#allocation2 + $0x1ed0] sm:$0xff] }
 0x338   : > { %3247 = vmatpush.msrb.mxu1 %v2837_v29  ;;  %3284 = vmatpush.msrb.mxu3 %v2942_v47  ;;  %v2804_v30 = vld [vmem:[#allocation2 + $0x1a30] sm:$0xff]  ;;  %v2805_v47 = vld [vmem:[#allocation2 + $0x1a38] sm:$0xff] }
 0x339   : > { %3248 = vmatmul.f32.vlgmr.msrb.gmra.mxu1 %v9628_v17  ;;  %3364 = vmatpush.msrb.mxu2 %v2751_v2  ;;  %v2700_v29 = vld [vmem:[#allocation2 + $0x16f0] sm:$0xff]  ;;  %v2949_v2 = vld [vmem:[#allocation2 + $0x1eb8] sm:$0xff] }
 0x33a   : > { %3332 = vmatpush.msra.mxu1 %v2739_v55  ;;  %3125 = vmatpush.msra.mxu0 %v2938_v53  ;;  %v2801_v55 = vld [vmem:[#allocation2 + $0x1a18] sm:$0xff] }
 0x33b   : > { %3285 = vmatpush.msrb.mxu3 %v2939_v51  ;;  %3365 = vmatpush.msrb.mxu2 %v2748_v15  ;;  %v2697_v53 = vld [vmem:[#allocation2 + $0x16d8] sm:$0xff]  ;;  %v2802_v51 = vld [vmem:[#allocation2 + $0x1a20] sm:$0xff] }
 0x33c   : > { %3333 = vmatpush.msra.mxu1 %v2736_v60  ;;  %3126 = vmatpush.msra.mxu0 %v2935_v57  ;;  %v2946_v15 = vld [vmem:[#allocation2 + $0x1ea0] sm:$0xff] }
 0x33d   : > { %3286 = vmatpush.msrb.mxu3 %v2936_v7  ;;  %3366 = vmatpush.msrb.mxu2 %v2745_v50  ;;  %v2798_v60 = vld [vmem:[#allocation2 + $0x1a00] sm:$0xff]  ;;  %v2799_v7 = vld [vmem:[#allocation2 + $0x1a08] sm:$0xff] }
 0x33e   : > { %3334 = vmatpush.msra.mxu1 %v2733_v9  ;;  %3127 = vmatpush.msra.mxu0 %v2932_v20  ;;  %v2694_v57 = vld [vmem:[#allocation2 + $0x16c0] sm:$0xff]  ;;  %v2943_v50 = vld [vmem:[#allocation2 + $0x1e88] sm:$0xff] }
 0x33f   : > { %3128 = vmatmul.f32.vlgmr.msra.gmra.mxu0 %v9546_v22  ;;  %3287 = vmatpush.msrb.mxu3 %v2933_v61  ;;  %v2931_v9 = vld [vmem:[#allocation2 + $0x1e28] sm:$0xff]  ;;  %v2796_v61 = vld [vmem:[#allocation2 + $0x19f0] sm:$0xff] }
 0x340   : > { %3212 = vmatpush.msrb.mxu0 %v2834_v44  ;;  %3335 = vmatpush.msra.mxu1 %v2730_v27  ;;  %v2795_v20 = vld [vmem:[#allocation2 + $0x19e8] sm:$0xff]  ;;  %v2940_v44 = vld [vmem:[#allocation2 + $0x1e70] sm:$0xff] }
 0x341   : > { %3367 = vmatpush.msrb.mxu2 %v2742_v63  ;;  %3288 = vmatmul.f32.vlgmr.msrb.gmra.mxu3 %v9546_v22  ;;  %v2928_v27 = vld [vmem:[#allocation2 + $0x1e10] sm:$0xff] }
 0x342   : > { %3368 = vmatmul.f32.vlgmr.msrb.gmra.mxu2 %v9392_v11  ;;  %3372 = vmatpush.msra.mxu3 %v2835_v5  ;;  %v2792_v63 = vld [vmem:[#allocation2 + $0x19d0] sm:$0xff]  ;;  %v2793_v5 = vld [vmem:[#allocation2 + $0x19d8] sm:$0xff] }
 0x343   : > { %3432 = vmatpush.msra.mxu2 %v2979_v48  ;;  %3213 = vmatpush.msrb.mxu0 %v2831_v12  ;;  %v2937_v48 = vld [vmem:[#allocation2 + $0x1e58] sm:$0xff] }
 0x344   : > { %3336 = vmatpush.msra.mxu1 %v2727_v6  ;;  %3373 = vmatpush.msra.mxu3 %v2832_v13  ;;  %v2925_v12 = vld [vmem:[#allocation2 + $0x1df8] sm:$0xff]  ;;  %v2790_v13 = vld [vmem:[#allocation2 + $0x19c0] sm:$0xff] }
 0x345   : > { %3433 = vmatpush.msra.mxu2 %v2976_v45  ;;  %3214 = vmatpush.msrb.mxu0 %v2828_v21  ;;  %v2789_v6 = vld [vmem:[#allocation2 + $0x19b8] sm:$0xff]  ;;  %v2922_v21 = vld [vmem:[#allocation2 + $0x1de0] sm:$0xff] }
 0x346   : > { %3337 = vmatpush.msra.mxu1 %v2724_v34  ;;  %3374 = vmatpush.msra.mxu3 %v2829_v8  ;;  %v2981_v45 = vld [vmem:[#allocation2 + $0x1fb8] sm:$0xf]  ;;  %v2934_v34 = vld [vmem:[#allocation2 + $0x1e40] sm:$0xff]  ;;  %v2691_v8 = vld [vmem:[#allocation2 + $0x16a8] sm:$0xff] }
 0x347   : > { %3434 = vmatpush.msra.mxu2 %v2973_v41  ;;  %3215 = vmatpush.msrb.mxu0 %v2825_v35  ;;  %v2982_v41 = vld [vmem:[#allocation2 + $0x1fc0] sm:$0xf]  ;;  %v3665_v35 = vld [vmem:[#allocation2 + $0x25b0] sm:$0xff] }
 0x348   : > { %3338 = vmatpush.msra.mxu1 %v2721_v37  ;;  %3375 = vmatpush.msra.mxu3 %v2826_v46  ;;  %v2919_v37 = vld [vmem:[#allocation2 + $0x1dc8] sm:$0xff]  ;;  %v3521_v46 = vld [vmem:[#allocation2 + $0x2130] sm:$0xff] }
 0x349   : > { %3435 = vmatpush.msra.mxu2 %v2970_v58  ;;  %3216 = vmatpush.msrb.mxu0 %v2822_v54  ;;  %v2688_v58 = vld [vmem:[#allocation2 + $0x1690] sm:$0xff]  ;;  %v3662_v54 = vld [vmem:[#allocation2 + $0x2598] sm:$0xff] }
 0x34a   : > { %3339 = vmatpush.msra.mxu1 %v2718_v10  ;;  %3376 = vmatpush.msra.mxu3 %v2823_v4  ;;  %v2916_v10 = vld [vmem:[#allocation2 + $0x1db0] sm:$0xff]  ;;  %v3518_v4 = vld [vmem:[#allocation2 + $0x2118] sm:$0xff] }
 0x34b   : > { %3436 = vmatpush.msra.mxu2 %v2967_v24  ;;  %3217 = vmatpush.msrb.mxu0 %v2819_v14  ;;  %v2685_v24 = vld [vmem:[#allocation2 + $0x1678] sm:$0xff]  ;;  %v3659_v14 = vld [vmem:[#allocation2 + $0x2580] sm:$0xff] }
 0x34c   : > { %3340 = vmatpush.msra.mxu1 %v2715_v39  ;;  %3377 = vmatpush.msra.mxu3 %v2820_v52  ;;  %v2913_v39 = vld [vmem:[#allocation2 + $0x1d98] sm:$0xff]  ;;  %v3515_v52 = vld [vmem:[#allocation2 + $0x2100] sm:$0xff] }
 0x34d   : > { %3437 = vmatpush.msra.mxu2 %v2964_v62  ;;  %3218 = vmatpush.msrb.mxu0 %v2816_v56  ;;  %v2682_v62 = vld [vmem:[#allocation2 + $0x1660] sm:$0xff]  ;;  %v3656_v56 = vld [vmem:[#allocation2 + $0x2568] sm:$0xff] }
 0x34e   : > { %3341 = vmatpush.msra.mxu1 %v2712_v16  ;;  %3378 = vmatpush.msra.mxu3 %v2817_v19  ;;  %v2910_v16 = vld [vmem:[#allocation2 + $0x1d80] sm:$0xff]  ;;  %v3512_v19 = vld [vmem:[#allocation2 + $0x20e8] sm:$0xff] }
 0x34f   : > { %3438 = vmatpush.msra.mxu2 %v2961_v0  ;;  %3219 = vmatpush.msrb.mxu0 %v2813_v38  ;;  %v2679_v0 = vld [vmem:[#allocation2 + $0x1648] sm:$0xff]  ;;  %v3653_v38 = vld [vmem:[#allocation2 + $0x2550] sm:$0xff] }
 0x350   : > { %3342 = vmatpush.msra.mxu1 %v2709_v42  ;;  %3379 = vmatpush.msra.mxu3 %v2814_v31  ;;  %v2907_v42 = vld [vmem:[#allocation2 + $0x1d68] sm:$0xff]  ;;  %v3509_v31 = vld [vmem:[#allocation2 + $0x20d0] sm:$0xff] }
 0x351   : > { %3439 = vmatpush.msra.mxu2 %v2958_v43  ;;  %3220 = vmatpush.msrb.mxu0 %v2810_v18  ;;  %v2676_v43 = vld [vmem:[#allocation2 + $0x1630] sm:$0xff]  ;;  %v3650_v18 = vld [vmem:[#allocation2 + $0x2538] sm:$0xff] }
 0x352   : > { %3343 = vmatpush.msra.mxu1 %v2706_v3  ;;  %3380 = vmatpush.msra.mxu3 %v2811_v28  ;;  %v2904_v3 = vld [vmem:[#allocation2 + $0x1d50] sm:$0xff]  ;;  %v3506_v28 = vld [vmem:[#allocation2 + $0x20b8] sm:$0xff] }
 0x353   : > { %3440 = vmatpush.msra.mxu2 %v2955_v40  ;;  %3221 = vmatpush.msrb.mxu0 %v2807_v36  ;;  %v2673_v40 = vld [vmem:[#allocation2 + $0x1618] sm:$0xff]  ;;  %v3647_v36 = vld [vmem:[#allocation2 + $0x2520] sm:$0xff] }
 0x354   : > { %3344 = vmatpush.msra.mxu1 %v2703_v25  ;;  %3381 = vmatpush.msra.mxu3 %v2808_v49  ;;  %v2901_v25 = vld [vmem:[#allocation2 + $0x1d38] sm:$0xff]  ;;  %v3503_v49 = vld [vmem:[#allocation2 + $0x20a0] sm:$0xff] }
 0x355   : > { %3441 = vmatpush.msra.mxu2 %v2952_v32  ;;  %3222 = vmatpush.msrb.mxu0 %v2804_v30  ;;  %v2670_v32 = vld [vmem:[#allocation2 + $0x1600] sm:$0xff]  ;;  %v3644_v30 = vld [vmem:[#allocation2 + $0x2508] sm:$0xff] }
 0x356   : > { %3345 = vmatpush.msra.mxu1 %v2700_v29  ;;  %3382 = vmatpush.msra.mxu3 %v2805_v47  ;;  %v2898_v29 = vld [vmem:[#allocation2 + $0x1d20] sm:$0xff]  ;;  %v3500_v47 = vld [vmem:[#allocation2 + $0x2088] sm:$0xff] }
 0x357   : > { %3442 = vmatpush.msra.mxu2 %v2949_v2  ;;  %3223 = vmatpush.msrb.mxu0 %v2801_v55  ;;  %v2667_v2 = vld [vmem:[#allocation2 + $0x15e8] sm:$0xff]  ;;  %v3641_v55 = vld [vmem:[#allocation2 + $0x24f0] sm:$0xff] }
 0x358   : > { %3346 = vmatpush.msra.mxu1 %v2697_v53  ;;  %3383 = vmatpush.msra.mxu3 %v2802_v51  ;;  %v2895_v53 = vld [vmem:[#allocation2 + $0x1d08] sm:$0xff]  ;;  %v3497_v51 = vld [vmem:[#allocation2 + $0x2070] sm:$0xff] }
 0x359   : > { %3443 = vmatpush.msra.mxu2 %v2946_v15  ;;  %3224 = vmatpush.msrb.mxu0 %v2798_v60  ;;  %v2664_v15 = vld [vmem:[#allocation2 + $0x15d0] sm:$0xff]  ;;  %v3638_v60 = vld [vmem:[#allocation2 + $0x24d8] sm:$0xff] }
 0x35a   : > { %3347 = vmatpush.msra.mxu1 %v2694_v57  ;;  %3384 = vmatpush.msra.mxu3 %v2799_v7  ;;  %v2892_v57 = vld [vmem:[#allocation2 + $0x1cf0] sm:$0xff]  ;;  %v3494_v7 = vld [vmem:[#allocation2 + $0x2058] sm:$0xff] }
 0x35b   : > { %3348 = vmatmul.f32.vlgmr.msra.gmra.mxu1 %v9473_v1  ;;  %3444 = vmatpush.msra.mxu2 %v2943_v50  ;;  %v2661_v50 = vld [vmem:[#allocation2 + $0x15b8] sm:$0xff] }
 0x35c   : > { %3412 = vmatpush.msrb.mxu1 %v2931_v9  ;;  %3225 = vmatpush.msrb.mxu0 %v2795_v20  ;;  %v3635_v9 = vld [vmem:[#allocation2 + $0x24c0] sm:$0xff]  ;;  %v2889_v20 = vld [vmem:[#allocation2 + $0x1cd8] sm:$0xff] }
 0x35d   : > { %3385 = vmatpush.msra.mxu3 %v2796_v61  ;;  %3445 = vmatpush.msra.mxu2 %v2940_v44  ;;  %v3491_v61 = vld [vmem:[#allocation2 + $0x2040] sm:$0xff] }
 0x35e   : > { %3413 = vmatpush.msrb.mxu1 %v2928_v27  ;;  %3226 = vmatpush.msrb.mxu0 %v2792_v63  ;;  %v2658_v44 = vld [vmem:[#allocation2 + $0x15a0] sm:$0xff]  ;;  %v3632_v27 = vld [vmem:[#allocation2 + $0x24a8] sm:$0xff] }
 0x35f   : > { %3386 = vmatpush.msra.mxu3 %v2793_v5  ;;  %3446 = vmatpush.msra.mxu2 %v2937_v48  ;;  %v2886_v63 = vld [vmem:[#allocation2 + $0x1cc0] sm:$0xff]  ;;  %v3488_v5 = vld [vmem:[#allocation2 + $0x2028] sm:$0xff] }
 0x360   : > { %3414 = vmatpush.msrb.mxu1 %v2925_v12  ;;  %3227 = vmatpush.msrb.mxu0 %v2789_v6  ;;  %v2655_v48 = vld [vmem:[#allocation2 + $0x1588] sm:$0xff]  ;;  %v3617_v12 = vld [vmem:[#allocation2 + $0x2430] sm:$0xff] }
 0x361   : > { %3228 = vmatmul.f32.vlgmr.msrb.gmra.mxu0 %v9457_v33  ;;  %3387 = vmatpush.msra.mxu3 %v2790_v13  ;;  %v3629_v6 = vld [vmem:[#allocation2 + $0x2490] sm:$0xff] }
 0x362   : > { %7885 = vmatpush.msk.msra.mxu0 %vm1321_vm8, %v2981_v45  ;;  %3415 = vmatpush.msrb.mxu1 %v2922_v21  ;;  %v3485_v13 = vld [vmem:[#allocation2 + $0x2010] sm:$0xff]  ;;  %v3614_v21 = vld [vmem:[#allocation2 + $0x2418] sm:$0xff] }
 0x363   : > { %3447 = vmatpush.msra.mxu2 %v2934_v34  ;;  %3388 = vmatmul.f32.vlgmr.msra.gmra.mxu3 %v9457_v33  ;;  %v2652_v45 = vld [vmem:[#allocation2 + $0x1570] sm:$0xff]  ;;  %v3626_v34 = vld [vmem:[#allocation2 + $0x2478] sm:$0xff] }
 0x364   : > { %3312 = vmatpush.msrb.mxu0 %v2691_v8  ;;  %3448 = vmatmul.f32.vlgmr.msra.gmra.mxu2 %v9546_v22  ;;  %v3482_v8 = vld [vmem:[#allocation2 + $0x1ff8] sm:$0xff] }
 0x365   : > { %7887 = vmatpush.msk.msrb.mxu3 %vm1321_vm8, %v2982_v41  ;;  %3884 = vmatpush.msrb.mxu2 %v3665_v35  ;;  %v2649_v41 = vld [vmem:[#allocation2 + $0x1558] sm:$0xff]  ;;  %v3611_v35 = vld [vmem:[#allocation2 + $0x2400] sm:$0xff] }
 0x366   : > { %3416 = vmatpush.msrb.mxu1 %v2919_v37  ;;  %3313 = vmatpush.msrb.mxu0 %v2688_v58  ;;  %v3623_v37 = vld [vmem:[#allocation2 + $0x2460] sm:$0xff] }
 0x367   : > { %3824 = vmatpush.msra.mxu3 %v3521_v46  ;;  %3885 = vmatpush.msrb.mxu2 %v3662_v54  ;;  %v3479_v46 = vld [vmem:[#allocation2 + $0x1fe0] sm:$0xff]  ;;  %v3608_v54 = vld [vmem:[#allocation2 + $0x23e8] sm:$0xff] }
 0x368   : > { %3417 = vmatpush.msrb.mxu1 %v2916_v10  ;;  %3314 = vmatpush.msrb.mxu0 %v2685_v24  ;;  %v2646_v58 = vld [vmem:[#allocation2 + $0x1540] sm:$0xff]  ;;  %v3620_v10 = vld [vmem:[#allocation2 + $0x2448] sm:$0xff] }
 0x369   : > { %3825 = vmatpush.msra.mxu3 %v3518_v4  ;;  %3886 = vmatpush.msrb.mxu2 %v3659_v14  ;;  %v3476_v4 = vld [vmem:[#allocation2 + $0x1fc8] sm:$0xff] }
 0x36a   : > { %3418 = vmatpush.msrb.mxu1 %v2913_v39  ;;  %3315 = vmatpush.msrb.mxu0 %v2682_v62  ;;  %v2883_v24 = vld [vmem:[#allocation2 + $0x1ca8] sm:$0xff]  ;;  %v3605_v39 = vld [vmem:[#allocation2 + $0x23d0] sm:$0xff]  ;;  %v3522_v62 = vld [vmem:[#allocation2 + $0x2138] sm:$0xff] }
 0x36b   : > { %3826 = vmatpush.msra.mxu3 %v3515_v52  ;;  %3887 = vmatpush.msrb.mxu2 %v3656_v56  ;;  %v3812_v14 = vld [vmem:[#allocation2 + $0x2a48] sm:$0xf]  ;;  %v3713_v52 = vld [vmem:[#allocation2 + $0x2730] sm:$0xff] }
 0x36c   : > { %7886 = vmatmul.msk.f32.vlgmr.msra.gmra.mxu0 %vm1317_vm9, %v9544_v59  ;;  %3419 = vmatpush.msrb.mxu1 %v2910_v16  ;;  %v2880_v56 = vld [vmem:[#allocation2 + $0x1c90] sm:$0xff]  ;;  %v3602_v16 = vld [vmem:[#allocation2 + $0x23b8] sm:$0xff] }
 0x36d   : > { %3827 = vmatpush.msra.mxu3 %v3512_v19  ;;  %3316 = vmatpush.msrb.mxu0 %v2679_v0  ;;  %v3710_v19 = vld [vmem:[#allocation2 + $0x2718] sm:$0xff]  ;;  %v3519_v0 = vld [vmem:[#allocation2 + $0x2120] sm:$0xff] }
 0x36e   : > { %7888 = vmatmul.msk.f32.vlgmr.msrb.gmra.mxu3 %vm1317_vm9, %v9544_v59  ;;  %3888 = vmatpush.msrb.mxu2 %v3653_v38  ;;  %v2877_v38 = vld [vmem:[#allocation2 + $0x1c78] sm:$0xff] }
 0x36f   : > { %3420 = vmatpush.msrb.mxu1 %v2907_v42  ;;  %3828 = vmatpush.msra.mxu3 %v3509_v31  ;;  %v3599_v42 = vld [vmem:[#allocation2 + $0x23a0] sm:$0xff] }
 0x370   : > { %3317 = vmatpush.msrb.mxu0 %v2676_v43  ;;  %3889 = vmatpush.msrb.mxu2 %v3650_v18  ;;  %v3707_v31 = vld [vmem:[#allocation2 + $0x2700] sm:$0xff]  ;;  %v3516_v43 = vld [vmem:[#allocation2 + $0x2108] sm:$0xff] }
 0x371   : > { %3421 = vmatpush.msrb.mxu1 %v2904_v3  ;;  %3829 = vmatpush.msra.mxu3 %v3506_v28  ;;  %v2874_v18 = vld [vmem:[#allocation2 + $0x1c60] sm:$0xff]  ;;  %v3596_v3 = vld [vmem:[#allocation2 + $0x2388] sm:$0xff] }
 0x372   : > { %3318 = vmatpush.msrb.mxu0 %v2673_v40  ;;  %3890 = vmatpush.msrb.mxu2 %v3647_v36  ;;  %v3704_v28 = vld [vmem:[#allocation2 + $0x26e8] sm:$0xff]  ;;  %v3513_v40 = vld [vmem:[#allocation2 + $0x20f0] sm:$0xff] }
 0x373   : > { %3422 = vmatpush.msrb.mxu1 %v2901_v25  ;;  %3830 = vmatpush.msra.mxu3 %v3503_v49  ;;  %v2871_v36 = vld [vmem:[#allocation2 + $0x1c48] sm:$0xff]  ;;  %v3593_v25 = vld [vmem:[#allocation2 + $0x2370] sm:$0xff] }
 0x374   : > { %3319 = vmatpush.msrb.mxu0 %v2670_v32  ;;  %3891 = vmatpush.msrb.mxu2 %v3644_v30  ;;  %v3701_v49 = vld [vmem:[#allocation2 + $0x26d0] sm:$0xff]  ;;  %v3510_v32 = vld [vmem:[#allocation2 + $0x20d8] sm:$0xff] }
 0x375   : > { %3423 = vmatpush.msrb.mxu1 %v2898_v29  ;;  %3831 = vmatpush.msra.mxu3 %v3500_v47  ;;  %v2868_v30 = vld [vmem:[#allocation2 + $0x1c30] sm:$0xff]  ;;  %v3590_v29 = vld [vmem:[#allocation2 + $0x2358] sm:$0xff] }
 0x376   : > { %3320 = vmatpush.msrb.mxu0 %v2667_v2  ;;  %3892 = vmatpush.msrb.mxu2 %v3641_v55  ;;  %v3698_v47 = vld [vmem:[#allocation2 + $0x26b8] sm:$0xff]  ;;  %v3507_v2 = vld [vmem:[#allocation2 + $0x20c0] sm:$0xff] }
 0x377   : > { %3424 = vmatpush.msrb.mxu1 %v2895_v53  ;;  %3832 = vmatpush.msra.mxu3 %v3497_v51  ;;  %v2865_v55 = vld [vmem:[#allocation2 + $0x1c18] sm:$0xff]  ;;  %v3587_v53 = vld [vmem:[#allocation2 + $0x2340] sm:$0xff] }
 0x378   : > { %3321 = vmatpush.msrb.mxu0 %v2664_v15  ;;  %3893 = vmatpush.msrb.mxu2 %v3638_v60  ;;  %v3695_v51 = vld [vmem:[#allocation2 + $0x26a0] sm:$0xff]  ;;  %v3504_v15 = vld [vmem:[#allocation2 + $0x20a8] sm:$0xff] }
 0x379   : > { %3425 = vmatpush.msrb.mxu1 %v2892_v57  ;;  %3833 = vmatpush.msra.mxu3 %v3494_v7  ;;  %v2862_v60 = vld [vmem:[#allocation2 + $0x1c00] sm:$0xff]  ;;  %v3584_v57 = vld [vmem:[#allocation2 + $0x2328] sm:$0xff] }
 0x37a   : > { %3322 = vmatpush.msrb.mxu0 %v2661_v50  ;;  %3894 = vmatpush.msrb.mxu2 %v3635_v9  ;;  %v3692_v7 = vld [vmem:[#allocation2 + $0x2688] sm:$0xff]  ;;  %v3501_v50 = vld [vmem:[#allocation2 + $0x2090] sm:$0xff] }
 0x37b   : > { %3426 = vmatpush.msrb.mxu1 %v2889_v20  ;;  %3834 = vmatpush.msra.mxu3 %v3491_v61  ;;  %v2859_v9 = vld [vmem:[#allocation2 + $0x1be8] sm:$0xff]  ;;  %v3581_v20 = vld [vmem:[#allocation2 + $0x2310] sm:$0xff] }
 0x37c   : > { %3323 = vmatpush.msrb.mxu0 %v2658_v44  ;;  %3895 = vmatpush.msrb.mxu2 %v3632_v27  ;;  %v3689_v61 = vld [vmem:[#allocation2 + $0x2670] sm:$0xff]  ;;  %v3498_v44 = vld [vmem:[#allocation2 + $0x2078] sm:$0xff] }
 0x37d   : > { %3427 = vmatpush.msrb.mxu1 %v2886_v63  ;;  %3835 = vmatpush.msra.mxu3 %v3488_v5  ;;  %v2856_v27 = vld [vmem:[#allocation2 + $0x1bd0] sm:$0xff]  ;;  %v3578_v63 = vld [vmem:[#allocation2 + $0x22f8] sm:$0xff] }
 0x37e   : > { %3324 = vmatpush.msrb.mxu0 %v2655_v48  ;;  %3428 = vmatmul.f32.vlgmr.msrb.gmra.mxu1 %v9600_v23  ;;  %v3686_v5 = vld [vmem:[#allocation2 + $0x2658] sm:$0xff]  ;;  %v3495_v48 = vld [vmem:[#allocation2 + $0x2060] sm:$0xff] }
 0x37f   : > { %3864 = vmatpush.msra.mxu1 %v3617_v12  ;;  %3896 = vmatpush.msrb.mxu2 %v3629_v6  ;;  %v2853_v12 = vld [vmem:[#allocation2 + $0x1bb8] sm:$0xff]  ;;  %v3575_v6 = vld [vmem:[#allocation2 + $0x22e0] sm:$0xff] }
 0x380   : > { %3836 = vmatpush.msra.mxu3 %v3485_v13  ;;  %3325 = vmatpush.msrb.mxu0 %v2652_v45  ;;  %v3683_v13 = vld [vmem:[#allocation2 + $0x2640] sm:$0xff]  ;;  %v3492_v45 = vld [vmem:[#allocation2 + $0x2048] sm:$0xff] }
 0x381   : > { %3865 = vmatpush.msra.mxu1 %v3614_v21  ;;  %3897 = vmatpush.msrb.mxu2 %v3626_v34  ;;  %v2850_v21 = vld [vmem:[#allocation2 + $0x1ba0] sm:$0xff]  ;;  %v3572_v34 = vld [vmem:[#allocation2 + $0x22c8] sm:$0xff] }
 0x382   : > { %3837 = vmatpush.msra.mxu3 %v3482_v8  ;;  %3326 = vmatpush.msrb.mxu0 %v2649_v41  ;;  %v3680_v8 = vld [vmem:[#allocation2 + $0x2628] sm:$0xff]  ;;  %v3489_v41 = vld [vmem:[#allocation2 + $0x2030] sm:$0xff] }
 0x383   : > { %3866 = vmatpush.msra.mxu1 %v3611_v35  ;;  %3898 = vmatpush.msrb.mxu2 %v3623_v37  ;;  %v2847_v35 = vld [vmem:[#allocation2 + $0x1b88] sm:$0xff]  ;;  %v3809_v37 = vld [vmem:[#allocation2 + $0x2a30] sm:$0xff] }
 0x384   : > { %3838 = vmatpush.msra.mxu3 %v3479_v46  ;;  %3327 = vmatpush.msrb.mxu0 %v2646_v58  ;;  %v3677_v46 = vld [vmem:[#allocation2 + $0x2610] sm:$0xff]  ;;  %v3486_v58 = vld [vmem:[#allocation2 + $0x2018] sm:$0xff] }
 0x385   : > { %3867 = vmatpush.msra.mxu1 %v3608_v54  ;;  %3899 = vmatpush.msrb.mxu2 %v3620_v10  ;;  %v2844_v54 = vld [vmem:[#allocation2 + $0x1b70] sm:$0xff]  ;;  %v3806_v10 = vld [vmem:[#allocation2 + $0x2a18] sm:$0xff] }
 0x386   : > { %3328 = vmatmul.f32.vlgmr.msrb.gmra.mxu0 %v9614_v26  ;;  %3839 = vmatpush.msra.mxu3 %v3476_v4  ;;  %v3674_v4 = vld [vmem:[#allocation2 + $0x25f8] sm:$0xff] }
 0x387   : > { %3392 = vmatpush.msra.mxu0 %v2883_v24  ;;  %3900 = vmatmul.f32.vlgmr.msrb.gmra.mxu2 %v9457_v33  ;;  %v3483_v24 = vld [vmem:[#allocation2 + $0x2000] sm:$0xff] }
 0x388   : > { %7889 = vmatpush.msk.msra.mxu2 %vm1321_vm8, %v3812_v14  ;;  %3840 = vmatmul.f32.vlgmr.msra.gmra.mxu3 %v9614_v26  ;;  %v2841_v14 = vld [vmem:[#allocation2 + $0x1b58] sm:$0xff] }
 0x389   : > { %3868 = vmatpush.msra.mxu1 %v3605_v39  ;;  %3904 = vmatpush.msrb.mxu3 %v3713_v52  ;;  %v3803_v39 = vld [vmem:[#allocation2 + $0x2a00] sm:$0xff] }
 0x38a   : > { %3984 = vmatpush.msrb.mxu2 %v3522_v62  ;;  %3393 = vmatpush.msra.mxu0 %v2880_v56  ;;  %v3671_v52 = vld [vmem:[#allocation2 + $0x25e0] sm:$0xff]  ;;  %v3480_v62 = vld [vmem:[#allocation2 + $0x1fe8] sm:$0xff] }
 0x38b   : > { %3869 = vmatpush.msra.mxu1 %v3602_v16  ;;  %3905 = vmatpush.msrb.mxu3 %v3710_v19  ;;  %v2838_v56 = vld [vmem:[#allocation2 + $0x1b40] sm:$0xff]  ;;  %v3800_v16 = vld [vmem:[#allocation2 + $0x29e8] sm:$0xff]  ;;  %v3569_v19 = vld [vmem:[#allocation2 + $0x22b0] sm:$0xff] }
 0x38c   : > { %3985 = vmatpush.msrb.mxu2 %v3519_v0  ;;  %3394 = vmatpush.msra.mxu0 %v2877_v38  ;;  %v3668_v0 = vld [vmem:[#allocation2 + $0x25c8] sm:$0xff]  ;;  %v3477_v38 = vld [vmem:[#allocation2 + $0x1fd0] sm:$0xff] }
 0x38d   : > { %3870 = vmatpush.msra.mxu1 %v3599_v42  ;;  %3906 = vmatpush.msrb.mxu3 %v3707_v31  ;;  %v3797_v42 = vld [vmem:[#allocation2 + $0x29d0] sm:$0xff]  ;;  %v3570_v31 = vld [vmem:[#allocation2 + $0x22b8] sm:$0xff] }
 0x38e   : > { %3986 = vmatpush.msrb.mxu2 %v3516_v43  ;;  %3395 = vmatpush.msra.mxu0 %v2874_v18  ;;  %v3714_v43 = vld [vmem:[#allocation2 + $0x2738] sm:$0xff] }
 0x38f   : > { %3871 = vmatpush.msra.mxu1 %v3596_v3  ;;  %3907 = vmatpush.msrb.mxu3 %v3704_v28  ;;  %v3566_v18 = vld [vmem:[#allocation2 + $0x2298] sm:$0xff]  ;;  %v3567_v28 = vld [vmem:[#allocation2 + $0x22a0] sm:$0xff] }
 0x390   : > { %3987 = vmatpush.msrb.mxu2 %v3513_v40  ;;  %3396 = vmatpush.msra.mxu0 %v2871_v36  ;;  %v3794_v3 = vld [vmem:[#allocation2 + $0x29b8] sm:$0xff]  ;;  %v3711_v40 = vld [vmem:[#allocation2 + $0x2720] sm:$0xff] }
 0x391   : > { %7890 = vmatmul.msk.f32.vlgmr.msra.gmra.mxu2 %vm1317_vm9, %v9544_v59  ;;  %3872 = vmatpush.msra.mxu1 %v3593_v25  ;;  %v3563_v36 = vld [vmem:[#allocation2 + $0x2280] sm:$0xff] }
 0x392   : > { %3908 = vmatpush.msrb.mxu3 %v3701_v49  ;;  %3988 = vmatpush.msrb.mxu2 %v3510_v32  ;;  %v3791_v25 = vld [vmem:[#allocation2 + $0x29a0] sm:$0xff]  ;;  %v3564_v49 = vld [vmem:[#allocation2 + $0x2288] sm:$0xff] }
 0x393   : > { %3397 = vmatpush.msra.mxu0 %v2868_v30  ;;  %3873 = vmatpush.msra.mxu1 %v3590_v29  ;;  %v3708_v32 = vld [vmem:[#allocation2 + $0x2708] sm:$0xff] }
 0x394   : > { %3909 = vmatpush.msrb.mxu3 %v3698_v47  ;;  %3989 = vmatpush.msrb.mxu2 %v3507_v2  ;;  %v3560_v30 = vld [vmem:[#allocation2 + $0x2268] sm:$0xff]  ;;  %v3561_v47 = vld [vmem:[#allocation2 + $0x2270] sm:$0xff] }
 0x395   : > { %3398 = vmatpush.msra.mxu0 %v2865_v55  ;;  %3874 = vmatpush.msra.mxu1 %v3587_v53  ;;  %v3788_v29 = vld [vmem:[#allocation2 + $0x2988] sm:$0xff]  ;;  %v3705_v2 = vld [vmem:[#allocation2 + $0x26f0] sm:$0xff] }
 0x396   : > { %3910 = vmatpush.msrb.mxu3 %v3695_v51  ;;  %3990 = vmatpush.msrb.mxu2 %v3504_v15  ;;  %v3557_v55 = vld [vmem:[#allocation2 + $0x2250] sm:$0xff]  ;;  %v3558_v51 = vld [vmem:[#allocation2 + $0x2258] sm:$0xff] }
 0x397   : > { %3399 = vmatpush.msra.mxu0 %v2862_v60  ;;  %3875 = vmatpush.msra.mxu1 %v3584_v57  ;;  %v3785_v53 = vld [vmem:[#allocation2 + $0x2970] sm:$0xff]  ;;  %v3702_v15 = vld [vmem:[#allocation2 + $0x26d8] sm:$0xff] }
 0x398   : > { %3911 = vmatpush.msrb.mxu3 %v3692_v7  ;;  %3991 = vmatpush.msrb.mxu2 %v3501_v50  ;;  %v3554_v60 = vld [vmem:[#allocation2 + $0x2238] sm:$0xff]  ;;  %v3555_v7 = vld [vmem:[#allocation2 + $0x2240] sm:$0xff] }
 0x399   : > { %3400 = vmatpush.msra.mxu0 %v2859_v9  ;;  %3876 = vmatpush.msra.mxu1 %v3581_v20  ;;  %v3782_v57 = vld [vmem:[#allocation2 + $0x2958] sm:$0xff]  ;;  %v3699_v50 = vld [vmem:[#allocation2 + $0x26c0] sm:$0xff] }
 0x39a   : > { %3912 = vmatpush.msrb.mxu3 %v3689_v61  ;;  %3992 = vmatpush.msrb.mxu2 %v3498_v44  ;;  %v3551_v9 = vld [vmem:[#allocation2 + $0x2220] sm:$0xff]  ;;  %v3552_v61 = vld [vmem:[#allocation2 + $0x2228] sm:$0xff] }
 0x39b   : > { %3401 = vmatpush.msra.mxu0 %v2856_v27  ;;  %3877 = vmatpush.msra.mxu1 %v3578_v63  ;;  %v3779_v20 = vld [vmem:[#allocation2 + $0x2940] sm:$0xff]  ;;  %v3696_v44 = vld [vmem:[#allocation2 + $0x26a8] sm:$0xff] }
 0x39c   : > { %3913 = vmatpush.msrb.mxu3 %v3686_v5  ;;  %3993 = vmatpush.msrb.mxu2 %v3495_v48  ;;  %v3548_v27 = vld [vmem:[#allocation2 + $0x2208] sm:$0xff]  ;;  %v3549_v5 = vld [vmem:[#allocation2 + $0x2210] sm:$0xff] }
 0x39d   : > { %3402 = vmatpush.msra.mxu0 %v2853_v12  ;;  %3878 = vmatpush.msra.mxu1 %v3575_v6  ;;  %v3776_v63 = vld [vmem:[#allocation2 + $0x2928] sm:$0xff]  ;;  %v3693_v48 = vld [vmem:[#allocation2 + $0x2690] sm:$0xff] }
 0x39e   : > { %3914 = vmatpush.msrb.mxu3 %v3683_v13  ;;  %3994 = vmatpush.msrb.mxu2 %v3492_v45  ;;  %v3545_v12 = vld [vmem:[#allocation2 + $0x21f0] sm:$0xff]  ;;  %v3546_v13 = vld [vmem:[#allocation2 + $0x21f8] sm:$0xff] }
 0x39f   : > { %3403 = vmatpush.msra.mxu0 %v2850_v21  ;;  %3879 = vmatpush.msra.mxu1 %v3572_v34  ;;  %v3773_v6 = vld [vmem:[#allocation2 + $0x2910] sm:$0xff]  ;;  %v3690_v45 = vld [vmem:[#allocation2 + $0x2678] sm:$0xff] }
 0x3a0   : > { %3915 = vmatpush.msrb.mxu3 %v3680_v8  ;;  %3995 = vmatpush.msrb.mxu2 %v3489_v41  ;;  %v3542_v21 = vld [vmem:[#allocation2 + $0x21d8] sm:$0xff]  ;;  %v3543_v8 = vld [vmem:[#allocation2 + $0x21e0] sm:$0xff] }
 0x3a1   : > { %3404 = vmatpush.msra.mxu0 %v2847_v35  ;;  %3880 = vmatmul.f32.vlgmr.msra.gmra.mxu1 %v9392_v11  ;;  %v3770_v34 = vld [vmem:[#allocation2 + $0x28f8] sm:$0xff]  ;;  %v3687_v41 = vld [vmem:[#allocation2 + $0x2660] sm:$0xff] }
 0x3a2   : > { %3944 = vmatpush.msrb.mxu1 %v3809_v37  ;;  %3916 = vmatpush.msrb.mxu3 %v3677_v46  ;;  %v3539_v35 = vld [vmem:[#allocation2 + $0x21c0] sm:$0xff]  ;;  %v3540_v46 = vld [vmem:[#allocation2 + $0x21c8] sm:$0xff] }
 0x3a3   : > { %3996 = vmatpush.msrb.mxu2 %v3486_v58  ;;  %3405 = vmatpush.msra.mxu0 %v2844_v54  ;;  %v3767_v37 = vld [vmem:[#allocation2 + $0x28e0] sm:$0xff]  ;;  %v3684_v58 = vld [vmem:[#allocation2 + $0x2648] sm:$0xff] }
 0x3a4   : > { %3945 = vmatpush.msrb.mxu1 %v3806_v10  ;;  %3917 = vmatpush.msrb.mxu3 %v3674_v4  ;;  %v3536_v54 = vld [vmem:[#allocation2 + $0x21a8] sm:$0xff]  ;;  %v3537_v4 = vld [vmem:[#allocation2 + $0x21b0] sm:$0xff] }
 0x3a5   : > { %3997 = vmatpush.msrb.mxu2 %v3483_v24  ;;  %3406 = vmatpush.msra.mxu0 %v2841_v14  ;;  %v3764_v10 = vld [vmem:[#allocation2 + $0x28c8] sm:$0xff]  ;;  %v3681_v24 = vld [vmem:[#allocation2 + $0x2630] sm:$0xff] }
 0x3a6   : > { %3946 = vmatpush.msrb.mxu1 %v3803_v39  ;;  %3918 = vmatpush.msrb.mxu3 %v3671_v52  ;;  %v3533_v14 = vld [vmem:[#allocation2 + $0x2190] sm:$0xff]  ;;  %v3666_v39 = vld [vmem:[#allocation2 + $0x25b8] sm:$0xff] }
 0x3a7   : > { %3998 = vmatpush.msrb.mxu2 %v3480_v62  ;;  %3407 = vmatpush.msra.mxu0 %v2838_v56  ;;  %v3534_v52 = vld [vmem:[#allocation2 + $0x2198] sm:$0xff] }
 0x3a8   : > { %3947 = vmatpush.msrb.mxu1 %v3800_v16  ;;  %3408 = vmatmul.f32.vlgmr.msra.gmra.mxu0 %v9628_v17  ;;  %v3678_v62 = vld [vmem:[#allocation2 + $0x2618] sm:$0xff]  ;;  %v9712_v16 = vpop.f32.mrf.mxu2 }
 0x3a9   : > { %3844 = vmatpush.msrb.mxu0 %v3569_v19  ;;  %3919 = vmatpush.msrb.mxu3 %v3668_v0  ;;  %v3530_v56 = vld [vmem:[#allocation2 + $0x2178] sm:$0xff]  ;;  %v3663_v19 = vld [vmem:[#allocation2 + $0x25a0] sm:$0xff] }
 0x3aa   : > { %3999 = vmatpush.msrb.mxu2 %v3477_v38  ;;  %3920 = vmatmul.f32.vlgmr.msrb.gmra.mxu3 %v9628_v17  ;;  %v3531_v0 = vld [vmem:[#allocation2 + $0x2180] sm:$0xff] }
 0x3ab   : > { %3948 = vmatpush.msrb.mxu1 %v3797_v42  ;;  %4000 = vmatmul.f32.vlgmr.msrb.gmra.mxu2 %v9614_v26  ;;  %v3675_v38 = vld [vmem:[#allocation2 + $0x2600] sm:$0xff] }
 0x3ac   : > { %4004 = vmatpush.msra.mxu3 %v3570_v31  ;;  %4064 = vmatpush.msra.mxu2 %v3714_v43  ;;  %v3527_v42 = vld [vmem:[#allocation2 + $0x2160] sm:$0xff]  ;;  %v3660_v31 = vld [vmem:[#allocation2 + $0x2588] sm:$0xff] }
 0x3ad   : > { %3845 = vmatpush.msrb.mxu0 %v3566_v18  ;;  %3949 = vmatpush.msrb.mxu1 %v3794_v3  ;;  %v3528_v43 = vld [vmem:[#allocation2 + $0x2168] sm:$0xff]  ;;  %v9715_v18 = vpop.f32.mrf.mxu3 }
 0x3ae   : > { %4005 = vmatpush.msra.mxu3 %v3567_v28  ;;  %4065 = vmatpush.msra.mxu2 %v3711_v40  ;;  %v3672_v3 = vld [vmem:[#allocation2 + $0x25e8] sm:$0xff]  ;;  %v3657_v40 = vld [vmem:[#allocation2 + $0x2570] sm:$0xff] }
 0x3af   : > { %3846 = vmatpush.msrb.mxu0 %v3563_v36  ;;  %3950 = vmatpush.msrb.mxu1 %v3791_v25  ;;  %v3524_v28 = vld [vmem:[#allocation2 + $0x2148] sm:$0xff]  ;;  %v3761_v36 = vld [vmem:[#allocation2 + $0x28b0] sm:$0xff] }
 0x3b0   : > { %4006 = vmatpush.msra.mxu3 %v3564_v49  ;;  %4066 = vmatpush.msra.mxu2 %v3708_v32  ;;  %v3525_v25 = vld [vmem:[#allocation2 + $0x2150] sm:$0xff]  ;;  %v9717_v32 = vpop.f32.mrf.mxu1 }
 0x3b1   : > { %3847 = vmatpush.msrb.mxu0 %v3560_v30  ;;  %3951 = vmatpush.msrb.mxu1 %v3788_v29  ;;  %v3669_v49 = vld [vmem:[#allocation2 + $0x25d0] sm:$0xff]  ;;  %v3654_v30 = vld [vmem:[#allocation2 + $0x2558] sm:$0xff]  ;;  %v9720_v29 = vpop.f32.mrf.mxu2 }
 0x3b2   : > { %4007 = vmatpush.msra.mxu3 %v3561_v47  ;;  %4067 = vmatpush.msra.mxu2 %v3705_v2  ;;  %v3762_v47 = vld [vmem:[#allocation2 + $0x28b8] sm:$0xff]  ;;  %v3571_v2 = vld [vmem:[#allocation2 + $0x22c0] sm:$0xff] }
 0x3b3   : > { %3848 = vmatpush.msrb.mxu0 %v3557_v55  ;;  %3952 = vmatpush.msrb.mxu1 %v3785_v53  ;;  %v3758_v55 = vld [vmem:[#allocation2 + $0x2898] sm:$0xff]  ;;  %v3651_v53 = vld [vmem:[#allocation2 + $0x2540] sm:$0xff] }
 0x3b4   : > { %4008 = vmatpush.msra.mxu3 %v3558_v51  ;;  %4068 = vmatpush.msra.mxu2 %v3702_v15  ;;  %v3759_v51 = vld [vmem:[#allocation2 + $0x28a0] sm:$0xff]  ;;  %v3568_v15 = vld [vmem:[#allocation2 + $0x22a8] sm:$0xff] }
 0x3b5   : > { %3849 = vmatpush.msrb.mxu0 %v3554_v60  ;;  %3953 = vmatpush.msrb.mxu1 %v3782_v57  ;;  %v9724_v60 = vpop.f32.mrf.mxu3  ;;  %v9726_v57 = vpop.f32.mrf.mxu0 }
 0x3b6   : > { %4009 = vmatpush.msra.mxu3 %v3555_v7  ;;  %4069 = vmatpush.msra.mxu2 %v3699_v50  ;;  %v3755_v7 = vld [vmem:[#allocation2 + $0x2880] sm:$0xff]  ;;  %v3648_v50 = vld [vmem:[#allocation2 + $0x2528] sm:$0xff] }
 0x3b7   : > { %3850 = vmatpush.msrb.mxu0 %v3551_v9  ;;  %3954 = vmatpush.msrb.mxu1 %v3779_v20  ;;  %v3756_v9 = vld [vmem:[#allocation2 + $0x2888] sm:$0xff]  ;;  %v3565_v20 = vld [vmem:[#allocation2 + $0x2290] sm:$0xff] }
 0x3b8   : > { %4010 = vmatpush.msra.mxu3 %v3552_v61  ;;  %4070 = vmatpush.msra.mxu2 %v3696_v44  ;;  %v3752_v61 = vld [vmem:[#allocation2 + $0x2868] sm:$0xff]  ;;  %v3645_v44 = vld [vmem:[#allocation2 + $0x2510] sm:$0xff] }
 0x3b9   : > { %3851 = vmatpush.msrb.mxu0 %v3548_v27  ;;  %3955 = vmatpush.msrb.mxu1 %v3776_v63  ;;  %v3753_v27 = vld [vmem:[#allocation2 + $0x2870] sm:$0xff]  ;;  %v3562_v63 = vld [vmem:[#allocation2 + $0x2278] sm:$0xff] }
 0x3ba   : > { %4011 = vmatpush.msra.mxu3 %v3549_v5  ;;  %4071 = vmatpush.msra.mxu2 %v3693_v48  ;;  %v9728_v5 = vpop.f32.mrf.mxu1  ;;  %v3749_v48 = vld [vmem:[#allocation2 + $0x2850] sm:$0xff] }
 0x3bb   : > { %3852 = vmatpush.msrb.mxu0 %v3545_v12  ;;  %3956 = vmatpush.msrb.mxu1 %v3773_v6  ;;  %v3642_v12 = vld [vmem:[#allocation2 + $0x24f8] sm:$0xff] }
 0x3bc   : > { %4012 = vmatpush.msra.mxu3 %v3546_v13  ;;  %4072 = vmatpush.msra.mxu2 %v3690_v45  ;;  %v3750_v6 = vld [vmem:[#allocation2 + $0x2858] sm:$0xff]  ;;  %v3559_v13 = vld [vmem:[#allocation2 + $0x2260] sm:$0xff] }
 0x3bd   : > { %3853 = vmatpush.msrb.mxu0 %v3542_v21  ;;  %3957 = vmatpush.msrb.mxu1 %v3770_v34  ;;  %v3746_v45 = vld [vmem:[#allocation2 + $0x2838] sm:$0xff]  ;;  %v3639_v21 = vld [vmem:[#allocation2 + $0x24e0] sm:$0xff]  ;;  %v9730_v34 = vpop.f32.mrf.mxu2 }
 0x3be   : > { %4013 = vmatpush.msra.mxu3 %v3543_v8  ;;  %4073 = vmatpush.msra.mxu2 %v3687_v41  ;;  %v3747_v8 = vld [vmem:[#allocation2 + $0x2840] sm:$0xff]  ;;  %v3556_v41 = vld [vmem:[#allocation2 + $0x2248] sm:$0xff] }
 0x3bf   : > { %3854 = vmatpush.msrb.mxu0 %v3539_v35  ;;  %3958 = vmatpush.msrb.mxu1 %v3767_v37  ;;  %v9732_v35 = vpop.f32.mrf.mxu3  ;;  %v3743_v37 = vld [vmem:[#allocation2 + $0x2820] sm:$0xff] }
 0x3c0   : > { %4014 = vmatpush.msra.mxu3 %v3540_v46  ;;  %4074 = vmatpush.msra.mxu2 %v3684_v58  ;;  %v3636_v46 = vld [vmem:[#allocation2 + $0x24c8] sm:$0xff] }
 0x3c1   : > { %3855 = vmatpush.msrb.mxu0 %v3536_v54  ;;  %3959 = vmatpush.msrb.mxu1 %v3764_v10  ;;  %v3744_v58 = vld [vmem:[#allocation2 + $0x2828] sm:$0xff]  ;;  %v3553_v54 = vld [vmem:[#allocation2 + $0x2230] sm:$0xff]  ;;  %v9734_v10 = vpop.f32.mrf.mxu0 }
 0x3c2   : > { %4015 = vmatpush.msra.mxu3 %v3537_v4  ;;  %4075 = vmatpush.msra.mxu2 %v3681_v24  ;;  %v3740_v4 = vld [vmem:[#allocation2 + $0x2808] sm:$0xff]  ;;  %v3633_v24 = vld [vmem:[#allocation2 + $0x24b0] sm:$0xff] }
 0x3c3   : > { %3856 = vmatpush.msrb.mxu0 %v3533_v14  ;;  %3960 = vmatmul.f32.vlgmr.msrb.gmra.mxu1 %v9546_v22  ;;  %v3741_v14 = vld [vmem:[#allocation2 + $0x2810] sm:$0xff] }
 0x3c4   : > { %4044 = vmatpush.msra.mxu1 %v3666_v39  ;;  %4016 = vmatpush.msra.mxu3 %v3534_v52  ;;  %v3550_v39 = vld [vmem:[#allocation2 + $0x2218] sm:$0xff]  ;;  %v3737_v52 = vld [vmem:[#allocation2 + $0x27f0] sm:$0xff] }
 0x3c5   : > { %4076 = vmatpush.msra.mxu2 %v3678_v62  ;;  %3857 = vmatpush.msrb.mxu0 %v3530_v56  ;;  %v3630_v62 = vld [vmem:[#allocation2 + $0x2498] sm:$0xff] }
 0x3c6   : > { %4045 = vmatpush.msra.mxu1 %v3663_v19  ;;  %4017 = vmatpush.msra.mxu3 %v3531_v0  ;;  %v3738_v56 = vld [vmem:[#allocation2 + $0x27f8] sm:$0xff]  ;;  %v3547_v19 = vld [vmem:[#allocation2 + $0x2200] sm:$0xff]  ;;  %v9736_v0 = vpop.f32.mrf.mxu1 }
 0x3c7   : > { %4077 = vmatpush.msra.mxu2 %v3675_v38  ;;  %3858 = vmatpush.msrb.mxu0 %v3527_v42  ;;  %v3734_v38 = vld [vmem:[#allocation2 + $0x27d8] sm:$0xff]  ;;  %v3627_v42 = vld [vmem:[#allocation2 + $0x2480] sm:$0xff] }
 0x3c8   : > { %4046 = vmatpush.msra.mxu1 %v3660_v31  ;;  %4018 = vmatpush.msra.mxu3 %v3528_v43  ;;  %v3735_v31 = vld [vmem:[#allocation2 + $0x27e0] sm:$0xff]  ;;  %v3544_v43 = vld [vmem:[#allocation2 + $0x21e8] sm:$0xff] }
 0x3c9   : > { %4078 = vmatpush.msra.mxu2 %v3672_v3  ;;  %3859 = vmatpush.msrb.mxu0 %v3524_v28  ;;  %v3731_v3 = vld [vmem:[#allocation2 + $0x27c0] sm:$0xff]  ;;  %v3624_v28 = vld [vmem:[#allocation2 + $0x2468] sm:$0xff] }
 0x3ca   : > { %4047 = vmatpush.msra.mxu1 %v3657_v40  ;;  %3860 = vmatmul.f32.vlgmr.msrb.gmra.mxu0 %v9473_v1  ;;  %v9738_v40 = vpop.f32.mrf.mxu2 }
 0x3cb   : > { %3924 = vmatpush.msra.mxu0 %v3761_v36  ;;  %4019 = vmatpush.msra.mxu3 %v3525_v25  ;;  %v3732_v36 = vld [vmem:[#allocation2 + $0x27c8] sm:$0xff]  ;;  %v3541_v25 = vld [vmem:[#allocation2 + $0x21d0] sm:$0xff] }
 0x3cc   : > { %4079 = vmatpush.msra.mxu2 %v3669_v49  ;;  %4020 = vmatmul.f32.vlgmr.msra.gmra.mxu3 %v9473_v1  ;;  %v9740_v49 = vpop.f32.mrf.mxu3 }
 0x3cd   : > { %4048 = vmatpush.msra.mxu1 %v3654_v30  ;;  %4080 = vmatmul.f32.vlgmr.msra.gmra.mxu2 %v9628_v17  ;;  %v9742_v30 = vpop.f32.mrf.mxu0 }
 0x3ce   : > { %4084 = vmatpush.msrb.mxu3 %v3762_v47  ;;  %4164 = vmatpush.msrb.mxu2 %v3571_v2  ;;  %v3728_v47 = vld [vmem:[#allocation2 + $0x27a8] sm:$0xff]  ;;  %v3621_v2 = vld [vmem:[#allocation2 + $0x2450] sm:$0xff] }
 0x3cf   : > { %3925 = vmatpush.msra.mxu0 %v3758_v55  ;;  %4049 = vmatpush.msra.mxu1 %v3651_v53  ;;  %v3729_v55 = vld [vmem:[#allocation2 + $0x27b0] sm:$0xff]  ;;  %v3538_v53 = vld [vmem:[#allocation2 + $0x21b8] sm:$0xff] }
 0x3d0   : > { %4085 = vmatpush.msrb.mxu3 %v3759_v51  ;;  %4165 = vmatpush.msrb.mxu2 %v3568_v15  ;;  %v3725_v51 = vld [vmem:[#allocation2 + $0x2790] sm:$0xff] }
 0x3d1   : > { %3926 = vmatpush.msra.mxu0 %v3755_v7  ;;  %4050 = vmatpush.msra.mxu1 %v3648_v50  ;;  %v3813_v15 = vld [vmem:[#allocation2 + $0x2a50] sm:$0xf]  ;;  %v3726_v7 = vld [vmem:[#allocation2 + $0x2798] sm:$0xff]  ;;  %v9744_v50 = vpop.f32.mrf.mxu1 }
 0x3d2   : > { %4086 = vmatpush.msrb.mxu3 %v3756_v9  ;;  %4166 = vmatpush.msrb.mxu2 %v3565_v20  ;;  %v3523_v9 = vld [vmem:[#allocation2 + $0x2140] sm:$0xff] }
 0x3d3   : > { %3927 = vmatpush.msra.mxu0 %v3752_v61  ;;  %4051 = vmatpush.msra.mxu1 %v3645_v44  ;;  %v3535_v20 = vld [vmem:[#allocation2 + $0x21a0] sm:$0xff]  ;;  %v3722_v61 = vld [vmem:[#allocation2 + $0x2778] sm:$0xff] }
 0x3d4   : > { %4087 = vmatpush.msrb.mxu3 %v3753_v27  ;;  %4167 = vmatpush.msrb.mxu2 %v3562_v63  ;;  %v3723_v44 = vld [vmem:[#allocation2 + $0x2780] sm:$0xff]  ;;  %v3520_v27 = vld [vmem:[#allocation2 + $0x2128] sm:$0xff] }
 0x3d5   : > { %3928 = vmatpush.msra.mxu0 %v3749_v48  ;;  %4052 = vmatpush.msra.mxu1 %v3642_v12  ;;  %v3532_v63 = vld [vmem:[#allocation2 + $0x2188] sm:$0xff]  ;;  %v9748_v48 = vpop.f32.mrf.mxu2  ;;  %v3719_v12 = vld [vmem:[#allocation2 + $0x2760] sm:$0xff] }
 0x3d6   : > { %4088 = vmatpush.msrb.mxu3 %v3750_v6  ;;  %4168 = vmatpush.msrb.mxu2 %v3559_v13  ;;  %v3720_v6 = vld [vmem:[#allocation2 + $0x2768] sm:$0xff]  ;;  %v9750_v13 = vpop.f32.mrf.mxu3 }
 0x3d7   : > { %3929 = vmatpush.msra.mxu0 %v3746_v45  ;;  %4053 = vmatpush.msra.mxu1 %v3639_v21  ;;  %12253 = vst [vmem:[#allocation21_spill] sm:$0xff] %v9750_v13  ;;  %v9752_v45 = vpop.f32.mrf.mxu0  ;;  %v3517_v21 = vld [vmem:[#allocation2 + $0x2110] sm:$0xff] }
 0x3d8   : > { %4089 = vmatpush.msrb.mxu3 %v3747_v8  ;;  %4169 = vmatpush.msrb.mxu2 %v3556_v41  ;;  %v3529_v8 = vld [vmem:[#allocation2 + $0x2170] sm:$0xff]  ;;  %v3716_v41 = vld [vmem:[#allocation2 + $0x2748] sm:$0xff] }
 0x3d9   : > { %3930 = vmatpush.msra.mxu0 %v3743_v37  ;;  %4054 = vmatpush.msra.mxu1 %v3636_v46  ;;  %v3717_v37 = vld [vmem:[#allocation2 + $0x2750] sm:$0xff]  ;;  %v3514_v46 = vld [vmem:[#allocation2 + $0x20f8] sm:$0xff] }
 0x3da   : > { %4090 = vmatpush.msrb.mxu3 %v3744_v58  ;;  %4170 = vmatpush.msrb.mxu2 %v3553_v54  ;;  %v3618_v58 = vld [vmem:[#allocation2 + $0x2438] sm:$0xff] }
 0x3db   : > { %3931 = vmatpush.msra.mxu0 %v3740_v4  ;;  %4055 = vmatpush.msra.mxu1 %v3633_v24  ;;  %v3526_v54 = vld [vmem:[#allocation2 + $0x2158] sm:$0xff]  ;;  %v9754_v4 = vpop.f32.mrf.mxu1  ;;  %v3619_v24 = vld [vmem:[#allocation2 + $0x2440] sm:$0xff] }
 0x3dc   : > { %4091 = vmatpush.msrb.mxu3 %v3741_v14  ;;  %4171 = vmatpush.msrb.mxu2 %v3550_v39  ;;  %12254 = vst [vmem:[#allocation22_spill] sm:$0xff] %v9754_v4  ;;  %v3763_v14 = vld [vmem:[#allocation2 + $0x28c0] sm:$0xff] }
 0x3dd   : > { %3932 = vmatpush.msra.mxu0 %v3737_v52  ;;  %4056 = vmatpush.msra.mxu1 %v3630_v62  ;;  %v3615_v39 = vld [vmem:[#allocation2 + $0x2420] sm:$0xff]  ;;  %v9757_v52 = vpop.f32.mrf.mxu2 }
 0x3de   : > { %4092 = vmatpush.msrb.mxu3 %v3738_v56  ;;  %4172 = vmatpush.msrb.mxu2 %v3547_v19  ;;  %12255 = vst [vmem:[#allocation23_spill] sm:$0xff] %v9757_v52  ;;  %v3511_v62 = vld [vmem:[#allocation2 + $0x20e0] sm:$0xff]  ;;  %v3616_v56 = vld [vmem:[#allocation2 + $0x2428] sm:$0xff]  ;;  %v9762_v19 = vpop.f32.mrf.mxu3  ;;  %v3634_v52 = vld [vmem:[#allocation2 + $0x24b8] sm:$0xff] }
 0x3df   : > { %3933 = vmatpush.msra.mxu0 %v3734_v38  ;;  %4057 = vmatpush.msra.mxu1 %v3627_v42  ;;  %12256 = vst [vmem:[#allocation24_spill] sm:$0xff] %v9762_v19  ;;  %v9764_v38 = vpop.f32.mrf.mxu0  ;;  %v3760_v42 = vld [vmem:[#allocation2 + $0x28a8] sm:$0xff] }
 0x3e0   : > { %4093 = vmatpush.msrb.mxu3 %v3735_v31  ;;  %4173 = vmatpush.msrb.mxu2 %v3544_v43  ;;  %12257 = vst [vmem:[#allocation25_spill] sm:$0xff] %v9764_v38  ;;  %v3612_v31 = vld [vmem:[#allocation2 + $0x2408] sm:$0xff]  ;;  %v3622_v38 = vld [vmem:[#allocation2 + $0x2458] sm:$0xff] }
 0x3e1   : > { %3934 = vmatpush.msra.mxu0 %v3731_v3  ;;  %4058 = vmatpush.msra.mxu1 %v3624_v28  ;;  %v3508_v43 = vld [vmem:[#allocation2 + $0x20c8] sm:$0xff]  ;;  %v3613_v3 = vld [vmem:[#allocation2 + $0x2410] sm:$0xff] }
 0x3e2   : > { %4094 = vmatpush.msrb.mxu3 %v3732_v36  ;;  %4174 = vmatpush.msrb.mxu2 %v3541_v25  ;;  %v3757_v28 = vld [vmem:[#allocation2 + $0x2890] sm:$0xff] }
 0x3e3   : > { %3935 = vmatpush.msra.mxu0 %v3728_v47  ;;  %4059 = vmatpush.msra.mxu1 %v3621_v2  ;;  %v3609_v36 = vld [vmem:[#allocation2 + $0x23f0] sm:$0xff]  ;;  %v3610_v47 = vld [vmem:[#allocation2 + $0x23f8] sm:$0xff] }
 0x3e4   : > { %4095 = vmatpush.msrb.mxu3 %v3729_v55  ;;  %4175 = vmatpush.msrb.mxu2 %v3538_v53  ;;  %v3505_v25 = vld [vmem:[#allocation2 + $0x20b0] sm:$0xff]  ;;  %v3754_v2 = vld [vmem:[#allocation2 + $0x2878] sm:$0xff]  ;;  %v3607_v53 = vld [vmem:[#allocation2 + $0x23e0] sm:$0xff] }
 0x3e5   : > { %3936 = vmatpush.msra.mxu0 %v3725_v51  ;;  %4060 = vmatmul.f32.vlgmr.msra.gmra.mxu1 %v9457_v33  ;;  %v3606_v55 = vld [vmem:[#allocation2 + $0x23d8] sm:$0xff]  ;;  %v9767_v51 = vpop.f32.mrf.mxu1 }
 0x3e6   : > { %7891 = vmatpush.msk.msrb.mxu1 %vm1321_vm8, %v3813_v15  ;;  %4096 = vmatpush.msrb.mxu3 %v3726_v7  ;;  %12258 = vst [vmem:[#allocation26_spill] sm:$0xff] %v9767_v51  ;;  %v3751_v15 = vld [vmem:[#allocation2 + $0x2860] sm:$0xff] }
 0x3e7   : > { %4176 = vmatpush.msrb.mxu2 %v3535_v20  ;;  %3937 = vmatpush.msra.mxu0 %v3722_v61  ;;  %v3603_v7 = vld [vmem:[#allocation2 + $0x23c0] sm:$0xff]  ;;  %v3604_v61 = vld [vmem:[#allocation2 + $0x23c8] sm:$0xff] }
 0x3e8   : > { %4144 = vmatpush.msra.mxu1 %v3523_v9  ;;  %4097 = vmatpush.msrb.mxu3 %v3723_v44  ;;  %v9769_v9 = vpop.f32.mrf.mxu2  ;;  %v3499_v20 = vld [vmem:[#allocation2 + $0x2080] sm:$0xff]  ;;  %v9771_v44 = vpop.f32.mrf.mxu3 }
 0x3e9   : > { %4177 = vmatpush.msrb.mxu2 %v3532_v63  ;;  %3938 = vmatpush.msra.mxu0 %v3719_v12  ;;  %v3748_v63 = vld [vmem:[#allocation2 + $0x2848] sm:$0xff] }
 0x3ea   : > { %4145 = vmatpush.msra.mxu1 %v3520_v27  ;;  %4098 = vmatpush.msrb.mxu3 %v3720_v6  ;;  %v9773_v27 = vpop.f32.mrf.mxu0  ;;  %v3600_v12 = vld [vmem:[#allocation2 + $0x23a8] sm:$0xff] }
 0x3eb   : > { %4178 = vmatpush.msrb.mxu2 %v3529_v8  ;;  %3939 = vmatpush.msra.mxu0 %v3716_v41  ;;  %12259 = vst [vmem:[#allocation27_spill] sm:$0xff] %v9773_v27  ;;  %v3496_v6 = vld [vmem:[#allocation2 + $0x2068] sm:$0xff]  ;;  %v3745_v8 = vld [vmem:[#allocation2 + $0x2830] sm:$0xff]  ;;  %v3646_v27 = vld [vmem:[#allocation2 + $0x2518] sm:$0xff] }
 0x3ec   : > { %4146 = vmatpush.msra.mxu1 %v3517_v21  ;;  %4099 = vmatpush.msrb.mxu3 %v3717_v37  ;;  %v3601_v21 = vld [vmem:[#allocation2 + $0x23b0] sm:$0xff] }
 0x3ed   : > { %3940 = vmatmul.f32.vlgmr.msra.gmra.mxu0 %v9600_v23  ;;  %4179 = vmatpush.msrb.mxu2 %v3526_v54  ;;  %v3597_v41 = vld [vmem:[#allocation2 + $0x2390] sm:$0xff]  ;;  %v3594_v54 = vld [vmem:[#allocation2 + $0x2378] sm:$0xff] }
 0x3ee   : > { %4147 = vmatpush.msra.mxu1 %v3514_v46  ;;  %4024 = vmatpush.msrb.mxu0 %v3618_v58  ;;  %v3493_v37 = vld [vmem:[#allocation2 + $0x2050] sm:$0xff]  ;;  %v3598_v46 = vld [vmem:[#allocation2 + $0x2398] sm:$0xff] }
 0x3ef   : > { %4100 = vmatmul.f32.vlgmr.msrb.gmra.mxu3 %v9600_v23  ;;  %7892 = vmatmul.msk.f32.vlgmr.msrb.gmra.mxu1 %vm1317_vm9, %v9544_v59  ;;  %v3742_v58 = vld [vmem:[#allocation2 + $0x2818] sm:$0xff] }
 0x3f0   : > { %4180 = vmatmul.f32.vlgmr.msrb.gmra.mxu2 %v9473_v1  ;;  %4184 = vmatpush.msra.mxu3 %v3619_v24  ;;  %v3502_v1 = vld [vmem:[#allocation2 + $0x2098] sm:$0xff] }
 0x3f1   : > { %4244 = vmatpush.msra.mxu2 %v3763_v14  ;;  %4025 = vmatpush.msrb.mxu0 %v3615_v39  ;;  %v3490_v24 = vld [vmem:[#allocation2 + $0x2038] sm:$0xff]  ;;  %v3595_v14 = vld [vmem:[#allocation2 + $0x2380] sm:$0xff]  ;;  %v9775_v39 = vpop.f32.mrf.mxu1 }
 0x3f2   : > { %4148 = vmatpush.msra.mxu1 %v3511_v62  ;;  %4185 = vmatpush.msra.mxu3 %v3616_v56  ;;  %v3739_v62 = vld [vmem:[#allocation2 + $0x2800] sm:$0xff] }
 0x3f3   : > { %4245 = vmatpush.msra.mxu2 %v3760_v42  ;;  %4026 = vmatpush.msrb.mxu0 %v3612_v31  ;;  %v3591_v56 = vld [vmem:[#allocation2 + $0x2360] sm:$0xff]  ;;  %v9777_v42 = vpop.f32.mrf.mxu2 }
 0x3f4   : > { %4149 = vmatpush.msra.mxu1 %v3508_v43  ;;  %4186 = vmatpush.msra.mxu3 %v3613_v3  ;;  %v3487_v31 = vld [vmem:[#allocation2 + $0x2020] sm:$0xff]  ;;  %v3592_v43 = vld [vmem:[#allocation2 + $0x2368] sm:$0xff]  ;;  %v9779_v3 = vpop.f32.mrf.mxu3 }
 0x3f5   : > { %4246 = vmatpush.msra.mxu2 %v3757_v28  ;;  %4027 = vmatpush.msrb.mxu0 %v3609_v36  ;;  %v9781_v28 = vpop.f32.mrf.mxu0  ;;  %v3736_v36 = vld [vmem:[#allocation2 + $0x27e8] sm:$0xff] }
 0x3f6   : > { %4150 = vmatpush.msra.mxu1 %v3505_v25  ;;  %4187 = vmatpush.msra.mxu3 %v3610_v47  ;;  %v3588_v25 = vld [vmem:[#allocation2 + $0x2348] sm:$0xff] }
 0x3f7   : > { %4247 = vmatpush.msra.mxu2 %v3754_v2  ;;  %4028 = vmatpush.msrb.mxu0 %v3606_v55  ;;  %v3484_v47 = vld [vmem:[#allocation2 + $0x2008] sm:$0xff]  ;;  %v3589_v2 = vld [vmem:[#allocation2 + $0x2350] sm:$0xff] }
 0x3f8   : > { %4151 = vmatpush.msra.mxu1 %v3502_v1  ;;  %4188 = vmatpush.msra.mxu3 %v3607_v53  ;;  %v3733_v55 = vld [vmem:[#allocation2 + $0x27d0] sm:$0xff] }
 0x3f9   : > { %4248 = vmatpush.msra.mxu2 %v3751_v15  ;;  %4029 = vmatpush.msrb.mxu0 %v3603_v7  ;;  %v3585_v1 = vld [vmem:[#allocation2 + $0x2330] sm:$0xff]  ;;  %v3586_v15 = vld [vmem:[#allocation2 + $0x2338] sm:$0xff] }
 0x3fa   : > { %4152 = vmatpush.msra.mxu1 %v3499_v20  ;;  %4189 = vmatpush.msra.mxu3 %v3604_v61  ;;  %v3481_v53 = vld [vmem:[#allocation2 + $0x1ff0] sm:$0xff]  ;;  %v3730_v7 = vld [vmem:[#allocation2 + $0x27b8] sm:$0xff] }
 0x3fb   : > { %4249 = vmatpush.msra.mxu2 %v3748_v63  ;;  %4030 = vmatpush.msrb.mxu0 %v3600_v12  ;;  %v3582_v20 = vld [vmem:[#allocation2 + $0x2318] sm:$0xff]  ;;  %v3583_v63 = vld [vmem:[#allocation2 + $0x2320] sm:$0xff]  ;;  %v9783_v12 = vpop.f32.mrf.mxu1 }
 0x3fc   : > { %4153 = vmatpush.msra.mxu1 %v3496_v6  ;;  %4190 = vmatpush.msra.mxu3 %v3601_v21  ;;  %v3478_v61 = vld [vmem:[#allocation2 + $0x1fd8] sm:$0xff]  ;;  %v3727_v6 = vld [vmem:[#allocation2 + $0x27a0] sm:$0xff] }
 0x3fd   : > { %4250 = vmatpush.msra.mxu2 %v3745_v8  ;;  %4031 = vmatpush.msrb.mxu0 %v3597_v41  ;;  %v3715_v21 = vld [vmem:[#allocation2 + $0x2740] sm:$0xff]  ;;  %v9785_v41 = vpop.f32.mrf.mxu3 }
 0x3fe   : > { %4154 = vmatpush.msra.mxu1 %v3493_v37  ;;  %4191 = vmatpush.msra.mxu3 %v3598_v46  ;;  %v3579_v8 = vld [vmem:[#allocation2 + $0x2300] sm:$0xff]  ;;  %v9787_v37 = vpop.f32.mrf.mxu0  ;;  %v3580_v46 = vld [vmem:[#allocation2 + $0x2308] sm:$0xff] }
 0x3ff   : > { %4251 = vmatpush.msra.mxu2 %v3742_v58  ;;  %4032 = vmatpush.msrb.mxu0 %v3594_v54  ;;  %v3724_v58 = vld [vmem:[#allocation2 + $0x2788] sm:$0xff] }
 0x400   : > { %4155 = vmatpush.msra.mxu1 %v3490_v24  ;;  %4192 = vmatpush.msra.mxu3 %v3595_v14  ;;  %v3712_v54 = vld [vmem:[#allocation2 + $0x2728] sm:$0xff]  ;;  %v9790_v14 = vpop.f32.mrf.mxu2 }
 0x401   : > { %4252 = vmatpush.msra.mxu2 %v3739_v62  ;;  %4033 = vmatpush.msrb.mxu0 %v3591_v56  ;;  %v3576_v24 = vld [vmem:[#allocation2 + $0x22e8] sm:$0xff]  ;;  %v3577_v62 = vld [vmem:[#allocation2 + $0x22f0] sm:$0xff] }
 0x402   : > { %4156 = vmatpush.msra.mxu1 %v3487_v31  ;;  %4193 = vmatpush.msra.mxu3 %v3592_v43  ;;  %v3721_v56 = vld [vmem:[#allocation2 + $0x2770] sm:$0xff] }
 0x403   : > { %4253 = vmatpush.msra.mxu2 %v3736_v36  ;;  %4034 = vmatpush.msrb.mxu0 %v3588_v25  ;;  %v3709_v31 = vld [vmem:[#allocation2 + $0x2710] sm:$0xff]  ;;  %v3574_v36 = vld [vmem:[#allocation2 + $0x22d8] sm:$0xff] }
 0x404   : > { %4157 = vmatpush.msra.mxu1 %v3484_v47  ;;  %4194 = vmatpush.msra.mxu3 %v3589_v2  ;;  %v3573_v43 = vld [vmem:[#allocation2 + $0x22d0] sm:$0xff]  ;;  %v3810_v25 = vld [vmem:[#allocation2 + $0x2a38] sm:$0xff]  ;;  %v9792_v47 = vpop.f32.mrf.mxu1 }
 0x405   : > { %4254 = vmatpush.msra.mxu2 %v3733_v55  ;;  %4035 = vmatpush.msrb.mxu0 %v3585_v1  ;;  %v3718_v2 = vld [vmem:[#allocation2 + $0x2758] sm:$0xff]  ;;  %v3811_v55 = vld [vmem:[#allocation2 + $0x2a40] sm:$0xff] }
 0x406   : > { %4158 = vmatpush.msra.mxu1 %v3481_v53  ;;  %4195 = vmatpush.msra.mxu3 %v3586_v15  ;;  %v9795_v1 = vpop.f32.mrf.mxu0  ;;  %v3807_v53 = vld [vmem:[#allocation2 + $0x2a20] sm:$0xff] }
 0x407   : > { %4255 = vmatpush.msra.mxu2 %v3730_v7  ;;  %4036 = vmatpush.msrb.mxu0 %v3582_v20  ;;  %v3703_v15 = vld [vmem:[#allocation2 + $0x26e0] sm:$0xff]  ;;  %v3808_v7 = vld [vmem:[#allocation2 + $0x2a28] sm:$0xff] }
 0x408   : > { %4159 = vmatpush.msra.mxu1 %v3478_v61  ;;  %4196 = vmatpush.msra.mxu3 %v3583_v63  ;;  %v9798_v20 = vpop.f32.mrf.mxu2  ;;  %v9800_v61 = vpop.f32.mrf.mxu3  ;;  %v3804_v63 = vld [vmem:[#allocation2 + $0x2a08] sm:$0xff] }
 0x409   : > { %4160 = vmatmul.f32.vlgmr.msra.gmra.mxu1 %v9614_v26  ;;  %4256 = vmatpush.msra.mxu2 %v3727_v6  ;;  %v3706_v26 = vld [vmem:[#allocation2 + $0x26f8] sm:$0xff]  ;;  %v3700_v6 = vld [vmem:[#allocation2 + $0x26c8] sm:$0xff] }
 0x40a   : > { %4224 = vmatpush.msrb.mxu1 %v3715_v21  ;;  %4037 = vmatpush.msrb.mxu0 %v3579_v8  ;;  %v3805_v21 = vld [vmem:[#allocation2 + $0x2a10] sm:$0xff] }
 0x40b   : > { %4197 = vmatpush.msra.mxu3 %v3580_v46  ;;  %4257 = vmatpush.msra.mxu2 %v3724_v58  ;;  %v3801_v8 = vld [vmem:[#allocation2 + $0x29f0] sm:$0xff]  ;;  %v3802_v58 = vld [vmem:[#allocation2 + $0x29f8] sm:$0xff] }
 0x40c   : > { %4225 = vmatpush.msrb.mxu1 %v3712_v54  ;;  %4038 = vmatpush.msrb.mxu0 %v3576_v24  ;;  %v3697_v46 = vld [vmem:[#allocation2 + $0x26b0] sm:$0xff]  ;;  %v3798_v54 = vld [vmem:[#allocation2 + $0x29d8] sm:$0xff] }
 0x40d   : > { %4198 = vmatpush.msra.mxu3 %v3577_v62  ;;  %4258 = vmatpush.msra.mxu2 %v3721_v56  ;;  %v3694_v24 = vld [vmem:[#allocation2 + $0x2698] sm:$0xff]  ;;  %v3795_v56 = vld [vmem:[#allocation2 + $0x29c0] sm:$0xff] }
 0x40e   : > { %4226 = vmatpush.msrb.mxu1 %v3709_v31  ;;  %4039 = vmatpush.msrb.mxu0 %v3573_v43  ;;  %v9805_v62 = vpop.f32.mrf.mxu0  ;;  %v3691_v31 = vld [vmem:[#allocation2 + $0x2680] sm:$0xff]  ;;  %v3796_v43 = vld [vmem:[#allocation2 + $0x29c8] sm:$0xff] }
 0x40f   : > { %4040 = vmatmul.f32.vlgmr.msrb.gmra.mxu0 %v9392_v11  ;;  %4199 = vmatpush.msra.mxu3 %v3574_v36 }
 0x410   : > { %4104 = vmatpush.msra.mxu0 %v3810_v25  ;;  %4227 = vmatpush.msrb.mxu1 %v3706_v26  ;;  %v9807_v36 = vpop.f32.mrf.mxu2  ;;  %v9809_v25 = vpop.f32.mrf.mxu3  ;;  %v3792_v26 = vld [vmem:[#allocation2 + $0x29a8] sm:$0xff] }
 0x411   : > { %4259 = vmatpush.msra.mxu2 %v3718_v2  ;;  %4200 = vmatmul.f32.vlgmr.msra.gmra.mxu3 %v9392_v11  ;;  %v9803_v11 = vpop.f32.mrf.mxu1  ;;  %v3688_v2 = vld [vmem:[#allocation2 + $0x2668] sm:$0xff] }
 0x412   : > { %4260 = vmatmul.f32.vlgmr.msra.gmra.mxu2 %v9600_v23  ;;  %4264 = vmatpush.msrb.mxu3 %v3811_v55  ;;  %v3799_v23 = vld [vmem:[#allocation2 + $0x29e0] sm:$0xff]  ;;  %v3793_v55 = vld [vmem:[#allocation2 + $0x29b0] sm:$0xff] }
 0x413   : > { %4105 = vmatpush.msra.mxu0 %v3807_v53  ;;  %4228 = vmatpush.msrb.mxu1 %v3703_v15  ;;  %v3789_v53 = vld [vmem:[#allocation2 + $0x2990] sm:$0xff] }
 0x414   : > { %4265 = vmatpush.msrb.mxu3 %v3808_v7  ;;  %v3685_v15 = vld [vmem:[#allocation2 + $0x2650] sm:$0xff]  ;;  %v3790_v7 = vld [vmem:[#allocation2 + $0x2998] sm:$0xff] }
 0x415   : > { %4106 = vmatpush.msra.mxu0 %v3804_v63  ;;  %4229 = vmatpush.msrb.mxu1 %v3700_v6  ;;  %v3786_v6 = vld [vmem:[#allocation2 + $0x2978] sm:$0xff] }
 0x416   : > { %4266 = vmatpush.msrb.mxu3 %v3805_v21  ;;  %v3682_v21 = vld [vmem:[#allocation2 + $0x2638] sm:$0xff] }
 0x417   : > { %4107 = vmatpush.msra.mxu0 %v3801_v8  ;;  %4230 = vmatpush.msrb.mxu1 %v3697_v46  ;;  %v3787_v8 = vld [vmem:[#allocation2 + $0x2980] sm:$0xff]  ;;  %v9813_v46 = vpop.f32.mrf.mxu0 }
 0x418   : > { %4267 = vmatpush.msrb.mxu3 %v3802_v58  ;;  %12261 = vst [vmem:[#allocation29_spill] sm:$0xff] %v9813_v46  ;;  %v3783_v58 = vld [vmem:[#allocation2 + $0x2960] sm:$0xff]  ;;  %v3637_v46 = vld [vmem:[#allocation2 + $0x24d0] sm:$0xff] }
 0x419   : > { %4108 = vmatpush.msra.mxu0 %v3798_v54  ;;  %4231 = vmatpush.msrb.mxu1 %v3694_v24  ;;  %v9811_v63 = vpop.f32.mrf.mxu1  ;;  %v3679_v54 = vld [vmem:[#allocation2 + $0x2620] sm:$0xff]  ;;  %v3784_v24 = vld [vmem:[#allocation2 + $0x2968] sm:$0xff] }
 0x41a   : > { %4268 = vmatpush.msrb.mxu3 %v3799_v23  ;;  %12260 = vst [vmem:[#allocation28_spill] sm:$0xff] %v9811_v63  ;;  %v9815_v23 = vpop.f32.mrf.mxu2 }
 0x41b   : > { %4109 = vmatpush.msra.mxu0 %v3795_v56  ;;  %4232 = vmatpush.msrb.mxu1 %v3691_v31  ;;  %12262 = vst [vmem:[#allocation30_spill] sm:$0xff] %v9815_v23  ;;  %v9817_v56 = vpop.f32.mrf.mxu3  ;;  %v3780_v31 = vld [vmem:[#allocation2 + $0x2948] sm:$0xff] }
 0x41c   : > { %4269 = vmatpush.msrb.mxu3 %v3796_v43  ;;  %12263 = vst [vmem:[#allocation31_spill] sm:$0xff] %v9817_v56  ;;  %v3676_v43 = vld [vmem:[#allocation2 + $0x2608] sm:$0xff] }
 0x41d   : > { %4110 = vmatpush.msra.mxu0 %v3792_v26  ;;  %4233 = vmatpush.msrb.mxu1 %v3688_v2  ;;  %v3781_v26 = vld [vmem:[#allocation2 + $0x2950] sm:$0xff] }
 0x41e   : > { %4270 = vmatpush.msrb.mxu3 %v3793_v55  ;;  %v3777_v2 = vld [vmem:[#allocation2 + $0x2930] sm:$0xff] }
 0x41f   : > { %4111 = vmatpush.msra.mxu0 %v3789_v53  ;;  %4234 = vmatpush.msrb.mxu1 %v3685_v15  ;;  %v3673_v55 = vld [vmem:[#allocation2 + $0x25f0] sm:$0xff]  ;;  %v3778_v53 = vld [vmem:[#allocation2 + $0x2938] sm:$0xff] }
 0x420   : > { %4271 = vmatpush.msrb.mxu3 %v3790_v7  ;;  %v3774_v7 = vld [vmem:[#allocation2 + $0x2918] sm:$0xff] }
 0x421   : > { %4112 = vmatpush.msra.mxu0 %v3786_v6  ;;  %4235 = vmatpush.msrb.mxu1 %v3682_v21  ;;  %v9819_v15 = vpop.f32.mrf.mxu1  ;;  %v3670_v6 = vld [vmem:[#allocation2 + $0x25d8] sm:$0xff]  ;;  %v3775_v21 = vld [vmem:[#allocation2 + $0x2920] sm:$0xff] }
 0x422   : > { %4272 = vmatpush.msrb.mxu3 %v3787_v8  ;;  %12264 = vst [vmem:[#allocation32_spill] sm:$0xff] %v9819_v15  ;;  %v9821_v8 = vpop.f32.mrf.mxu0  ;;  %v3643_v15 = vld [vmem:[#allocation2 + $0x2500] sm:$0xff] }
 0x423   : > { %4113 = vmatpush.msra.mxu0 %v3783_v58  ;;  %4236 = vmatpush.msrb.mxu1 %v3679_v54  ;;  %v3771_v58 = vld [vmem:[#allocation2 + $0x2900] sm:$0xff]  ;;  %v3772_v54 = vld [vmem:[#allocation2 + $0x2908] sm:$0xff] }
 0x424   : > { %4273 = vmatpush.msrb.mxu3 %v3784_v24  ;;  %v9823_v24 = vpop.f32.mrf.mxu3 }
 0x425   : > { %4114 = vmatpush.msra.mxu0 %v3780_v31  ;;  %4237 = vmatpush.msrb.mxu1 %v3676_v43  ;;  %v3768_v31 = vld [vmem:[#allocation2 + $0x28e8] sm:$0xff]  ;;  %v3769_v43 = vld [vmem:[#allocation2 + $0x28f0] sm:$0xff] }
 0x426   : > { %4274 = vmatpush.msrb.mxu3 %v3781_v26  ;;  %v9826_v26 = vpop.f32.mrf.mxu2 }
 0x427   : > { %4115 = vmatpush.msra.mxu0 %v3777_v2  ;;  %4238 = vmatpush.msrb.mxu1 %v3673_v55  ;;  %12265 = vst [vmem:[#allocation33_spill] sm:$0xff] %v9826_v26  ;;  %v3765_v2 = vld [vmem:[#allocation2 + $0x28d0] sm:$0xff]  ;;  %v3766_v55 = vld [vmem:[#allocation2 + $0x28d8] sm:$0xff]  ;;  %v3652_v26 = vld [vmem:[#allocation2 + $0x2548] sm:$0xff] }
 0x428   : > { %4275 = vmatpush.msrb.mxu3 %v3778_v53  ;;  %v3667_v53 = vld [vmem:[#allocation2 + $0x25c0] sm:$0xff] }
 0x429   : > { %4116 = vmatpush.msra.mxu0 %v3774_v7  ;;  %4239 = vmatpush.msrb.mxu1 %v3670_v6  ;;  %v9828_v51 = vpop.f32.mrf.mxu1 }
 0x42a   : > { %4240 = vmatmul.f32.vlgmr.msrb.gmra.mxu1 %v9628_v17  ;;  %4276 = vmatpush.msrb.mxu3 %v3775_v21  ;;  %v9830_v7 = vpop.f32.mrf.mxu0  ;;  %v3664_v17 = vld [vmem:[#allocation2 + $0x25a8] sm:$0xff]  ;;  %v3661_v21 = vld [vmem:[#allocation2 + $0x2590] sm:$0xff] }
 0x42b   : > { %4117 = vmatpush.msra.mxu0 %v3771_v58 }
 0x42c   : > { %4277 = vmatpush.msrb.mxu3 %v3772_v54  ;;  %v9834_v6 = vpop.f32.mrf.mxu3  ;;  %v3658_v54 = vld [vmem:[#allocation2 + $0x2578] sm:$0xff] }
 0x42d   : > { %4118 = vmatpush.msra.mxu0 %v3768_v31  ;;  %v3655_v31 = vld [vmem:[#allocation2 + $0x2560] sm:$0xff] }
 0x42e   : > { %4278 = vmatpush.msrb.mxu3 %v3769_v43  ;;  %v3009_v58 = vpop.f32.mrf.mxu2 }
 0x42f   : > { %4119 = vmatpush.msra.mxu0 %v3765_v2 }
 0x430   : > { %4120 = vmatmul.f32.vlgmr.msra.gmra.mxu0 %v9546_v22  ;;  %4279 = vmatpush.msrb.mxu3 %v3766_v55 }
 0x431   : > { %4204 = vmatpush.msrb.mxu0 %v3667_v53  ;;  %4280 = vmatmul.f32.vlgmr.msrb.gmra.mxu3 %v9546_v22  ;;  %v9836_v43 = vpop.f32.mrf.mxu1  ;;  %v3649_v53 = vld [vmem:[#allocation2 + $0x2530] sm:$0xff] }
 0x432   : > { %v9838_v2 = vpop.f32.mrf.mxu0 }
 0x433   : > { %4205 = vmatpush.msrb.mxu0 %v3664_v17 }
 0x434   : > { %v9840_v55 = vpop.f32.mrf.mxu3 }
 0x435   : > { %4206 = vmatpush.msrb.mxu0 %v3661_v21  ;;  %v3640_v21 = vld [vmem:[#allocation2 + $0x24e8] sm:$0xff] }
 0x436   : > { %v3089_v22 = vpop.f32.mrf.mxu2 }
 0x437   : > { %4207 = vmatpush.msrb.mxu0 %v3658_v54 }
 0x439   : > { %4208 = vmatpush.msrb.mxu0 %v3655_v31  ;;  %v9842_v17 = vpop.f32.mrf.mxu1 }
 0x43a   : > { %v9846_v19 = vpop.f32.mrf.mxu0 }
 0x43b   : > { %4209 = vmatpush.msrb.mxu0 %v3652_v26  ;;  %v3631_v26 = vld [vmem:[#allocation2 + $0x24a0] sm:$0xff] }
 0x43c   : > { %v9844_v54 = vpop.f32.mrf.mxu3 }
 0x43d   : > { %4210 = vmatpush.msrb.mxu0 %v3649_v53  ;;  %v3628_v53 = vld [vmem:[#allocation2 + $0x2488] sm:$0xff] }
 0x43e   : > { %v9848_v31 = vpop.f32.mrf.mxu2 }
 0x43f   : > { %4211 = vmatpush.msrb.mxu0 %v3646_v27 }
 0x441   : > { %4212 = vmatpush.msrb.mxu0 %v3643_v15  ;;  %v9850_v56 = vpop.f32.mrf.mxu1  ;;  %v3625_v15 = vld [vmem:[#allocation2 + $0x2470] sm:$0xff] }
 0x442   : > { %v9854_v4 = vpop.f32.mrf.mxu0 }
 0x443   : > { %4213 = vmatpush.msrb.mxu0 %v3640_v21  ;;  %v3814_v21 = vld [vmem:[#allocation2 + $0x2a58] sm:$0xf] }
 0x444   : > { %v9852_v27 = vpop.f32.mrf.mxu3 }
 0x445   : > { %4214 = vmatpush.msrb.mxu0 %v3637_v46  ;;  %12266 = vst [vmem:[#allocation34_spill] sm:$0xff] %v9852_v27  ;;  %v3030_v27 = vadd.f32 %v9823_v24, %v3009_v58 }
 0x446   : > { %v9856_v23 = vpop.f32.mrf.mxu2 }
 0x447   : > { %4215 = vmatpush.msrb.mxu0 %v3634_v52 }
 0x449   : > { %4216 = vmatpush.msrb.mxu0 %v3631_v26  ;;  %v9858_v63 = vpop.f32.mrf.mxu1 }
 0x44a   : > { %v9862_v52 = vpop.f32.mrf.mxu0 }
 0x44b   : > { %4217 = vmatpush.msrb.mxu0 %v3628_v53  ;;  %12267 = vst [vmem:[#allocation35_spill] sm:$0xff] %v9862_v52  ;;  %v1369_v53 = vadd.f32 %v9717_v32, %v9726_v57 }
 0x44c   : > { %v9866_v26 = vpop.f32.mrf.mxu3 }
 0x44d   : > { %4218 = vmatpush.msrb.mxu0 %v3625_v15  ;;  %12268 = vst [vmem:[#allocation36_spill] sm:$0xff] %v9866_v26  ;;  %v2198_v15 = vadd.f32 %v9769_v9, %v9775_v39  ;;  %v3050_v26 = vadd.f32 %v9821_v8, %v3030_v27 }
 0x44e   : > { %v9864_v46 = vpop.f32.mrf.mxu2 }
 0x44f   : > { %4219 = vmatpush.msrb.mxu0 %v3622_v38  ;;  %v2218_v38 = vadd.f32 %v9771_v44, %v2198_v15  ;;  %v3070_v39 = vadd.f32 %v9828_v51, %v3050_v26 }
 0x450   : > { %4220 = vmatmul.f32.vlgmr.msrb.gmra.mxu0 %v9457_v33  ;;  %v1389_v33 = vadd.f32 %v9712_v16, %v1369_v53 }
 0x451   : > { %7893 = vmatpush.msk.msra.mxu0 %vm1321_vm8, %v3814_v21  ;;  %v9874_v13 = vpop.f32.mrf.mxu1  ;;  %v2238_v21 = vadd.f32 %v9781_v28, %v2218_v38  ;;  %v3090_v53 = vadd.f32 %v3089_v22, %v3070_v39 }
 0x452   : > { %v3861_v52 = vpop.f32.mrf.mxu0  ;;  %v1409_v9 = vadd.f32 %v9715_v18, %v1389_v33 }
 0x453   : > { %v2258_v44 = vadd.f32 %v9783_v12, %v2238_v21  ;;  %v3110_v38 = vadd.f32 %v9834_v6, %v3090_v53 }
 0x454   : > { %v3841_v57 = vpop.f32.mrf.mxu3  ;;  %v1429_v58 = vadd.f32 %v9734_v10, %v1409_v9 }
 0x455   : > { %v3862_v24 = vadd.f32 %v3861_v52, %v3841_v57  ;;  %v2278_v16 = vadd.f32 %v9777_v42, %v2258_v44  ;;  %v3130_v51 = vadd.f32 %v9830_v7, %v3110_v38 }
 0x456   : > { %v9881_v32 = vpop.f32.mrf.mxu2  ;;  %v1449_v8 = vadd.f32 %v9728_v5, %v1429_v58 }
 0x457   : > { %v2298_v15 = vadd.f32 %v9779_v3, %v2278_v16  ;;  %v3150_v22 = vadd.f32 %v9836_v43, %v3130_v51  ;;  %v3190_v43 = vadd.f32 %v9848_v31, %v9842_v17 }
 0x458   : > { %7894 = vmatmul.msk.f32.vlgmr.msra.gmra.mxu0 %vm1317_vm9, %v9544_v59  ;;  %v1469_v12 = vadd.f32 %v9720_v29, %v1449_v8 }
 0x459   : > { %v3881_v59 = vpop.f32.mrf.mxu1  ;;  %v2318_v10 = vadd.f32 %v9790_v14, %v2298_v15  ;;  %v1529_v14 = vadd.f32 %v9742_v30, %v9732_v35 }
 0x45a   : > { %v3882_v28 = vadd.f32 %v3881_v59, %v3862_v24  ;;  %v1489_v42 = vadd.f32 %v9724_v60, %v1469_v12  ;;  %v2358_v60 = vadd.f32 %v9792_v47, %v9787_v37  ;;  %v3210_v24 = vadd.f32 %v9840_v55, %v3190_v43 }
 0x45b   : > { %v1549_v39 = vadd.f32 %v9736_v0, %v1529_v14  ;;  %v12277_v14 = vld [vmem:[#allocation23_spill] sm:$0xff] }
 0x45c   : > { %v3921_v52 = vpop.f32.mrf.mxu3  ;;  %v2640_v57 = vmax.f32 %v1489_v42, %v2318_v10  ;;  %v2378_v7 = vadd.f32 %v9798_v20, %v2358_v60  ;;  %v3230_v16 = vadd.f32 %v9838_v2, %v3210_v24  ;;  %v12269_v10 = vld [vmem:[#allocation21_spill] sm:$0xff] }
 0x45d   : > { %v1569_v35 = vadd.f32 %v9730_v34, %v1549_v39 }
 0x45e   : > { %v3901_v27 = vpop.f32.mrf.mxu2  ;;  %v3472_v6 = vmax.f32 %v2640_v57, %v3150_v22  ;;  %v2398_v59 = vadd.f32 %v9785_v41, %v2378_v7  ;;  %v3250_v17 = vadd.f32 %v9850_v56, %v3230_v16  ;;  %v12271_v22 = vld [vmem:[#allocation25_spill] sm:$0xff]  ;;  %v5465_v57 = vld [vmem:[%s12225_s4 + $0x30] sm:$0x1]  ;;  %v12279_v16 = vld [vmem:[#allocation24_spill] sm:$0xff] }
 0x45f   : > { %v3902_v18 = vadd.f32 %v3901_v27, %v3882_v28  ;;  %v1589_v0 = vadd.f32 %v9740_v49, %v1569_v35  ;;  %v12278_v7 = vld [vmem:[#allocation29_spill] sm:$0xff] }
 0x460   : > { %v2418_v30 = vadd.f32 %v9795_v1, %v2398_v59  ;;  %v3270_v2 = vadd.f32 %v9856_v23, %v3250_v17  ;;  %v12281_v17 = vld [vmem:[#allocation27_spill] sm:$0xff] }
 0x461   : > { %v3922_v26 = vadd.f32 %v3921_v52, %v3902_v18  ;;  %v3961_v21 = vpop.f32.mrf.mxu1  ;;  %v1609_v41 = vadd.f32 %v9752_v45, %v1589_v0  ;;  %v3350_v52 = vadd.f32 %v9858_v63, %v9854_v4  ;;  %v12274_v63 = vld [vmem:[#allocation34_spill] sm:$0xff] }
 0x462   : > { %v2438_v55 = vadd.f32 %v9803_v11, %v2418_v30  ;;  %v3290_v56 = vadd.f32 %v9844_v54, %v3270_v2  ;;  %v5459_v54 = vld [vmem:[%s12225_s4] sm:$0xff] }
 0x463   : > { %v1629_v8 = vadd.f32 %v9744_v50, %v1609_v41  ;;  %v12282_v41 = vld [vmem:[#allocation33_spill] sm:$0xff] }
 0x464   : > { %v4021_v58 = vpop.f32.mrf.mxu3  ;;  %v2458_v34 = vadd.f32 %v9807_v36, %v2438_v55  ;;  %v3310_v45 = vadd.f32 %v9846_v19, %v3290_v56  ;;  %v2518_v19 = vadd.f32 %v9805_v62, %v9809_v25  ;;  %v12272_v62 = vld [vmem:[#allocation30_spill] sm:$0xff] }
 0x465   : > { %v1649_v15 = vadd.f32 %v9738_v40, %v1629_v8  ;;  %v5462_v40 = vld [vmem:[%s12225_s4 + $0x18] sm:$0xff] }
 0x466   : > { %v3981_v9 = vpop.f32.mrf.mxu2  ;;  %v2478_v49 = vadd.f32 %v9800_v61, %v2458_v34  ;;  %v12284_v8 = vld [vmem:[#allocation36_spill] sm:$0xff] }
 0x468   : > { %v2641_v18 = vmax.f32 %v1649_v15, %v2478_v49 }
 0x469   : > { %v4061_v53 = vpop.f32.mrf.mxu1 }
 0x46a   : > { %v3941_v33 = vpop.f32.mrf.mxu0  ;;  %v3473_v51 = vmax.f32 %v2641_v18, %v3310_v45  ;;  %v4307_v18 = vld [vmem:[%s12224_s3] sm:$0xff] }
 0x46b   : > { %v3942_v5 = vadd.f32 %v3941_v33, %v3922_v26  ;;  %v1689_v26 = vadd.f32 %v12269_v10, %v9748_v48  ;;  %v12270_v33 = vld [vmem:[#allocation28_spill] sm:$0xff]  ;;  %v12275_v48 = vld [vmem:[#allocation31_spill] sm:$0xff]  ;;  %v4312_v10 = vld [vmem:[%s12224_s3 + $0x28] sm:$0xff] }
 0x46c   : > { %v2538_v42 = vadd.f32 %v12270_v33, %v2518_v19  ;;  %v10008_v19 = vld [vmem:[%s12224_s3 + $0x38] sm:$0xff] }
 0x46d   : > { %v3962_v3 = vadd.f32 %v3961_v21, %v3942_v5  ;;  %v1709_v5 = vadd.f32 %v12271_v22, %v1689_v26  ;;  %v3370_v21 = vadd.f32 %v9864_v46, %v3350_v52 }
 0x46e   : > { %v4001_v37 = vpop.f32.mrf.mxu2  ;;  %v2558_v25 = vadd.f32 %v12272_v62, %v2538_v42  ;;  %v10026_v42 = vld [vmem:[%s12224_s3 + $0x40] sm:$0xff]  ;;  %v10046_v62 = vld [vmem:[%s12224_s3 + $0x48] sm:$0xff] }
 0x46f   : > { %v3982_v44 = vadd.f32 %v3981_v9, %v3962_v3  ;;  %v4022_v20 = vadd.f32 %v4021_v58, %v4001_v37  ;;  %v12273_v3 = vld [vmem:[#allocation22_spill] sm:$0xff]  ;;  %v3390_v9 = vadd.f32 %v12274_v63, %v3370_v21 }
 0x470   : > { %v1729_v4 = vadd.f32 %v12273_v3, %v1709_v5  ;;  %v5461_v5 = vld [vmem:[%s12225_s4 + $0x10] sm:$0xff]  ;;  %v5464_v3 = vld [vmem:[%s12225_s4 + $0x28] sm:$0xff] }
 0x471   : > { %v4304_v29 = vmax.f32 %v3472_v6, %v3982_v44  ;;  %v4141_v12 = vpop.f32.mrf.mxu1  ;;  %v2578_v6 = vadd.f32 %v12275_v48, %v2558_v25  ;;  %v12276_v44 = vld [vmem:[#allocation35_spill] sm:$0xff]  ;;  %v4313_v21 = vld [vmem:[%s12224_s3 + $0x30] sm:$0x1] }
 0x472   : > { %v4101_v11 = vpop.f32.mrf.mxu3  ;;  %v1749_v46 = vadd.f32 %v12277_v14, %v1729_v4  ;;  %v10056_v4 = vld [vmem:[%s12224_s3 + $0xa8] sm:$0xff]  ;;  %v10066_v48 = vld [vmem:[%s12224_s3 + $0x50] sm:$0xff]  ;;  %v10080_v14 = vld [vmem:[%s12224_s3 + $0x58] sm:$0xff] }
 0x473   : > { %4325 = vrot.lane.b32.xlu1 %v4304_v29, %s8867_s25  ;;  %7918 = vmatpush.msk.msrb.mxu2 %vm4355_vm10, %v4304_v29  ;;  %v2598_v43 = vadd.f32 %v12278_v7, %v2578_v6 }
 0x474   : > { %v1769_v37 = vadd.f32 %v12279_v16, %v1749_v46  ;;  %7919 = vmatmul.msk.f32.vlgmr.msrb.gmra.mxu2 %vm4333_vm11, %v4307_v18 }
 0x476   : > { %v4081_v1 = vpop.f32.mrf.mxu2 }
 0x47b   : > { %4545 = vrot.lane.b32.xlu1 %v4304_v29, %s8869_s12 }
 0x47e   : > { %v4181_v39 = vpop.f32.mrf.mxu2 }
 0x483   : > { %4676 = vrot.lane.b32.xlu1 %v4304_v29, %s8875_s15 }
 0x486   : > { %v4161_v60 = vpop.f32.mrf.mxu1 }
 0x487   : > { %v4182_v59 = vadd.f32 %v4181_v39, %v4161_v60 }
 0x48b   : > { %4808 = vrot.lane.b32.xlu1 %v4304_v29, %s8876_s5 }
 0x48c   : > { %v4041_v47 = vpop.f32.mrf.mxu0 }
 0x48d   : > { %v4042_v31 = vadd.f32 %v4041_v47, %v4022_v20  ;;  %v12280_v47 = vld [vmem:[#allocation32_spill] sm:$0xff] }
 0x48e   : > { %v2618_v35 = vadd.f32 %v12280_v47, %v2598_v43  ;;  %v7959_v43 = vld [vmem:[%s12224_s3 + $0xb8] sm:$0xff] }
 0x48f   : > { %v4062_v28 = vadd.f32 %v4061_v53, %v4042_v31  ;;  %v1789_v31 = vadd.f32 %v12281_v17, %v1769_v37  ;;  %v10109_v37 = vld [vmem:[%s12224_s3 + $0x68] sm:$0x1] }
 0x490   : > { %v2638_v2 = vadd.f32 %v12282_v41, %v2618_v35  ;;  %v10120_v35 = vld [vmem:[%s12224_s3 + $0xc8] sm:$0xff] }
 0x491   : > { %v4082_v27 = vadd.f32 %v4081_v1, %v4062_v28 }
 0x493   : > { %4940 = vrot.lane.b32.xlu1 %v4304_v29, %s8877_s17  ;;  %v4102_v23 = vadd.f32 %v4101_v11, %v4082_v27 }
 0x494   : > { %v4201_v24 = vpop.f32.mrf.mxu3 }
 0x495   : > { %v4202_v30 = vadd.f32 %v4201_v24, %v4182_v59  ;;  %v4261_v34 = vpop.f32.mrf.mxu2  ;;  %v10096_v24 = vld [vmem:[%s12224_s3 + $0x60] sm:$0xff] }
 0x49b   : > { %5072 = vrot.lane.b32.xlu1 %v4304_v29, %s8871_s22 }
 0x4a3   : > { %5203 = vrot.lane.b32.xlu1 %v4304_v29, %s8878_s19 }
 0x4a7   : > { %v4241_v53 = vpop.f32.mrf.mxu1 }
 0x4ab   : > { %5335 = vrot.lane.b32.xlu1 %v4304_v29, %s8879_s20  ;;  %v3410_v29 = vadd.f32 %v12276_v44, %v3390_v9 }
 0x4ad   : > { %v4121_v38 = vpop.f32.mrf.mxu0  ;;  %v3430_v58 = vadd.f32 %v9874_v13, %v3410_v29  ;;  %v12283_v13 = vld [vmem:[#allocation26_spill] sm:$0xff] }
 0x4ae   : > { %v4122_v36 = vadd.f32 %v4121_v38, %v4102_v23  ;;  %v1809_v1 = vadd.f32 %v12283_v13, %v1789_v31  ;;  %v7958_v29 = vld [vmem:[%s12224_s3 + $0xb0] sm:$0xff] }
 0x4af   : > { %v3450_v0 = vadd.f32 %v9881_v32, %v3430_v58  ;;  %v7960_v58 = vld [vmem:[%s12224_s3 + $0xc0] sm:$0xff] }
 0x4b0   : > { %v4142_v50 = vadd.f32 %v4141_v12, %v4122_v36  ;;  %v2642_v11 = vmax.f32 %v1809_v1, %v2638_v2  ;;  %v4308_v36 = vld [vmem:[%s12224_s3 + $0x8] sm:$0xff]  ;;  %v4309_v12 = vld [vmem:[%s12224_s3 + $0x10] sm:$0xff]  ;;  %v10158_v2 = vld [vmem:[%s12224_s3 + $0xd8] sm:$0x1] }
 0x4b1   : > { %v3470_v56 = vadd.f32 %v12284_v8, %v3450_v0  ;;  %7920 = vmatmul.msk.f32.gmra.mxu2 %vm4333_vm11, %v4308_v36  ;;  %v10139_v0 = vld [vmem:[%s12224_s3 + $0xd0] sm:$0xff]  ;;  %v10177_v1 = vld [vmem:[%s12224_s3 + $0x118] sm:$0xff]  ;;  %v10183_v8 = vld [vmem:[%s12224_s3 + $0x88] sm:$0xff] }
 0x4b2   : > { %v4305_v61 = vmax.f32 %v3473_v51, %v4142_v50  ;;  %v4310_v51 = vld [vmem:[%s12224_s3 + $0x18] sm:$0xff] }
 0x4b3   : > { %5468 = vperm.xlu1 %8648, %v5459_v54   ;;  %v3474_v23 = vmax.f32 %v2642_v11, %v3470_v56  ;;  %v4311_v54 = vld [vmem:[%s12224_s3 + $0x20] sm:$0xff]  ;;  %v10203_v11 = vld [vmem:[%s12224_s3 + $0x90] sm:$0xff] }
 0x4b4   : > { %4327 = vrot.lane.b32.xlu2 %v4305_v61, %s8867_s25  ;;  %7926 = vmatpush.msk.msra.mxu3 %vm4355_vm10, %v4305_v61  ;;  %v4281_v49 = vpop.f32.mrf.mxu3 }
 0x4b5   : > { %7927 = vmatmul.msk.f32.vlgmr.msra.gmra.mxu3 %vm4333_vm11, %v4307_v18  ;;  %v10235_v18 = vld [vmem:[%s12224_s3 + $0x130] sm:$0xff] }
 0x4b9   : > { %7921 = vmatmul.msk.f32.gmra.mxu2 %vm4333_vm11, %v4309_v12 }
 0x4bb   : > { %5483 = vperm.xlu1 %8648, %v5462_v40  }
 0x4bc   : > { %4547 = vrot.lane.b32.xlu2 %v4305_v61, %s8869_s12 }
 0x4bd   : > { %7928 = vmatmul.msk.f32.gmra.mxu3 %vm4333_vm11, %v4308_v36  ;;  %v10240_v36 = vld [vmem:[%s12224_s3 + $0xa0] sm:$0x1] }
 0x4c1   : > { %7922 = vmatmul.msk.f32.gmra.mxu2 %vm4333_vm11, %v4310_v51 }
 0x4c3   : > { %5498 = vperm.xlu1 %8648, %v5465_v57  }
 0x4c4   : > { %4678 = vrot.lane.b32.xlu2 %v4305_v61, %s8875_s15 }
 0x4c5   : > { %7929 = vmatmul.msk.f32.gmra.mxu3 %vm4333_vm11, %v4309_v12  ;;  %v10252_v12 = vld [vmem:[%s12224_s3 + $0x138] sm:$0xff] }
 0x4c9   : > { %7923 = vmatmul.msk.f32.gmra.mxu2 %vm4333_vm11, %v4311_v54 }
 0x4cc   : > { %4810 = vrot.lane.b32.xlu2 %v4305_v61, %s8876_s5 }
 0x4cd   : > { %v4221_v20 = vpop.f32.mrf.mxu0  ;;  %7930 = vmatmul.msk.f32.gmra.mxu3 %vm4333_vm11, %v4310_v51 }
 0x4ce   : > { %v4222_v55 = vadd.f32 %v4221_v20, %v4202_v30  ;;  %v10125_v30 = vld [vmem:[%s12224_s3 + $0x70] sm:$0xff] }
 0x4d0   : > { %v4242_v28 = vadd.f32 %v4241_v53, %v4222_v55  ;;  %v10145_v55 = vld [vmem:[%s12224_s3 + $0x78] sm:$0xff] }
 0x4d1   : > { %7924 = vmatmul.msk.f32.gmra.mxu2 %vm4333_vm11, %v4312_v10 }
 0x4d2   : > { %v4262_v27 = vadd.f32 %v4261_v34, %v4242_v28  ;;  %v10164_v28 = vld [vmem:[%s12224_s3 + $0x80] sm:$0xff] }
 0x4d4   : > { %v4282_v15 = vadd.f32 %v4281_v49, %v4262_v27  ;;  %4942 = vrot.lane.b32.xlu2 %v4305_v61, %s8877_s17  ;;  %v10197_v49 = vld [vmem:[%s12224_s3 + $0x120] sm:$0xff] }
 0x4d5   : > { %v4301_v45 = vpop.f32.mrf.mxu0  ;;  %7931 = vmatmul.msk.f32.gmra.mxu3 %vm4333_vm11, %v4311_v54 }
 0x4d6   : > { %v4302_v38 = vadd.f32 %v4301_v45, %v4282_v15  ;;  %v10215_v45 = vld [vmem:[%s12224_s3 + $0x128] sm:$0xff] }
 0x4d8   : > { %v4306_v32 = vmax.f32 %v3474_v23, %v4302_v38  ;;  %v10223_v38 = vld [vmem:[%s12224_s3 + $0x98] sm:$0xff] }
 0x4d9   : > { %7925 = vmatmul.msk.f32.gmra.mxu2 %vm4333_vm11, %v4313_v21 }
 0x4da   : > { %4329 = vrot.lane.b32.xlu0 %v4306_v32, %s8867_s25 }
 0x4dc   : > { %5074 = vrot.lane.b32.xlu2 %v4305_v61, %s8871_s22 }
 0x4dd   : > { %7932 = vmatmul.msk.f32.gmra.mxu3 %vm4333_vm11, %v4312_v10  ;;  %v10283_v10 = vld [vmem:[%s12224_s3 + $0xe8] sm:$0xff] }
 0x4e2   : > { %4549 = vrot.lane.b32.xlu0 %v4306_v32, %s8869_s12 }
 0x4e4   : > { %5205 = vrot.lane.b32.xlu2 %v4305_v61, %s8878_s19 }
 0x4e5   : > { %v4326_v50 = vpop.permute.xlu1 %4325  ;;  %7933 = vmatmul.msk.f32.gmra.mxu3 %vm4333_vm11, %v4313_v21  ;;  %v10321_v21 = vld [vmem:[%s12224_s3 + $0x188] sm:$0xff] }
 0x4ea   : > { %4680 = vrot.lane.b32.xlu0 %v4306_v32, %s8875_s15 }
 0x4ec   : > { %5337 = vrot.lane.b32.xlu2 %v4305_v61, %s8879_s20 }
 0x4ed   : > { %v4546_v61 = vpop.permute.xlu1 %4545 }
 0x4f2   : > { %4812 = vrot.lane.b32.xlu0 %v4306_v32, %s8876_s5 }
 0x4f5   : > { %v4677_v26 = vpop.permute.xlu1 %4676 }
 0x4fa   : > { %4944 = vrot.lane.b32.xlu0 %v4306_v32, %s8877_s17 }
 0x4fd   : > { %v4809_v63 = vpop.permute.xlu1 %4808 }
 0x502   : > { %5076 = vrot.lane.b32.xlu0 %v4306_v32, %s8871_s22 }
 0x505   : > { %v4941_v44 = vpop.permute.xlu1 %4940 }
 0x50a   : > { %5207 = vrot.lane.b32.xlu0 %v4306_v32, %s8878_s19  ;;  %s438_s19 = sand.u32 1, %s8840_s18  }
 0x50b   : > { %s439_s24 = scalar_lea.vmem [#allocation10], %s438_s19  ;;  %s7750_s13 = scalar_lea.sflag [#allocation4], %s438_s19 }
 0x50c   : > { %s7760_s25 = sshll.u32 %s439_s24, 4  ;;  %s7761_s25 = int_to_ptr.vmem [resolvable:$true] %s7760_s25 }
 0x50d   : > { %v5073_v7 = vpop.permute.xlu1 %5072 }
 0x50e   : > { %v10003_v40 = vpop.permute.xlu2 %4327 }
 0x50f   : > { %v4331_v52 = vsel %vm526_vm0, %v4326_v50, %v10003_v40 }
 0x510   : > { %7902 = vmatpush.msk.msrb.mxu0 %vm4355_vm10, %v4331_v52  ;;  %v10278_v52 = vld [vmem:[%s12224_s3 + $0x140] sm:$0xff] }
 0x511   : > { %7903 = vmatmul.msk.f32.vlgmr.msrb.gmra.mxu0 %vm4333_vm11, %v10008_v19 }
 0x512   : > { %5339 = vrot.lane.b32.xlu0 %v4306_v32, %s8879_s20  ;;  %s7762_s20 = sshll.u32 %s7758_s14, 4  ;;  %s7763_s20 = int_to_ptr.hbm [resolvable:$true] %s7762_s20 }
 0x513   : > { %s8788_s12 = sshra.s32 %s7763_s20, 4  ;;  %s8789_s12 = int_to_ptr.hbm [resolvable:$true] %s8788_s12 }
 0x514   : > { %s8790_s6 = scalar_lea.hbm %s8789_s12, 1  ;;  %p8795_p3 = scmp.lt.s32.totalorder %s8789_s12, %s12232_s11 }
 0x515   : > { %v5204_v59 = vpop.permute.xlu1 %5203  ;;  %p8791_p0 = scmp.ne.s32.totalorder %s8789_s12, %s8790_s6  ;;  %p8796_p4 = scmp.lt.s32.totalorder %s8794_s23, %s8790_s6 }
 0x516   : > { %v10021_v33 = vpop.permute.xlu2 %4547 }
 0x517   : > { %v4551_v22 = vsel %vm586_vm1, %v4546_v61, %v10021_v33  ;;  %v10262_v61 = vld [vmem:[%s12224_s3 + $0xe0] sm:$0xff]  ;;  %p8792_p1 = pnand %p8791_p0, %p8978_p5  ;;  %p8797_p7 = por %p8796_p4, %p8795_p3 }
 0x518   : > { %7941 = vmatpush.msk.msra.mxu0 %vm4355_vm10, %v4551_v22 }
 0x519   : > { %7904 = vmatmul.msk.f32.gmra.mxu0 %vm4333_vm11, %v10026_v42  ;;  %p8793_p2 = pneg %p8792_p1 }
 0x51a   : > { %5478 = vperm.xlu0 %8647, %v5461_v5   ;;  %v10308_v5 = vld [vmem:[%s12224_s3 + $0xf0] sm:$0xff] }
 0x51b   : > { %p8798_p8 = pnand %p8797_p7, %p8793_p2 }
 0x51e   : > { %v10041_v57 = vpop.permute.xlu2 %4678 }
 0x51f   : > { %v4683_v25 = vsel %vm4682_vm12, %v4677_v26, %v10041_v57 }
 0x520   : > { %7964 = vmatpush.msk.msra.mxu2 %vm4355_vm10, %v4683_v25  ;;  %v10330_v25 = vld [vmem:[%s12224_s3 + $0xf8] sm:$0xff] }
 0x521   : > { %7905 = vmatmul.msk.f32.gmra.mxu0 %vm4333_vm11, %v10046_v62  ;;  %7965 = vmatmul.msk.f32.vlgmr.msra.gmra.mxu2 %vm4333_vm11, %v10056_v4 }
 0x522   : > { %5493 = vperm.xlu0 %8647, %v5464_v3   ;;  %v10343_v3 = vld [vmem:[%s12224_s3 + $0x190] sm:$0xff] }
 0x526   : > { %v4811_v9 = vpop.permute.xlu2 %4810 }
 0x527   : > { %v4815_v6 = vsel %vm4814_vm13, %v4809_v63, %v4811_v9  ;;  %v10350_v63 = vld [vmem:[%s12224_s3 + $0x100] sm:$0xff] }
 0x528   : > { %7987 = vmatpush.msk.msrb.mxu0 %vm4355_vm10, %v4815_v6 }
 0x529   : > { %7906 = vmatmul.msk.f32.gmra.mxu0 %vm4333_vm11, %v10066_v48  ;;  %7966 = vmatmul.msk.f32.gmra.mxu2 %vm4333_vm11, %v7958_v29 }
 0x52e   : > { %v10075_v60 = vpop.permute.xlu2 %4942 }
 0x52f   : > { %v4947_v46 = vsel %vm4946_vm14, %v4941_v44, %v10075_v60  ;;  %v10370_v44 = vld [vmem:[%s12224_s3 + $0x108] sm:$0xff] }
 0x530   : > { %8010 = vmatpush.msk.msrb.mxu2 %vm4355_vm10, %v4947_v46  ;;  %v10389_v46 = vld [vmem:[%s12224_s3 + $0x110] sm:$0x1] }
 0x531   : > { %7907 = vmatmul.msk.f32.gmra.mxu0 %vm4333_vm11, %v10080_v14  ;;  %7967 = vmatmul.msk.f32.gmra.mxu2 %vm4333_vm11, %v7959_v43 }
 0x536   : > { %v10091_v39 = vpop.permute.xlu2 %5074 }
 0x537   : > { %v5078_v20 = vsel %vm766_vm4, %v5073_v7, %v10091_v39 }
 0x539   : > { %7908 = vmatmul.msk.f32.gmra.mxu0 %vm4333_vm11, %v10096_v24  ;;  %7968 = vmatmul.msk.f32.gmra.mxu2 %vm4333_vm11, %v7960_v58 }
 0x53e   : > { %v10104_v16 = vpop.permute.xlu2 %5205 }
 0x53f   : > { %v5210_v47 = vsel %vm5209_vm15, %v5204_v59, %v10104_v16  ;;  %v8054_v59 = vld [vmem:[%s12224_s3 + $0x1b0] sm:$0xff] }
 0x540   : > { %8056 = vmatpush.msk.msra.mxu2 %vm4355_vm10, %v5210_v47  ;;  %v10427_v47 = vld [vmem:[%s12224_s3 + $0x158] sm:$0xff] }
 0x541   : > { %7909 = vmatmul.msk.f32.gmra.mxu0 %vm4333_vm11, %v10109_v37  ;;  %7969 = vmatmul.msk.f32.gmra.mxu2 %vm4333_vm11, %v10120_v35 }
 0x546   : > { %v10256_v54 = vpop.permute.xlu2 %5337 }
 0x549   : > { %7942 = vmatmul.msk.f32.vlgmr.msra.gmra.mxu0 %vm4333_vm11, %v10125_v30  ;;  %7970 = vmatmul.msk.f32.gmra.mxu2 %vm4333_vm11, %v10139_v0 }
 0x54a   : > { %8033 = vmatpush.msk.msra.mxu0 %vm4355_vm10, %v5078_v20 }
 0x54c   : > { %v4330_v17 = vpop.permute.xlu0 %4329 }
 0x54d   : > { %v4332_v31 = vsel %vm526_vm0, %v10003_v40, %v4330_v17  ;;  %vm5341_vm0 = vcmask 769024   ;;  %v5336_v40 = vpop.permute.xlu1 %5335  ;;  %v10447_v17 = vld [vmem:[%s12224_s3 + $0x160] sm:$0xff] }
 0x54e   : > { %7910 = vmatpush.msk.msra.mxu1 %vm4355_vm10, %v4332_v31 }
 0x54f   : > { %7911 = vmatmul.msk.f32.vlgmr.msra.gmra.mxu1 %vm4333_vm11, %v10008_v19  ;;  %v5342_v19 = vsel %vm5341_vm0, %v5336_v40, %v10256_v54  ;;  %v8073_v40 = vld [vmem:[%s12224_s3 + $0x1c8] sm:$0xff] }
 0x551   : > { %7943 = vmatmul.msk.f32.gmra.mxu0 %vm4333_vm11, %v10145_v55  ;;  %7971 = vmatmul.msk.f32.gmra.mxu2 %vm4333_vm11, %v10158_v2 }
 0x554   : > { %v4550_v53 = vpop.permute.xlu0 %4549 }
 0x555   : > { %v4552_v41 = vsel %vm586_vm1, %v10021_v33, %v4550_v53  ;;  %v10299_v33 = vld [vmem:[%s12224_s3 + $0x148] sm:$0x1]  ;;  %vm5997_vm1 = vcmask 1040384  }
 0x556   : > { %7949 = vmatpush.msk.msrb.mxu1 %vm4355_vm10, %v4552_v41  ;;  %v10467_v41 = vld [vmem:[%s12224_s3 + $0x168] sm:$0xff] }
 0x557   : > { %7912 = vmatmul.msk.f32.gmra.mxu1 %vm4333_vm11, %v10026_v42  ;;  %v10301_v42 = vpop.f32.mrf.mxu2 }
 0x559   : > { %7944 = vmatmul.msk.f32.gmra.mxu0 %vm4333_vm11, %v10164_v28  ;;  %8011 = vmatmul.msk.f32.vlgmr.msrb.gmra.mxu2 %vm4333_vm11, %v10177_v1 }
 0x55c   : > { %v4681_v34 = vpop.permute.xlu0 %4680 }
 0x55d   : > { %v4684_v13 = vsel %vm4682_vm12, %v10041_v57, %v4681_v34 }
 0x55e   : > { %7972 = vmatpush.msk.msrb.mxu3 %vm4355_vm10, %v4684_v13 }
 0x55f   : > { %7913 = vmatmul.msk.f32.gmra.mxu1 %vm4333_vm11, %v10046_v62  ;;  %7973 = vmatmul.msk.f32.vlgmr.msrb.gmra.mxu3 %vm4333_vm11, %v10056_v4  ;;  %v10325_v62 = vpop.f32.mrf.mxu2 }
 0x561   : > { %7945 = vmatmul.msk.f32.gmra.mxu0 %vm4333_vm11, %v10183_v8  ;;  %8012 = vmatmul.msk.f32.gmra.mxu2 %vm4333_vm11, %v10197_v49 }
 0x564   : > { %v4813_v56 = vpop.permute.xlu0 %4812 }
 0x565   : > { %v4816_v27 = vsel %vm4814_vm13, %v4811_v9, %v4813_v56 }
 0x566   : > { %7995 = vmatpush.msk.msra.mxu1 %vm4355_vm10, %v4816_v27 }
 0x567   : > { %7914 = vmatmul.msk.f32.gmra.mxu1 %vm4333_vm11, %v10066_v48  ;;  %7974 = vmatmul.msk.f32.gmra.mxu3 %vm4333_vm11, %v7958_v29  ;;  %v10358_v9 = vpop.f32.mrf.mxu2  ;;  %v8051_v48 = vld [vmem:[%s12224_s3 + $0x198] sm:$0xff] }
 0x569   : > { %7946 = vmatmul.msk.f32.gmra.mxu0 %vm4333_vm11, %v10203_v11  ;;  %8013 = vmatmul.msk.f32.gmra.mxu2 %vm4333_vm11, %v10215_v45 }
 0x56c   : > { %v4945_v15 = vpop.permute.xlu0 %4944 }
 0x56d   : > { %v4948_v23 = vsel %vm4946_vm14, %v10075_v60, %v4945_v15  ;;  %v8052_v60 = vld [vmem:[%s12224_s3 + $0x1a0] sm:$0xff] }
 0x56e   : > { %8018 = vmatpush.msk.msra.mxu3 %vm4355_vm10, %v4948_v23 }
 0x56f   : > { %7915 = vmatmul.msk.f32.gmra.mxu1 %vm4333_vm11, %v10080_v14  ;;  %7975 = vmatmul.msk.f32.gmra.mxu3 %vm4333_vm11, %v7959_v43  ;;  %v10379_v29 = vpop.f32.mrf.mxu2  ;;  %v8053_v43 = vld [vmem:[%s12224_s3 + $0x1a8] sm:$0xff] }
 0x571   : > { %7947 = vmatmul.msk.f32.gmra.mxu0 %vm4333_vm11, %v10223_v38  ;;  %8014 = vmatmul.msk.f32.gmra.mxu2 %vm4333_vm11, %v10235_v18 }
 0x574   : > { %v5077_v32 = vpop.permute.xlu0 %5076 }
 0x575   : > { %v5079_v26 = vsel %vm766_vm4, %v10091_v39, %v5077_v32  ;;  %vm7706_vm4 = vcmask 80896  }
 0x577   : > { %7916 = vmatmul.msk.f32.gmra.mxu1 %vm4333_vm11, %v10096_v24  ;;  %7976 = vmatmul.msk.f32.gmra.mxu3 %vm4333_vm11, %v7960_v58  ;;  %v10398_v7 = vpop.f32.mrf.mxu2  ;;  %v10408_v24 = vld [vmem:[%s12224_s3 + $0x150] sm:$0xff] }
 0x579   : > { %7948 = vmatmul.msk.f32.gmra.mxu0 %vm4333_vm11, %v10240_v36  ;;  %8015 = vmatmul.msk.f32.gmra.mxu2 %vm4333_vm11, %v10252_v12 }
 0x57c   : > { %v5208_v51 = vpop.permute.xlu0 %5207 }
 0x57d   : > { %v5211_v50 = vsel %vm5209_vm15, %v10104_v16, %v5208_v51 }
 0x57e   : > { %8064 = vmatpush.msk.msrb.mxu3 %vm4355_vm10, %v5211_v50 }
 0x57f   : > { %7917 = vmatmul.msk.f32.gmra.mxu1 %vm4333_vm11, %v10109_v37  ;;  %7977 = vmatmul.msk.f32.gmra.mxu3 %vm4333_vm11, %v10120_v35  ;;  %v10420_v16 = vpop.f32.mrf.mxu2 }
 0x581   : > { %7988 = vmatmul.msk.f32.vlgmr.msrb.gmra.mxu0 %vm4333_vm11, %v10262_v61  ;;  %8016 = vmatmul.msk.f32.gmra.mxu2 %vm4333_vm11, %v10278_v52 }
 0x582   : > { %8079 = vmatpush.msk.msrb.mxu0 %vm4355_vm10, %v5342_v19 }
 0x584   : > { %v5340_v58 = vpop.permute.xlu0 %5339 }
 0x585   : > { %v5343_v35 = vsel %vm5341_vm0, %v10256_v54, %v5340_v58 }
 0x587   : > { %7950 = vmatmul.msk.f32.vlgmr.msrb.gmra.mxu1 %vm4333_vm11, %v10125_v30  ;;  %7978 = vmatmul.msk.f32.gmra.mxu3 %vm4333_vm11, %v10139_v0  ;;  %v8055_v30 = vld [vmem:[%s12224_s3 + $0x1b8] sm:$0x1]  ;;  %v10454_v31 = vpop.f32.mrf.mxu2 }
 0x588   : > { %8041 = vmatpush.msk.msrb.mxu1 %vm4355_vm10, %v5079_v26 }
 0x589   : > { %7989 = vmatmul.msk.f32.gmra.mxu0 %vm4333_vm11, %v10283_v10  ;;  %8017 = vmatmul.msk.f32.gmra.mxu2 %vm4333_vm11, %v10299_v33 }
 0x58e   : > { %v10303_v22 = vpop.f32.mrf.mxu0 }
 0x58f   : > { %7951 = vmatmul.msk.f32.gmra.mxu1 %vm4333_vm11, %v10145_v55  ;;  %7979 = vmatmul.msk.f32.gmra.mxu3 %vm4333_vm11, %v10158_v2  ;;  %v10460_v55 = vpop.f32.mrf.mxu3 }
 0x591   : > { %7990 = vmatmul.msk.f32.gmra.mxu0 %vm4333_vm11, %v10308_v5  ;;  %8057 = vmatmul.msk.f32.vlgmr.msra.gmra.mxu2 %vm4333_vm11, %v10321_v21 }
 0x596   : > { %v10323_v57 = vpop.f32.mrf.mxu0 }
 0x597   : > { %7952 = vmatmul.msk.f32.gmra.mxu1 %vm4333_vm11, %v10164_v28  ;;  %8019 = vmatmul.msk.f32.vlgmr.msra.gmra.mxu3 %vm4333_vm11, %v10177_v1  ;;  %v10479_v34 = vpop.f32.mrf.mxu3  ;;  %v8030_v1 = vld [vmem:[%s12224_s3 + $0x170] sm:$0xff] }
 0x598   : > { %12285 = vst [vmem:[#allocation21_spill] sm:$0xff] %v10479_v34 }
 0x599   : > { %7991 = vmatmul.msk.f32.gmra.mxu0 %vm4333_vm11, %v10330_v25  ;;  %8058 = vmatmul.msk.f32.gmra.mxu2 %vm4333_vm11, %v10343_v3 }
 0x59e   : > { %v10345_v4 = vpop.f32.mrf.mxu0 }
 0x59f   : > { %7953 = vmatmul.msk.f32.gmra.mxu1 %vm4333_vm11, %v10183_v8  ;;  %8020 = vmatmul.msk.f32.gmra.mxu3 %vm4333_vm11, %v10197_v49  ;;  %v10500_v49 = vld [vmem:[%s12224_s3 + $0x178] sm:$0xff] }
 0x5a1   : > { %7992 = vmatmul.msk.f32.gmra.mxu0 %vm4333_vm11, %v10350_v63  ;;  %8059 = vmatmul.msk.f32.gmra.mxu2 %vm4333_vm11, %v8051_v48 }
 0x5a4   : > { %v10475_v2 = vpop.f32.mrf.mxu2 }
 0x5a6   : > { %v10365_v6 = vpop.f32.mrf.mxu0 }
 0x5a7   : > { %7954 = vmatmul.msk.f32.gmra.mxu1 %vm4333_vm11, %v10203_v11  ;;  %8021 = vmatmul.msk.f32.gmra.mxu3 %vm4333_vm11, %v10215_v45  ;;  %v10505_v11 = vpop.f32.mrf.mxu3 }
 0x5a8   : > { %12287 = vst [vmem:[#allocation25_spill] sm:$0xff] %v10505_v11 }
 0x5a9   : > { %7993 = vmatmul.msk.f32.gmra.mxu0 %vm4333_vm11, %v10370_v44  ;;  %8060 = vmatmul.msk.f32.gmra.mxu2 %vm4333_vm11, %v8052_v60 }
 0x5ac   : > { %v10491_v8 = vpop.f32.mrf.mxu2 }
 0x5ae   : > { %v10384_v14 = vpop.f32.mrf.mxu0 }
 0x5af   : > { %7955 = vmatmul.msk.f32.gmra.mxu1 %vm4333_vm11, %v10223_v38  ;;  %8022 = vmatmul.msk.f32.gmra.mxu3 %vm4333_vm11, %v10235_v18  ;;  %v8032_v38 = vld [vmem:[%s12224_s3 + $0x180] sm:$0x1]  ;;  %v10522_v32 = vpop.f32.mrf.mxu3 }
 0x5b0   : > { %12289 = vst [vmem:[#allocation22_spill] sm:$0xff] %v10522_v32 }
 0x5b1   : > { %7994 = vmatmul.msk.f32.gmra.mxu0 %vm4333_vm11, %v10389_v46  ;;  %8061 = vmatmul.msk.f32.gmra.mxu2 %vm4333_vm11, %v8053_v43 }
 0x5b4   : > { %v10511_v45 = vpop.f32.mrf.mxu2 }
 0x5b6   : > { %v10403_v39 = vpop.f32.mrf.mxu0 }
 0x5b7   : > { %7956 = vmatmul.msk.f32.gmra.mxu1 %vm4333_vm11, %v10240_v36  ;;  %8023 = vmatmul.msk.f32.gmra.mxu3 %vm4333_vm11, %v10252_v12  ;;  %v8072_v12 = vld [vmem:[%s12224_s3 + $0x1c0] sm:$0xff]  ;;  %v10537_v50 = vpop.f32.mrf.mxu3 }
 0x5b8   : > { %12291 = vst [vmem:[#allocation31_spill] sm:$0xff] %v10537_v50 }
 0x5b9   : > { %8034 = vmatmul.msk.f32.vlgmr.msra.gmra.mxu0 %vm4333_vm11, %v10408_v24  ;;  %8062 = vmatmul.msk.f32.gmra.mxu2 %vm4333_vm11, %v8054_v59 }
 0x5bc   : > { %v10534_v51 = vpop.f32.mrf.mxu2 }
 0x5be   : > { %v10422_v37 = vpop.f32.mrf.mxu0 }
 0x5bf   : > { %7996 = vmatmul.msk.f32.vlgmr.msra.gmra.mxu1 %vm4333_vm11, %v10262_v61  ;;  %8024 = vmatmul.msk.f32.gmra.mxu3 %vm4333_vm11, %v10278_v52 }
 0x5c0   : > { %8087 = vmatpush.msk.msra.mxu1 %vm4355_vm10, %v5343_v35  ;;  %v5463_v35 = vld [vmem:[%s12225_s4 + $0x20] sm:$0xff] }
 0x5c1   : > { %8035 = vmatmul.msk.f32.gmra.mxu0 %vm4333_vm11, %v10427_v47  ;;  %8063 = vmatmul.msk.f32.gmra.mxu2 %vm4333_vm11, %v8055_v30 }
 0x5c4   : > { %v10550_v19 = vpop.f32.mrf.mxu2 }
 0x5c6   : > { %v10442_v20 = vpop.f32.mrf.mxu0 }
 0x5c7   : > { %7997 = vmatmul.msk.f32.gmra.mxu1 %vm4333_vm11, %v10283_v10  ;;  %8025 = vmatmul.msk.f32.gmra.mxu3 %vm4333_vm11, %v10299_v33  ;;  %v10554_v10 = vpop.f32.mrf.mxu3  ;;  %v10561_v33 = vld [vmem:[%s12224_s3 + $0x1d0] sm:$0xff] }
 0x5c8   : > { %12294 = vst [vmem:[#allocation29_spill] sm:$0xff] %v10554_v10 }
 0x5c9   : > { %8036 = vmatmul.msk.f32.gmra.mxu0 %vm4333_vm11, %v10447_v17 }
 0x5cc   : > { %v10458_v0 = vpop.f32.mrf.mxu1 }
 0x5ce   : > { %v10462_v53 = vpop.f32.mrf.mxu0 }
 0x5cf   : > { %7998 = vmatmul.msk.f32.gmra.mxu1 %vm4333_vm11, %v10308_v5  ;;  %8065 = vmatmul.msk.f32.vlgmr.msrb.gmra.mxu3 %vm4333_vm11, %v10321_v21  ;;  %v5460_v5 = vld [vmem:[%s12225_s4 + $0x8] sm:$0xff]  ;;  %v10571_v21 = vpop.f32.mrf.mxu2 }
 0x5d0   : > { %5473 = vperm.xlu2 %8649, %v5460_v5  }
 0x5d1   : > { %8037 = vmatmul.msk.f32.gmra.mxu0 %vm4333_vm11, %v10467_v41 }
 0x5d4   : > { %v10477_v28 = vpop.f32.mrf.mxu1 }
 0x5d6   : > { %v10481_v13 = vpop.f32.mrf.mxu0 }
 0x5d7   : > { %7999 = vmatmul.msk.f32.gmra.mxu1 %vm4333_vm11, %v10330_v25  ;;  %8066 = vmatmul.msk.f32.gmra.mxu3 %vm4333_vm11, %v10343_v3 }
 0x5d8   : > { %5488 = vperm.xlu2 %8649, %v5463_v35  }
 0x5d9   : > { %8038 = vmatmul.msk.f32.gmra.mxu0 %vm4333_vm11, %v8030_v1 }
 0x5dc   : > { %v10493_v56 = vpop.f32.mrf.mxu1 }
 0x5dd   : > { %12286 = vst [vmem:[#allocation28_spill] sm:$0xff] %v10493_v56  ;;  %v5650_v56 = vld [vmem:[#allocation5 + $0x160] sm:$0xff] }
 0x5de   : > { %v10495_v27 = vpop.f32.mrf.mxu0 }
 0x5df   : > { %8000 = vmatmul.msk.f32.gmra.mxu1 %vm4333_vm11, %v10350_v63  ;;  %8067 = vmatmul.msk.f32.gmra.mxu3 %vm4333_vm11, %v8051_v48  ;;  %v10580_v63 = vld [vmem:[%s12224_s3 + $0x1d8] sm:$0xff]  ;;  %v10584_v48 = vpop.f32.mrf.mxu3 }
 0x5e0   : > { %12295 = vst [vmem:[#allocation24_spill] sm:$0xff] %v10584_v48 }
 0x5e1   : > { %8039 = vmatmul.msk.f32.gmra.mxu0 %vm4333_vm11, %v10500_v49 }
 0x5e4   : > { %v10509_v15 = vpop.f32.mrf.mxu1 }
 0x5e5   : > { %12288 = vst [vmem:[#allocation30_spill] sm:$0xff] %v10509_v15 }
 0x5e6   : > { %v10513_v23 = vpop.f32.mrf.mxu0 }
 0x5e7   : > { %8001 = vmatmul.msk.f32.gmra.mxu1 %vm4333_vm11, %v10370_v44  ;;  %8068 = vmatmul.msk.f32.gmra.mxu3 %vm4333_vm11, %v8052_v60  ;;  %v10590_v60 = vpop.f32.mrf.mxu2 }
 0x5e9   : > { %8040 = vmatmul.msk.f32.gmra.mxu0 %vm4333_vm11, %v8032_v38 }
 0x5ec   : > { %v10524_v18 = vpop.f32.mrf.mxu1 }
 0x5ed   : > { %12290 = vst [vmem:[#allocation34_spill] sm:$0xff] %v10524_v18 }
 0x5ee   : > { %v10526_v36 = vpop.f32.mrf.mxu0 }
 0x5ef   : > { %8002 = vmatmul.msk.f32.gmra.mxu1 %vm4333_vm11, %v10389_v46  ;;  %8069 = vmatmul.msk.f32.gmra.mxu3 %vm4333_vm11, %v8053_v43  ;;  %v10597_v43 = vld [vmem:[%s12224_s3 + $0x1e0] sm:$0xff] }
 0x5f1   : > { %8080 = vmatmul.msk.f32.vlgmr.msrb.gmra.mxu0 %vm4333_vm11, %v8072_v12 }
 0x5f4   : > { %v10539_v54 = vpop.f32.mrf.mxu1 }
 0x5f5   : > { %12292 = vst [vmem:[#allocation35_spill] sm:$0xff] %v10539_v54 }
 0x5f6   : > { %v10541_v61 = vpop.f32.mrf.mxu0 }
 0x5f7   : > { %8042 = vmatmul.msk.f32.vlgmr.msrb.gmra.mxu1 %vm4333_vm11, %v10408_v24  ;;  %8070 = vmatmul.msk.f32.gmra.mxu3 %vm4333_vm11, %v8054_v59  ;;  %v10601_v24 = vpop.f32.mrf.mxu3 }
 0x5f9   : > { %8081 = vmatmul.msk.f32.gmra.mxu0 %vm4333_vm11, %v8073_v40 }
 0x5fc   : > { %v10552_v52 = vpop.f32.mrf.mxu1 }
 0x5fd   : > { %12293 = vst [vmem:[#allocation23_spill] sm:$0xff] %v10552_v52 }
 0x5fe   : > { %v10556_v26 = vpop.f32.mrf.mxu0 }
 0x5ff   : > { %8043 = vmatmul.msk.f32.gmra.mxu1 %vm4333_vm11, %v10427_v47  ;;  %8071 = vmatmul.msk.f32.gmra.mxu3 %vm4333_vm11, %v8055_v30  ;;  %v10612_v47 = vld [vmem:[%s12224_s3 + $0x1e8] sm:$0xff]  ;;  %v10618_v30 = vpop.f32.mrf.mxu2 }
 0x601   : > { %8082 = vmatmul.msk.f32.gmra.mxu0 %vm4333_vm11, %v10561_v33 }
 0x604   : > { %v10573_v25 = vpop.f32.mrf.mxu1 }
 0x606   : > { %v10575_v3 = vpop.f32.mrf.mxu0 }
 0x607   : > { %8044 = vmatmul.msk.f32.gmra.mxu1 %vm4333_vm11, %v10447_v17  ;;  %v10622_v17 = vpop.f32.mrf.mxu3  ;;  %v10637_v35 = vpop.f32.mrf.mxu2 }
 0x608   : > { %12298 = vst [vmem:[#allocation33_spill] sm:$0xff] %v10622_v17 }
 0x609   : > { %8083 = vmatmul.msk.f32.gmra.mxu0 %vm4333_vm11, %v10580_v63 }
 0x60c   : > { %v10588_v44 = vpop.f32.mrf.mxu1 }
 0x60d   : > { %12296 = vst [vmem:[#allocation32_spill] sm:$0xff] %v10588_v44 }
 0x60e   : > { %v10592_v46 = vpop.f32.mrf.mxu0 }
 0x60f   : > { %8045 = vmatmul.msk.f32.gmra.mxu1 %vm4333_vm11, %v10467_v41  ;;  %v10639_v48 = vpop.f32.mrf.mxu3  ;;  %v10646_v54 = vpop.f32.mrf.mxu2 }
 0x610   : > { %12300 = vst [vmem:[#allocation36_spill] sm:$0xff] %v10639_v48 }
 0x611   : > { %8084 = vmatmul.msk.f32.gmra.mxu0 %vm4333_vm11, %v10597_v43 }
 0x614   : > { %v10605_v58 = vpop.f32.mrf.mxu1 }
 0x615   : > { %12297 = vst [vmem:[#allocation27_spill] sm:$0xff] %v10605_v58  ;;  %v5542_v58 = vld [vmem:[#allocation5 + $0x68] sm:$0xff] }
 0x616   : > { %v10607_v59 = vpop.f32.mrf.mxu0 }
 0x617   : > { %8046 = vmatmul.msk.f32.gmra.mxu1 %vm4333_vm11, %v8030_v1  ;;  %v10631_v1 = vld [vmem:[%s12224_s3 + $0x1f0] sm:$0x1]  ;;  %v10650_v18 = vpop.f32.mrf.mxu3  ;;  %v10657_v32 = vpop.f32.mrf.mxu2 }
 0x618   : > { %12303 = vst [vmem:[#allocation39_spill] sm:$0xff] %v10650_v18  ;;  %v5652_v18 = vld [vmem:[#allocation5 + $0x170] sm:$0xff] }
 0x619   : > { %8085 = vmatmul.msk.f32.gmra.mxu0 %vm4333_vm11, %v10612_v47 }
 0x61c   : > { %v10624_v41 = vpop.f32.mrf.mxu1 }
 0x61d   : > { %12299 = vst [vmem:[#allocation26_spill] sm:$0xff] %v10624_v41 }
 0x61e   : > { %v10626_v5 = vpop.f32.mrf.mxu0 }
 0x61f   : > { %8047 = vmatmul.msk.f32.gmra.mxu1 %vm4333_vm11, %v10500_v49  ;;  %v10662_v48 = vpop.f32.mrf.mxu3 }
 0x620   : > { %12305 = vst [vmem:[#allocation41_spill] sm:$0xff] %v10662_v48  ;;  %v5538_v48 = vld [vmem:[#allocation5 + $0x48] sm:$0xff] }
 0x621   : > { %8086 = vmatmul.msk.f32.gmra.mxu0 %vm4333_vm11, %v10631_v1 }
 0x624   : > { %v10641_v52 = vpop.f32.mrf.mxu1 }
 0x625   : > { %12301 = vst [vmem:[#allocation37_spill] sm:$0xff] %v10641_v52  ;;  %v5544_v52 = vld [vmem:[#allocation5 + $0x78] sm:$0xff] }
 0x626   : > { %v10643_v10 = vpop.f32.mrf.mxu0  ;;  %5561 = vmatpush.msrb.mxu2 %v5544_v52  ;;  %v5649_v52 = vld [vmem:[#allocation5 + $0x158] sm:$0xff] }
 0x627   : > { %8048 = vmatmul.msk.f32.gmra.mxu1 %vm4333_vm11, %v8032_v38  ;;  %v5653_v38 = vld [vmem:[#allocation5 + $0x178] sm:$0xff] }
 0x628   : > { %5670 = vmatpush.msra.mxu0 %v5653_v38  ;;  %v10670_v38 = vpop.f32.mrf.mxu2 }
 0x62a   : > { %5671 = vmatpush.msra.mxu0 %v5652_v18  ;;  %v5539_v18 = vld [vmem:[#allocation5 + $0x50] sm:$0xff] }
 0x62c   : > { %v10648_v50 = vpop.f32.mrf.mxu1 }
 0x62d   : > { %12302 = vst [vmem:[#allocation38_spill] sm:$0xff] %v10648_v50  ;;  %v5543_v50 = vld [vmem:[#allocation5 + $0x70] sm:$0xff] }
 0x62e   : > { %v10652_v49 = vpop.f32.mrf.mxu0  ;;  %5562 = vmatpush.msrb.mxu2 %v5543_v50  ;;  %v5648_v50 = vld [vmem:[#allocation5 + $0x150] sm:$0xff] }
 0x62f   : > { %8088 = vmatmul.msk.f32.vlgmr.msra.gmra.mxu1 %vm4333_vm11, %v8072_v12  ;;  %v5651_v12 = vld [vmem:[#allocation5 + $0x168] sm:$0xff] }
 0x630   : > { %5563 = vmatpush.msrb.mxu2 %v5542_v58  ;;  %5672 = vmatpush.msra.mxu0 %v5651_v12  ;;  %v10672_v58 = vpop.f32.mrf.mxu3  ;;  %v5647_v12 = vld [vmem:[#allocation5 + $0x148] sm:$0xff] }
 0x631   : > { %12307 = vst [vmem:[#allocation43_spill] sm:$0xff] %v10672_v58  ;;  %v5534_v58 = vld [vmem:[#allocation5 + $0x28] sm:$0xff] }
 0x632   : > { %5673 = vmatpush.msra.mxu0 %v5650_v56  ;;  %v5537_v56 = vld [vmem:[#allocation5 + $0x40] sm:$0xff] }
 0x634   : > { %v10655_v41 = vpop.f32.mrf.mxu1  ;;  %5674 = vmatpush.msra.mxu0 %v5649_v52  ;;  %v5645_v52 = vld [vmem:[#allocation5 + $0x138] sm:$0xff] }
 0x635   : > { %12304 = vst [vmem:[#allocation40_spill] sm:$0xff] %v10655_v41  ;;  %v5541_v41 = vld [vmem:[#allocation5 + $0x60] sm:$0xff] }
 0x636   : > { %v10659_v15 = vpop.f32.mrf.mxu0  ;;  %5564 = vmatpush.msrb.mxu2 %v5541_v41  ;;  %5675 = vmatpush.msra.mxu0 %v5648_v50  ;;  %v5644_v50 = vld [vmem:[#allocation5 + $0x130] sm:$0xff] }
 0x637   : > { %8089 = vmatmul.msk.f32.gmra.mxu1 %vm4333_vm11, %v8073_v40  ;;  %v5540_v40 = vld [vmem:[#allocation5 + $0x58] sm:$0xff] }
 0x638   : > { %5565 = vmatpush.msrb.mxu2 %v5540_v40  ;;  %5676 = vmatpush.msra.mxu0 %v5647_v12  ;;  %v5536_v40 = vld [vmem:[#allocation5 + $0x38] sm:$0xff]  ;;  %v10682_v12 = vpop.f32.mrf.mxu3 }
 0x639   : > { %12309 = vst [vmem:[#allocation45_spill] sm:$0xff] %v10682_v12  ;;  %v5530_v12 = vld [vmem:[#allocation5 + $0x8] sm:$0xff] }
 0x63a   : > { %5566 = vmatpush.msrb.mxu2 %v5539_v18  ;;  %v5535_v18 = vld [vmem:[#allocation5 + $0x30] sm:$0xff] }
 0x63c   : > { %v10664_v11 = vpop.f32.mrf.mxu1  ;;  %5567 = vmatpush.msrb.mxu2 %v5538_v48  ;;  %v5643_v48 = vld [vmem:[#allocation5 + $0x128] sm:$0xff] }
 0x63d   : > { %12306 = vst [vmem:[#allocation42_spill] sm:$0xff] %v10664_v11  ;;  %v10680_v11 = vpop.f32.mrf.mxu2 }
 0x63e   : > { %v10666_v17 = vpop.f32.mrf.mxu0  ;;  %5568 = vmatpush.msrb.mxu2 %v5537_v56  ;;  %v5533_v56 = vld [vmem:[#allocation5 + $0x20] sm:$0xff] }
 0x63f   : > { %8090 = vmatmul.msk.f32.gmra.mxu1 %vm4333_vm11, %v10561_v33  ;;  %v5646_v33 = vld [vmem:[#allocation5 + $0x140] sm:$0xff] }
 0x640   : > { %5677 = vmatpush.msra.mxu0 %v5646_v33  ;;  %5569 = vmatpush.msrb.mxu2 %v5536_v40  ;;  %v5532_v40 = vld [vmem:[#allocation5 + $0x18] sm:$0xff]  ;;  %v10694_v34 = vpop.f32.mrf.mxu3 }
 0x642   : > { %5678 = vmatpush.msra.mxu0 %v5645_v52  ;;  %5570 = vmatpush.msrb.mxu2 %v5535_v18  ;;  %v5641_v52 = vld [vmem:[#allocation5 + $0x118] sm:$0xff]  ;;  %v5531_v18 = vld [vmem:[#allocation5 + $0x10] sm:$0xff] }
 0x644   : > { %v10674_v44 = vpop.f32.mrf.mxu1  ;;  %5679 = vmatpush.msra.mxu0 %v5644_v50  ;;  %5571 = vmatpush.msrb.mxu2 %v5534_v58  ;;  %v5640_v50 = vld [vmem:[#allocation5 + $0x110] sm:$0xff]  ;;  %v5639_v58 = vld [vmem:[#allocation5 + $0x108] sm:$0xff] }
 0x645   : > { %12308 = vst [vmem:[#allocation44_spill] sm:$0xff] %v10674_v44 }
 0x646   : > { %v10676_v41 = vpop.f32.mrf.mxu0  ;;  %5680 = vmatpush.msra.mxu0 %v5643_v48  ;;  %5572 = vmatpush.msrb.mxu2 %v5533_v56  ;;  %v10690_v48 = vpop.f32.mrf.mxu2  ;;  %v5529_v56 = vld [vmem:[#allocation5] sm:$0xff] }
 0x647   : > { %8091 = vmatmul.msk.f32.gmra.mxu1 %vm4333_vm11, %v10580_v63  ;;  %v5642_v63 = vld [vmem:[#allocation5 + $0x120] sm:$0xff] }
 0x648   : > { %5681 = vmatpush.msra.mxu0 %v5642_v63  ;;  %5573 = vmatpush.msrb.mxu2 %v5532_v40  ;;  %v5638_v63 = vld [vmem:[#allocation5 + $0x100] sm:$0xff]  ;;  %v4479_v40 = vadd.f32 %v10301_v42, %v10303_v22 }
 0x64a   : > { %5682 = vmatpush.msra.mxu0 %v5641_v52  ;;  %5574 = vmatpush.msrb.mxu2 %v5531_v18  ;;  %v4654_v18 = vadd.f32 %v10442_v20, %v4479_v40 }
 0x64c   : > { %v10684_v44 = vpop.f32.mrf.mxu1  ;;  %5683 = vmatpush.msra.mxu0 %v5640_v50  ;;  %5575 = vmatpush.msrb.mxu2 %v5530_v12 }
 0x64d   : > { %12310 = vst [vmem:[#allocation46_spill] sm:$0xff] %v10684_v44 }
 0x64e   : > { %v10686_v33 = vpop.f32.mrf.mxu0  ;;  %5684 = vmatpush.msra.mxu0 %v5639_v58  ;;  %5576 = vmatpush.msrb.mxu2 %v5529_v56  ;;  %v5254_v12 = vpop.f32.mrf.mxu2  ;;  %v4482_v56 = vadd.f32 %v10325_v62, %v10323_v57 }
 0x64f   : > { %8092 = vmatmul.msk.f32.gmra.mxu1 %vm4333_vm11, %v10597_v43  ;;  %v10709_v58 = vpop.f32.mrf.mxu3 }
 0x650   : > { %5685 = vmatpush.msra.mxu0 %v5638_v63  ;;  %v4656_v22 = vadd.f32 %v10462_v53, %v4482_v56 }
 0x654   : > { %v10692_v44 = vpop.f32.mrf.mxu1 }
 0x655   : > { %12311 = vst [vmem:[#allocation47_spill] sm:$0xff] %v10692_v44  ;;  %v4788_v44 = vadd.f32 %v10491_v8, %v4656_v22 }
 0x656   : > { %v10696_v43 = vpop.f32.mrf.mxu0 }
 0x657   : > { %8093 = vmatmul.msk.f32.gmra.mxu1 %vm4333_vm11, %v10612_v47  ;;  %v4786_v47 = vadd.f32 %v10475_v2, %v4654_v18  ;;  %v10725_v62 = vpop.f32.mrf.mxu3  ;;  %v4920_v2 = vadd.f32 %v10575_v3, %v4788_v44  ;;  %v5768_v3 = vld [vmem:[#allocation5 + $0x270] sm:$0xff] }
 0x658   : > { %v5884_v44 = vld [vmem:[#allocation5 + $0x370] sm:$0xff] }
 0x659   : > { %v4918_v63 = vadd.f32 %v10556_v26, %v4786_v47 }
 0x65b   : > { %v5050_v40 = vadd.f32 %v10618_v30, %v4918_v63  ;;  %v5052_v30 = vadd.f32 %v10637_v35, %v4920_v2  ;;  %v5769_v63 = vld [vmem:[#allocation5 + $0x278] sm:$0xff]  ;;  %v5882_v2 = vld [vmem:[#allocation5 + $0x360] sm:$0xff] }
 0x65c   : > { %v10702_v52 = vpop.f32.mrf.mxu1  ;;  %5786 = vmatpush.msra.mxu2 %v5769_v63 }
 0x65d   : > { %12312 = vst [vmem:[#allocation48_spill] sm:$0xff] %v10702_v52  ;;  %v5257_v52 = vpop.f32.mrf.mxu2  ;;  %v5181_v57 = vadd.f32 %v10659_v15, %v5050_v40  ;;  %v5183_v15 = vadd.f32 %v10666_v17, %v5052_v30  ;;  %v5767_v40 = vld [vmem:[#allocation5 + $0x268] sm:$0xff]  ;;  %v5668_v30 = vld [vmem:[#allocation5 + $0x1f0] sm:$0xff] }
 0x65e   : > { %v10705_v50 = vpop.f32.mrf.mxu0  ;;  %5787 = vmatpush.msra.mxu2 %v5768_v3 }
 0x65f   : > { %8094 = vmatmul.msk.f32.gmra.mxu1 %vm4333_vm11, %v10631_v1  ;;  %v4485_v1 = vadd.f32 %v10358_v9, %v10345_v4  ;;  %v5313_v18 = vadd.f32 %v5254_v12, %v5181_v57  ;;  %v10732_v4 = vpop.permute.xlu1 %5468  ;;  %v4488_v9 = vadd.f32 %v10379_v29, %v10365_v6  ;;  %v5560_v29 = vld [vmem:[#allocation5 + $0xf8] sm:$0xff]  ;;  %v5315_v57 = vadd.f32 %v5257_v52, %v5183_v15  ;;  %v5667_v15 = vld [vmem:[#allocation5 + $0x1e8] sm:$0xff] }
 0x660   : > { %5788 = vmatpush.msra.mxu2 %v5767_v40  ;;  %5599 = vmatpush.msra.mxu3 %v5560_v29  ;;  %v5881_v52 = vld [vmem:[#allocation5 + $0x358] sm:$0xff]  ;;  %v5557_v40 = vld [vmem:[#allocation5 + $0xe0] sm:$0xff]  ;;  %v5763_v29 = vld [vmem:[#allocation5 + $0x248] sm:$0xff] }
 0x661   : > { %v4658_v53 = vadd.f32 %v10481_v13, %v4485_v1  ;;  %v10742_v1 = vpop.f32.mrf.mxu3  ;;  %v4660_v17 = vadd.f32 %v10495_v27, %v4488_v9  ;;  %v5765_v27 = vld [vmem:[#allocation5 + $0x258] sm:$0xff]  ;;  %v4491_v9 = vadd.f32 %v10398_v7, %v10384_v14 }
 0x663   : > { %v4790_v8 = vadd.f32 %v10511_v45, %v4658_v53  ;;  %v5669_v45 = vld [vmem:[#allocation5 + $0x1f8] sm:$0xff] }
 0x664   : > { %v10715_v42 = vpop.f32.mrf.mxu1  ;;  %5708 = vmatpush.msrb.mxu1 %v5669_v45 }
 0x665   : > { %12313 = vst [vmem:[#allocation49_spill] sm:$0xff] %v10715_v42  ;;  %v5885_v42 = vld [vmem:[#allocation5 + $0x378] sm:$0xff]  ;;  %v5260_v12 = vpop.f32.mrf.mxu2  ;;  %v4922_v35 = vadd.f32 %v10592_v46, %v4790_v8  ;;  %v5766_v46 = vld [vmem:[#allocation5 + $0x260] sm:$0xff]  ;;  %v5558_v8 = vld [vmem:[#allocation5 + $0xe8] sm:$0xff] }
 0x666   : > { %v10718_v20 = vpop.f32.mrf.mxu0  ;;  %5902 = vmatpush.msrb.mxu0 %v5885_v42  ;;  %v5883_v42 = vld [vmem:[#allocation5 + $0x368] sm:$0xff]  ;;  %5789 = vmatpush.msra.mxu2 %v5766_v46  ;;  %v4662_v46 = vadd.f32 %v10513_v23, %v4491_v9  ;;  %v5761_v23 = vld [vmem:[#allocation5 + $0x238] sm:$0xff]  ;;  %v10768_v9 = vpop.permute.xlu0 %5478 }
 0x667   : > { %5709 = vmatpush.msrb.mxu1 %v5668_v30 }
 0x668   : > { %5903 = vmatpush.msrb.mxu0 %v5884_v44  ;;  %5790 = vmatpush.msra.mxu2 %v5765_v27 }
 0x669   : > { %5710 = vmatpush.msrb.mxu1 %v5667_v15  ;;  %v5554_v15 = vld [vmem:[#allocation5 + $0xc8] sm:$0xff] }
 0x66a   : > { %5904 = vmatpush.msrb.mxu0 %v5883_v42  ;;  %v5666_v42 = vld [vmem:[#allocation5 + $0x1e0] sm:$0xff] }
 0x66b   : > { %5711 = vmatpush.msrb.mxu1 %v5666_v42 }
 0x66c   : > { %v10728_v26 = vpop.f32.mrf.mxu1  ;;  %5905 = vmatpush.msrb.mxu0 %v5882_v2 }
 0x66d   : > { %v5263_v45 = vpop.f32.mrf.mxu2 }
 0x66e   : > { %v5386_v56 = vpop.f32.mrf.mxu0  ;;  %5906 = vmatpush.msrb.mxu0 %v5881_v52 }
 0x66f   : > { %v5445_v47 = vadd.f32 %v5386_v56, %v5313_v18  ;;  %v10749_v18 = vpop.permute.xlu2 %5473  ;;  %v5559_v56 = vld [vmem:[#allocation5 + $0xf0] sm:$0xff] }
 0x670   : > { %5600 = vmatpush.msra.mxu3 %v5559_v56  ;;  %v10765_v56 = vpop.f32.mrf.mxu3 }
 0x671   : > { %v5501_v13 = vadd.f32 %v10732_v4, %v5445_v47  ;;  %v5054_v47 = vadd.f32 %v10646_v54, %v4922_v35  ;;  %v5764_v54 = vld [vmem:[#allocation5 + $0x250] sm:$0xff] }
 0x672   : > { %v5880_v35 = vld [vmem:[#allocation5 + $0x350] sm:$0xff]  ;;  %5601 = vmatpush.msra.mxu3 %v5558_v8  ;;  %5791 = vmatpush.msra.mxu2 %v5764_v54  ;;  %v4494_v8 = vadd.f32 %v10420_v16, %v10403_v39  ;;  %v5553_v39 = vld [vmem:[#allocation5 + $0xc0] sm:$0xff] }
 0x673   : > { %v10740_v22 = vmax.f32 %v5501_v13, 0.0  ;;  %v4792_v13 = vadd.f32 %v10534_v51, %v4660_v17  ;;  %v5185_v3 = vadd.f32 %v10676_v41, %v5054_v47  ;;  %5907 = vmatpush.msrb.mxu0 %v5880_v35  ;;  %v5879_v51 = vld [vmem:[#allocation5 + $0x348] sm:$0xff]  ;;  %v5556_v17 = vld [vmem:[#allocation5 + $0xd8] sm:$0xff]  ;;  %v5555_v47 = vld [vmem:[#allocation5 + $0xd0] sm:$0xff] }
 0x674   : > { %v10744_v6 = vpop.f32.mrf.mxu1  ;;  %5602 = vmatpush.msra.mxu3 %v5557_v40  ;;  %5792 = vmatpush.msra.mxu2 %v5763_v29  ;;  %v5760_v54 = vld [vmem:[#allocation5 + $0x230] sm:$0xff]  ;;  %v5662_v16 = vld [vmem:[#allocation5 + $0x1c0] sm:$0xff]  ;;  %v4664_v29 = vadd.f32 %v10526_v36, %v4494_v8 }
 0x675   : > { %5577 = vmatmul.f32.vlgmr.msrb.gmra.mxu2 %v10740_v22  ;;  %5686 = vmatmul.f32.vlgmr.msra.gmra.mxu0 %v10740_v22  ;;  %v4924_v14 = vadd.f32 %v10607_v59, %v4792_v13  ;;  %v5317_v2 = vadd.f32 %v5260_v12, %v5185_v3  ;;  %v5762_v59 = vld [vmem:[#allocation5 + $0x240] sm:$0xff]  ;;  %v5877_v12 = vld [vmem:[#allocation5 + $0x338] sm:$0xff]  ;;  %v5663_v13 = vld [vmem:[#allocation5 + $0x1c8] sm:$0xff]  ;;  %v4794_v3 = vadd.f32 %v10550_v19, %v4662_v46 }
 0x676   : > { %v5389_v53 = vpop.f32.mrf.mxu0  ;;  %5908 = vmatpush.msrb.mxu0 %v5879_v51  ;;  %5603 = vmatpush.msra.mxu3 %v5556_v17  ;;  %v5876_v35 = vld [vmem:[#allocation5 + $0x330] sm:$0xff]  ;;  %v5759_v19 = vld [vmem:[#allocation5 + $0x228] sm:$0xff]  ;;  %v5661_v17 = vld [vmem:[#allocation5 + $0x1b8] sm:$0xff] }
 0x677   : > { %v5447_v63 = vadd.f32 %v5389_v53, %v5315_v57  ;;  %v5665_v57 = vld [vmem:[#allocation5 + $0x1d8] sm:$0xff]  ;;  %v5878_v53 = vld [vmem:[#allocation5 + $0x340] sm:$0xff]  ;;  %v5056_v27 = vadd.f32 %v10657_v32, %v4924_v14  ;;  %5793 = vmatpush.msra.mxu2 %v5762_v59  ;;  %v4926_v40 = vadd.f32 %v10626_v5, %v4794_v3  ;;  %v5660_v36 = vld [vmem:[#allocation5 + $0x1b0] sm:$0xff] }
 0x678   : > { %5712 = vmatpush.msrb.mxu1 %v5665_v57  ;;  %5909 = vmatpush.msrb.mxu0 %v5878_v53  ;;  %v5552_v5 = vld [vmem:[#allocation5 + $0xb8] sm:$0xff]  ;;  %v5266_v57 = vpop.f32.mrf.mxu2  ;;  %v5874_v59 = vld [vmem:[#allocation5 + $0x320] sm:$0xff]  ;;  %v5756_v3 = vld [vmem:[#allocation5 + $0x210] sm:$0xff] }
 0x679   : > { %v5503_v44 = vadd.f32 %v10749_v18, %v5447_v63  ;;  %v5664_v63 = vld [vmem:[#allocation5 + $0x1d0] sm:$0xff]  ;;  %5604 = vmatpush.msra.mxu3 %v5555_v47  ;;  %5794 = vmatpush.msra.mxu2 %v5761_v23  ;;  %v5058_v53 = vadd.f32 %v10670_v38, %v4926_v40  ;;  %v5873_v23 = vld [vmem:[#allocation5 + $0x318] sm:$0xff]  ;;  %v5871_v40 = vld [vmem:[#allocation5 + $0x308] sm:$0xff] }
 0x67a   : > { %5713 = vmatpush.msrb.mxu1 %v5664_v63  ;;  %5910 = vmatpush.msrb.mxu0 %v5877_v12  ;;  %v5551_v47 = vld [vmem:[#allocation5 + $0xb0] sm:$0xff]  ;;  %v4497_v63 = vadd.f32 %v10454_v31, %v10422_v37  ;;  %v4796_v12 = vadd.f32 %v10571_v21, %v4664_v29  ;;  %v5549_v21 = vld [vmem:[#allocation5 + $0xa0] sm:$0xff] }
 0x67b   : > { %v10758_v7 = vmax.f32 %v5503_v44, 0.0  ;;  %v5187_v44 = vadd.f32 %v10686_v33, %v5056_v27  ;;  %5605 = vmatpush.msra.mxu3 %v5554_v15  ;;  %5795 = vmatpush.msra.mxu2 %v5760_v54  ;;  %v5875_v33 = vld [vmem:[#allocation5 + $0x328] sm:$0xff]  ;;  %v10788_v27 = vpop.f32.mrf.mxu3  ;;  %v5189_v38 = vadd.f32 %v10696_v43, %v5058_v53  ;;  %v5658_v43 = vld [vmem:[#allocation5 + $0x1a0] sm:$0xff] }
 0x67c   : > { %v10760_v41 = vpop.f32.mrf.mxu1  ;;  %5714 = vmatpush.msrb.mxu1 %v5663_v13  ;;  %5911 = vmatpush.msrb.mxu0 %v5876_v35  ;;  %v5550_v15 = vld [vmem:[#allocation5 + $0xa8] sm:$0xff]  ;;  %v4928_v37 = vadd.f32 %v10643_v10, %v4796_v12  ;;  %v4666_v54 = vadd.f32 %v10541_v61, %v4497_v63  ;;  %v5754_v61 = vld [vmem:[#allocation5 + $0x200] sm:$0xff] }
 0x67d   : > { %5580 = vmatmul.f32.gmra.mxu2 %v10758_v7  ;;  %5689 = vmatmul.f32.gmra.mxu0 %v10758_v7  ;;  %v5319_v51 = vadd.f32 %v5263_v45, %v5187_v44  ;;  %v10784_v45 = vpop.permute.xlu1 %5483  ;;  %v5659_v13 = vld [vmem:[#allocation5 + $0x1a8] sm:$0xff]  ;;  %v5872_v44 = vld [vmem:[#allocation5 + $0x310] sm:$0xff]  ;;  %v5321_v35 = vadd.f32 %v5266_v57, %v5189_v38 }
 0x67e   : > { %v5392_v30 = vpop.f32.mrf.mxu0  ;;  %5606 = vmatpush.msra.mxu3 %v5553_v39  ;;  %5715 = vmatpush.msrb.mxu1 %v5662_v16  ;;  %v5755_v10 = vld [vmem:[#allocation5 + $0x208] sm:$0xff]  ;;  %v10801_v16 = vpop.permute.xlu2 %5488  ;;  %v5060_v29 = vadd.f32 %v10680_v11, %v4928_v37  ;;  %v5547_v57 = vld [vmem:[#allocation5 + $0x90] sm:$0xff] }
 0x67f   : > { %v5449_v52 = vadd.f32 %v5392_v30, %v5317_v2  ;;  %v5758_v2 = vld [vmem:[#allocation5 + $0x220] sm:$0xff]  ;;  %5796 = vmatpush.msra.mxu2 %v5759_v19  ;;  %5912 = vmatpush.msrb.mxu0 %v5875_v33  ;;  %v5548_v19 = vld [vmem:[#allocation5 + $0x98] sm:$0xff]  ;;  %v5655_v63 = vld [vmem:[#allocation5 + $0x188] sm:$0xff] }
 0x680   : > { %5607 = vmatpush.msra.mxu3 %v5552_v5  ;;  %5716 = vmatpush.msrb.mxu1 %v5661_v17  ;;  %v5657_v33 = vld [vmem:[#allocation5 + $0x198] sm:$0xff]  ;;  %v5870_v5 = vld [vmem:[#allocation5 + $0x300] sm:$0xff]  ;;  %v5269_v17 = vpop.f32.mrf.mxu2 }
 0x681   : > { %v5505_v32 = vadd.f32 %v10768_v9, %v5449_v52  ;;  %v5757_v52 = vld [vmem:[#allocation5 + $0x218] sm:$0xff]  ;;  %5797 = vmatpush.msra.mxu2 %v5758_v2  ;;  %5913 = vmatpush.msrb.mxu0 %v5874_v59  ;;  %v4798_v2 = vadd.f32 %v10590_v60, %v4666_v54  ;;  %v5191_v59 = vadd.f32 %v10705_v50, %v5060_v29  ;;  %v5545_v50 = vld [vmem:[#allocation5 + $0x80] sm:$0xff] }
 0x682   : > { %5608 = vmatpush.msra.mxu3 %v5551_v47  ;;  %5717 = vmatpush.msrb.mxu1 %v5660_v36  ;;  %v5546_v36 = vld [vmem:[#allocation5 + $0x88] sm:$0xff] }
 0x683   : > { %v10776_v42 = vmax.f32 %v5505_v32, 0.0  ;;  %5798 = vmatpush.msra.mxu2 %v5757_v52  ;;  %5914 = vmatpush.msrb.mxu0 %v5873_v23  ;;  %v4930_v11 = vadd.f32 %v10652_v49, %v4798_v2  ;;  %v5323_v60 = vadd.f32 %v5269_v17, %v5191_v59  ;;  %v5654_v23 = vld [vmem:[#allocation5 + $0x180] sm:$0xff] }
 0x684   : > { %v10778_v14 = vpop.f32.mrf.mxu1  ;;  %5609 = vmatpush.msra.mxu3 %v5550_v15  ;;  %5718 = vmatpush.msrb.mxu1 %v5659_v13  ;;  %v4517_v15 = vadd.f32 %v10460_v55, %v10458_v0  ;;  %v12317_v17 = vld [vmem:[#allocation33_spill] sm:$0xff] }
 0x685   : > { %5583 = vmatmul.f32.gmra.mxu2 %v10776_v42  ;;  %5692 = vmatmul.f32.gmra.mxu0 %v10776_v42  ;;  %v5062_v49 = vadd.f32 %v10690_v48, %v4930_v11  ;;  %v12319_v2 = vld [vmem:[#allocation25_spill] sm:$0xff] }
 0x686   : > { %v5395_v46 = vpop.f32.mrf.mxu0  ;;  %5799 = vmatpush.msra.mxu2 %v5756_v3  ;;  %5915 = vmatpush.msrb.mxu0 %v5872_v44  ;;  %v4655_v44 = vadd.f32 %v10573_v25, %v4517_v15  ;;  %v12315_v25 = vld [vmem:[#allocation42_spill] sm:$0xff]  ;;  %v12322_v15 = vld [vmem:[#allocation36_spill] sm:$0xff] }
 0x687   : > { %v5451_v30 = vadd.f32 %v5395_v46, %v5319_v51  ;;  %5610 = vmatpush.msra.mxu3 %v5549_v21  ;;  %5719 = vmatpush.msrb.mxu1 %v5658_v43  ;;  %v5656_v46 = vld [vmem:[#allocation5 + $0x190] sm:$0xff]  ;;  %v5193_v13 = vadd.f32 %v10718_v20, %v5062_v49  ;;  %v10831_v20 = vpop.permute.xlu1 %5498 }
 0x688   : > { %5800 = vmatpush.msra.mxu2 %v5755_v10  ;;  %5916 = vmatpush.msrb.mxu0 %v5871_v40  ;;  %v5272_v3 = vpop.f32.mrf.mxu2  ;;  %v4787_v0 = vadd.f32 %v10601_v24, %v4655_v44  ;;  %v12314_v10 = vld [vmem:[#allocation21_spill] sm:$0xff] }
 0x689   : > { %v5507_v8 = vadd.f32 %v10784_v45, %v5451_v30  ;;  %5611 = vmatpush.msra.mxu3 %v5548_v19  ;;  %5720 = vmatpush.msrb.mxu1 %v5657_v33  ;;  %v10807_v30 = vpop.f32.mrf.mxu3  ;;  %v5325_v48 = vadd.f32 %v5272_v3, %v5193_v13  ;;  %v4520_v40 = vadd.f32 %v12314_v10, %v10477_v28  ;;  %v12316_v33 = vld [vmem:[#allocation32_spill] sm:$0xff] }
 0x68a   : > { %5801 = vmatpush.msra.mxu2 %v5754_v61  ;;  %5917 = vmatpush.msrb.mxu0 %v5870_v5 }
 0x68b   : > { %v10794_v31 = vmax.f32 %v5507_v8, 0.0  ;;  %5612 = vmatpush.msra.mxu3 %v5547_v57  ;;  %5721 = vmatpush.msrb.mxu1 %v5656_v46  ;;  %v10817_v8 = vpop.permute.xlu0 %5493  ;;  %v4657_v29 = vadd.f32 %v12316_v33, %v4520_v40  ;;  %v12318_v46 = vld [vmem:[#allocation28_spill] sm:$0xff] }
 0x68c   : > { %v10796_v32 = vpop.f32.mrf.mxu1  ;;  %v4523_v59 = vadd.f32 %v12319_v2, %v12318_v46  ;;  %v5782_v40 = vld [vmem:[#allocation5 + $0x2e0] sm:$0xff]  ;;  %v5781_v33 = vld [vmem:[#allocation5 + $0x2d8] sm:$0xff] }
 0x68d   : > { %5586 = vmatmul.f32.gmra.mxu2 %v10794_v31  ;;  %5695 = vmatmul.f32.gmra.mxu0 %v10794_v31  ;;  %v4789_v57 = vadd.f32 %v12317_v17, %v4657_v29  ;;  %v5897_v29 = vld [vmem:[#allocation5 + $0x3d8] sm:$0xff] }
 0x68e   : > { %v5398_v39 = vpop.f32.mrf.mxu0  ;;  %5613 = vmatpush.msra.mxu3 %v5546_v36  ;;  %5722 = vmatpush.msrb.mxu1 %v5655_v63  ;;  %v12321_v36 = vld [vmem:[#allocation27_spill] sm:$0xff] }
 0x68f   : > { %v5453_v51 = vadd.f32 %v5398_v39, %v5321_v35  ;;  %v4919_v39 = vadd.f32 %v12315_v25, %v4787_v0  ;;  %v4659_v63 = vadd.f32 %v12321_v36, %v4523_v59  ;;  %v5898_v25 = vld [vmem:[#allocation5 + $0x3e0] sm:$0xff]  ;;  %v12329_v36 = vld [vmem:[#allocation31_spill] sm:$0xff] }
 0x690   : > { %5614 = vmatpush.msra.mxu3 %v5545_v50  ;;  %5723 = vmatpush.msrb.mxu1 %v5654_v23  ;;  %v5785_v23 = vld [vmem:[#allocation5 + $0x2f8] sm:$0xff] }
 0x691   : > { %v5509_v53 = vadd.f32 %v10801_v16, %v5453_v51  ;;  %v5292_v43 = vpop.f32.mrf.mxu3  ;;  %v5051_v5 = vadd.f32 %v10694_v34, %v4919_v39  ;;  %v5901_v34 = vld [vmem:[#allocation5 + $0x3f8] sm:$0xff]  ;;  %v4791_v13 = vadd.f32 %v12322_v15, %v4659_v63  ;;  %v12326_v39 = vld [vmem:[#allocation26_spill] sm:$0xff] }
 0x692   : > { %5824 = vmatpush.msrb.mxu3 %v5785_v23  ;;  %5940 = vmatpush.msra.mxu1 %v5901_v34  ;;  %v5778_v23 = vld [vmem:[#allocation5 + $0x2c0] sm:$0xff]  ;;  %v5893_v15 = vld [vmem:[#allocation5 + $0x3b8] sm:$0xff] }
 0x693   : > { %v10810_v47 = vmax.f32 %v5509_v53, 0.0  ;;  %v5182_v28 = vadd.f32 %v10744_v6, %v5051_v5  ;;  %v12320_v53 = vld [vmem:[#allocation44_spill] sm:$0xff]  ;;  %v5784_v6 = vld [vmem:[#allocation5 + $0x2f0] sm:$0xff] }
 0x694   : > { %v10812_v52 = vpop.f32.mrf.mxu1  ;;  %v4921_v11 = vadd.f32 %v12320_v53, %v4789_v57  ;;  %5825 = vmatpush.msrb.mxu3 %v5784_v6  ;;  %v5780_v57 = vld [vmem:[#allocation5 + $0x2d0] sm:$0xff]  ;;  %v5779_v53 = vld [vmem:[#allocation5 + $0x2c8] sm:$0xff]  ;;  %v5894_v34 = vld [vmem:[#allocation5 + $0x3c0] sm:$0xff] }
 0x695   : > { %5589 = vmatmul.f32.gmra.mxu2 %v10810_v47  ;;  %5698 = vmatmul.f32.gmra.mxu0 %v10810_v47 }
 0x696   : > { %v5401_v12 = vpop.f32.mrf.mxu0 }
 0x697   : > { %v5455_v38 = vadd.f32 %v5401_v12, %v5323_v60  ;;  %v5314_v60 = vadd.f32 %v5292_v43, %v5182_v28  ;;  %v5053_v12 = vadd.f32 %v10709_v58, %v4921_v11  ;;  %v5783_v43 = vld [vmem:[#allocation5 + $0x2e8] sm:$0xff]  ;;  %v12327_v28 = vld [vmem:[#allocation39_spill] sm:$0xff] }
 0x698   : > { %v5899_v58 = vld [vmem:[#allocation5 + $0x3e8] sm:$0xff]  ;;  %5826 = vmatpush.msrb.mxu3 %v5783_v43 }
 0x699   : > { %v5511_v37 = vadd.f32 %v10817_v8, %v5455_v38  ;;  %v5295_v24 = vpop.f32.mrf.mxu3  ;;  %v5900_v38 = vld [vmem:[#allocation5 + $0x3f0] sm:$0xff]  ;;  %v5895_v11 = vld [vmem:[#allocation5 + $0x3c8] sm:$0xff] }
 0x69a   : > { %5941 = vmatpush.msra.mxu1 %v5900_v38  ;;  %5827 = vmatpush.msrb.mxu3 %v5782_v40  ;;  %v5777_v38 = vld [vmem:[#allocation5 + $0x2b8] sm:$0xff]  ;;  %v12332_v43 = vld [vmem:[#allocation41_spill] sm:$0xff] }
 0x69b   : > { %v10824_v21 = vmax.f32 %v5511_v37, 0.0  ;;  %v5184_v37 = vadd.f32 %v10760_v41, %v5053_v12 }
 0x69c   : > { %v10826_v54 = vpop.f32.mrf.mxu1  ;;  %5942 = vmatpush.msra.mxu1 %v5899_v58  ;;  %5828 = vmatpush.msrb.mxu3 %v5781_v33 }
 0x69d   : > { %5592 = vmatmul.f32.gmra.mxu2 %v10824_v21  ;;  %5701 = vmatmul.f32.gmra.mxu0 %v10824_v21 }
 0x69e   : > { %v5404_v35 = vpop.f32.mrf.mxu0  ;;  %5943 = vmatpush.msra.mxu1 %v5898_v25  ;;  %5829 = vmatpush.msrb.mxu3 %v5780_v57  ;;  %v12335_v25 = vld [vmem:[#allocation48_spill] sm:$0xff] }
 0x69f   : > { %v5457_v55 = vadd.f32 %v5404_v35, %v5325_v48  ;;  %v12323_v48 = vld [vmem:[#allocation30_spill] sm:$0xff] }
 0x6a0   : > { %v12324_v35 = vld [vmem:[#allocation22_spill] sm:$0xff]  ;;  %5944 = vmatpush.msra.mxu1 %v5897_v29  ;;  %5830 = vmatpush.msrb.mxu3 %v5779_v53  ;;  %v5889_v29 = vld [vmem:[#allocation5 + $0x398] sm:$0xff] }
 0x6a1   : > { %v5513_v19 = vadd.f32 %v10831_v20, %v5457_v55  ;;  %v5298_v44 = vpop.f32.mrf.mxu3  ;;  %v4526_v0 = vadd.f32 %v12324_v35, %v12323_v48  ;;  %v12325_v55 = vld [vmem:[#allocation46_spill] sm:$0xff] }
 0x6a2   : > { %5831 = vmatpush.msrb.mxu3 %v5778_v23 }
 0x6a3   : > { %v10838_v51 = vmax.f32 %v5513_v19, 0.0  ;;  %v4661_v41 = vadd.f32 %v12326_v39, %v4526_v0  ;;  %v5316_v19 = vadd.f32 %v5295_v24, %v5184_v37  ;;  %v5896_v24 = vld [vmem:[#allocation5 + $0x3d0] sm:$0xff]  ;;  %v5775_v0 = vld [vmem:[#allocation5 + $0x2a8] sm:$0xff] }
 0x6a4   : > { %v10840_v61 = vpop.f32.mrf.mxu1  ;;  %5945 = vmatpush.msra.mxu1 %v5896_v24  ;;  %5832 = vmatpush.msrb.mxu3 %v5777_v38 }
 0x6a5   : > { %5595 = vmatmul.f32.gmra.mxu2 %v10838_v51  ;;  %5704 = vmatmul.f32.gmra.mxu0 %v10838_v51  ;;  %v4793_v46 = vadd.f32 %v12327_v28, %v4661_v41  ;;  %v5774_v41 = vld [vmem:[#allocation5 + $0x2a0] sm:$0xff]  ;;  %v5772_v28 = vld [vmem:[#allocation5 + $0x290] sm:$0xff] }
 0x6a6   : > { %5946 = vmatpush.msra.mxu1 %v5895_v11 }
 0x6a8   : > { %5947 = vmatpush.msra.mxu1 %v5894_v34  ;;  %v5770_v34 = vld [vmem:[#allocation5 + $0x280] sm:$0xff] }
 0x6a9   : > { %v5301_v12 = vpop.f32.mrf.mxu3 }
 0x6aa   : > { %5948 = vmatpush.msra.mxu1 %v5893_v15  ;;  %v12342_v15 = vld [vmem:[#allocation45_spill] sm:$0xff] }
 0x6ac   : > { %v5424_v50 = vpop.f32.mrf.mxu1 }
 0x6ad   : > { %v5446_v49 = vadd.f32 %v5424_v50, %v5314_v60  ;;  %5802 = vmatmul.f32.vlgmr.msra.gmra.mxu2 %v10740_v22  ;;  %5918 = vmatmul.f32.vlgmr.msrb.gmra.mxu0 %v10740_v22  ;;  %v4923_v22 = vadd.f32 %v12325_v55, %v4791_v13  ;;  %v12330_v60 = vld [vmem:[#allocation47_spill] sm:$0xff]  ;;  %v5891_v55 = vld [vmem:[#allocation5 + $0x3a8] sm:$0xff] }
 0x6ae   : > { %v4925_v50 = vadd.f32 %v12330_v60, %v4793_v46  ;;  %v5888_v46 = vld [vmem:[#allocation5 + $0x390] sm:$0xff] }
 0x6af   : > { %v5502_v3 = vadd.f32 %v10732_v4, %v5446_v49  ;;  %v5055_v5 = vadd.f32 %v10725_v62, %v4923_v22  ;;  %v12328_v62 = vld [vmem:[#allocation34_spill] sm:$0xff]  ;;  %v12331_v49 = vld [vmem:[#allocation37_spill] sm:$0xff] }
 0x6b0   : > { %v4529_v63 = vadd.f32 %v12329_v36, %v12328_v62  ;;  %v5057_v13 = vadd.f32 %v10742_v1, %v4925_v50  ;;  %v12333_v1 = vld [vmem:[#allocation35_spill] sm:$0xff]  ;;  %v12334_v22 = vld [vmem:[#allocation29_spill] sm:$0xff] }
 0x6b1   : > { %v10860_v10 = vmax.f32 %v5502_v3, 0.0  ;;  %v5186_v2 = vadd.f32 %v10778_v14, %v5055_v5  ;;  %v5776_v3 = vld [vmem:[#allocation5 + $0x2b0] sm:$0xff]  ;;  %v4532_v40 = vadd.f32 %v12334_v22, %v12333_v1  ;;  %v5304_v5 = vpop.f32.mrf.mxu3  ;;  %v5771_v62 = vld [vmem:[#allocation5 + $0x288] sm:$0xff] }
 0x6b2   : > { %v4663_v14 = vadd.f32 %v12331_v49, %v4529_v63  ;;  %v5188_v48 = vadd.f32 %v10796_v32, %v5057_v13  ;;  %5833 = vmatpush.msrb.mxu3 %v5776_v3  ;;  %v5887_v36 = vld [vmem:[#allocation5 + $0x388] sm:$0xff]  ;;  %v12339_v63 = vld [vmem:[#allocation24_spill] sm:$0xff] }
 0x6b3   : > { %5615 = vmatmul.f32.vlgmr.msra.gmra.mxu3 %v10860_v10  ;;  %5724 = vmatmul.f32.vlgmr.msrb.gmra.mxu1 %v10860_v10  ;;  %v5318_v6 = vadd.f32 %v5298_v44, %v5186_v2  ;;  %v5892_v44 = vld [vmem:[#allocation5 + $0x3b0] sm:$0xff]  ;;  %v12340_v50 = vld [vmem:[#allocation49_spill] sm:$0xff]  ;;  %v12341_v49 = vld [vmem:[#allocation40_spill] sm:$0xff] }
 0x6b4   : > { %v5427_v4 = vpop.f32.mrf.mxu1  ;;  %v4795_v58 = vadd.f32 %v12332_v43, %v4663_v14  ;;  %5949 = vmatpush.msra.mxu1 %v5892_v44  ;;  %5834 = vmatpush.msrb.mxu3 %v5775_v0  ;;  %v5320_v32 = vadd.f32 %v5301_v12, %v5188_v48  ;;  %v12337_v2 = vld [vmem:[#allocation43_spill] sm:$0xff]  ;;  %v5886_v12 = vld [vmem:[#allocation5 + $0x380] sm:$0xff] }
 0x6b5   : > { %v5448_v17 = vadd.f32 %v5427_v4, %v5316_v19  ;;  %5805 = vmatmul.f32.gmra.mxu2 %v10758_v7  ;;  %5921 = vmatmul.f32.gmra.mxu0 %v10758_v7  ;;  %v5890_v19 = vld [vmem:[#allocation5 + $0x3a0] sm:$0xff]  ;;  %v12336_v4 = vld [vmem:[#allocation38_spill] sm:$0xff] }
 0x6b6   : > { %v4927_v39 = vadd.f32 %v12335_v25, %v4795_v58  ;;  %5950 = vmatpush.msra.mxu1 %v5891_v55  ;;  %v4665_v33 = vadd.f32 %v12336_v4, %v4532_v40  ;;  %5835 = vmatpush.msrb.mxu3 %v5774_v41  ;;  %v8103_v41 = vld [vmem:[%s12228_s7 + $0x68] sm:$0x1]  ;;  %v5990_v4 = vld [vmem:[%s12228_s7 + $0x20] sm:$0xff] }
 0x6b7   : > { %v5504_v59 = vadd.f32 %v10749_v18, %v5448_v17 }
 0x6b8   : > { %5951 = vmatpush.msra.mxu1 %v5890_v19  ;;  %v5059_v57 = vadd.f32 %v10765_v56, %v4927_v39  ;;  %v12338_v56 = vld [vmem:[#allocation23_spill] sm:$0xff]  ;;  %v5992_v39 = vld [vmem:[%s12228_s7 + $0x30] sm:$0x1] }
 0x6b9   : > { %v10874_v7 = vmax.f32 %v5504_v59, 0.0  ;;  %v4797_v59 = vadd.f32 %v12337_v2, %v4665_v33  ;;  %v4535_v60 = vadd.f32 %v12339_v63, %v12338_v56  ;;  %v5307_v38 = vpop.f32.mrf.mxu3  ;;  %8095 = vmatpush.msk.msrb.mxu2 %vm5997_vm1, %v5992_v39  ;;  %v8102_v33 = vld [vmem:[%s12228_s7 + $0x60] sm:$0xff]  ;;  %v8116_v39 = vld [vmem:[%s12228_s7 + $0xb0] sm:$0xff] }
 0x6ba   : > { %5952 = vmatpush.msra.mxu1 %v5889_v29  ;;  %v5190_v53 = vadd.f32 %v10812_v52, %v5059_v57  ;;  %v5989_v29 = vld [vmem:[%s12228_s7 + $0x18] sm:$0xff]  ;;  %v8098_v56 = vld [vmem:[%s12228_s7 + $0x40] sm:$0xff] }
 0x6bb   : > { %5618 = vmatmul.f32.gmra.mxu3 %v10874_v7  ;;  %5727 = vmatmul.f32.gmra.mxu1 %v10874_v7  ;;  %v4929_v23 = vadd.f32 %v12340_v50, %v4797_v59  ;;  %v4667_v14 = vadd.f32 %v12341_v49, %v4535_v60  ;;  %v8099_v59 = vld [vmem:[%s12228_s7 + $0x48] sm:$0xff]  ;;  %v8164_v63 = vld [vmem:[%s12228_s7 + $0x1e0] sm:$0xff]  ;;  %v8173_v49 = vld [vmem:[%s12228_s7 + $0x218] sm:$0xff] }
 0x6bc   : > { %v5430_v18 = vpop.f32.mrf.mxu1  ;;  %5953 = vmatpush.msra.mxu1 %v5888_v46  ;;  %v5987_v46 = vld [vmem:[%s12228_s7 + $0x8] sm:$0xff]  ;;  %v8174_v50 = vld [vmem:[%s12228_s7 + $0x220] sm:$0xff] }
 0x6bd   : > { %v5450_v37 = vadd.f32 %v5430_v18, %v5318_v6  ;;  %5808 = vmatmul.f32.gmra.mxu2 %v10776_v42  ;;  %5924 = vmatmul.f32.gmra.mxu0 %v10776_v42  ;;  %v5322_v6 = vadd.f32 %v5304_v5, %v5190_v53  ;;  %v5061_v52 = vadd.f32 %v10788_v27, %v4929_v23  ;;  %v8101_v5 = vld [vmem:[%s12228_s7 + $0x58] sm:$0xff]  ;;  %v8165_v53 = vld [vmem:[%s12228_s7 + $0x1e8] sm:$0xff]  ;;  %v8112_v23 = vld [vmem:[%s12228_s7 + $0xa0] sm:$0x1] }
 0x6be   : > { %5954 = vmatpush.msra.mxu1 %v5887_v36  ;;  %v4799_v13 = vadd.f32 %v12342_v15, %v4667_v14  ;;  %v5986_v36 = vld [vmem:[%s12228_s7] sm:$0xff]  ;;  %v8111_v14 = vld [vmem:[%s12228_s7 + $0x98] sm:$0xff] }
 0x6bf   : > { %v5506_v35 = vadd.f32 %v10768_v9, %v5450_v37  ;;  %v5773_v9 = vld [vmem:[#allocation5 + $0x298] sm:$0xff]  ;;  %v5192_v37 = vadd.f32 %v10826_v54, %v5061_v52  ;;  %v8172_v52 = vld [vmem:[%s12228_s7 + $0x210] sm:$0xff] }
 0x6c0   : > { %5836 = vmatpush.msrb.mxu3 %v5773_v9  ;;  %5955 = vmatpush.msra.mxu1 %v5886_v12  ;;  %v4931_v44 = vadd.f32 %v10728_v26, %v4799_v13  ;;  %v8163_v12 = vld [vmem:[%s12228_s7 + $0x1d8] sm:$0xff]  ;;  %v8161_v13 = vld [vmem:[%s12228_s7 + $0x1c8] sm:$0xff] }
 0x6c1   : > { %v10888_v42 = vmax.f32 %v5506_v35, 0.0  ;;  %v5324_v58 = vadd.f32 %v5307_v38, %v5192_v37  ;;  %v5310_v0 = vpop.f32.mrf.mxu3  ;;  %v8120_v38 = vld [vmem:[%s12228_s7 + $0xd0] sm:$0xff]  ;;  %v8171_v37 = vld [vmem:[%s12228_s7 + $0x208] sm:$0xff] }
 0x6c2   : > { %5837 = vmatpush.msrb.mxu3 %v5772_v28  ;;  %v5063_v27 = vadd.f32 %v10807_v30, %v4931_v44  ;;  %v8166_v28 = vld [vmem:[%s12228_s7 + $0x1f0] sm:$0x1] }
 0x6c3   : > { %5621 = vmatmul.f32.gmra.mxu3 %v10888_v42  ;;  %5730 = vmatmul.f32.gmra.mxu1 %v10888_v42 }
 0x6c4   : > { %v5433_v17 = vpop.f32.mrf.mxu1  ;;  %5838 = vmatpush.msrb.mxu3 %v5771_v62  ;;  %8167 = vmatpush.msk.msra.mxu0 %vm5997_vm1, %v8166_v28  ;;  %v8198_v28 = vld [vmem:[%s12228_s7 + $0x2b0] sm:$0xff] }
 0x6c5   : > { %v5452_v24 = vadd.f32 %v5433_v17, %v5320_v32  ;;  %5811 = vmatmul.f32.gmra.mxu2 %v10794_v31  ;;  %5927 = vmatmul.f32.gmra.mxu0 %v10794_v31  ;;  %v5988_v17 = vld [vmem:[%s12228_s7 + $0x10] sm:$0xff] }
 0x6c6   : > { %5839 = vmatpush.msrb.mxu3 %v5770_v34  ;;  %6291 = vmatpush.msra.mxu0 %v8165_v53  ;;  %v8097_v34 = vld [vmem:[%s12228_s7 + $0x38] sm:$0xff] }
 0x6c7   : > { %v5508_v11 = vadd.f32 %v10784_v45, %v5452_v24  ;;  %v8100_v24 = vld [vmem:[%s12228_s7 + $0x50] sm:$0xff] }
 0x6c8   : > { %8104 = vmatpush.msk.msra.mxu3 %vm5997_vm1, %v8103_v41  ;;  %6292 = vmatpush.msra.mxu0 %v8164_v63  ;;  %v8210_v41 = vld [vmem:[%s12228_s7 + $0x300] sm:$0xff] }
 0x6c9   : > { %v5522_v31 = vmax.f32 %v5508_v11, 0.0  ;;  %v8175_v11 = vld [vmem:[%s12228_s7 + $0x228] sm:$0x1]  ;;  %v8206_v63 = vld [vmem:[%s12228_s7 + $0x2e0] sm:$0xff] }
 0x6ca   : > { %6046 = vmatpush.msra.mxu3 %v8102_v33  ;;  %8176 = vmatpush.msk.msrb.mxu1 %vm5997_vm1, %v8175_v11  ;;  %v8197_v11 = vld [vmem:[%s12228_s7 + $0x2a8] sm:$0xff] }
 0x6cb   : > { %5624 = vmatmul.f32.gmra.mxu3 %v5522_v31  ;;  %5733 = vmatmul.f32.gmra.mxu1 %v5522_v31 }
 0x6cc   : > { %v5436_v45 = vpop.f32.mrf.mxu1  ;;  %6047 = vmatpush.msra.mxu3 %v8101_v5  ;;  %6326 = vmatpush.msrb.mxu1 %v8174_v50  ;;  %v8209_v5 = vld [vmem:[%s12228_s7 + $0x2f8] sm:$0xff] }
 0x6cd   : > { %v5454_v18 = vadd.f32 %v5436_v45, %v5322_v6  ;;  %5814 = vmatmul.f32.gmra.mxu2 %v10810_v47  ;;  %5930 = vmatmul.f32.gmra.mxu0 %v10810_v47  ;;  %v5194_v47 = vadd.f32 %v10840_v61, %v5063_v27  ;;  %v8121_v6 = vld [vmem:[%s12228_s7 + $0xd8] sm:$0x1]  ;;  %v8162_v45 = vld [vmem:[%s12228_s7 + $0x1d0] sm:$0xff]  ;;  %v8170_v27 = vld [vmem:[%s12228_s7 + $0x200] sm:$0xff] }
 0x6ce   : > { %6048 = vmatpush.msra.mxu3 %v8100_v24  ;;  %6293 = vmatpush.msra.mxu0 %v8163_v12 }
 0x6cf   : > { %v5510_v3 = vadd.f32 %v10801_v16, %v5454_v18  ;;  %v5326_v55 = vadd.f32 %v5310_v0, %v5194_v47  ;;  %6327 = vmatpush.msrb.mxu1 %v8173_v49  ;;  %v8110_v18 = vld [vmem:[%s12228_s7 + $0x90] sm:$0xff]  ;;  %v8108_v47 = vld [vmem:[%s12228_s7 + $0x80] sm:$0xff] }
 0x6d0   : > { %6049 = vmatpush.msra.mxu3 %v8099_v59  ;;  %6294 = vmatpush.msra.mxu0 %v8162_v45  ;;  %v8202_v0 = vld [vmem:[%s12228_s7 + $0x2d0] sm:$0x1] }
 0x6d1   : > { %v5524_v43 = vmax.f32 %v5510_v3, 0.0  ;;  %6328 = vmatpush.msrb.mxu1 %v8172_v52 }
 0x6d2   : > { %6050 = vmatpush.msra.mxu3 %v8098_v56  ;;  %6295 = vmatpush.msra.mxu0 %v8161_v13  ;;  %v8196_v56 = vld [vmem:[%s12228_s7 + $0x2a0] sm:$0xff] }
 0x6d3   : > { %5627 = vmatmul.f32.gmra.mxu3 %v5524_v43  ;;  %5736 = vmatmul.f32.gmra.mxu1 %v5524_v43 }
 0x6d4   : > { %v5439_v48 = vpop.f32.mrf.mxu1  ;;  %6051 = vmatpush.msra.mxu3 %v8097_v34  ;;  %6329 = vmatpush.msrb.mxu1 %v8171_v37 }
 0x6d5   : > { %v5456_v35 = vadd.f32 %v5439_v48, %v5324_v58  ;;  %5817 = vmatmul.f32.gmra.mxu2 %v10824_v21  ;;  %5933 = vmatmul.f32.gmra.mxu0 %v10824_v21  ;;  %v8119_v58 = vld [vmem:[%s12228_s7 + $0xc8] sm:$0xff]  ;;  %v8160_v48 = vld [vmem:[%s12228_s7 + $0x1c0] sm:$0xff] }
 0x6d6   : > { %6296 = vmatpush.msra.mxu0 %v8160_v48  ;;  %6330 = vmatpush.msrb.mxu1 %v8170_v27 }
 0x6d7   : > { %v5512_v54 = vadd.f32 %v10817_v8, %v5456_v35 }
 0x6d8   : > { %8203 = vmatpush.msk.msrb.mxu0 %vm5997_vm1, %v8202_v0  ;;  %v8129_v0 = vld [vmem:[%s12228_s7 + $0x108] sm:$0xff] }
 0x6d9   : > { %v5526_v16 = vmax.f32 %v5512_v54, 0.0  ;;  %v8118_v54 = vld [vmem:[%s12228_s7 + $0xc0] sm:$0xff] }
 0x6db   : > { %5630 = vmatmul.f32.gmra.mxu3 %v5526_v16  ;;  %5739 = vmatmul.f32.gmra.mxu1 %v5526_v16 }
 0x6dc   : > { %v5442_v26 = vpop.f32.mrf.mxu1 }
 0x6dd   : > { %v5458_v1 = vadd.f32 %v5442_v26, %v5326_v55  ;;  %5820 = vmatmul.f32.gmra.mxu2 %v10838_v51  ;;  %5936 = vmatmul.f32.gmra.mxu0 %v10838_v51  ;;  %v8169_v55 = vld [vmem:[%s12228_s7 + $0x1f8] sm:$0xff] }
 0x6de   : > { %v8107_v26 = vld [vmem:[%s12228_s7 + $0x78] sm:$0xff]  ;;  %6331 = vmatpush.msrb.mxu1 %v8169_v55 }
 0x6df   : > { %v5514_v30 = vadd.f32 %v10831_v20, %v5458_v1  ;;  %v8117_v1 = vld [vmem:[%s12228_s7 + $0xb8] sm:$0xff] }
 0x6e1   : > { %v5528_v22 = vmax.f32 %v5514_v30, 0.0  ;;  %v8201_v30 = vld [vmem:[%s12228_s7 + $0x2c8] sm:$0xff] }
 0x6e2   : > { %6431 = vmatpush.msrb.mxu0 %v8201_v30 }
 0x6e3   : > { %5633 = vmatmul.f32.gmra.mxu3 %v5528_v22  ;;  %5742 = vmatmul.f32.gmra.mxu1 %v5528_v22 }
 0x6eb   : > { %5840 = vmatmul.f32.vlgmr.msrb.gmra.mxu3 %v10860_v10  ;;  %5956 = vmatmul.f32.vlgmr.msra.gmra.mxu1 %v10860_v10 }
 0x6ec   : > { %8122 = vmatpush.msk.msrb.mxu3 %vm5997_vm1, %v8121_v6 }
 0x6ee   : > { %6116 = vmatpush.msrb.mxu3 %v8120_v38 }
 0x6f0   : > { %6117 = vmatpush.msrb.mxu3 %v8119_v58 }
 0x6f2   : > { %v10924_v8 = vpop.f32.mrf.mxu0  ;;  %6118 = vmatpush.msrb.mxu3 %v8118_v54 }
 0x6f3   : > { %5843 = vmatmul.f32.gmra.mxu3 %v10874_v7  ;;  %5959 = vmatmul.f32.gmra.mxu1 %v10874_v7 }
 0x6f4   : > { %6119 = vmatpush.msrb.mxu3 %v8117_v1  ;;  %v8138_v1 = vld [vmem:[%s12228_s7 + $0x140] sm:$0xff] }
 0x6f6   : > { %6120 = vmatpush.msrb.mxu3 %v8116_v39  ;;  %v8127_v39 = vld [vmem:[%s12228_s7 + $0xf8] sm:$0xff] }
 0x6f8   : > { %v10926_v21 = vpop.f32.mrf.mxu2 }
 0x6fa   : > { %v10928_v20 = vpop.f32.mrf.mxu0 }
 0x6fb   : > { %5846 = vmatmul.f32.gmra.mxu3 %v10888_v42  ;;  %5962 = vmatmul.f32.gmra.mxu1 %v10888_v42  ;;  %v5991_v42 = vld [vmem:[%s12228_s7 + $0x28] sm:$0xff] }
 0x6fc   : > { %6011 = vmatpush.msrb.mxu2 %v5991_v42  ;;  %v8200_v42 = vld [vmem:[%s12228_s7 + $0x2c0] sm:$0xff] }
 0x6fd   : > { %6432 = vmatpush.msrb.mxu0 %v8200_v42  ;;  %v8137_v42 = vld [vmem:[%s12228_s7 + $0x138] sm:$0xff] }
 0x6fe   : > { %6012 = vmatpush.msrb.mxu2 %v5990_v4 }
 0x700   : > { %v10930_v51 = vpop.f32.mrf.mxu2  ;;  %6013 = vmatpush.msrb.mxu2 %v5989_v29  ;;  %v8199_v29 = vld [vmem:[%s12228_s7 + $0x2b8] sm:$0xff] }
 0x701   : > { %6433 = vmatpush.msrb.mxu0 %v8199_v29  ;;  %v8238_v29 = vld [vmem:[%s12228_s7 + $0x3b0] sm:$0x1] }
 0x702   : > { %v5693_v7 = vpop.f32.mrf.mxu0  ;;  %6014 = vmatpush.msrb.mxu2 %v5988_v17 }
 0x703   : > { %5849 = vmatmul.f32.gmra.mxu3 %v5522_v31  ;;  %5965 = vmatmul.f32.gmra.mxu1 %v5522_v31 }
 0x704   : > { %6015 = vmatpush.msrb.mxu2 %v5987_v46  ;;  %v8208_v46 = vld [vmem:[%s12228_s7 + $0x2f0] sm:$0xff]  ;;  %6434 = vmatpush.msrb.mxu0 %v8198_v28 }
 0x706   : > { %6016 = vmatpush.msrb.mxu2 %v5986_v36  ;;  %v8207_v36 = vld [vmem:[%s12228_s7 + $0x2e8] sm:$0xff]  ;;  %6435 = vmatpush.msrb.mxu0 %v8197_v11 }
 0x707   : > { %v8247_v11 = vld [vmem:[%s12228_s7 + $0x3e8] sm:$0x1] }
 0x708   : > { %v10938_v25 = vpop.f32.mrf.mxu2  ;;  %8113 = vmatpush.msk.msra.mxu2 %vm5997_vm1, %v8112_v23  ;;  %6436 = vmatpush.msrb.mxu0 %v8196_v56  ;;  %v8205_v23 = vld [vmem:[%s12228_s7 + $0x2d8] sm:$0xff]  ;;  %v8134_v56 = vld [vmem:[%s12228_s7 + $0x120] sm:$0xff] }
 0x70a   : > { %v5696_v57 = vpop.f32.mrf.mxu0  ;;  %6081 = vmatpush.msra.mxu2 %v8111_v14 }
 0x70b   : > { %5852 = vmatmul.f32.gmra.mxu3 %v5524_v43  ;;  %5968 = vmatmul.f32.gmra.mxu1 %v5524_v43  ;;  %v8109_v43 = vld [vmem:[%s12228_s7 + $0x88] sm:$0xff] }
 0x70c   : > { %6082 = vmatpush.msra.mxu2 %v8110_v18 }
 0x70e   : > { %6083 = vmatpush.msra.mxu2 %v8109_v43 }
 0x710   : > { %v10979_v2 = vpop.f32.mrf.mxu2  ;;  %6084 = vmatpush.msra.mxu2 %v8108_v47 }
 0x712   : > { %v5699_v15 = vpop.f32.mrf.mxu0  ;;  %6085 = vmatpush.msra.mxu2 %v8107_v26 }
 0x713   : > { %5855 = vmatmul.f32.gmra.mxu3 %v5526_v16  ;;  %5971 = vmatmul.f32.gmra.mxu1 %v5526_v16 }
 0x718   : > { %v5590_v3 = vpop.f32.mrf.mxu2 }
 0x71a   : > { %v5702_v4 = vpop.f32.mrf.mxu0 }
 0x71b   : > { %5858 = vmatmul.f32.gmra.mxu3 %v5528_v22  ;;  %5974 = vmatmul.f32.gmra.mxu1 %v5528_v22  ;;  %v8211_v22 = vld [vmem:[%s12228_s7 + $0x308] sm:$0x1] }
 0x71c   : > { %8212 = vmatpush.msk.msra.mxu1 %vm5997_vm1, %v8211_v22 }
 0x71e   : > { %6466 = vmatpush.msra.mxu1 %v8210_v41 }
 0x720   : > { %v5593_v17 = vpop.f32.mrf.mxu2  ;;  %6467 = vmatpush.msra.mxu1 %v8209_v5 }
 0x722   : > { %6468 = vmatpush.msra.mxu1 %v8208_v46  ;;  %v5705_v34 = vpop.f32.mrf.mxu0  ;;  %v8237_v46 = vld [vmem:[%s12228_s7 + $0x3a8] sm:$0xff] }
 0x724   : > { %6469 = vmatpush.msra.mxu1 %v8207_v36  ;;  %v8124_v36 = vld [vmem:[%s12228_s7 + $0xe0] sm:$0xff] }
 0x726   : > { %6470 = vmatpush.msra.mxu1 %v8206_v63  ;;  %v8236_v63 = vld [vmem:[%s12228_s7 + $0x3a0] sm:$0xff] }
 0x728   : > { %v5596_v49 = vpop.f32.mrf.mxu2  ;;  %6471 = vmatpush.msra.mxu1 %v8205_v23  ;;  %v8148_v23 = vld [vmem:[%s12228_s7 + $0x180] sm:$0x1] }
 0x730   : > { %v10932_v61 = vpop.f32.mrf.mxu1  ;;  %v5803_v38 = vpop.f32.mrf.mxu2 }
 0x731   : > { %v5726_v37 = vadd.f32 %v10932_v61, %v10924_v8 }
 0x736   : > { %v10934_v10 = vpop.f32.mrf.mxu3 }
 0x738   : > { %v10936_v40 = vpop.f32.mrf.mxu1  ;;  %v5806_v8 = vpop.f32.mrf.mxu2 }
 0x73e   : > { %v10951_v19 = vpop.f32.mrf.mxu3 }
 0x73f   : > { %v5620_v47 = vadd.f32 %v10951_v19, %v10930_v51  ;;  %v8139_v51 = vld [vmem:[%s12228_s7 + $0x148] sm:$0x1] }
 0x740   : > { %v5731_v32 = vpop.f32.mrf.mxu1 }
 0x741   : > { %v10959_v9 = vadd.f32 %v5731_v32, %v5693_v7  ;;  %v8106_v7 = vld [vmem:[%s12228_s7 + $0x70] sm:$0xff]  ;;  %v8115_v32 = vld [vmem:[%s12228_s7 + $0xa8] sm:$0xff] }
 0x742   : > { %6086 = vmatpush.msra.mxu2 %v8106_v7  ;;  %6121 = vmatpush.msrb.mxu3 %v8115_v32  ;;  %v8136_v32 = vld [vmem:[%s12228_s7 + $0x130] sm:$0xff] }
 0x746   : > { %v10992_v62 = vpop.f32.mrf.mxu3 }
 0x748   : > { %v5734_v60 = vpop.f32.mrf.mxu1 }
 0x749   : > { %v11009_v31 = vadd.f32 %v5734_v60, %v5696_v57 }
 0x74e   : > { %v11046_v44 = vpop.f32.mrf.mxu3 }
 0x750   : > { %v5737_v35 = vpop.f32.mrf.mxu1 }
 0x751   : > { %v11069_v16 = vadd.f32 %v5737_v35, %v5699_v15  ;;  %v5617_v15 = vadd.f32 %v10934_v10, %v10926_v21  ;;  %v8130_v21 = vld [vmem:[%s12228_s7 + $0x110] sm:$0x1]  ;;  %v5729_v10 = vadd.f32 %v10936_v40, %v10928_v20  ;;  %v8128_v40 = vld [vmem:[%s12228_s7 + $0x100] sm:$0xff] }
 0x753   : > { %v5746_v58 = vmax.f32 %v5617_v15, %v5726_v37  ;;  %v5747_v26 = vmax.f32 %v5620_v47, %v5729_v10  ;;  %v8157_v15 = vld [vmem:[%s12228_s7 + $0x1b8] sm:$0x1]  ;;  %v8233_v47 = vld [vmem:[%s12228_s7 + $0x388] sm:$0xff] }
 0x756   : > { %v5628_v33 = vpop.f32.mrf.mxu3 }
 0x757   : > { %v11109_v57 = vadd.f32 %v5628_v33, %v5590_v3  ;;  %v5919_v3 = vpop.f32.mrf.mxu0  ;;  %v8126_v33 = vld [vmem:[%s12228_s7 + $0xf0] sm:$0xff] }
 0x758   : > { %v5740_v24 = vpop.f32.mrf.mxu1 }
 0x759   : > { %v5750_v59 = vmax.f32 %v11109_v57, %v11069_v16  ;;  %v11119_v53 = vadd.f32 %v5740_v24, %v5702_v4  ;;  %v8135_v24 = vld [vmem:[%s12228_s7 + $0x128] sm:$0xff] }
 0x75a   : > { %v8387_v16 = vld [vmem:[%s12228_s7 + $0x748] sm:$0xff] }
 0x75b   : > { %v8289_v57 = vld [vmem:[%s12228_s7 + $0x4e8] sm:$0xff] }
 0x75e   : > { %v5631_v60 = vpop.f32.mrf.mxu3 }
 0x75f   : > { %v11133_v50 = vadd.f32 %v5631_v60, %v5593_v17  ;;  %v5922_v30 = vpop.f32.mrf.mxu0  ;;  %v8125_v17 = vld [vmem:[%s12228_s7 + $0xe8] sm:$0xff]  ;;  %v8246_v60 = vld [vmem:[%s12228_s7 + $0x3e0] sm:$0xff] }
 0x760   : > { %v5743_v12 = vpop.f32.mrf.mxu1 }
 0x761   : > { %v5751_v14 = vmax.f32 %v11133_v50, %v11119_v53  ;;  %v11140_v6 = vadd.f32 %v5743_v12, %v5705_v34  ;;  %v8133_v34 = vld [vmem:[%s12228_s7 + $0x118] sm:$0xff]  ;;  %v8459_v53 = vld [vmem:[%s12228_s7 + $0x908] sm:$0xff] }
 0x762   : > { %v8235_v12 = vld [vmem:[%s12228_s7 + $0x398] sm:$0xff]  ;;  %v8361_v50 = vld [vmem:[%s12228_s7 + $0x6a8] sm:$0xff] }
 0x766   : > { %v5634_v45 = vpop.f32.mrf.mxu3 }
 0x767   : > { %v11142_v52 = vadd.f32 %v5634_v45, %v5596_v49  ;;  %v8245_v49 = vld [vmem:[%s12228_s7 + $0x3d8] sm:$0xff] }
 0x768   : > { %v5957_v13 = vpop.f32.mrf.mxu1  ;;  %v8147_v45 = vld [vmem:[%s12228_s7 + $0x178] sm:$0xff] }
 0x769   : > { %v5752_v18 = vmax.f32 %v11142_v52, %v11140_v6  ;;  %v5958_v27 = vadd.f32 %v5957_v13, %v5919_v3  ;;  %v5623_v13 = vadd.f32 %v10992_v62, %v10938_v25  ;;  %v8244_v3 = vld [vmem:[%s12228_s7 + $0x3d0] sm:$0xff]  ;;  %v8432_v6 = vld [vmem:[%s12228_s7 + $0x860] sm:$0xff] }
 0x76a   : > { %v8146_v25 = vld [vmem:[%s12228_s7 + $0x170] sm:$0xff]  ;;  %v8442_v52 = vld [vmem:[%s12228_s7 + $0x8a0] sm:$0xff] }
 0x76e   : > { %v5841_v43 = vpop.f32.mrf.mxu3 }
 0x76f   : > { %v5842_v48 = vadd.f32 %v5841_v43, %v5803_v38  ;;  %v5809_v43 = vpop.f32.mrf.mxu2 }
 0x770   : > { %v5960_v19 = vpop.f32.mrf.mxu1 }
 0x771   : > { %v5862_v35 = vmax.f32 %v5746_v58, %v5842_v48  ;;  %v5961_v22 = vadd.f32 %v5960_v19, %v5922_v30  ;;  %v8234_v48 = vld [vmem:[%s12228_s7 + $0x390] sm:$0xff] }
 0x773   : > { %v11152_v54 = vmax.f32 %v5862_v35, %v5958_v27  ;;  %v8156_v27 = vld [vmem:[%s12228_s7 + $0x1b0] sm:$0xff] }
 0x775   : > { %8096 = vmatmul.msk.f32.vlgmr.msrb.gmra.mxu2 %vm5993_vm2, %v11152_v54  ;;  %v6030_v61 = vrot.slane %v11152_v54, 1  ;;  %v6065_v4 = vrot.slane %v11152_v54, 2  ;;  %v6100_v5 = vrot.slane %v11152_v54, 3  ;;  %v6135_v37 = vrot.slane %v11152_v54, 4 }
 0x776   : > { %8131 = vmatpush.msk.msrb.mxu2 %vm5997_vm1, %v8130_v21  ;;  %v5844_v55 = vpop.f32.mrf.mxu3  ;;  %v5748_v21 = vmax.f32 %v5623_v13, %v10959_v9  ;;  %v6170_v10 = vrot.slane %v11152_v54, 5  ;;  %v8155_v9 = vld [vmem:[%s12228_s7 + $0x1a8] sm:$0xff] }
 0x777   : > { %v5845_v20 = vadd.f32 %v5844_v55, %v5806_v8  ;;  %8105 = vmatmul.msk.f32.vlgmr.msra.gmra.mxu3 %vm5993_vm2, %v6030_v61  ;;  %v8243_v8 = vld [vmem:[%s12228_s7 + $0x3c8] sm:$0xff]  ;;  %v8242_v55 = vld [vmem:[%s12228_s7 + $0x3c0] sm:$0xff] }
 0x778   : > { %6151 = vmatpush.msrb.mxu2 %v8129_v0  ;;  %8140 = vmatpush.msk.msra.mxu3 %vm5997_vm1, %v8139_v51  ;;  %v8145_v61 = vld [vmem:[%s12228_s7 + $0x168] sm:$0xff]  ;;  %v5963_v0 = vpop.f32.mrf.mxu1  ;;  %v8232_v51 = vld [vmem:[%s12228_s7 + $0x380] sm:$0xff] }
 0x779   : > { %v5863_v7 = vmax.f32 %v5747_v26, %v5845_v20  ;;  %v8144_v26 = vld [vmem:[%s12228_s7 + $0x160] sm:$0xff]  ;;  %v5925_v20 = vpop.f32.mrf.mxu0  ;;  %v8191_v13 = vld [vmem:[%s12228_s7 + $0x288] sm:$0xff] }
 0x77a   : > { %6152 = vmatpush.msrb.mxu2 %v8128_v40  ;;  %6186 = vmatpush.msra.mxu3 %v8138_v1  ;;  %v8154_v40 = vld [vmem:[%s12228_s7 + $0x1a0] sm:$0xff]  ;;  %v8274_v1 = vld [vmem:[%s12228_s7 + $0x490] sm:$0x1]  ;;  %v5964_v30 = vadd.f32 %v5963_v0, %v5925_v20 }
 0x77b   : > { %v11183_v41 = vmax.f32 %v5863_v7, %v5961_v22  ;;  %v8241_v22 = vld [vmem:[%s12228_s7 + $0x3b8] sm:$0xff]  ;;  %v8188_v0 = vld [vmem:[%s12228_s7 + $0x270] sm:$0xff]  ;;  %v8220_v20 = vld [vmem:[%s12228_s7 + $0x340] sm:$0x1] }
 0x77c   : > { %6153 = vmatpush.msrb.mxu2 %v8127_v39  ;;  %6187 = vmatpush.msra.mxu3 %v8137_v42  ;;  %v8143_v7 = vld [vmem:[%s12228_s7 + $0x158] sm:$0xff]  ;;  %v8273_v42 = vld [vmem:[%s12228_s7 + $0x488] sm:$0xff] }
 0x77d   : > { %8114 = vmatmul.msk.f32.vlgmr.msra.gmra.mxu2 %vm5993_vm2, %v6065_v4  ;;  %8168 = vmatmul.msk.f32.vlgmr.msra.gmra.mxu0 %vm5993_vm2, %v11183_v41  ;;  %v6310_v28 = vrot.slane %v11183_v41, 1  ;;  %v6415_v58 = vrot.slane %v11183_v41, 4  ;;  %v6450_v35 = vrot.slane %v11183_v41, 5  ;;  %v8153_v39 = vld [vmem:[%s12228_s7 + $0x198] sm:$0xff] }
 0x77e   : > { %6154 = vmatpush.msrb.mxu2 %v8126_v33  ;;  %6188 = vmatpush.msra.mxu3 %v8136_v32  ;;  %v5847_v38 = vpop.f32.mrf.mxu3  ;;  %v8283_v33 = vld [vmem:[%s12228_s7 + $0x4c8] sm:$0x1]  ;;  %v8142_v32 = vld [vmem:[%s12228_s7 + $0x150] sm:$0xff] }
 0x77f   : > { %8239 = vmatpush.msk.msra.mxu0 %vm5997_vm1, %v8238_v29  ;;  %8123 = vmatmul.msk.f32.vlgmr.msrb.gmra.mxu3 %vm5993_vm2, %v6100_v5  ;;  %v5848_v62 = vadd.f32 %v5847_v38, %v5809_v43  ;;  %v8152_v29 = vld [vmem:[%s12228_s7 + $0x190] sm:$0xff]  ;;  %v8272_v5 = vld [vmem:[%s12228_s7 + $0x480] sm:$0xff]  ;;  %v8279_v38 = vld [vmem:[%s12228_s7 + $0x4a8] sm:$0xff] }
 0x780   : > { %6155 = vmatpush.msrb.mxu2 %v8125_v17  ;;  %6189 = vmatpush.msra.mxu3 %v8135_v24  ;;  %v8282_v17 = vld [vmem:[%s12228_s7 + $0x4c0] sm:$0xff]  ;;  %v6205_v24 = vrot.slane %v11152_v54, 6 }
 0x781   : > { %8177 = vmatmul.msk.f32.vlgmr.msrb.gmra.mxu1 %vm5993_vm2, %v6310_v28  ;;  %6571 = vmatpush.msra.mxu0 %v8237_v46  ;;  %v5864_v19 = vmax.f32 %v5748_v21, %v5848_v62  ;;  %v8184_v28 = vld [vmem:[%s12228_s7 + $0x260] sm:$0x1]  ;;  %v8277_v62 = vld [vmem:[%s12228_s7 + $0x498] sm:$0xff] }
 0x782   : > { %8248 = vmatpush.msk.msrb.mxu1 %vm5997_vm1, %v8247_v11  ;;  %6156 = vmatpush.msrb.mxu2 %v8124_v36  ;;  %v8151_v11 = vld [vmem:[%s12228_s7 + $0x188] sm:$0xff]  ;;  %v8271_v36 = vld [vmem:[%s12228_s7 + $0x478] sm:$0xff]  ;;  %v8180_v43 = vld [vmem:[%s12228_s7 + $0x240] sm:$0xff] }
 0x783   : > { %6190 = vmatpush.msra.mxu3 %v8134_v56  ;;  %6572 = vmatpush.msra.mxu0 %v8236_v63  ;;  %v11310_v4 = vmax.f32 %v5864_v19, %v5964_v30  ;;  %v8281_v56 = vld [vmem:[%s12228_s7 + $0x4b8] sm:$0xff]  ;;  %v8318_v19 = vld [vmem:[%s12228_s7 + $0x5a0] sm:$0xff] }
 0x784   : > { %6606 = vmatpush.msrb.mxu1 %v8246_v60  ;;  %8149 = vmatpush.msk.msra.mxu2 %vm5997_vm1, %v8148_v23  ;;  %v8183_v63 = vld [vmem:[%s12228_s7 + $0x258] sm:$0xff]  ;;  %v6240_v60 = vrot.slane %v11152_v54, 7  ;;  %v8192_v54 = vld [vmem:[%s12228_s7 + $0x290] sm:$0xff] }
 0x785   : > { %6191 = vmatpush.msra.mxu3 %v8133_v34  ;;  %6573 = vmatpush.msra.mxu0 %v8235_v12  ;;  %v6590_v46 = vrot.slane %v11310_v4, 1  ;;  %v8193_v23 = vld [vmem:[%s12228_s7 + $0x298] sm:$0x1]  ;;  %v8270_v34 = vld [vmem:[%s12228_s7 + $0x470] sm:$0xff]  ;;  %v6730_v21 = vrot.slane %v11310_v4, 5 }
 0x786   : > { %6607 = vmatpush.msrb.mxu1 %v8245_v49  ;;  %6221 = vmatpush.msra.mxu2 %v8147_v45  ;;  %v8280_v12 = vld [vmem:[%s12228_s7 + $0x4b0] sm:$0xff]  ;;  %v8269_v45 = vld [vmem:[%s12228_s7 + $0x468] sm:$0xff]  ;;  %v8219_v30 = vld [vmem:[%s12228_s7 + $0x338] sm:$0xff] }
 0x787   : > { %8158 = vmatpush.msk.msrb.mxu3 %vm5997_vm1, %v8157_v15  ;;  %8132 = vmatmul.msk.f32.vlgmr.msrb.gmra.mxu2 %vm5993_vm2, %v6135_v37  ;;  %v8182_v49 = vld [vmem:[%s12228_s7 + $0x250] sm:$0xff]  ;;  %v8181_v15 = vld [vmem:[%s12228_s7 + $0x248] sm:$0xff]  ;;  %v8268_v37 = vld [vmem:[%s12228_s7 + $0x460] sm:$0xff] }
 0x788   : > { %8204 = vmatmul.msk.f32.vlgmr.msrb.gmra.mxu0 %vm5993_vm2, %v6415_v58  ;;  %6608 = vmatpush.msrb.mxu1 %v8244_v3  ;;  %v8278_v3 = vld [vmem:[%s12228_s7 + $0x4a0] sm:$0xff] }
 0x789   : > { %6574 = vmatpush.msra.mxu0 %v8234_v48  ;;  %6222 = vmatpush.msra.mxu2 %v8146_v25  ;;  %v8190_v58 = vld [vmem:[%s12228_s7 + $0x280] sm:$0xff]  ;;  %v6695_v48 = vrot.slane %v11310_v4, 4  ;;  %v8310_v25 = vld [vmem:[%s12228_s7 + $0x570] sm:$0x1] }
 0x78a   : > { %6256 = vmatpush.msrb.mxu3 %v8156_v27  ;;  %8213 = vmatmul.msk.f32.vlgmr.msra.gmra.mxu1 %vm5993_vm2, %v6450_v35  ;;  %v8179_v27 = vld [vmem:[%s12228_s7 + $0x238] sm:$0xff] }
 0x78b   : > { %8141 = vmatmul.msk.f32.vlgmr.msra.gmra.mxu3 %vm5993_vm2, %v6170_v10  ;;  %6575 = vmatpush.msra.mxu0 %v8233_v47  ;;  %v8189_v35 = vld [vmem:[%s12228_s7 + $0x278] sm:$0xff]  ;;  %v8309_v47 = vld [vmem:[%s12228_s7 + $0x568] sm:$0xff] }
 0x78c   : > { %6609 = vmatpush.msrb.mxu1 %v8243_v8  ;;  %6223 = vmatpush.msra.mxu2 %v8145_v61  ;;  %v8319_v10 = vld [vmem:[%s12228_s7 + $0x5a8] sm:$0x1]  ;;  %v8178_v8 = vld [vmem:[%s12228_s7 + $0x230] sm:$0xff]  ;;  %v5850_v61 = vpop.f32.mrf.mxu3 }
 0x78d   : > { %6257 = vmatpush.msrb.mxu3 %v8155_v9  ;;  %6576 = vmatpush.msra.mxu0 %v8232_v51  ;;  %v8308_v9 = vld [vmem:[%s12228_s7 + $0x560] sm:$0xff]  ;;  %v5626_v51 = vadd.f32 %v11046_v44, %v10979_v2  ;;  %v8187_v2 = vld [vmem:[%s12228_s7 + $0x268] sm:$0xff] }
 0x78e   : > { %6610 = vmatpush.msrb.mxu1 %v8242_v55  ;;  %6224 = vmatpush.msra.mxu2 %v8144_v26  ;;  %v5812_v55 = vpop.f32.mrf.mxu2  ;;  %v6345_v26 = vrot.slane %v11183_v41, 2 }
 0x78f   : > { %6258 = vmatpush.msrb.mxu3 %v8154_v40  ;;  %8275 = vmatpush.msk.msrb.mxu0 %vm5997_vm1, %v8274_v1  ;;  %v5851_v44 = vadd.f32 %v5850_v61, %v5812_v55  ;;  %v8307_v40 = vld [vmem:[%s12228_s7 + $0x558] sm:$0xff]  ;;  %v8352_v61 = vld [vmem:[%s12228_s7 + $0x670] sm:$0xff]  ;;  %v8263_v55 = vld [vmem:[%s12228_s7 + $0x448] sm:$0xff] }
 0x790   : > { %6611 = vmatpush.msrb.mxu1 %v8241_v22  ;;  %6225 = vmatpush.msra.mxu2 %v8143_v7  ;;  %v8317_v1 = vld [vmem:[%s12228_s7 + $0x598] sm:$0xff]  ;;  %v5749_v22 = vmax.f32 %v5626_v51, %v11009_v31  ;;  %v6380_v7 = vrot.slane %v11183_v41, 3  ;;  %v8316_v31 = vld [vmem:[%s12228_s7 + $0x590] sm:$0xff]  ;;  %v8351_v51 = vld [vmem:[%s12228_s7 + $0x668] sm:$0xff] }
 0x791   : > { %6259 = vmatpush.msrb.mxu3 %v8153_v39  ;;  %6711 = vmatpush.msrb.mxu0 %v8273_v42  ;;  %v8229_v39 = vld [vmem:[%s12228_s7 + $0x378] sm:$0x1]  ;;  %v8306_v42 = vld [vmem:[%s12228_s7 + $0x550] sm:$0xff] }
 0x792   : > { %8284 = vmatpush.msk.msra.mxu1 %vm5997_vm1, %v8283_v33  ;;  %8240 = vmatmul.msk.f32.vlgmr.msra.gmra.mxu0 %vm5993_vm2, %v11310_v4  ;;  %v5966_v33 = vpop.f32.mrf.mxu1 }
 0x793   : > { %6226 = vmatpush.msra.mxu2 %v8142_v32  ;;  %6260 = vmatpush.msrb.mxu3 %v8152_v29  ;;  %v8218_v32 = vld [vmem:[%s12228_s7 + $0x330] sm:$0xff]  ;;  %v5865_v29 = vmax.f32 %v5749_v22, %v5851_v44  ;;  %v8262_v44 = vld [vmem:[%s12228_s7 + $0x440] sm:$0xff]  ;;  %v8251_v22 = vld [vmem:[%s12228_s7 + $0x3f8] sm:$0xff] }
 0x794   : > { %6712 = vmatpush.msrb.mxu0 %v8272_v5  ;;  %6746 = vmatpush.msra.mxu1 %v8282_v17  ;;  %v8228_v5 = vld [vmem:[%s12228_s7 + $0x370] sm:$0xff]  ;;  %v8305_v17 = vld [vmem:[%s12228_s7 + $0x548] sm:$0xff] }
 0x795   : > { %8150 = vmatmul.msk.f32.vlgmr.msra.gmra.mxu2 %vm5993_vm2, %v6205_v24  ;;  %8249 = vmatmul.msk.f32.vlgmr.msrb.gmra.mxu1 %vm5993_vm2, %v6590_v46  ;;  %v5928_v24 = vpop.f32.mrf.mxu0  ;;  %v8217_v46 = vld [vmem:[%s12228_s7 + $0x328] sm:$0xff] }
 0x796   : > { %8185 = vmatpush.msk.msrb.mxu2 %vm5997_vm1, %v8184_v28  ;;  %6261 = vmatpush.msrb.mxu3 %v8151_v11  ;;  %v8315_v28 = vld [vmem:[%s12228_s7 + $0x588] sm:$0xff]  ;;  %v5967_v11 = vadd.f32 %v5966_v33, %v5928_v24  ;;  %v5815_v24 = vpop.f32.mrf.mxu2 }
 0x797   : > { %6713 = vmatpush.msrb.mxu0 %v8271_v36  ;;  %6747 = vmatpush.msra.mxu1 %v8281_v56  ;;  %v8227_v36 = vld [vmem:[%s12228_s7 + $0x368] sm:$0xff]  ;;  %v8304_v56 = vld [vmem:[%s12228_s7 + $0x540] sm:$0xff] }
 0x798   : > { %8159 = vmatmul.msk.f32.vlgmr.msrb.gmra.mxu3 %vm5993_vm2, %v6240_v60  ;;  %6361 = vmatpush.msrb.mxu2 %v8183_v63  ;;  %v8314_v63 = vld [vmem:[%s12228_s7 + $0x580] sm:$0xff]  ;;  %v8391_v33 = vld [vmem:[%s12228_s7 + $0x768] sm:$0x1] }
 0x799   : > { %8194 = vmatpush.msk.msra.mxu3 %vm5997_vm1, %v8193_v23  ;;  %6714 = vmatpush.msrb.mxu0 %v8270_v34  ;;  %v8216_v60 = vld [vmem:[%s12228_s7 + $0x320] sm:$0xff]  ;;  %v11489_v23 = vmax.f32 %v5865_v29, %v5967_v11  ;;  %v8260_v29 = vld [vmem:[%s12228_s7 + $0x430] sm:$0xff]  ;;  %v8259_v11 = vld [vmem:[%s12228_s7 + $0x428] sm:$0xff] }
 0x79a   : > { %6748 = vmatpush.msra.mxu1 %v8280_v12  ;;  %6362 = vmatpush.msrb.mxu2 %v8182_v49  ;;  %v8226_v34 = vld [vmem:[%s12228_s7 + $0x360] sm:$0xff]  ;;  %v8346_v12 = vld [vmem:[%s12228_s7 + $0x650] sm:$0x1]  ;;  %v8313_v49 = vld [vmem:[%s12228_s7 + $0x578] sm:$0xff] }
 0x79b   : > { %6396 = vmatpush.msra.mxu3 %v8192_v54  ;;  %6715 = vmatpush.msrb.mxu0 %v8269_v45  ;;  %v8215_v54 = vld [vmem:[%s12228_s7 + $0x318] sm:$0xff] }
 0x79c   : > { %6749 = vmatpush.msra.mxu1 %v8279_v38  ;;  %6363 = vmatpush.msrb.mxu2 %v8181_v15  ;;  %v8225_v45 = vld [vmem:[%s12228_s7 + $0x358] sm:$0xff]  ;;  %v8345_v38 = vld [vmem:[%s12228_s7 + $0x648] sm:$0xff]  ;;  %v6870_v15 = vrot.slane %v11489_v23, 1 }
 0x79d   : > { %6397 = vmatpush.msra.mxu3 %v8191_v13  ;;  %6716 = vmatpush.msrb.mxu0 %v8268_v37  ;;  %v8355_v13 = vld [vmem:[%s12228_s7 + $0x688] sm:$0x1]  ;;  %v8214_v37 = vld [vmem:[%s12228_s7 + $0x310] sm:$0xff] }
 0x79e   : > { %6750 = vmatpush.msra.mxu1 %v8278_v3  ;;  %6364 = vmatpush.msrb.mxu2 %v8180_v43  ;;  %v8224_v3 = vld [vmem:[%s12228_s7 + $0x350] sm:$0xff]  ;;  %v8344_v43 = vld [vmem:[%s12228_s7 + $0x640] sm:$0xff] }
 0x79f   : > { %6398 = vmatpush.msra.mxu3 %v8190_v58  ;;  %8276 = vmatmul.msk.f32.vlgmr.msrb.gmra.mxu0 %vm5993_vm2, %v6695_v48  ;;  %v8354_v58 = vld [vmem:[%s12228_s7 + $0x680] sm:$0xff]  ;;  %v6485_v48 = vrot.slane %v11183_v41, 6 }
 0x7a0   : > { %8311 = vmatpush.msk.msra.mxu0 %vm5997_vm1, %v8310_v25  ;;  %6751 = vmatpush.msra.mxu1 %v8277_v62  ;;  %v8256_v25 = vld [vmem:[%s12228_s7 + $0x420] sm:$0x1]  ;;  %v8223_v62 = vld [vmem:[%s12228_s7 + $0x348] sm:$0xff] }
 0x7a1   : > { %6365 = vmatpush.msrb.mxu2 %v8179_v27  ;;  %6399 = vmatpush.msra.mxu3 %v8189_v35  ;;  %v8343_v27 = vld [vmem:[%s12228_s7 + $0x638] sm:$0xff] }
 0x7a2   : > { %8285 = vmatmul.msk.f32.vlgmr.msra.gmra.mxu1 %vm5993_vm2, %v6730_v21  ;;  %6851 = vmatpush.msra.mxu0 %v8309_v47  ;;  %v8353_v35 = vld [vmem:[%s12228_s7 + $0x678] sm:$0xff]  ;;  %v6520_v21 = vrot.slane %v11183_v41, 7  ;;  %v8264_v41 = vld [vmem:[%s12228_s7 + $0x450] sm:$0xff] }
 0x7a3   : > { %8320 = vmatpush.msk.msrb.mxu1 %vm5997_vm1, %v8319_v10  ;;  %6366 = vmatpush.msrb.mxu2 %v8178_v8  ;;  %v8255_v47 = vld [vmem:[%s12228_s7 + $0x418] sm:$0xff]  ;;  %v8342_v8 = vld [vmem:[%s12228_s7 + $0x630] sm:$0xff] }
 0x7a4   : > { %6400 = vmatpush.msra.mxu3 %v8188_v0  ;;  %6852 = vmatpush.msra.mxu0 %v8308_v9  ;;  %v8265_v10 = vld [vmem:[%s12228_s7 + $0x458] sm:$0x1]  ;;  %v8254_v0 = vld [vmem:[%s12228_s7 + $0x410] sm:$0xff]  ;;  %v8341_v9 = vld [vmem:[%s12228_s7 + $0x628] sm:$0xff] }
 0x7a5   : > { %6886 = vmatpush.msrb.mxu1 %v8318_v19  ;;  %8186 = vmatmul.msk.f32.vlgmr.msrb.gmra.mxu2 %vm5993_vm2, %v6345_v26  ;;  %v8253_v19 = vld [vmem:[%s12228_s7 + $0x408] sm:$0xff]  ;;  %v8340_v26 = vld [vmem:[%s12228_s7 + $0x620] sm:$0xff] }
 0x7a6   : > { %8221 = vmatpush.msk.msra.mxu2 %vm5997_vm1, %v8220_v20  ;;  %6401 = vmatpush.msra.mxu3 %v8187_v2  ;;  %v8350_v20 = vld [vmem:[%s12228_s7 + $0x660] sm:$0xff] }
 0x7a7   : > { %6853 = vmatpush.msra.mxu0 %v8307_v40  ;;  %6887 = vmatpush.msrb.mxu1 %v8317_v1  ;;  %v8252_v2 = vld [vmem:[%s12228_s7 + $0x400] sm:$0xff]  ;;  %v6975_v40 = vrot.slane %v11489_v23, 4  ;;  %v8382_v1 = vld [vmem:[%s12228_s7 + $0x730] sm:$0x1] }
 0x7a8   : > { %8195 = vmatmul.msk.f32.vlgmr.msra.gmra.mxu3 %vm5993_vm2, %v6380_v7  ;;  %6501 = vmatpush.msra.mxu2 %v8219_v30  ;;  %v8349_v30 = vld [vmem:[%s12228_s7 + $0x658] sm:$0xff] }
 0x7a9   : > { %8230 = vmatpush.msk.msrb.mxu3 %vm5997_vm1, %v8229_v39  ;;  %6854 = vmatpush.msra.mxu0 %v8306_v42  ;;  %v8261_v7 = vld [vmem:[%s12228_s7 + $0x438] sm:$0xff]  ;;  %v8381_v39 = vld [vmem:[%s12228_s7 + $0x728] sm:$0xff]  ;;  %v7010_v42 = vrot.slane %v11489_v23, 5 }
 0x7aa   : > { %6888 = vmatpush.msrb.mxu1 %v8316_v31  ;;  %6502 = vmatpush.msra.mxu2 %v8218_v32  ;;  %v8250_v31 = vld [vmem:[%s12228_s7 + $0x3f0] sm:$0xff]  ;;  %v5853_v32 = vpop.f32.mrf.mxu3 }
 0x7ab   : > { %6536 = vmatpush.msrb.mxu3 %v8228_v5  ;;  %6855 = vmatpush.msra.mxu0 %v8305_v17  ;;  %v8380_v5 = vld [vmem:[%s12228_s7 + $0x720] sm:$0xff] }
 0x7ac   : > { %6889 = vmatpush.msrb.mxu1 %v8315_v28  ;;  %6503 = vmatpush.msra.mxu2 %v8217_v46  ;;  %v8390_v17 = vld [vmem:[%s12228_s7 + $0x760] sm:$0xff]  ;;  %v6625_v28 = vrot.slane %v11310_v4, 2 }
 0x7ad   : > { %6537 = vmatpush.msrb.mxu3 %v8227_v36  ;;  %6856 = vmatpush.msra.mxu0 %v8304_v56  ;;  %v8292_v46 = vld [vmem:[%s12228_s7 + $0x500] sm:$0x1]  ;;  %v5854_v36 = vadd.f32 %v5853_v32, %v5815_v24  ;;  %v8379_v56 = vld [vmem:[%s12228_s7 + $0x718] sm:$0xff]  ;;  %v8335_v32 = vld [vmem:[%s12228_s7 + $0x608] sm:$0xff] }
 0x7ae   : > { %6890 = vmatpush.msrb.mxu1 %v8314_v63  ;;  %6504 = vmatpush.msra.mxu2 %v8216_v60  ;;  %v8389_v63 = vld [vmem:[%s12228_s7 + $0x758] sm:$0xff]  ;;  %v8334_v24 = vld [vmem:[%s12228_s7 + $0x600] sm:$0xff] }
 0x7af   : > { %6538 = vmatpush.msrb.mxu3 %v8226_v34  ;;  %8312 = vmatmul.msk.f32.vlgmr.msra.gmra.mxu0 %vm5993_vm2, %v11489_v23  ;;  %v8291_v60 = vld [vmem:[%s12228_s7 + $0x4f8] sm:$0xff]  ;;  %v6660_v34 = vrot.slane %v11310_v4, 3 }
 0x7b0   : > { %8347 = vmatpush.msk.msrb.mxu0 %vm5997_vm1, %v8346_v12  ;;  %6891 = vmatpush.msrb.mxu1 %v8313_v49  ;;  %v8301_v12 = vld [vmem:[%s12228_s7 + $0x538] sm:$0x1]  ;;  %v8378_v49 = vld [vmem:[%s12228_s7 + $0x710] sm:$0xff] }
 0x7b1   : > { %6505 = vmatpush.msra.mxu2 %v8215_v54  ;;  %6539 = vmatpush.msrb.mxu3 %v8225_v45  ;;  %v5969_v54 = vpop.f32.mrf.mxu1  ;;  %v8388_v45 = vld [vmem:[%s12228_s7 + $0x750] sm:$0xff] }
 0x7b2   : > { %8321 = vmatmul.msk.f32.vlgmr.msrb.gmra.mxu1 %vm5993_vm2, %v6870_v15  ;;  %6991 = vmatpush.msrb.mxu0 %v8345_v38  ;;  %v8290_v38 = vld [vmem:[%s12228_s7 + $0x4f0] sm:$0xff]  ;;  %v5866_v15 = vmax.f32 %v5750_v59, %v5854_v36  ;;  %v8323_v36 = vld [vmem:[%s12228_s7 + $0x5b8] sm:$0xff] }
 0x7b3   : > { %8356 = vmatpush.msk.msra.mxu1 %vm5997_vm1, %v8355_v13  ;;  %6506 = vmatpush.msra.mxu2 %v8214_v37  ;;  %v8300_v13 = vld [vmem:[%s12228_s7 + $0x530] sm:$0xff]  ;;  %v8377_v37 = vld [vmem:[%s12228_s7 + $0x708] sm:$0xff] }
 0x7b4   : > { %6540 = vmatpush.msrb.mxu3 %v8224_v3  ;;  %6992 = vmatpush.msrb.mxu0 %v8344_v43  ;;  %v5931_v3 = vpop.f32.mrf.mxu0  ;;  %v8299_v43 = vld [vmem:[%s12228_s7 + $0x528] sm:$0xff] }
 0x7b5   : > { %7026 = vmatpush.msra.mxu1 %v8354_v58  ;;  %8222 = vmatmul.msk.f32.vlgmr.msra.gmra.mxu2 %vm5993_vm2, %v6485_v48  ;;  %v5970_v59 = vadd.f32 %v5969_v54, %v5931_v3  ;;  %v8376_v58 = vld [vmem:[%s12228_s7 + $0x700] sm:$0xff]  ;;  %v8332_v54 = vld [vmem:[%s12228_s7 + $0x5f0] sm:$0xff]  ;;  %v8331_v3 = vld [vmem:[%s12228_s7 + $0x5e8] sm:$0xff] }
 0x7b6   : > { %8257 = vmatpush.msk.msrb.mxu2 %vm5997_vm1, %v8256_v25  ;;  %6541 = vmatpush.msrb.mxu3 %v8223_v62  ;;  %v8386_v48 = vld [vmem:[%s12228_s7 + $0x740] sm:$0xff] }
 0x7b7   : > { %6993 = vmatpush.msrb.mxu0 %v8343_v27  ;;  %7027 = vmatpush.msra.mxu1 %v8353_v35  ;;  %v8288_v25 = vld [vmem:[%s12228_s7 + $0x4e0] sm:$0xff]  ;;  %v11686_v62 = vmax.f32 %v5866_v15, %v5970_v59  ;;  %v8418_v35 = vld [vmem:[%s12228_s7 + $0x810] sm:$0x1]  ;;  %v5818_v15 = vpop.f32.mrf.mxu2  ;;  %v8461_v59 = vld [vmem:[%s12228_s7 + $0x918] sm:$0xff] }
 0x7b8   : > { %8231 = vmatmul.msk.f32.vlgmr.msrb.gmra.mxu3 %vm5993_vm2, %v6520_v21  ;;  %6641 = vmatpush.msrb.mxu2 %v8255_v47  ;;  %v8298_v27 = vld [vmem:[%s12228_s7 + $0x520] sm:$0xff]  ;;  %v8385_v47 = vld [vmem:[%s12228_s7 + $0x738] sm:$0xff] }
 0x7b9   : > { %8266 = vmatpush.msk.msra.mxu3 %vm5997_vm1, %v8265_v10  ;;  %6994 = vmatpush.msrb.mxu0 %v8342_v8  ;;  %v8287_v21 = vld [vmem:[%s12228_s7 + $0x4d8] sm:$0xff]  ;;  %v8417_v8 = vld [vmem:[%s12228_s7 + $0x808] sm:$0xff] }
 0x7ba   : > { %7028 = vmatpush.msra.mxu1 %v8352_v61  ;;  %6642 = vmatpush.msrb.mxu2 %v8254_v0  ;;  %v8297_v10 = vld [vmem:[%s12228_s7 + $0x518] sm:$0xff]  ;;  %v7150_v61 = vrot.slane %v11686_v62, 1  ;;  %v8427_v0 = vld [vmem:[%s12228_s7 + $0x848] sm:$0x1] }
 0x7bb   : > { %6676 = vmatpush.msra.mxu3 %v8264_v41  ;;  %6995 = vmatpush.msrb.mxu0 %v8341_v9  ;;  %v8286_v41 = vld [vmem:[%s12228_s7 + $0x4d0] sm:$0xff] }
 0x7bc   : > { %7029 = vmatpush.msra.mxu1 %v8351_v51  ;;  %6643 = vmatpush.msrb.mxu2 %v8253_v19  ;;  %v8296_v9 = vld [vmem:[%s12228_s7 + $0x510] sm:$0xff]  ;;  %v8416_v51 = vld [vmem:[%s12228_s7 + $0x800] sm:$0xff] }
 0x7bd   : > { %6677 = vmatpush.msra.mxu3 %v8263_v55  ;;  %6996 = vmatpush.msrb.mxu0 %v8340_v26  ;;  %v8426_v19 = vld [vmem:[%s12228_s7 + $0x840] sm:$0xff]  ;;  %v6765_v55 = vrot.slane %v11310_v4, 6 }
 0x7be   : > { %7030 = vmatpush.msra.mxu1 %v8350_v20  ;;  %6644 = vmatpush.msrb.mxu2 %v8252_v2  ;;  %v8328_v26 = vld [vmem:[%s12228_s7 + $0x5e0] sm:$0x1]  ;;  %v8295_v20 = vld [vmem:[%s12228_s7 + $0x508] sm:$0xff]  ;;  %v8415_v2 = vld [vmem:[%s12228_s7 + $0x7f8] sm:$0xff] }
 0x7bf   : > { %6678 = vmatpush.msra.mxu3 %v8262_v44  ;;  %8348 = vmatmul.msk.f32.vlgmr.msrb.gmra.mxu0 %vm5993_vm2, %v6975_v40  ;;  %v8425_v44 = vld [vmem:[%s12228_s7 + $0x838] sm:$0xff] }
 0x7c0   : > { %8383 = vmatpush.msk.msra.mxu0 %vm5997_vm1, %v8382_v1  ;;  %7031 = vmatpush.msra.mxu1 %v8349_v30  ;;  %v8327_v40 = vld [vmem:[%s12228_s7 + $0x5d8] sm:$0xff]  ;;  %v6800_v1 = vrot.slane %v11310_v4, 7  ;;  %v8336_v4 = vld [vmem:[%s12228_s7 + $0x610] sm:$0xff] }
 0x7c1   : > { %6645 = vmatpush.msrb.mxu2 %v8251_v22  ;;  %6679 = vmatpush.msra.mxu3 %v8261_v7  ;;  %v8337_v30 = vld [vmem:[%s12228_s7 + $0x618] sm:$0x1]  ;;  %v8414_v22 = vld [vmem:[%s12228_s7 + $0x7f0] sm:$0xff] }
 0x7c2   : > { %8357 = vmatmul.msk.f32.vlgmr.msra.gmra.mxu1 %vm5993_vm2, %v7010_v42  ;;  %7131 = vmatpush.msra.mxu0 %v8381_v39  ;;  %v8424_v7 = vld [vmem:[%s12228_s7 + $0x830] sm:$0xff]  ;;  %v8413_v42 = vld [vmem:[%s12228_s7 + $0x7e8] sm:$0xff] }
 0x7c3   : > { %8392 = vmatpush.msk.msrb.mxu1 %vm5997_vm1, %v8391_v33  ;;  %6646 = vmatpush.msrb.mxu2 %v8250_v31  ;;  %v8326_v39 = vld [vmem:[%s12228_s7 + $0x5d0] sm:$0xff]  ;;  %v8423_v33 = vld [vmem:[%s12228_s7 + $0x828] sm:$0xff] }
 0x7c4   : > { %6680 = vmatpush.msra.mxu3 %v8260_v29  ;;  %7132 = vmatpush.msra.mxu0 %v8380_v5  ;;  %v8325_v31 = vld [vmem:[%s12228_s7 + $0x5c8] sm:$0xff]  ;;  %v8412_v29 = vld [vmem:[%s12228_s7 + $0x7e0] sm:$0xff] }
 0x7c5   : > { %7166 = vmatpush.msrb.mxu1 %v8390_v17  ;;  %8258 = vmatmul.msk.f32.vlgmr.msrb.gmra.mxu2 %vm5993_vm2, %v6625_v28  ;;  %v8422_v5 = vld [vmem:[%s12228_s7 + $0x820] sm:$0xff]  ;;  %v7255_v28 = vrot.slane %v11686_v62, 4 }
 0x7c6   : > { %8293 = vmatpush.msk.msra.mxu2 %vm5997_vm1, %v8292_v46  ;;  %6681 = vmatpush.msra.mxu3 %v8259_v11  ;;  %v8324_v17 = vld [vmem:[%s12228_s7 + $0x5c0] sm:$0xff]  ;;  %v8454_v46 = vld [vmem:[%s12228_s7 + $0x8f0] sm:$0x1]  ;;  %v8421_v11 = vld [vmem:[%s12228_s7 + $0x818] sm:$0xff] }
 0x7c7   : > { %7133 = vmatpush.msra.mxu0 %v8379_v56  ;;  %7167 = vmatpush.msrb.mxu1 %v8389_v63  ;;  %v8333_v56 = vld [vmem:[%s12228_s7 + $0x5f8] sm:$0xff]  ;;  %v8453_v63 = vld [vmem:[%s12228_s7 + $0x8e8] sm:$0xff] }
 0x7c8   : > { %8267 = vmatmul.msk.f32.vlgmr.msra.gmra.mxu3 %vm5993_vm2, %v6660_v34  ;;  %6781 = vmatpush.msra.mxu2 %v8291_v60  ;;  %v7290_v60 = vrot.slane %v11686_v62, 5  ;;  %v8463_v34 = vld [vmem:[%s12228_s7 + $0x928] sm:$0x1] }
 0x7c9   : > { %8302 = vmatpush.msk.msrb.mxu3 %vm5997_vm1, %v8301_v12  ;;  %7134 = vmatpush.msra.mxu0 %v8378_v49  ;;  %v8322_v12 = vld [vmem:[%s12228_s7 + $0x5b0] sm:$0xff]  ;;  %v5856_v49 = vpop.f32.mrf.mxu3 }
 0x7ca   : > { %7168 = vmatpush.msrb.mxu1 %v8388_v45  ;;  %6782 = vmatpush.msra.mxu2 %v8290_v38  ;;  %v8452_v45 = vld [vmem:[%s12228_s7 + $0x8e0] sm:$0xff] }
 0x7cb   : > { %6816 = vmatpush.msrb.mxu3 %v8300_v13  ;;  %7135 = vmatpush.msra.mxu0 %v8377_v37  ;;  %v8462_v38 = vld [vmem:[%s12228_s7 + $0x920] sm:$0xff]  ;;  %v6905_v13 = vrot.slane %v11489_v23, 2 }
 0x7cc   : > { %7169 = vmatpush.msrb.mxu1 %v8387_v16  ;;  %6783 = vmatpush.msra.mxu2 %v8289_v57  ;;  %v8364_v37 = vld [vmem:[%s12228_s7 + $0x6c0] sm:$0x1]  ;;  %v5857_v16 = vadd.f32 %v5856_v49, %v5818_v15  ;;  %v8451_v57 = vld [vmem:[%s12228_s7 + $0x8d8] sm:$0xff] }
 0x7cd   : > { %6817 = vmatpush.msrb.mxu3 %v8299_v43  ;;  %7136 = vmatpush.msra.mxu0 %v8376_v58  ;;  %v8363_v43 = vld [vmem:[%s12228_s7 + $0x6b8] sm:$0xff]  ;;  %v6940_v58 = vrot.slane %v11489_v23, 3  ;;  %v8396_v49 = vld [vmem:[%s12228_s7 + $0x780] sm:$0xff] }
 0x7ce   : > { %7170 = vmatpush.msrb.mxu1 %v8386_v48  ;;  %6784 = vmatpush.msra.mxu2 %v8288_v25  ;;  %v8373_v48 = vld [vmem:[%s12228_s7 + $0x6f8] sm:$0x1]  ;;  %v8450_v25 = vld [vmem:[%s12228_s7 + $0x8d0] sm:$0xff] }
 0x7cf   : > { %6818 = vmatpush.msrb.mxu3 %v8298_v27  ;;  %8384 = vmatmul.msk.f32.vlgmr.msra.gmra.mxu0 %vm5993_vm2, %v11686_v62  ;;  %v5972_v27 = vpop.f32.mrf.mxu1  ;;  %v8493_v15 = vld [vmem:[%s12228_s7 + $0x9d8] sm:$0xff] }
 0x7d0   : > { %8419 = vmatpush.msk.msrb.mxu0 %vm5997_vm1, %v8418_v35  ;;  %7171 = vmatpush.msrb.mxu1 %v8385_v47  ;;  %v8460_v35 = vld [vmem:[%s12228_s7 + $0x910] sm:$0xff] }
 0x7d1   : > { %6785 = vmatpush.msra.mxu2 %v8287_v21  ;;  %6819 = vmatpush.msrb.mxu3 %v8297_v10  ;;  %v8362_v47 = vld [vmem:[%s12228_s7 + $0x6b0] sm:$0xff]  ;;  %v5867_v21 = vmax.f32 %v5751_v14, %v5857_v16  ;;  %v8525_v16 = vld [vmem:[%s12228_s7 + $0xaa8] sm:$0xff] }
 0x7d2   : > { %8393 = vmatmul.msk.f32.vlgmr.msrb.gmra.mxu1 %vm5993_vm2, %v7150_v61  ;;  %7271 = vmatpush.msrb.mxu0 %v8417_v8  ;;  %v8372_v10 = vld [vmem:[%s12228_s7 + $0x6f0] sm:$0xff]  ;;  %v8449_v8 = vld [vmem:[%s12228_s7 + $0x8c8] sm:$0xff]  ;;  %v5934_v61 = vpop.f32.mrf.mxu0 }
 0x7d3   : > { %8428 = vmatpush.msk.msra.mxu1 %vm5997_vm1, %v8427_v0  ;;  %6786 = vmatpush.msra.mxu2 %v8286_v41  ;;  %v5973_v14 = vadd.f32 %v5972_v27, %v5934_v61  ;;  %v8371_v0 = vld [vmem:[%s12228_s7 + $0x6e8] sm:$0xff]  ;;  %v8448_v41 = vld [vmem:[%s12228_s7 + $0x8c0] sm:$0xff]  ;;  %v8445_v61 = vld [vmem:[%s12228_s7 + $0x8b8] sm:$0x1] }
 0x7d4   : > { %6820 = vmatpush.msrb.mxu3 %v8296_v9  ;;  %7272 = vmatpush.msrb.mxu0 %v8416_v51  ;;  %v8458_v9 = vld [vmem:[%s12228_s7 + $0x900] sm:$0xff] }
 0x7d5   : > { %7306 = vmatpush.msra.mxu1 %v8426_v19  ;;  %8294 = vmatmul.msk.f32.vlgmr.msra.gmra.mxu2 %vm5993_vm2, %v6765_v55  ;;  %v8360_v51 = vld [vmem:[%s12228_s7 + $0x6a0] sm:$0xff]  ;;  %v11883_v19 = vmax.f32 %v5867_v21, %v5973_v14  ;;  %v8444_v14 = vld [vmem:[%s12228_s7 + $0x8b0] sm:$0xff] }
 0x7d6   : > { %8329 = vmatpush.msk.msrb.mxu2 %vm5997_vm1, %v8328_v26  ;;  %6821 = vmatpush.msrb.mxu3 %v8295_v20  ;;  %v8370_v55 = vld [vmem:[%s12228_s7 + $0x6e0] sm:$0xff]  ;;  %v8490_v26 = vld [vmem:[%s12228_s7 + $0x9d0] sm:$0x1]  ;;  %v8457_v20 = vld [vmem:[%s12228_s7 + $0x8f8] sm:$0xff] }
 0x7d7   : > { %7273 = vmatpush.msrb.mxu0 %v8415_v2  ;;  %7307 = vmatpush.msra.mxu1 %v8425_v44  ;;  %v8359_v2 = vld [vmem:[%s12228_s7 + $0x698] sm:$0xff]  ;;  %v8436_v27 = vld [vmem:[%s12228_s7 + $0x880] sm:$0x1] }
 0x7d8   : > { %8303 = vmatmul.msk.f32.vlgmr.msrb.gmra.mxu3 %vm5993_vm2, %v6800_v1  ;;  %6921 = vmatpush.msrb.mxu2 %v8327_v40  ;;  %v8369_v44 = vld [vmem:[%s12228_s7 + $0x6d8] sm:$0xff]  ;;  %v8489_v40 = vld [vmem:[%s12228_s7 + $0x9c8] sm:$0xff]  ;;  %v7430_v1 = vrot.slane %v11883_v19, 1 }
 0x7d9   : > { %8338 = vmatpush.msk.msra.mxu3 %vm5997_vm1, %v8337_v30  ;;  %7274 = vmatpush.msrb.mxu0 %v8414_v22  ;;  %v8499_v30 = vld [vmem:[%s12228_s7 + $0xa08] sm:$0x1]  ;;  %v8358_v22 = vld [vmem:[%s12228_s7 + $0x690] sm:$0xff] }
 0x7da   : > { %7308 = vmatpush.msra.mxu1 %v8424_v7  ;;  %6922 = vmatpush.msrb.mxu2 %v8326_v39  ;;  %v8368_v7 = vld [vmem:[%s12228_s7 + $0x6d0] sm:$0xff]  ;;  %v8488_v39 = vld [vmem:[%s12228_s7 + $0x9c0] sm:$0xff] }
 0x7db   : > { %6956 = vmatpush.msra.mxu3 %v8336_v4  ;;  %7275 = vmatpush.msrb.mxu0 %v8413_v42  ;;  %v8498_v4 = vld [vmem:[%s12228_s7 + $0xa00] sm:$0xff]  ;;  %v7045_v42 = vrot.slane %v11489_v23, 6 }
 0x7dc   : > { %7309 = vmatpush.msra.mxu1 %v8423_v33  ;;  %6923 = vmatpush.msrb.mxu2 %v8325_v31  ;;  %v8400_v33 = vld [vmem:[%s12228_s7 + $0x7a0] sm:$0x1]  ;;  %v8367_v31 = vld [vmem:[%s12228_s7 + $0x6c8] sm:$0xff] }
 0x7dd   : > { %6957 = vmatpush.msra.mxu3 %v8335_v32  ;;  %7276 = vmatpush.msrb.mxu0 %v8412_v29  ;;  %v8487_v32 = vld [vmem:[%s12228_s7 + $0x9b8] sm:$0xff] }
 0x7de   : > { %7310 = vmatpush.msra.mxu1 %v8422_v5  ;;  %6924 = vmatpush.msrb.mxu2 %v8324_v17  ;;  %v8497_v29 = vld [vmem:[%s12228_s7 + $0x9f8] sm:$0xff]  ;;  %v7080_v17 = vrot.slane %v11489_v23, 7  ;;  %v8408_v23 = vld [vmem:[%s12228_s7 + $0x7d0] sm:$0xff] }
 0x7df   : > { %6958 = vmatpush.msra.mxu3 %v8334_v24  ;;  %8420 = vmatmul.msk.f32.vlgmr.msrb.gmra.mxu0 %vm5993_vm2, %v7255_v28  ;;  %v8399_v5 = vld [vmem:[%s12228_s7 + $0x798] sm:$0xff]  ;;  %v8486_v28 = vld [vmem:[%s12228_s7 + $0x9b0] sm:$0xff] }
 0x7e0   : > { %8455 = vmatpush.msk.msra.mxu0 %vm5997_vm1, %v8454_v46  ;;  %7311 = vmatpush.msra.mxu1 %v8421_v11  ;;  %v8409_v24 = vld [vmem:[%s12228_s7 + $0x7d8] sm:$0x1]  ;;  %v8496_v46 = vld [vmem:[%s12228_s7 + $0x9f0] sm:$0xff] }
 0x7e1   : > { %6925 = vmatpush.msrb.mxu2 %v8323_v36  ;;  %6959 = vmatpush.msra.mxu3 %v8333_v56  ;;  %v8398_v11 = vld [vmem:[%s12228_s7 + $0x790] sm:$0xff]  ;;  %v8485_v36 = vld [vmem:[%s12228_s7 + $0x9a8] sm:$0xff] }
 0x7e2   : > { %8429 = vmatmul.msk.f32.vlgmr.msra.gmra.mxu1 %vm5993_vm2, %v7290_v60  ;;  %7411 = vmatpush.msra.mxu0 %v8453_v63  ;;  %v8495_v56 = vld [vmem:[%s12228_s7 + $0x9e8] sm:$0xff] }
 0x7e3   : > { %8464 = vmatpush.msk.msrb.mxu1 %vm5997_vm1, %v8463_v34  ;;  %6926 = vmatpush.msrb.mxu2 %v8322_v12  ;;  %v8397_v63 = vld [vmem:[%s12228_s7 + $0x788] sm:$0xff]  ;;  %v8484_v34 = vld [vmem:[%s12228_s7 + $0x9a0] sm:$0xff] }
 0x7e4   : > { %6960 = vmatpush.msra.mxu3 %v8332_v54  ;;  %7412 = vmatpush.msra.mxu0 %v8452_v45  ;;  %v8407_v60 = vld [vmem:[%s12228_s7 + $0x7c8] sm:$0xff]  ;;  %v8494_v12 = vld [vmem:[%s12228_s7 + $0x9e0] sm:$0xff]  ;;  %v7535_v45 = vrot.slane %v11883_v19, 4 }
 0x7e5   : > { %7446 = vmatpush.msrb.mxu1 %v8462_v38  ;;  %8330 = vmatmul.msk.f32.vlgmr.msrb.gmra.mxu2 %vm5993_vm2, %v6905_v13  ;;  %v8406_v54 = vld [vmem:[%s12228_s7 + $0x7c0] sm:$0xff]  ;;  %v8526_v38 = vld [vmem:[%s12228_s7 + $0xab0] sm:$0x1]  ;;  %v8395_v13 = vld [vmem:[%s12228_s7 + $0x778] sm:$0xff] }
 0x7e6   : > { %8365 = vmatpush.msk.msra.mxu2 %vm5997_vm1, %v8364_v37  ;;  %6961 = vmatpush.msra.mxu3 %v8331_v3  ;;  %v8405_v37 = vld [vmem:[%s12228_s7 + $0x7b8] sm:$0xff]  ;;  %v5821_v3 = vpop.f32.mrf.mxu2 }
 0x7e7   : > { %7413 = vmatpush.msra.mxu0 %v8451_v57  ;;  %7447 = vmatpush.msrb.mxu1 %v8461_v59  ;;  %v7570_v57 = vrot.slane %v11883_v19, 5  ;;  %v8394_v59 = vld [vmem:[%s12228_s7 + $0x770] sm:$0xff] }
 0x7e8   : > { %8339 = vmatmul.msk.f32.vlgmr.msra.gmra.mxu3 %vm5993_vm2, %v6940_v58  ;;  %7061 = vmatpush.msra.mxu2 %v8363_v43  ;;  %v8404_v43 = vld [vmem:[%s12228_s7 + $0x7b0] sm:$0xff]  ;;  %v5859_v58 = vpop.f32.mrf.mxu3 }
 0x7e9   : > { %8374 = vmatpush.msk.msrb.mxu3 %vm5997_vm1, %v8373_v48  ;;  %7414 = vmatpush.msra.mxu0 %v8450_v25  ;;  %v8524_v48 = vld [vmem:[%s12228_s7 + $0xaa0] sm:$0xff]  ;;  %v7185_v25 = vrot.slane %v11686_v62, 2  ;;  %v5860_v21 = vadd.f32 %v5859_v58, %v5821_v3  ;;  %v7500_v3 = vrot.slane %v11883_v19, 3  ;;  %v8516_v58 = vld [vmem:[%s12228_s7 + $0xa70] sm:$0xff] }
 0x7ea   : > { %7448 = vmatpush.msrb.mxu1 %v8460_v35  ;;  %7062 = vmatpush.msra.mxu2 %v8362_v47  ;;  %v8403_v35 = vld [vmem:[%s12228_s7 + $0x7a8] sm:$0xff]  ;;  %v8523_v47 = vld [vmem:[%s12228_s7 + $0xa98] sm:$0xff] }
 0x7eb   : > { %7096 = vmatpush.msrb.mxu3 %v8372_v10  ;;  %7415 = vmatpush.msra.mxu0 %v8449_v8  ;;  %v7220_v10 = vrot.slane %v11686_v62, 3  ;;  %v8435_v8 = vld [vmem:[%s12228_s7 + $0x878] sm:$0xff] }
 0x7ec   : > { %7449 = vmatpush.msrb.mxu1 %v8459_v53  ;;  %7063 = vmatpush.msra.mxu2 %v8361_v50  ;;  %v8522_v53 = vld [vmem:[%s12228_s7 + $0xa90] sm:$0xff] }
 0x7ed   : > { %7097 = vmatpush.msrb.mxu3 %v8371_v0  ;;  %7416 = vmatpush.msra.mxu0 %v8448_v41  ;;  %v8434_v50 = vld [vmem:[%s12228_s7 + $0x870] sm:$0xff]  ;;  %v5975_v0 = vpop.f32.mrf.mxu1  ;;  %v8521_v41 = vld [vmem:[%s12228_s7 + $0xa88] sm:$0xff] }
 0x7ee   : > { %7450 = vmatpush.msrb.mxu1 %v8458_v9  ;;  %7064 = vmatpush.msra.mxu2 %v8360_v51  ;;  %v5868_v51 = vmax.f32 %v5752_v18, %v5860_v21  ;;  %v8514_v21 = vld [vmem:[%s12228_s7 + $0xa60] sm:$0xff] }
 0x7ef   : > { %7098 = vmatpush.msrb.mxu3 %v8370_v55  ;;  %8456 = vmatmul.msk.f32.vlgmr.msra.gmra.mxu0 %vm5993_vm2, %v11883_v19  ;;  %v8433_v55 = vld [vmem:[%s12228_s7 + $0x868] sm:$0xff] }
 0x7f0   : > { %8491 = vmatpush.msk.msrb.mxu0 %vm5997_vm1, %v8490_v26  ;;  %7451 = vmatpush.msrb.mxu1 %v8457_v20  ;;  %v8443_v26 = vld [vmem:[%s12228_s7 + $0x8a8] sm:$0xff]  ;;  %v5937_v20 = vpop.f32.mrf.mxu0 }
 0x7f1   : > { %7065 = vmatpush.msra.mxu2 %v8359_v2  ;;  %7099 = vmatpush.msrb.mxu3 %v8369_v44  ;;  %v8520_v2 = vld [vmem:[%s12228_s7 + $0xa80] sm:$0xff]  ;;  %v5976_v44 = vadd.f32 %v5975_v0, %v5937_v20 }
 0x7f2   : > { %8465 = vmatmul.msk.f32.vlgmr.msrb.gmra.mxu1 %vm5993_vm2, %v7430_v1  ;;  %7551 = vmatpush.msrb.mxu0 %v8489_v40  ;;  %v8431_v1 = vld [vmem:[%s12228_s7 + $0x858] sm:$0xff] }
 0x7f3   : > { %8500 = vmatpush.msk.msra.mxu1 %vm5997_vm1, %v8499_v30  ;;  %7066 = vmatpush.msra.mxu2 %v8358_v22  ;;  %v5984_v40 = vmax.f32 %v5868_v51, %v5976_v44  ;;  %v8441_v30 = vld [vmem:[%s12228_s7 + $0x898] sm:$0xff]  ;;  %v8430_v22 = vld [vmem:[%s12228_s7 + $0x850] sm:$0xff] }
 0x7f4   : > { %7100 = vmatpush.msrb.mxu3 %v8368_v7  ;;  %7552 = vmatpush.msrb.mxu0 %v8488_v39  ;;  %v8440_v7 = vld [vmem:[%s12228_s7 + $0x890] sm:$0xff]  ;;  %v7325_v39 = vrot.slane %v11686_v62, 6 }
 0x7f5   : > { %7586 = vmatpush.msra.mxu1 %v8498_v4  ;;  %8366 = vmatmul.msk.f32.vlgmr.msra.gmra.mxu2 %vm5993_vm2, %v7045_v42  ;;  %v8472_v4 = vld [vmem:[%s12228_s7 + $0x960] sm:$0x1]  ;;  %v8439_v42 = vld [vmem:[%s12228_s7 + $0x888] sm:$0xff] }
 0x7f6   : > { %8401 = vmatpush.msk.msrb.mxu2 %vm5997_vm1, %v8400_v33  ;;  %7101 = vmatpush.msrb.mxu3 %v8367_v31  ;;  %v5985_v33 = vld [vmem:[#allocation7] sm:$0x1] }
 0x7f7   : > { %7553 = vmatpush.msrb.mxu0 %v8487_v32  ;;  %7587 = vmatpush.msra.mxu1 %v8497_v29  ;;  %v7360_v32 = vrot.slane %v11686_v62, 7  ;;  %v8471_v29 = vld [vmem:[%s12228_s7 + $0x958] sm:$0xff]  ;;  %v8480_v62 = vld [vmem:[%s12228_s7 + $0x990] sm:$0xff] }
 0x7f8   : > { %8375 = vmatmul.msk.f32.vlgmr.msrb.gmra.mxu3 %vm5993_vm2, %v7080_v17  ;;  %7201 = vmatpush.msrb.mxu2 %v8399_v5  ;;  %v6018_v9 = vpop.f32.mrf.mxu2  ;;  %v8481_v5 = vld [vmem:[%s12228_s7 + $0x998] sm:$0x1] }
 0x7f9   : > { %8410 = vmatpush.msk.msra.mxu3 %vm5997_vm1, %v8409_v24  ;;  %7554 = vmatpush.msrb.mxu0 %v8486_v28  ;;  %v6021_v17 = vadd.f32 %v6018_v9, %v5985_v33  ;;  %v8470_v24 = vld [vmem:[%s12228_s7 + $0x950] sm:$0xff]  ;;  %v8511_v9 = vld [vmem:[%s12228_s7 + $0xa48] sm:$0xff] }
 0x7fa   : > { %7588 = vmatpush.msra.mxu1 %v8496_v46  ;;  %7202 = vmatpush.msrb.mxu2 %v8398_v11  ;;  %v6053_v18 = vpop.f32.mrf.mxu3  ;;  %v8469_v46 = vld [vmem:[%s12228_s7 + $0x948] sm:$0xff]  ;;  %v6298_v51 = vpop.f32.mrf.mxu0 }
 0x7fb   : > { %7236 = vmatpush.msra.mxu3 %v8408_v23  ;;  %7555 = vmatpush.msrb.mxu0 %v8485_v36  ;;  %v8479_v11 = vld [vmem:[%s12228_s7 + $0x988] sm:$0xff]  ;;  %v6056_v23 = vadd.f32 %v6053_v18, %v6021_v17  ;;  %v8468_v36 = vld [vmem:[%s12228_s7 + $0x940] sm:$0xff] }
 0x7fc   : > { %7589 = vmatpush.msra.mxu1 %v8495_v56  ;;  %7203 = vmatpush.msrb.mxu2 %v8397_v63  ;;  %v8478_v56 = vld [vmem:[%s12228_s7 + $0x980] sm:$0xff] }
 0x7fd   : > { %7237 = vmatpush.msra.mxu3 %v8407_v60  ;;  %7556 = vmatpush.msrb.mxu0 %v8484_v34  ;;  %v8467_v60 = vld [vmem:[%s12228_s7 + $0x938] sm:$0xff] }
 0x7fe   : > { %7590 = vmatpush.msra.mxu1 %v8494_v12  ;;  %7204 = vmatpush.msrb.mxu2 %v8396_v49  ;;  %v8477_v34 = vld [vmem:[%s12228_s7 + $0x978] sm:$0xff]  ;;  %v8466_v49 = vld [vmem:[%s12228_s7 + $0x930] sm:$0xff]  ;;  %v6333_v20 = vpop.f32.mrf.mxu1 }
 0x7ff   : > { %7238 = vmatpush.msra.mxu3 %v8406_v54  ;;  %8492 = vmatmul.msk.f32.vlgmr.msrb.gmra.mxu0 %vm5993_vm2, %v7535_v45  ;;  %v8476_v54 = vld [vmem:[%s12228_s7 + $0x970] sm:$0xff] }
 0x800   : > { %8527 = vmatpush.msk.msra.mxu0 %vm5997_vm1, %v8526_v38  ;;  %7591 = vmatpush.msra.mxu1 %v8493_v15  ;;  %v6088_v31 = vpop.f32.mrf.mxu2  ;;  %v7465_v38 = vrot.slane %v11883_v19, 2  ;;  %v8508_v15 = vld [vmem:[%s12228_s7 + $0xa40] sm:$0x1] }
 0x801   : > { %7205 = vmatpush.msrb.mxu2 %v8395_v13  ;;  %7239 = vmatpush.msra.mxu3 %v8405_v37  ;;  %v6091_v63 = vadd.f32 %v6088_v31, %v6056_v23  ;;  %v8475_v13 = vld [vmem:[%s12228_s7 + $0x968] sm:$0xff] }
 0x802   : > { %8501 = vmatmul.msk.f32.vlgmr.msra.gmra.mxu1 %vm5993_vm2, %v7570_v57  ;;  %7691 = vmatpush.msra.mxu0 %v8525_v16  ;;  %v6123_v28 = vpop.f32.mrf.mxu3  ;;  %v8507_v16 = vld [vmem:[%s12228_s7 + $0xa38] sm:$0xff] }
 0x803   : > { %7206 = vmatpush.msrb.mxu2 %v8394_v59  ;;  %7240 = vmatpush.msra.mxu3 %v8404_v43  ;;  %v6126_v45 = vadd.f32 %v6123_v28, %v6091_v63  ;;  %v8517_v57 = vld [vmem:[%s12228_s7 + $0xa78] sm:$0x1]  ;;  %v8506_v43 = vld [vmem:[%s12228_s7 + $0xa30] sm:$0xff] }
 0x804   : > { %7692 = vmatpush.msra.mxu0 %v8524_v48  ;;  %8402 = vmatmul.msk.f32.vlgmr.msrb.gmra.mxu2 %vm5993_vm2, %v7185_v25 }
 0x805   : > { %8437 = vmatpush.msk.msra.mxu2 %vm5997_vm1, %v8436_v27  ;;  %7241 = vmatpush.msra.mxu3 %v8403_v35  ;;  %v8505_v27 = vld [vmem:[%s12228_s7 + $0xa28] sm:$0xff] }
 0x806   : > { %7693 = vmatpush.msra.mxu0 %v8523_v47  ;;  %8411 = vmatmul.msk.f32.vlgmr.msra.gmra.mxu3 %vm5993_vm2, %v7220_v10  ;;  %v8515_v35 = vld [vmem:[%s12228_s7 + $0xa68] sm:$0xff]  ;;  %v8504_v47 = vld [vmem:[%s12228_s7 + $0xa20] sm:$0xff] }
 0x807   : > { %7341 = vmatpush.msra.mxu2 %v8435_v8  ;;  %8446 = vmatpush.msk.msrb.mxu3 %vm5997_vm1, %v8445_v61  ;;  %v8503_v61 = vld [vmem:[%s12228_s7 + $0xa18] sm:$0xff] }
 0x808   : > { %7694 = vmatpush.msra.mxu0 %v8522_v53  ;;  %v8513_v53 = vld [vmem:[%s12228_s7 + $0xa58] sm:$0xff] }
 0x809   : > { %7342 = vmatpush.msra.mxu2 %v8434_v50  ;;  %7376 = vmatpush.msrb.mxu3 %v8444_v14  ;;  %v8502_v50 = vld [vmem:[%s12228_s7 + $0xa10] sm:$0xff] }
 0x80a   : > { %7695 = vmatpush.msra.mxu0 %v8521_v41  ;;  %v6158_v12 = vpop.f32.mrf.mxu2  ;;  %v8512_v14 = vld [vmem:[%s12228_s7 + $0xa50] sm:$0xff]  ;;  %v7605_v41 = vrot.slane %v11883_v19, 6 }
 0x80b   : > { %7343 = vmatpush.msra.mxu2 %v8433_v55  ;;  %7377 = vmatpush.msrb.mxu3 %v8443_v26  ;;  %v6161_v59 = vadd.f32 %v6158_v12, %v6126_v45  ;;  %v7640_v55 = vrot.slane %v11883_v19, 7 }
 0x80c   : > { %7696 = vmatpush.msra.mxu0 %v8520_v2 }
 0x80d   : > { %7344 = vmatpush.msra.mxu2 %v8432_v6  ;;  %7378 = vmatpush.msrb.mxu3 %v8442_v52 }
 0x80e   : > { %8528 = vmatmul.msk.f32.vlgmr.msra.gmra.mxu0 %vm5993_vm2, %v5984_v40  ;;  %v6193_v37 = vpop.f32.mrf.mxu3  ;;  %v6438_v40 = vpop.f32.mrf.mxu0 }
 0x80f   : > { %7345 = vmatpush.msra.mxu2 %v8431_v1  ;;  %7379 = vmatpush.msrb.mxu3 %v8441_v30  ;;  %v6196_v25 = vadd.f32 %v6193_v37, %v6161_v59  ;;  %v6473_v30 = vpop.f32.mrf.mxu1 }
 0x811   : > { %7346 = vmatpush.msra.mxu2 %v8430_v22  ;;  %7380 = vmatpush.msrb.mxu3 %v8440_v7 }
 0x812   : > { %8438 = vmatmul.msk.f32.vlgmr.msra.gmra.mxu2 %vm5993_vm2, %v7325_v39 }
 0x813   : > { %8473 = vmatpush.msk.msrb.mxu2 %vm5997_vm1, %v8472_v4  ;;  %7381 = vmatpush.msrb.mxu3 %v8439_v42 }
 0x814   : > { %8447 = vmatmul.msk.f32.vlgmr.msrb.gmra.mxu3 %vm5993_vm2, %v7360_v32 }
 0x815   : > { %7481 = vmatpush.msrb.mxu2 %v8471_v29  ;;  %8482 = vmatpush.msk.msra.mxu3 %vm5997_vm1, %v8481_v5 }
 0x816   : > { %v6578_v33 = vpop.f32.mrf.mxu0 }
 0x817   : > { %7482 = vmatpush.msrb.mxu2 %v8470_v24  ;;  %7516 = vmatpush.msra.mxu3 %v8480_v62  ;;  %v6613_v31 = vpop.f32.mrf.mxu1 }
 0x818   : > { %v6228_v48 = vpop.f32.mrf.mxu2 }
 0x819   : > { %7483 = vmatpush.msrb.mxu2 %v8469_v46  ;;  %7517 = vmatpush.msra.mxu3 %v8479_v11  ;;  %v6231_v10 = vadd.f32 %v6228_v48, %v6196_v25 }
 0x81b   : > { %7484 = vmatpush.msrb.mxu2 %v8468_v36  ;;  %7518 = vmatpush.msra.mxu3 %v8478_v56  ;;  %v6263_v8 = vpop.f32.mrf.mxu3 }
 0x81c   : > { %v6266_v0 = vadd.f32 %v6263_v8, %v6231_v10 }
 0x81d   : > { %7485 = vmatpush.msrb.mxu2 %v8467_v60  ;;  %7519 = vmatpush.msra.mxu3 %v8477_v34 }
 0x81e   : > { %v6301_v26 = vadd.f32 %v6298_v51, %v6266_v0  ;;  %v6718_v62 = vpop.f32.mrf.mxu0 }
 0x81f   : > { %7486 = vmatpush.msrb.mxu2 %v8466_v49  ;;  %7520 = vmatpush.msra.mxu3 %v8476_v54  ;;  %v6753_v46 = vpop.f32.mrf.mxu1 }
 0x820   : > { %8474 = vmatmul.msk.f32.vlgmr.msrb.gmra.mxu2 %vm5993_vm2, %v7465_v38  ;;  %v6336_v44 = vadd.f32 %v6333_v20, %v6301_v26 }
 0x821   : > { %8509 = vmatpush.msk.msra.mxu2 %vm5997_vm1, %v8508_v15  ;;  %7521 = vmatpush.msra.mxu3 %v8475_v13 }
 0x822   : > { %8483 = vmatmul.msk.f32.vlgmr.msra.gmra.mxu3 %vm5993_vm2, %v7500_v3 }
 0x823   : > { %7621 = vmatpush.msra.mxu2 %v8507_v16  ;;  %8518 = vmatpush.msk.msrb.mxu3 %vm5997_vm1, %v8517_v57 }
 0x825   : > { %7622 = vmatpush.msra.mxu2 %v8506_v43  ;;  %7656 = vmatpush.msrb.mxu3 %v8516_v58 }
 0x827   : > { %7623 = vmatpush.msra.mxu2 %v8505_v27  ;;  %7657 = vmatpush.msrb.mxu3 %v8515_v35 }
 0x828   : > { %v6368_v2 = vpop.f32.mrf.mxu2 }
 0x829   : > { %7624 = vmatpush.msra.mxu2 %v8504_v47  ;;  %7658 = vmatpush.msrb.mxu3 %v8514_v21  ;;  %v6371_v6 = vadd.f32 %v6368_v2, %v6336_v44 }
 0x82b   : > { %7625 = vmatpush.msra.mxu2 %v8503_v61  ;;  %7659 = vmatpush.msrb.mxu3 %v8513_v53  ;;  %v6403_v52 = vpop.f32.mrf.mxu3 }
 0x82c   : > { %v6406_v18 = vadd.f32 %v6403_v52, %v6371_v6  ;;  %v6858_v60 = vpop.f32.mrf.mxu0 }
 0x82d   : > { %7626 = vmatpush.msra.mxu2 %v8502_v50  ;;  %7660 = vmatpush.msrb.mxu3 %v8512_v14  ;;  %v7704_v50 = vld [vmem:[%s12230_s9 + $0x8] sm:$0x3] }
 0x82e   : > { %8510 = vmatmul.msk.f32.vlgmr.msra.gmra.mxu2 %vm5993_vm2, %v7605_v41  ;;  %v6441_v1 = vadd.f32 %v6438_v40, %v6406_v18  ;;  %8529 = vmatpush.msk.msrb.mxu1 %vm7710_vm3, %v7704_v50 }
 0x82f   : > { %7661 = vmatpush.msrb.mxu3 %v8511_v9  ;;  %v6893_v12 = vpop.f32.mrf.mxu1 }
 0x830   : > { %8519 = vmatmul.msk.f32.vlgmr.msrb.gmra.mxu3 %vm5993_vm2, %v7640_v55  ;;  %v6476_v7 = vadd.f32 %v6473_v30, %v6441_v1  ;;  %v7703_v55 = vld [vmem:[%s12230_s9] sm:$0xff] }
 0x831   : > { %7729 = vmatpush.msrb.mxu1 %v7703_v55 }
 0x838   : > { %v6508_v22 = vpop.f32.mrf.mxu2 }
 0x839   : > { %v6511_v39 = vadd.f32 %v6508_v22, %v6476_v7 }
 0x83b   : > { %v6543_v4 = vpop.f32.mrf.mxu3 }
 0x83c   : > { %v6546_v42 = vadd.f32 %v6543_v4, %v6511_v39  ;;  %v6998_v13 = vpop.f32.mrf.mxu0 }
 0x83e   : > { %v6581_v19 = vadd.f32 %v6578_v33, %v6546_v42 }
 0x83f   : > { %v7033_v3 = vpop.f32.mrf.mxu1 }
 0x840   : > { %v6616_v29 = vadd.f32 %v6613_v31, %v6581_v19 }
 0x848   : > { %v6648_v32 = vpop.f32.mrf.mxu2 }
 0x849   : > { %v6651_v5 = vadd.f32 %v6648_v32, %v6616_v29 }
 0x84b   : > { %v6683_v17 = vpop.f32.mrf.mxu3 }
 0x84c   : > { %v6686_v24 = vadd.f32 %v6683_v17, %v6651_v5  ;;  %v7138_v48 = vpop.f32.mrf.mxu0  ;;  %v7705_v5 = vld [vmem:[#allocation8] sm:$0x1] }
 0x84e   : > { %v6721_v28 = vadd.f32 %v6718_v62, %v6686_v24 }
 0x84f   : > { %v7173_v27 = vpop.f32.mrf.mxu1 }
 0x850   : > { %v6756_v23 = vadd.f32 %v6753_v46, %v6721_v28 }
 0x858   : > { %v6788_v11 = vpop.f32.mrf.mxu2 }
 0x859   : > { %v6791_v36 = vadd.f32 %v6788_v11, %v6756_v23 }
 0x85b   : > { %v6823_v56 = vpop.f32.mrf.mxu3 }
 0x85c   : > { %v6826_v63 = vadd.f32 %v6823_v56, %v6791_v36  ;;  %v7278_v61 = vpop.f32.mrf.mxu0 }
 0x85e   : > { %v6861_v34 = vadd.f32 %v6858_v60, %v6826_v63 }
 0x85f   : > { %v7313_v14 = vpop.f32.mrf.mxu1 }
 0x860   : > { %v6896_v54 = vadd.f32 %v6893_v12, %v6861_v34 }
 0x868   : > { %v6928_v49 = vpop.f32.mrf.mxu2 }
 0x869   : > { %v6931_v45 = vadd.f32 %v6928_v49, %v6896_v54 }
 0x86b   : > { %v6963_v38 = vpop.f32.mrf.mxu3 }
 0x86c   : > { %v6966_v15 = vadd.f32 %v6963_v38, %v6931_v45  ;;  %v7418_v20 = vpop.f32.mrf.mxu0 }
 0x86e   : > { %v7001_v37 = vadd.f32 %v6998_v13, %v6966_v15 }
 0x86f   : > { %v7453_v44 = vpop.f32.mrf.mxu1 }
 0x870   : > { %v7036_v16 = vadd.f32 %v7033_v3, %v7001_v37 }
 0x878   : > { %v7068_v57 = vpop.f32.mrf.mxu2 }
 0x879   : > { %v7071_v59 = vadd.f32 %v7068_v57, %v7036_v16 }
 0x87b   : > { %v7103_v43 = vpop.f32.mrf.mxu3 }
 0x87c   : > { %v7106_v58 = vadd.f32 %v7103_v43, %v7071_v59  ;;  %v7558_v30 = vpop.f32.mrf.mxu0 }
 0x87e   : > { %v7141_v25 = vadd.f32 %v7138_v48, %v7106_v58 }
 0x87f   : > { %v7593_v7 = vpop.f32.mrf.mxu1 }
 0x880   : > { %v7176_v35 = vadd.f32 %v7173_v27, %v7141_v25 }
 0x887   : > { %v7208_v47 = vpop.f32.mrf.mxu2 }
 0x888   : > { %v7211_v21 = vadd.f32 %v7208_v47, %v7176_v35 }
 0x889   : > { %v7243_v10 = vpop.f32.mrf.mxu3 }
 0x88a   : > { %v7246_v8 = vadd.f32 %v7243_v10, %v7211_v21 }
 0x88b   : > { %v7698_v31 = vpop.f32.mrf.mxu0 }
 0x88c   : > { %v7281_v53 = vadd.f32 %v7278_v61, %v7246_v8 }
 0x88e   : > { %v7316_v0 = vadd.f32 %v7313_v14, %v7281_v53 }
 0x895   : > { %v7348_v41 = vpop.f32.mrf.mxu2 }
 0x896   : > { %v7351_v9 = vadd.f32 %v7348_v41, %v7316_v0 }
 0x897   : > { %v7383_v51 = vpop.f32.mrf.mxu3 }
 0x898   : > { %v7386_v26 = vadd.f32 %v7383_v51, %v7351_v9 }
 0x89a   : > { %v7421_v2 = vadd.f32 %v7418_v20, %v7386_v26 }
 0x89c   : > { %v7456_v6 = vadd.f32 %v7453_v44, %v7421_v2 }
 0x8a3   : > { %v7488_v52 = vpop.f32.mrf.mxu2 }
 0x8a4   : > { %v7491_v18 = vadd.f32 %v7488_v52, %v7456_v6 }
 0x8a5   : > { %v7523_v40 = vpop.f32.mrf.mxu3 }
 0x8a6   : > { %v7526_v1 = vadd.f32 %v7523_v40, %v7491_v18 }
 0x8a8   : > { %v7561_v22 = vadd.f32 %v7558_v30, %v7526_v1 }
 0x8aa   : > { %v7596_v39 = vadd.f32 %v7593_v7, %v7561_v22 }
 0x8b1   : > { %v7628_v4 = vpop.f32.mrf.mxu2 }
 0x8b2   : > { %v7631_v42 = vadd.f32 %v7628_v4, %v7596_v39 }
 0x8b3   : > { %v7663_v33 = vpop.f32.mrf.mxu3 }
 0x8b4   : > { %v7666_v19 = vadd.f32 %v7663_v33, %v7631_v42 }
 0x8b6   : > { %v7701_v32 = vadd.f32 %v7698_v31, %v7666_v19 }
 0x8b8   : > { %v7702_v29 = vmax.f32 %v7701_v32, 0.0 }
 0x8ba   : > { %8530 = vmatmul.msk.f32.vlgmr.msrb.gmra.mxu1 %vm7706_vm4, %v7702_v29 }
 0x937   : > { %v7731_v17 = vpop.f32.mrf.mxu1 }
 0x938   : > { %v7732_v24 = vadd.f32 %v7731_v17, %v7705_v5 }
 0x93a   : > { %v7735_v62 = vsel %vm7734_vm5, %v7732_v24, -inf }
 0x93b   : > { %7736 = vmax.xlane.f32.xlu2 %v7735_v62 }
 0x9ae   : > { %v7737_v28 = vpop.xlane.xlu2 %7736 }
 0x9af   : > { %v7738_v46 = vsub.f32 %v7732_v24, %v7737_v28 }
 0x9b1   : > { %v7739_v11 = vmul.f32 1.442695, %v7738_v46 }
 0x9b3   : > { %8650 = vpow2.f32 %v7739_v11 }
 0x9b9   : > { %v8651_v23 = vpop.eup %8650 }
 0x9ba   : > { %v7741_v36 = vsel %vm7734_vm5, %v8651_v23, 0.0 }
 0x9bb   : > { %7742 = vadd.xlane.f32.xlu0 %v7741_v36 }
 0xa2e   : > { %v7743_v56 = vpop.xlane.xlu0 %7742 }
 0xa2f   : > { %8652 = vlog2.f32 %v7743_v56 }
 0xa35   : > { %v8653_v63 = vpop.eup %8652 }
 0xa36   : > { %v7745_v60 = vmul.f32 0.6931472, %v8653_v63 }
 0xa38   : > { %v7746_v34 = vadd.f32 %v7745_v60, %v7737_v28 }
 0xa3a   : > { %v7747_v12 = vsub.f32 %v7732_v24, %v7746_v34 }
 0xa3c   : > { %7748 = vst.msk [vmem:[%s439_s24] sm:$0x1] %vm7734_vm5, %v7747_v12 }
 0xa3d   : > { %8801 = shalt.err (!%p8798_p8)
}
 0xa3e   : > { %8549 = dma.vmem_to_hbm [thread:$0]  (%p8978_p5), %s7761_s25, 16, %s7763_s20, %s7750_s13  }
 0xa3f PF: > { %s12343_s17 = sld [smem:[#allocation17_spill]] }
 0xa40   : > { %s12344_s28 = sld [smem:[#allocation15_spill]] }
 0xa45   : > { %p8576_p9 = scmp.ge.s32.totalorder %s12343_s17, 2 }
 0xa46   : > { %s7774_s29 = sand.u32 1, %s12344_s28  }
 0xa47   : > { %p8565_p10 = pnand %p8576_p9, %p8982_p6  ;;  %s7775_s19 = scalar_lea.sflag [#allocation4], %s7774_s29 }
 0xa49   : > { %p8566_p11 = pneg %p8565_p10 }
 0xa4b   : > { %8831 = dma.done.wait (%p8566_p11), %s7775_s19, 16  }
 0xa4c   : > { %8833 = vsyncadd (%p8566_p11), %s7775_s19, 4294967280  ;;  %s12346_s20 = sld [smem:[#allocation18_spill]]  ;;  %s12349_s17 = smov %s8840_s18 }
 0xa4d   : > { %s12347_s16 = sld [smem:[#allocation16_spill]] }
 0xa4e   : > { %s12348_s19 = sld [smem:[#allocation19_spill]] }
 0xa52   : > { %p24_p12 = scmp.ge.s32.totalorder %s12346_s20, 4  }
 0xa53   : > { %s12350_s18 = smov %s12347_s16 }
 0xa54   :  { %26 = sbr.rel (!%p24_p12) target bundleno = 9 (0x9), region = 178 }
 0xa59   :  { %7780 = vsyncpa [#allocation3], 1 }
 0xa5a   :  { %7782 = vsyncpa [#allocation3 + $0x1], 1 }
 0xa5b   :  { %7783 = vsyncpa [#allocation6], 1 }
 0xa5c   :  { %7784 = vsyncpa [#allocation9], 1 }
 0xa5d   :  { %7785 = vsyncpa [#allocation4], 1 }
 0xa5e   :  { %7787 = vsyncpa [#allocation4 + $0x1], 1 }

</bundles_post_ra>
